<compile_context>
chip_gen: v6e
topology: v6e:2x2x1
jax: 0.10.0
libtpu: 0.0.40
codegen_flags: <defaults>
</compile_context>

<pallas_src>
import jax
import jax.numpy as jnp
from jax.experimental import pallas as pl
from jax.experimental.pallas import tpu as pltpu


_COUT_PAD = 128          # lane-dense padding for the 65-channel head
_LAYER_CFG = [           # (Cin, Cout) for conv1_1 ... convKp2
    (1, 64), (64, 64), (64, 64), (64, 64),
    (64, 128), (128, 128), (128, 128), (128, 128),
    (128, 256), (256, 65),
]


# ---------------------------------------------------------------------------
# Fused forward kernel: one batch element per grid step, everything in VMEM.
# ---------------------------------------------------------------------------
def _fused_kernel(x_ref,
                  w11_ref, b11_ref, w12_ref, b12_ref,
                  w21_ref, b21_ref, w22_ref, b22_ref,
                  w31_ref, b31_ref, w32_ref, b32_ref,
                  w41_ref, b41_ref, w42_ref, b42_ref,
                  wk1_ref, bk1_ref, wk2_ref, bk2_ref,
                  o_ref):
    def pad_hw(x):
        """Zero-pad the two leading (spatial) dims of a 2-D/3-D value by 1."""
        if x.ndim == 2:
            h, w = x.shape
            zc = jnp.zeros((h, 1), x.dtype)
            x = jnp.concatenate([zc, x, zc], axis=1)
            zr = jnp.zeros((1, w + 2), x.dtype)
            return jnp.concatenate([zr, x, zr], axis=0)
        h, w, c = x.shape
        zc = jnp.zeros((h, 1, c), x.dtype)
        x = jnp.concatenate([zc, x, zc], axis=1)
        zr = jnp.zeros((1, w + 2, c), x.dtype)
        return jnp.concatenate([zr, x, zr], axis=0)

    def conv3x3(x, w_ref, b_ref, relu=True):
        """x: (H, W, Cin) f32.  w_ref: (9*Cin, Cout) bf16.  b_ref: (1, Cout) f32."""
        h, w, cin = x.shape
        cout = w_ref.shape[-1]
        xp = pad_hw(x.astype(jnp.bfloat16))                    # (H+2, W+2, Cin)
        # im2col: fold the 9 taps into the contraction dim -> K = 9*Cin.
        cols = [xp[dy:dy + h, dx:dx + w, :].reshape(h * w, cin)
                for dy in range(3) for dx in range(3)]
        patch = jnp.concatenate(cols, axis=-1)                 # (H*W, 9*Cin) bf16
        acc = jnp.dot(patch, w_ref[...],
                      preferred_element_type=jnp.float32)      # MXU, f32 acc
        acc = acc + b_ref[...]
        if relu:
            acc = jnp.maximum(acc, 0.0)
        return acc.reshape(h, w, cout)

    def maxpool2(x):
        h, w, c = x.shape
        x5 = x.reshape(h // 2, 2, w // 2, 2, c)
        return jnp.maximum(
            jnp.maximum(x5[:, 0, :, 0, :], x5[:, 0, :, 1, :]),
            jnp.maximum(x5[:, 1, :, 0, :], x5[:, 1, :, 1, :]))

    # conv1_1: Cin == 1 -> 9-tap stencil on the VPU (keeps the MXU free).
    x2d = x_ref[0].astype(jnp.float32)                         # (H, W)
    h, w = x2d.shape
    c1 = w11_ref.shape[-1]
    xp1 = pad_hw(x2d)                                          # (H+2, W+2)
    acc = jnp.zeros((h, w, c1), jnp.float32)
    for dy in range(3):
        for dx in range(3):
            tap = xp1[dy:dy + h, dx:dx + w]                    # (H, W)
            acc = acc + tap[:, :, None] * w11_ref[dy * 3 + dx][None, None, :]
    x = jnp.maximum(acc + b11_ref[0][None, None, :], 0.0)      # (H, W, 64)

    # VGG trunk (convs + fused pools), all resident in VMEM.
    x = conv3x3(x, w12_ref, b12_ref)
    x = maxpool2(x)
    x = conv3x3(x, w21_ref, b21_ref)
    x = conv3x3(x, w22_ref, b22_ref)
    x = maxpool2(x)
    x = conv3x3(x, w31_ref, b31_ref)
    x = conv3x3(x, w32_ref, b32_ref)
    x = maxpool2(x)
    x = conv3x3(x, w41_ref, b41_ref)
    x = conv3x3(x, w42_ref, b42_ref)
    x = conv3x3(x, wk1_ref, bk1_ref)
    x = conv3x3(x, wk2_ref, bk2_ref, relu=False)               # (H/8, W/8, 128)

    o_ref[0] = x.astype(o_ref.dtype)                           # lane-dense store


# ---------------------------------------------------------------------------
# Parameters (deterministic synthetic init, shapes from the PyTorch __init__)
# ---------------------------------------------------------------------------
def init_params(key):
    params = []
    for cin, cout in _LAYER_CFG:
        key, wk, bk = jax.random.split(key, 3)
        fan_in = 9 * cin
        wgt = jax.random.normal(wk, (3, 3, cin, cout), jnp.float32) * jnp.sqrt(
            2.0 / fan_in)
        bias = jax.random.normal(bk, (cout,), jnp.float32) * 0.01
        params.append((wgt, bias))
    return params


# ---------------------------------------------------------------------------
# Wrapper: NCHW in / NCHW out, one pallas_call for the whole network.
# ---------------------------------------------------------------------------
def event_point_net(x_nchw, params):
    """x_nchw: (N, 1, H, W) f32, H and W divisible by 8 -> (N, 65, H/8, W/8)."""
    n, cin, hh, ww = x_nchw.shape
    assert cin == 1 and hh % 8 == 0 and ww % 8 == 0
    x = x_nchw[:, 0, :, :].astype(jnp.float32)                 # (N, H, W), glue

    (w11, b11) = params[0]
    flat_inputs = [x,
                   w11.reshape(9, 64).astype(jnp.float32),     # stencil weights
                   b11.reshape(1, 64).astype(jnp.float32)]
    in_specs = [pl.BlockSpec((1, hh, ww), lambda i: (i, 0, 0)),
                pl.BlockSpec((9, 64), lambda i: (0, 0)),
                pl.BlockSpec((1, 64), lambda i: (0, 0))]

    for li, (wgt, bias) in enumerate(params[1:]):
        _, _, ci, co = wgt.shape
        if li == len(params) - 2:            # convKp2: pad 65 -> 128 lanes
            pad = _COUT_PAD - co
            wgt = jnp.pad(wgt, ((0, 0), (0, 0), (0, 0), (0, pad)))
            bias = jnp.pad(bias, ((0, pad),))
            co = _COUT_PAD
        wm = wgt.reshape(9 * ci, co).astype(jnp.bfloat16)      # im2col weights
        bm = bias.reshape(1, co).astype(jnp.float32)
        flat_inputs += [wm, bm]
        in_specs += [pl.BlockSpec((9 * ci, co), lambda i: (0, 0)),
                     pl.BlockSpec((1, co), lambda i: (0, 0))]

    ho, wo = hh // 8, ww // 8
    out = pl.pallas_call(
        _fused_kernel,
        out_shape=jax.ShapeDtypeStruct((n, ho, wo, _COUT_PAD), jnp.float32),
        grid=(n,),
        in_specs=in_specs,
        out_specs=pl.BlockSpec((1, ho, wo, _COUT_PAD), lambda i: (i, 0, 0, 0)),
        compiler_params=pltpu.CompilerParams(
            dimension_semantics=("parallel",)),                # v7x megacore
    )(*flat_inputs)

    out = out[..., :65]                                        # drop lane pad
    return jnp.transpose(out, (0, 3, 1, 2))                    # NHWC -> NCHW


# ---------------------------------------------------------------------------
# Pure-XLA f32 reference (for a loose sanity check only)
# ---------------------------------------------------------------------------
def _reference_forward(x_nchw, params):
    x = jnp.transpose(x_nchw, (0, 2, 3, 1)).astype(jnp.float32)

    def conv(x, wgt, bias, relu=True):
        y = jax.lax.conv_general_dilated(
            x, wgt, window_strides=(1, 1), padding="SAME",
            dimension_numbers=("NHWC", "HWIO", "NHWC"),
            precision=jax.lax.Precision.HIGHEST)
        y = y + bias
        return jnp.maximum(y, 0.0) if relu else y

    def pool(x):
        return jax.lax.reduce_window(x, -jnp.inf, jax.lax.max,
                                     (1, 2, 2, 1), (1, 2, 2, 1), "VALID")

    ((w11, b11), (w12, b12), (w21, b21), (w22, b22), (w31, b31),
     (w32, b32), (w41, b41), (w42, b42), (wk1, bk1), (wk2, bk2)) = params
    x = conv(x, w11, b11); x = conv(x, w12, b12); x = pool(x)
    x = conv(x, w21, b21); x = conv(x, w22, b22); x = pool(x)
    x = conv(x, w31, b31); x = conv(x, w32, b32); x = pool(x)
    x = conv(x, w41, b41); x = conv(x, w42, b42)
    x = conv(x, wk1, bk1); x = conv(x, wk2, bk2, relu=False)
    return jnp.transpose(x, (0, 3, 1, 2))


if __name__ == "__main__":
    key = jax.random.PRNGKey(0)
    pkey, xkey = jax.random.split(key)
    params = init_params(pkey)

    # batch=2, 1 input channel (conv1_1 expects Cin=1), 16x16 spatial
    # (divisible by 8 so the three 2x2 pools are exact).
    x = jax.random.normal(xkey, (2, 1, 16, 16), jnp.float32)

    fwd = jax.jit(lambda xx: event_point_net(xx, params))
    out = fwd(x)
    jax.block_until_ready(out)

    assert out.shape == (2, 65, 2, 2), out.shape
    assert out.dtype == jnp.float32
    assert bool(jnp.all(jnp.isfinite(out)))

    # Loose sanity check vs. a pure-XLA f32 reference (kernel matmuls are bf16
    # with f32 accumulation, so allow a few percent of drift).
    ref = jax.jit(lambda xx: _reference_forward(xx, params))(x)
    num = jnp.sqrt(jnp.sum((out - ref) ** 2))
    den = jnp.sqrt(jnp.sum(ref ** 2)) + 1e-6
    assert float(num / den) < 0.15, float(num / den)

    print("KERNEL_OK")
</pallas_src>

<mosaic_0001>
module attributes {stable_mosaic.version = 11 : i64} {
  func.func @_fused_kernel(%arg0: i32, %arg1: memref<1x16x16xf32, #tpu.memory_space<vmem>>, %arg2: memref<9x64xf32, #tpu.memory_space<vmem>>, %arg3: memref<1x64xf32, #tpu.memory_space<vmem>>, %arg4: memref<576x64xbf16, #tpu.memory_space<vmem>>, %arg5: memref<1x64xf32, #tpu.memory_space<vmem>>, %arg6: memref<576x64xbf16, #tpu.memory_space<vmem>>, %arg7: memref<1x64xf32, #tpu.memory_space<vmem>>, %arg8: memref<576x64xbf16, #tpu.memory_space<vmem>>, %arg9: memref<1x64xf32, #tpu.memory_space<vmem>>, %arg10: memref<576x128xbf16, #tpu.memory_space<vmem>>, %arg11: memref<1x128xf32, #tpu.memory_space<vmem>>, %arg12: memref<1152x128xbf16, #tpu.memory_space<vmem>>, %arg13: memref<1x128xf32, #tpu.memory_space<vmem>>, %arg14: memref<1152x128xbf16, #tpu.memory_space<vmem>>, %arg15: memref<1x128xf32, #tpu.memory_space<vmem>>, %arg16: memref<1152x128xbf16, #tpu.memory_space<vmem>>, %arg17: memref<1x128xf32, #tpu.memory_space<vmem>>, %arg18: memref<1152x256xbf16, #tpu.memory_space<vmem>>, %arg19: memref<1x256xf32, #tpu.memory_space<vmem>>, %arg20: memref<2304x128xbf16, #tpu.memory_space<vmem>>, %arg21: memref<1x128xf32, #tpu.memory_space<vmem>>, %arg22: memref<1x2x2x128xf32, #tpu.memory_space<vmem>>) attributes {dimension_semantics = [#tpu.dimension_semantics<parallel>], iteration_bounds = array<i64: 2>, scalar_prefetch = 0 : i64, scratch_operands = 0 : i64, tpu.core_type = #tpu.core_type<tc>, window_params = [{transform_indices = @transform_0, window_bounds = array<i64: 1, 16, 16>}, {pipeline_mode = #tpu.pipeline_mode<synchronous>, transform_indices = @transform_1, window_bounds = array<i64: 9, 64>}, {pipeline_mode = #tpu.pipeline_mode<synchronous>, transform_indices = @transform_2, window_bounds = array<i64: 1, 64>}, {pipeline_mode = #tpu.pipeline_mode<synchronous>, transform_indices = @transform_3, window_bounds = array<i64: 576, 64>}, {pipeline_mode = #tpu.pipeline_mode<synchronous>, transform_indices = @transform_4, window_bounds = array<i64: 1, 64>}, {pipeline_mode = #tpu.pipeline_mode<synchronous>, transform_indices = @transform_5, window_bounds = array<i64: 576, 64>}, {pipeline_mode = #tpu.pipeline_mode<synchronous>, transform_indices = @transform_6, window_bounds = array<i64: 1, 64>}, {pipeline_mode = #tpu.pipeline_mode<synchronous>, transform_indices = @transform_7, window_bounds = array<i64: 576, 64>}, {pipeline_mode = #tpu.pipeline_mode<synchronous>, transform_indices = @transform_8, window_bounds = array<i64: 1, 64>}, {pipeline_mode = #tpu.pipeline_mode<synchronous>, transform_indices = @transform_9, window_bounds = array<i64: 576, 128>}, {pipeline_mode = #tpu.pipeline_mode<synchronous>, transform_indices = @transform_10, window_bounds = array<i64: 1, 128>}, {pipeline_mode = #tpu.pipeline_mode<synchronous>, transform_indices = @transform_11, window_bounds = array<i64: 1152, 128>}, {pipeline_mode = #tpu.pipeline_mode<synchronous>, transform_indices = @transform_12, window_bounds = array<i64: 1, 128>}, {pipeline_mode = #tpu.pipeline_mode<synchronous>, transform_indices = @transform_13, window_bounds = array<i64: 1152, 128>}, {pipeline_mode = #tpu.pipeline_mode<synchronous>, transform_indices = @transform_14, window_bounds = array<i64: 1, 128>}, {pipeline_mode = #tpu.pipeline_mode<synchronous>, transform_indices = @transform_15, window_bounds = array<i64: 1152, 128>}, {pipeline_mode = #tpu.pipeline_mode<synchronous>, transform_indices = @transform_16, window_bounds = array<i64: 1, 128>}, {pipeline_mode = #tpu.pipeline_mode<synchronous>, transform_indices = @transform_17, window_bounds = array<i64: 1152, 256>}, {pipeline_mode = #tpu.pipeline_mode<synchronous>, transform_indices = @transform_18, window_bounds = array<i64: 1, 256>}, {pipeline_mode = #tpu.pipeline_mode<synchronous>, transform_indices = @transform_19, window_bounds = array<i64: 2304, 128>}, {pipeline_mode = #tpu.pipeline_mode<synchronous>, transform_indices = @transform_20, window_bounds = array<i64: 1, 128>}, {transform_indices = @transform_21, window_bounds = array<i64: 1, 2, 2, 128>}]} {
    %c0 = arith.constant 0 : index
    %c0_0 = arith.constant 0 : index
    %c0_1 = arith.constant 0 : index
    %0 = vector.load %arg1[%c0, %c0_0, %c0_1] : memref<1x16x16xf32, #tpu.memory_space<vmem>>, vector<1x16x16xf32>
    %1 = vector.shape_cast %0 : vector<1x16x16xf32> to vector<16x16xf32>
    %cst = arith.constant 0.000000e+00 : f32
    %2 = vector.broadcast %cst : f32 to vector<16x1xf32>
    %3 = tpu.concatenate %2, %1, %2 in 1 : vector<16x1xf32>, vector<16x16xf32>, vector<16x1xf32> -> vector<16x18xf32>
    %cst_2 = arith.constant 0.000000e+00 : f32
    %4 = vector.broadcast %cst_2 : f32 to vector<1x18xf32>
    %5 = tpu.concatenate %4, %3, %4 in 0 : vector<1x18xf32>, vector<16x18xf32>, vector<1x18xf32> -> vector<18x18xf32>
    %cst_3 = arith.constant 0.000000e+00 : f32
    %6 = vector.broadcast %cst_3 : f32 to vector<16x16x64xf32>
    %7 = vector.extract_strided_slice %5 {offsets = [0, 0], sizes = [16, 16], strides = [1, 1]} : vector<18x18xf32> to vector<16x16xf32>
    %8 = vector.shape_cast %7 : vector<16x16xf32> to vector<16x16x1xf32>
    %c0_4 = arith.constant 0 : index
    %c0_5 = arith.constant 0 : index
    %9 = vector.load %arg2[%c0_4, %c0_5] : memref<9x64xf32, #tpu.memory_space<vmem>>, vector<1x64xf32>
    %10 = vector.shape_cast %9 : vector<1x64xf32> to vector<64xf32>
    %11 = vector.shape_cast %10 : vector<64xf32> to vector<1x1x64xf32>
    %12 = vector.broadcast %8 : vector<16x16x1xf32> to vector<16x16x64xf32>
    %13 = vector.broadcast %11 : vector<1x1x64xf32> to vector<16x16x64xf32>
    %14 = arith.mulf %12, %13 : vector<16x16x64xf32>
    %15 = arith.addf %6, %14 : vector<16x16x64xf32>
    %16 = vector.extract_strided_slice %5 {offsets = [0, 1], sizes = [16, 16], strides = [1, 1]} : vector<18x18xf32> to vector<16x16xf32>
    %17 = vector.shape_cast %16 : vector<16x16xf32> to vector<16x16x1xf32>
    %c1 = arith.constant 1 : index
    %c0_6 = arith.constant 0 : index
    %18 = vector.load %arg2[%c1, %c0_6] : memref<9x64xf32, #tpu.memory_space<vmem>>, vector<1x64xf32>
    %19 = vector.shape_cast %18 : vector<1x64xf32> to vector<64xf32>
    %20 = vector.shape_cast %19 : vector<64xf32> to vector<1x1x64xf32>
    %21 = vector.broadcast %17 : vector<16x16x1xf32> to vector<16x16x64xf32>
    %22 = vector.broadcast %20 : vector<1x1x64xf32> to vector<16x16x64xf32>
    %23 = arith.mulf %21, %22 : vector<16x16x64xf32>
    %24 = arith.addf %15, %23 : vector<16x16x64xf32>
    %25 = vector.extract_strided_slice %5 {offsets = [0, 2], sizes = [16, 16], strides = [1, 1]} : vector<18x18xf32> to vector<16x16xf32>
    %26 = vector.shape_cast %25 : vector<16x16xf32> to vector<16x16x1xf32>
    %c2 = arith.constant 2 : index
    %c0_7 = arith.constant 0 : index
    %27 = vector.load %arg2[%c2, %c0_7] : memref<9x64xf32, #tpu.memory_space<vmem>>, vector<1x64xf32>
    %28 = vector.shape_cast %27 : vector<1x64xf32> to vector<64xf32>
    %29 = vector.shape_cast %28 : vector<64xf32> to vector<1x1x64xf32>
    %30 = vector.broadcast %26 : vector<16x16x1xf32> to vector<16x16x64xf32>
    %31 = vector.broadcast %29 : vector<1x1x64xf32> to vector<16x16x64xf32>
    %32 = arith.mulf %30, %31 : vector<16x16x64xf32>
    %33 = arith.addf %24, %32 : vector<16x16x64xf32>
    %34 = vector.extract_strided_slice %5 {offsets = [1, 0], sizes = [16, 16], strides = [1, 1]} : vector<18x18xf32> to vector<16x16xf32>
    %35 = vector.shape_cast %34 : vector<16x16xf32> to vector<16x16x1xf32>
    %c3 = arith.constant 3 : index
    %c0_8 = arith.constant 0 : index
    %36 = vector.load %arg2[%c3, %c0_8] : memref<9x64xf32, #tpu.memory_space<vmem>>, vector<1x64xf32>
    %37 = vector.shape_cast %36 : vector<1x64xf32> to vector<64xf32>
    %38 = vector.shape_cast %37 : vector<64xf32> to vector<1x1x64xf32>
    %39 = vector.broadcast %35 : vector<16x16x1xf32> to vector<16x16x64xf32>
    %40 = vector.broadcast %38 : vector<1x1x64xf32> to vector<16x16x64xf32>
    %41 = arith.mulf %39, %40 : vector<16x16x64xf32>
    %42 = arith.addf %33, %41 : vector<16x16x64xf32>
    %43 = vector.extract_strided_slice %5 {offsets = [1, 1], sizes = [16, 16], strides = [1, 1]} : vector<18x18xf32> to vector<16x16xf32>
    %44 = vector.shape_cast %43 : vector<16x16xf32> to vector<16x16x1xf32>
    %c4 = arith.constant 4 : index
    %c0_9 = arith.constant 0 : index
    %45 = vector.load %arg2[%c4, %c0_9] : memref<9x64xf32, #tpu.memory_space<vmem>>, vector<1x64xf32>
    %46 = vector.shape_cast %45 : vector<1x64xf32> to vector<64xf32>
    %47 = vector.shape_cast %46 : vector<64xf32> to vector<1x1x64xf32>
    %48 = vector.broadcast %44 : vector<16x16x1xf32> to vector<16x16x64xf32>
    %49 = vector.broadcast %47 : vector<1x1x64xf32> to vector<16x16x64xf32>
    %50 = arith.mulf %48, %49 : vector<16x16x64xf32>
    %51 = arith.addf %42, %50 : vector<16x16x64xf32>
    %52 = vector.extract_strided_slice %5 {offsets = [1, 2], sizes = [16, 16], strides = [1, 1]} : vector<18x18xf32> to vector<16x16xf32>
    %53 = vector.shape_cast %52 : vector<16x16xf32> to vector<16x16x1xf32>
    %c5 = arith.constant 5 : index
    %c0_10 = arith.constant 0 : index
    %54 = vector.load %arg2[%c5, %c0_10] : memref<9x64xf32, #tpu.memory_space<vmem>>, vector<1x64xf32>
    %55 = vector.shape_cast %54 : vector<1x64xf32> to vector<64xf32>
    %56 = vector.shape_cast %55 : vector<64xf32> to vector<1x1x64xf32>
    %57 = vector.broadcast %53 : vector<16x16x1xf32> to vector<16x16x64xf32>
    %58 = vector.broadcast %56 : vector<1x1x64xf32> to vector<16x16x64xf32>
    %59 = arith.mulf %57, %58 : vector<16x16x64xf32>
    %60 = arith.addf %51, %59 : vector<16x16x64xf32>
    %61 = vector.extract_strided_slice %5 {offsets = [2, 0], sizes = [16, 16], strides = [1, 1]} : vector<18x18xf32> to vector<16x16xf32>
    %62 = vector.shape_cast %61 : vector<16x16xf32> to vector<16x16x1xf32>
    %c6 = arith.constant 6 : index
    %c0_11 = arith.constant 0 : index
    %63 = vector.load %arg2[%c6, %c0_11] : memref<9x64xf32, #tpu.memory_space<vmem>>, vector<1x64xf32>
    %64 = vector.shape_cast %63 : vector<1x64xf32> to vector<64xf32>
    %65 = vector.shape_cast %64 : vector<64xf32> to vector<1x1x64xf32>
    %66 = vector.broadcast %62 : vector<16x16x1xf32> to vector<16x16x64xf32>
    %67 = vector.broadcast %65 : vector<1x1x64xf32> to vector<16x16x64xf32>
    %68 = arith.mulf %66, %67 : vector<16x16x64xf32>
    %69 = arith.addf %60, %68 : vector<16x16x64xf32>
    %70 = vector.extract_strided_slice %5 {offsets = [2, 1], sizes = [16, 16], strides = [1, 1]} : vector<18x18xf32> to vector<16x16xf32>
    %71 = vector.shape_cast %70 : vector<16x16xf32> to vector<16x16x1xf32>
    %c7 = arith.constant 7 : index
    %c0_12 = arith.constant 0 : index
    %72 = vector.load %arg2[%c7, %c0_12] : memref<9x64xf32, #tpu.memory_space<vmem>>, vector<1x64xf32>
    %73 = vector.shape_cast %72 : vector<1x64xf32> to vector<64xf32>
    %74 = vector.shape_cast %73 : vector<64xf32> to vector<1x1x64xf32>
    %75 = vector.broadcast %71 : vector<16x16x1xf32> to vector<16x16x64xf32>
    %76 = vector.broadcast %74 : vector<1x1x64xf32> to vector<16x16x64xf32>
    %77 = arith.mulf %75, %76 : vector<16x16x64xf32>
    %78 = arith.addf %69, %77 : vector<16x16x64xf32>
    %79 = vector.extract_strided_slice %5 {offsets = [2, 2], sizes = [16, 16], strides = [1, 1]} : vector<18x18xf32> to vector<16x16xf32>
    %80 = vector.shape_cast %79 : vector<16x16xf32> to vector<16x16x1xf32>
    %c8 = arith.constant 8 : index
    %c0_13 = arith.constant 0 : index
    %81 = vector.load %arg2[%c8, %c0_13] : memref<9x64xf32, #tpu.memory_space<vmem>>, vector<1x64xf32>
    %82 = vector.shape_cast %81 : vector<1x64xf32> to vector<64xf32>
    %83 = vector.shape_cast %82 : vector<64xf32> to vector<1x1x64xf32>
    %84 = vector.broadcast %80 : vector<16x16x1xf32> to vector<16x16x64xf32>
    %85 = vector.broadcast %83 : vector<1x1x64xf32> to vector<16x16x64xf32>
    %86 = arith.mulf %84, %85 : vector<16x16x64xf32>
    %87 = arith.addf %78, %86 : vector<16x16x64xf32>
    %c0_14 = arith.constant 0 : index
    %c0_15 = arith.constant 0 : index
    %88 = vector.load %arg3[%c0_14, %c0_15] : memref<1x64xf32, #tpu.memory_space<vmem>>, vector<1x64xf32>
    %89 = vector.shape_cast %88 : vector<1x64xf32> to vector<64xf32>
    %90 = vector.shape_cast %89 : vector<64xf32> to vector<1x1x64xf32>
    %91 = vector.broadcast %90 : vector<1x1x64xf32> to vector<16x16x64xf32>
    %92 = arith.addf %87, %91 : vector<16x16x64xf32>
    %cst_16 = arith.constant 0.000000e+00 : f32
    %93 = vector.broadcast %cst_16 : f32 to vector<16x16x64xf32>
    %94 = arith.maximumf %92, %93 : vector<16x16x64xf32>
    %95 = arith.truncf %94 : vector<16x16x64xf32> to vector<16x16x64xbf16>
    %cst_17 = arith.constant 0.000000e+00 : bf16
    %96 = vector.broadcast %cst_17 : bf16 to vector<16x1x64xbf16>
    %97 = tpu.concatenate %96, %95, %96 in 1 : vector<16x1x64xbf16>, vector<16x16x64xbf16>, vector<16x1x64xbf16> -> vector<16x18x64xbf16>
    %cst_18 = arith.constant 0.000000e+00 : bf16
    %98 = vector.broadcast %cst_18 : bf16 to vector<1x18x64xbf16>
    %99 = tpu.concatenate %98, %97, %98 in 0 : vector<1x18x64xbf16>, vector<16x18x64xbf16>, vector<1x18x64xbf16> -> vector<18x18x64xbf16>
    %100 = vector.extract_strided_slice %99 {offsets = [0, 0, 0], sizes = [16, 16, 64], strides = [1, 1, 1]} : vector<18x18x64xbf16> to vector<16x16x64xbf16>
    %101 = vector.shape_cast %100 : vector<16x16x64xbf16> to vector<256x64xbf16>
    %102 = vector.extract_strided_slice %99 {offsets = [0, 1, 0], sizes = [16, 16, 64], strides = [1, 1, 1]} : vector<18x18x64xbf16> to vector<16x16x64xbf16>
    %103 = vector.shape_cast %102 : vector<16x16x64xbf16> to vector<256x64xbf16>
    %104 = vector.extract_strided_slice %99 {offsets = [0, 2, 0], sizes = [16, 16, 64], strides = [1, 1, 1]} : vector<18x18x64xbf16> to vector<16x16x64xbf16>
    %105 = vector.shape_cast %104 : vector<16x16x64xbf16> to vector<256x64xbf16>
    %106 = vector.extract_strided_slice %99 {offsets = [1, 0, 0], sizes = [16, 16, 64], strides = [1, 1, 1]} : vector<18x18x64xbf16> to vector<16x16x64xbf16>
    %107 = vector.shape_cast %106 : vector<16x16x64xbf16> to vector<256x64xbf16>
    %108 = vector.extract_strided_slice %99 {offsets = [1, 1, 0], sizes = [16, 16, 64], strides = [1, 1, 1]} : vector<18x18x64xbf16> to vector<16x16x64xbf16>
    %109 = vector.shape_cast %108 : vector<16x16x64xbf16> to vector<256x64xbf16>
    %110 = vector.extract_strided_slice %99 {offsets = [1, 2, 0], sizes = [16, 16, 64], strides = [1, 1, 1]} : vector<18x18x64xbf16> to vector<16x16x64xbf16>
    %111 = vector.shape_cast %110 : vector<16x16x64xbf16> to vector<256x64xbf16>
    %112 = vector.extract_strided_slice %99 {offsets = [2, 0, 0], sizes = [16, 16, 64], strides = [1, 1, 1]} : vector<18x18x64xbf16> to vector<16x16x64xbf16>
    %113 = vector.shape_cast %112 : vector<16x16x64xbf16> to vector<256x64xbf16>
    %114 = vector.extract_strided_slice %99 {offsets = [2, 1, 0], sizes = [16, 16, 64], strides = [1, 1, 1]} : vector<18x18x64xbf16> to vector<16x16x64xbf16>
    %115 = vector.shape_cast %114 : vector<16x16x64xbf16> to vector<256x64xbf16>
    %116 = vector.extract_strided_slice %99 {offsets = [2, 2, 0], sizes = [16, 16, 64], strides = [1, 1, 1]} : vector<18x18x64xbf16> to vector<16x16x64xbf16>
    %117 = vector.shape_cast %116 : vector<16x16x64xbf16> to vector<256x64xbf16>
    %118 = tpu.concatenate %101, %103, %105, %107, %109, %111, %113, %115, %117 in 1 : vector<256x64xbf16>, vector<256x64xbf16>, vector<256x64xbf16>, vector<256x64xbf16>, vector<256x64xbf16>, vector<256x64xbf16>, vector<256x64xbf16>, vector<256x64xbf16>, vector<256x64xbf16> -> vector<256x576xbf16>
    %c0_19 = arith.constant 0 : index
    %c0_20 = arith.constant 0 : index
    %119 = vector.load %arg4[%c0_19, %c0_20] : memref<576x64xbf16, #tpu.memory_space<vmem>>, vector<576x64xbf16>
    %cst_21 = arith.constant dense<0.000000e+00> : vector<256x64xf32>
    %120 = tpu.matmul %118, %119, %cst_21 {dimension_numbers = #tpu.dot_dimension_numbers<[1], [0], [0], [1], [0, 0, 1, 1], [], []>} : vector<256x576xbf16>, vector<576x64xbf16>, vector<256x64xf32> -> vector<256x64xf32>
    %c0_22 = arith.constant 0 : index
    %c0_23 = arith.constant 0 : index
    %121 = vector.load %arg5[%c0_22, %c0_23] : memref<1x64xf32, #tpu.memory_space<vmem>>, vector<1x64xf32>
    %122 = vector.broadcast %121 : vector<1x64xf32> to vector<256x64xf32>
    %123 = arith.addf %120, %122 : vector<256x64xf32>
    %cst_24 = arith.constant 0.000000e+00 : f32
    %124 = vector.broadcast %cst_24 : f32 to vector<256x64xf32>
    %125 = arith.maximumf %123, %124 : vector<256x64xf32>
    %126 = vector.shape_cast %125 : vector<256x64xf32> to vector<16x16x64xf32>
    %127 = vector.shape_cast %126 : vector<16x16x64xf32> to vector<8x2x8x2x64xf32>
    %128 = vector.extract_strided_slice %127 {offsets = [0, 0, 0, 0, 0], sizes = [8, 1, 8, 1, 64], strides = [1, 1, 1, 1, 1]} : vector<8x2x8x2x64xf32> to vector<8x1x8x1x64xf32>
    %129 = vector.shape_cast %128 : vector<8x1x8x1x64xf32> to vector<8x8x64xf32>
    %130 = vector.extract_strided_slice %127 {offsets = [0, 0, 0, 1, 0], sizes = [8, 1, 8, 1, 64], strides = [1, 1, 1, 1, 1]} : vector<8x2x8x2x64xf32> to vector<8x1x8x1x64xf32>
    %131 = vector.shape_cast %130 : vector<8x1x8x1x64xf32> to vector<8x8x64xf32>
    %132 = arith.maximumf %129, %131 : vector<8x8x64xf32>
    %133 = vector.extract_strided_slice %127 {offsets = [0, 1, 0, 0, 0], sizes = [8, 1, 8, 1, 64], strides = [1, 1, 1, 1, 1]} : vector<8x2x8x2x64xf32> to vector<8x1x8x1x64xf32>
    %134 = vector.shape_cast %133 : vector<8x1x8x1x64xf32> to vector<8x8x64xf32>
    %135 = vector.extract_strided_slice %127 {offsets = [0, 1, 0, 1, 0], sizes = [8, 1, 8, 1, 64], strides = [1, 1, 1, 1, 1]} : vector<8x2x8x2x64xf32> to vector<8x1x8x1x64xf32>
    %136 = vector.shape_cast %135 : vector<8x1x8x1x64xf32> to vector<8x8x64xf32>
    %137 = arith.maximumf %134, %136 : vector<8x8x64xf32>
    %138 = arith.maximumf %132, %137 : vector<8x8x64xf32>
    %139 = arith.truncf %138 : vector<8x8x64xf32> to vector<8x8x64xbf16>
    %cst_25 = arith.constant 0.000000e+00 : bf16
    %140 = vector.broadcast %cst_25 : bf16 to vector<8x1x64xbf16>
    %141 = tpu.concatenate %140, %139, %140 in 1 : vector<8x1x64xbf16>, vector<8x8x64xbf16>, vector<8x1x64xbf16> -> vector<8x10x64xbf16>
    %cst_26 = arith.constant 0.000000e+00 : bf16
    %142 = vector.broadcast %cst_26 : bf16 to vector<1x10x64xbf16>
    %143 = tpu.concatenate %142, %141, %142 in 0 : vector<1x10x64xbf16>, vector<8x10x64xbf16>, vector<1x10x64xbf16> -> vector<10x10x64xbf16>
    %144 = vector.extract_strided_slice %143 {offsets = [0, 0, 0], sizes = [8, 8, 64], strides = [1, 1, 1]} : vector<10x10x64xbf16> to vector<8x8x64xbf16>
    %145 = vector.shape_cast %144 : vector<8x8x64xbf16> to vector<64x64xbf16>
    %146 = vector.extract_strided_slice %143 {offsets = [0, 1, 0], sizes = [8, 8, 64], strides = [1, 1, 1]} : vector<10x10x64xbf16> to vector<8x8x64xbf16>
    %147 = vector.shape_cast %146 : vector<8x8x64xbf16> to vector<64x64xbf16>
    %148 = vector.extract_strided_slice %143 {offsets = [0, 2, 0], sizes = [8, 8, 64], strides = [1, 1, 1]} : vector<10x10x64xbf16> to vector<8x8x64xbf16>
    %149 = vector.shape_cast %148 : vector<8x8x64xbf16> to vector<64x64xbf16>
    %150 = vector.extract_strided_slice %143 {offsets = [1, 0, 0], sizes = [8, 8, 64], strides = [1, 1, 1]} : vector<10x10x64xbf16> to vector<8x8x64xbf16>
    %151 = vector.shape_cast %150 : vector<8x8x64xbf16> to vector<64x64xbf16>
    %152 = vector.extract_strided_slice %143 {offsets = [1, 1, 0], sizes = [8, 8, 64], strides = [1, 1, 1]} : vector<10x10x64xbf16> to vector<8x8x64xbf16>
    %153 = vector.shape_cast %152 : vector<8x8x64xbf16> to vector<64x64xbf16>
    %154 = vector.extract_strided_slice %143 {offsets = [1, 2, 0], sizes = [8, 8, 64], strides = [1, 1, 1]} : vector<10x10x64xbf16> to vector<8x8x64xbf16>
    %155 = vector.shape_cast %154 : vector<8x8x64xbf16> to vector<64x64xbf16>
    %156 = vector.extract_strided_slice %143 {offsets = [2, 0, 0], sizes = [8, 8, 64], strides = [1, 1, 1]} : vector<10x10x64xbf16> to vector<8x8x64xbf16>
    %157 = vector.shape_cast %156 : vector<8x8x64xbf16> to vector<64x64xbf16>
    %158 = vector.extract_strided_slice %143 {offsets = [2, 1, 0], sizes = [8, 8, 64], strides = [1, 1, 1]} : vector<10x10x64xbf16> to vector<8x8x64xbf16>
    %159 = vector.shape_cast %158 : vector<8x8x64xbf16> to vector<64x64xbf16>
    %160 = vector.extract_strided_slice %143 {offsets = [2, 2, 0], sizes = [8, 8, 64], strides = [1, 1, 1]} : vector<10x10x64xbf16> to vector<8x8x64xbf16>
    %161 = vector.shape_cast %160 : vector<8x8x64xbf16> to vector<64x64xbf16>
    %162 = tpu.concatenate %145, %147, %149, %151, %153, %155, %157, %159, %161 in 1 : vector<64x64xbf16>, vector<64x64xbf16>, vector<64x64xbf16>, vector<64x64xbf16>, vector<64x64xbf16>, vector<64x64xbf16>, vector<64x64xbf16>, vector<64x64xbf16>, vector<64x64xbf16> -> vector<64x576xbf16>
    %c0_27 = arith.constant 0 : index
    %c0_28 = arith.constant 0 : index
    %163 = vector.load %arg6[%c0_27, %c0_28] : memref<576x64xbf16, #tpu.memory_space<vmem>>, vector<576x64xbf16>
    %cst_29 = arith.constant dense<0.000000e+00> : vector<64x64xf32>
    %164 = tpu.matmul %162, %163, %cst_29 {dimension_numbers = #tpu.dot_dimension_numbers<[1], [0], [0], [1], [0, 0, 1, 1], [], []>} : vector<64x576xbf16>, vector<576x64xbf16>, vector<64x64xf32> -> vector<64x64xf32>
    %c0_30 = arith.constant 0 : index
    %c0_31 = arith.constant 0 : index
    %165 = vector.load %arg7[%c0_30, %c0_31] : memref<1x64xf32, #tpu.memory_space<vmem>>, vector<1x64xf32>
    %166 = vector.broadcast %165 : vector<1x64xf32> to vector<64x64xf32>
    %167 = arith.addf %164, %166 : vector<64x64xf32>
    %cst_32 = arith.constant 0.000000e+00 : f32
    %168 = vector.broadcast %cst_32 : f32 to vector<64x64xf32>
    %169 = arith.maximumf %167, %168 : vector<64x64xf32>
    %170 = vector.shape_cast %169 : vector<64x64xf32> to vector<8x8x64xf32>
    %171 = arith.truncf %170 : vector<8x8x64xf32> to vector<8x8x64xbf16>
    %cst_33 = arith.constant 0.000000e+00 : bf16
    %172 = vector.broadcast %cst_33 : bf16 to vector<8x1x64xbf16>
    %173 = tpu.concatenate %172, %171, %172 in 1 : vector<8x1x64xbf16>, vector<8x8x64xbf16>, vector<8x1x64xbf16> -> vector<8x10x64xbf16>
    %cst_34 = arith.constant 0.000000e+00 : bf16
    %174 = vector.broadcast %cst_34 : bf16 to vector<1x10x64xbf16>
    %175 = tpu.concatenate %174, %173, %174 in 0 : vector<1x10x64xbf16>, vector<8x10x64xbf16>, vector<1x10x64xbf16> -> vector<10x10x64xbf16>
    %176 = vector.extract_strided_slice %175 {offsets = [0, 0, 0], sizes = [8, 8, 64], strides = [1, 1, 1]} : vector<10x10x64xbf16> to vector<8x8x64xbf16>
    %177 = vector.shape_cast %176 : vector<8x8x64xbf16> to vector<64x64xbf16>
    %178 = vector.extract_strided_slice %175 {offsets = [0, 1, 0], sizes = [8, 8, 64], strides = [1, 1, 1]} : vector<10x10x64xbf16> to vector<8x8x64xbf16>
    %179 = vector.shape_cast %178 : vector<8x8x64xbf16> to vector<64x64xbf16>
    %180 = vector.extract_strided_slice %175 {offsets = [0, 2, 0], sizes = [8, 8, 64], strides = [1, 1, 1]} : vector<10x10x64xbf16> to vector<8x8x64xbf16>
    %181 = vector.shape_cast %180 : vector<8x8x64xbf16> to vector<64x64xbf16>
    %182 = vector.extract_strided_slice %175 {offsets = [1, 0, 0], sizes = [8, 8, 64], strides = [1, 1, 1]} : vector<10x10x64xbf16> to vector<8x8x64xbf16>
    %183 = vector.shape_cast %182 : vector<8x8x64xbf16> to vector<64x64xbf16>
    %184 = vector.extract_strided_slice %175 {offsets = [1, 1, 0], sizes = [8, 8, 64], strides = [1, 1, 1]} : vector<10x10x64xbf16> to vector<8x8x64xbf16>
    %185 = vector.shape_cast %184 : vector<8x8x64xbf16> to vector<64x64xbf16>
    %186 = vector.extract_strided_slice %175 {offsets = [1, 2, 0], sizes = [8, 8, 64], strides = [1, 1, 1]} : vector<10x10x64xbf16> to vector<8x8x64xbf16>
    %187 = vector.shape_cast %186 : vector<8x8x64xbf16> to vector<64x64xbf16>
    %188 = vector.extract_strided_slice %175 {offsets = [2, 0, 0], sizes = [8, 8, 64], strides = [1, 1, 1]} : vector<10x10x64xbf16> to vector<8x8x64xbf16>
    %189 = vector.shape_cast %188 : vector<8x8x64xbf16> to vector<64x64xbf16>
    %190 = vector.extract_strided_slice %175 {offsets = [2, 1, 0], sizes = [8, 8, 64], strides = [1, 1, 1]} : vector<10x10x64xbf16> to vector<8x8x64xbf16>
    %191 = vector.shape_cast %190 : vector<8x8x64xbf16> to vector<64x64xbf16>
    %192 = vector.extract_strided_slice %175 {offsets = [2, 2, 0], sizes = [8, 8, 64], strides = [1, 1, 1]} : vector<10x10x64xbf16> to vector<8x8x64xbf16>
    %193 = vector.shape_cast %192 : vector<8x8x64xbf16> to vector<64x64xbf16>
    %194 = tpu.concatenate %177, %179, %181, %183, %185, %187, %189, %191, %193 in 1 : vector<64x64xbf16>, vector<64x64xbf16>, vector<64x64xbf16>, vector<64x64xbf16>, vector<64x64xbf16>, vector<64x64xbf16>, vector<64x64xbf16>, vector<64x64xbf16>, vector<64x64xbf16> -> vector<64x576xbf16>
    %c0_35 = arith.constant 0 : index
    %c0_36 = arith.constant 0 : index
    %195 = vector.load %arg8[%c0_35, %c0_36] : memref<576x64xbf16, #tpu.memory_space<vmem>>, vector<576x64xbf16>
    %cst_37 = arith.constant dense<0.000000e+00> : vector<64x64xf32>
    %196 = tpu.matmul %194, %195, %cst_37 {dimension_numbers = #tpu.dot_dimension_numbers<[1], [0], [0], [1], [0, 0, 1, 1], [], []>} : vector<64x576xbf16>, vector<576x64xbf16>, vector<64x64xf32> -> vector<64x64xf32>
    %c0_38 = arith.constant 0 : index
    %c0_39 = arith.constant 0 : index
    %197 = vector.load %arg9[%c0_38, %c0_39] : memref<1x64xf32, #tpu.memory_space<vmem>>, vector<1x64xf32>
    %198 = vector.broadcast %197 : vector<1x64xf32> to vector<64x64xf32>
    %199 = arith.addf %196, %198 : vector<64x64xf32>
    %cst_40 = arith.constant 0.000000e+00 : f32
    %200 = vector.broadcast %cst_40 : f32 to vector<64x64xf32>
    %201 = arith.maximumf %199, %200 : vector<64x64xf32>
    %202 = vector.shape_cast %201 : vector<64x64xf32> to vector<8x8x64xf32>
    %203 = vector.shape_cast %202 : vector<8x8x64xf32> to vector<4x2x4x2x64xf32>
    %204 = vector.extract_strided_slice %203 {offsets = [0, 0, 0, 0, 0], sizes = [4, 1, 4, 1, 64], strides = [1, 1, 1, 1, 1]} : vector<4x2x4x2x64xf32> to vector<4x1x4x1x64xf32>
    %205 = vector.shape_cast %204 : vector<4x1x4x1x64xf32> to vector<4x4x64xf32>
    %206 = vector.extract_strided_slice %203 {offsets = [0, 0, 0, 1, 0], sizes = [4, 1, 4, 1, 64], strides = [1, 1, 1, 1, 1]} : vector<4x2x4x2x64xf32> to vector<4x1x4x1x64xf32>
    %207 = vector.shape_cast %206 : vector<4x1x4x1x64xf32> to vector<4x4x64xf32>
    %208 = arith.maximumf %205, %207 : vector<4x4x64xf32>
    %209 = vector.extract_strided_slice %203 {offsets = [0, 1, 0, 0, 0], sizes = [4, 1, 4, 1, 64], strides = [1, 1, 1, 1, 1]} : vector<4x2x4x2x64xf32> to vector<4x1x4x1x64xf32>
    %210 = vector.shape_cast %209 : vector<4x1x4x1x64xf32> to vector<4x4x64xf32>
    %211 = vector.extract_strided_slice %203 {offsets = [0, 1, 0, 1, 0], sizes = [4, 1, 4, 1, 64], strides = [1, 1, 1, 1, 1]} : vector<4x2x4x2x64xf32> to vector<4x1x4x1x64xf32>
    %212 = vector.shape_cast %211 : vector<4x1x4x1x64xf32> to vector<4x4x64xf32>
    %213 = arith.maximumf %210, %212 : vector<4x4x64xf32>
    %214 = arith.maximumf %208, %213 : vector<4x4x64xf32>
    %215 = arith.truncf %214 : vector<4x4x64xf32> to vector<4x4x64xbf16>
    %cst_41 = arith.constant 0.000000e+00 : bf16
    %216 = vector.broadcast %cst_41 : bf16 to vector<4x1x64xbf16>
    %217 = tpu.concatenate %216, %215, %216 in 1 : vector<4x1x64xbf16>, vector<4x4x64xbf16>, vector<4x1x64xbf16> -> vector<4x6x64xbf16>
    %cst_42 = arith.constant 0.000000e+00 : bf16
    %218 = vector.broadcast %cst_42 : bf16 to vector<1x6x64xbf16>
    %219 = tpu.concatenate %218, %217, %218 in 0 : vector<1x6x64xbf16>, vector<4x6x64xbf16>, vector<1x6x64xbf16> -> vector<6x6x64xbf16>
    %220 = vector.extract_strided_slice %219 {offsets = [0, 0, 0], sizes = [4, 4, 64], strides = [1, 1, 1]} : vector<6x6x64xbf16> to vector<4x4x64xbf16>
    %221 = vector.shape_cast %220 : vector<4x4x64xbf16> to vector<16x64xbf16>
    %222 = vector.extract_strided_slice %219 {offsets = [0, 1, 0], sizes = [4, 4, 64], strides = [1, 1, 1]} : vector<6x6x64xbf16> to vector<4x4x64xbf16>
    %223 = vector.shape_cast %222 : vector<4x4x64xbf16> to vector<16x64xbf16>
    %224 = vector.extract_strided_slice %219 {offsets = [0, 2, 0], sizes = [4, 4, 64], strides = [1, 1, 1]} : vector<6x6x64xbf16> to vector<4x4x64xbf16>
    %225 = vector.shape_cast %224 : vector<4x4x64xbf16> to vector<16x64xbf16>
    %226 = vector.extract_strided_slice %219 {offsets = [1, 0, 0], sizes = [4, 4, 64], strides = [1, 1, 1]} : vector<6x6x64xbf16> to vector<4x4x64xbf16>
    %227 = vector.shape_cast %226 : vector<4x4x64xbf16> to vector<16x64xbf16>
    %228 = vector.extract_strided_slice %219 {offsets = [1, 1, 0], sizes = [4, 4, 64], strides = [1, 1, 1]} : vector<6x6x64xbf16> to vector<4x4x64xbf16>
    %229 = vector.shape_cast %228 : vector<4x4x64xbf16> to vector<16x64xbf16>
    %230 = vector.extract_strided_slice %219 {offsets = [1, 2, 0], sizes = [4, 4, 64], strides = [1, 1, 1]} : vector<6x6x64xbf16> to vector<4x4x64xbf16>
    %231 = vector.shape_cast %230 : vector<4x4x64xbf16> to vector<16x64xbf16>
    %232 = vector.extract_strided_slice %219 {offsets = [2, 0, 0], sizes = [4, 4, 64], strides = [1, 1, 1]} : vector<6x6x64xbf16> to vector<4x4x64xbf16>
    %233 = vector.shape_cast %232 : vector<4x4x64xbf16> to vector<16x64xbf16>
    %234 = vector.extract_strided_slice %219 {offsets = [2, 1, 0], sizes = [4, 4, 64], strides = [1, 1, 1]} : vector<6x6x64xbf16> to vector<4x4x64xbf16>
    %235 = vector.shape_cast %234 : vector<4x4x64xbf16> to vector<16x64xbf16>
    %236 = vector.extract_strided_slice %219 {offsets = [2, 2, 0], sizes = [4, 4, 64], strides = [1, 1, 1]} : vector<6x6x64xbf16> to vector<4x4x64xbf16>
    %237 = vector.shape_cast %236 : vector<4x4x64xbf16> to vector<16x64xbf16>
    %238 = tpu.concatenate %221, %223, %225, %227, %229, %231, %233, %235, %237 in 1 : vector<16x64xbf16>, vector<16x64xbf16>, vector<16x64xbf16>, vector<16x64xbf16>, vector<16x64xbf16>, vector<16x64xbf16>, vector<16x64xbf16>, vector<16x64xbf16>, vector<16x64xbf16> -> vector<16x576xbf16>
    %c0_43 = arith.constant 0 : index
    %c0_44 = arith.constant 0 : index
    %239 = vector.load %arg10[%c0_43, %c0_44] : memref<576x128xbf16, #tpu.memory_space<vmem>>, vector<576x128xbf16>
    %cst_45 = arith.constant dense<0.000000e+00> : vector<16x128xf32>
    %240 = tpu.matmul %238, %239, %cst_45 {dimension_numbers = #tpu.dot_dimension_numbers<[1], [0], [0], [1], [0, 0, 1, 1], [], []>} : vector<16x576xbf16>, vector<576x128xbf16>, vector<16x128xf32> -> vector<16x128xf32>
    %c0_46 = arith.constant 0 : index
    %c0_47 = arith.constant 0 : index
    %241 = vector.load %arg11[%c0_46, %c0_47] : memref<1x128xf32, #tpu.memory_space<vmem>>, vector<1x128xf32>
    %242 = vector.broadcast %241 : vector<1x128xf32> to vector<16x128xf32>
    %243 = arith.addf %240, %242 : vector<16x128xf32>
    %cst_48 = arith.constant 0.000000e+00 : f32
    %244 = vector.broadcast %cst_48 : f32 to vector<16x128xf32>
    %245 = arith.maximumf %243, %244 : vector<16x128xf32>
    %246 = vector.shape_cast %245 : vector<16x128xf32> to vector<4x4x128xf32>
    %247 = arith.truncf %246 : vector<4x4x128xf32> to vector<4x4x128xbf16>
    %cst_49 = arith.constant 0.000000e+00 : bf16
    %248 = vector.broadcast %cst_49 : bf16 to vector<4x1x128xbf16>
    %249 = tpu.concatenate %248, %247, %248 in 1 : vector<4x1x128xbf16>, vector<4x4x128xbf16>, vector<4x1x128xbf16> -> vector<4x6x128xbf16>
    %cst_50 = arith.constant 0.000000e+00 : bf16
    %250 = vector.broadcast %cst_50 : bf16 to vector<1x6x128xbf16>
    %251 = tpu.concatenate %250, %249, %250 in 0 : vector<1x6x128xbf16>, vector<4x6x128xbf16>, vector<1x6x128xbf16> -> vector<6x6x128xbf16>
    %252 = vector.extract_strided_slice %251 {offsets = [0, 0, 0], sizes = [4, 4, 128], strides = [1, 1, 1]} : vector<6x6x128xbf16> to vector<4x4x128xbf16>
    %253 = vector.shape_cast %252 : vector<4x4x128xbf16> to vector<16x128xbf16>
    %254 = vector.extract_strided_slice %251 {offsets = [0, 1, 0], sizes = [4, 4, 128], strides = [1, 1, 1]} : vector<6x6x128xbf16> to vector<4x4x128xbf16>
    %255 = vector.shape_cast %254 : vector<4x4x128xbf16> to vector<16x128xbf16>
    %256 = vector.extract_strided_slice %251 {offsets = [0, 2, 0], sizes = [4, 4, 128], strides = [1, 1, 1]} : vector<6x6x128xbf16> to vector<4x4x128xbf16>
    %257 = vector.shape_cast %256 : vector<4x4x128xbf16> to vector<16x128xbf16>
    %258 = vector.extract_strided_slice %251 {offsets = [1, 0, 0], sizes = [4, 4, 128], strides = [1, 1, 1]} : vector<6x6x128xbf16> to vector<4x4x128xbf16>
    %259 = vector.shape_cast %258 : vector<4x4x128xbf16> to vector<16x128xbf16>
    %260 = vector.extract_strided_slice %251 {offsets = [1, 1, 0], sizes = [4, 4, 128], strides = [1, 1, 1]} : vector<6x6x128xbf16> to vector<4x4x128xbf16>
    %261 = vector.shape_cast %260 : vector<4x4x128xbf16> to vector<16x128xbf16>
    %262 = vector.extract_strided_slice %251 {offsets = [1, 2, 0], sizes = [4, 4, 128], strides = [1, 1, 1]} : vector<6x6x128xbf16> to vector<4x4x128xbf16>
    %263 = vector.shape_cast %262 : vector<4x4x128xbf16> to vector<16x128xbf16>
    %264 = vector.extract_strided_slice %251 {offsets = [2, 0, 0], sizes = [4, 4, 128], strides = [1, 1, 1]} : vector<6x6x128xbf16> to vector<4x4x128xbf16>
    %265 = vector.shape_cast %264 : vector<4x4x128xbf16> to vector<16x128xbf16>
    %266 = vector.extract_strided_slice %251 {offsets = [2, 1, 0], sizes = [4, 4, 128], strides = [1, 1, 1]} : vector<6x6x128xbf16> to vector<4x4x128xbf16>
    %267 = vector.shape_cast %266 : vector<4x4x128xbf16> to vector<16x128xbf16>
    %268 = vector.extract_strided_slice %251 {offsets = [2, 2, 0], sizes = [4, 4, 128], strides = [1, 1, 1]} : vector<6x6x128xbf16> to vector<4x4x128xbf16>
    %269 = vector.shape_cast %268 : vector<4x4x128xbf16> to vector<16x128xbf16>
    %270 = tpu.concatenate %253, %255, %257, %259, %261, %263, %265, %267, %269 in 1 : vector<16x128xbf16>, vector<16x128xbf16>, vector<16x128xbf16>, vector<16x128xbf16>, vector<16x128xbf16>, vector<16x128xbf16>, vector<16x128xbf16>, vector<16x128xbf16>, vector<16x128xbf16> -> vector<16x1152xbf16>
    %c0_51 = arith.constant 0 : index
    %c0_52 = arith.constant 0 : index
    %271 = vector.load %arg12[%c0_51, %c0_52] : memref<1152x128xbf16, #tpu.memory_space<vmem>>, vector<1152x128xbf16>
    %cst_53 = arith.constant dense<0.000000e+00> : vector<16x128xf32>
    %272 = tpu.matmul %270, %271, %cst_53 {dimension_numbers = #tpu.dot_dimension_numbers<[1], [0], [0], [1], [0, 0, 1, 1], [], []>} : vector<16x1152xbf16>, vector<1152x128xbf16>, vector<16x128xf32> -> vector<16x128xf32>
    %c0_54 = arith.constant 0 : index
    %c0_55 = arith.constant 0 : index
    %273 = vector.load %arg13[%c0_54, %c0_55] : memref<1x128xf32, #tpu.memory_space<vmem>>, vector<1x128xf32>
    %274 = vector.broadcast %273 : vector<1x128xf32> to vector<16x128xf32>
    %275 = arith.addf %272, %274 : vector<16x128xf32>
    %cst_56 = arith.constant 0.000000e+00 : f32
    %276 = vector.broadcast %cst_56 : f32 to vector<16x128xf32>
    %277 = arith.maximumf %275, %276 : vector<16x128xf32>
    %278 = vector.shape_cast %277 : vector<16x128xf32> to vector<4x4x128xf32>
    %279 = vector.shape_cast %278 : vector<4x4x128xf32> to vector<2x2x2x2x128xf32>
    %280 = vector.extract_strided_slice %279 {offsets = [0, 0, 0, 0, 0], sizes = [2, 1, 2, 1, 128], strides = [1, 1, 1, 1, 1]} : vector<2x2x2x2x128xf32> to vector<2x1x2x1x128xf32>
    %281 = vector.shape_cast %280 : vector<2x1x2x1x128xf32> to vector<2x2x128xf32>
    %282 = vector.extract_strided_slice %279 {offsets = [0, 0, 0, 1, 0], sizes = [2, 1, 2, 1, 128], strides = [1, 1, 1, 1, 1]} : vector<2x2x2x2x128xf32> to vector<2x1x2x1x128xf32>
    %283 = vector.shape_cast %282 : vector<2x1x2x1x128xf32> to vector<2x2x128xf32>
    %284 = arith.maximumf %281, %283 : vector<2x2x128xf32>
    %285 = vector.extract_strided_slice %279 {offsets = [0, 1, 0, 0, 0], sizes = [2, 1, 2, 1, 128], strides = [1, 1, 1, 1, 1]} : vector<2x2x2x2x128xf32> to vector<2x1x2x1x128xf32>
    %286 = vector.shape_cast %285 : vector<2x1x2x1x128xf32> to vector<2x2x128xf32>
    %287 = vector.extract_strided_slice %279 {offsets = [0, 1, 0, 1, 0], sizes = [2, 1, 2, 1, 128], strides = [1, 1, 1, 1, 1]} : vector<2x2x2x2x128xf32> to vector<2x1x2x1x128xf32>
    %288 = vector.shape_cast %287 : vector<2x1x2x1x128xf32> to vector<2x2x128xf32>
    %289 = arith.maximumf %286, %288 : vector<2x2x128xf32>
    %290 = arith.maximumf %284, %289 : vector<2x2x128xf32>
    %291 = arith.truncf %290 : vector<2x2x128xf32> to vector<2x2x128xbf16>
    %cst_57 = arith.constant 0.000000e+00 : bf16
    %292 = vector.broadcast %cst_57 : bf16 to vector<2x1x128xbf16>
    %293 = tpu.concatenate %292, %291, %292 in 1 : vector<2x1x128xbf16>, vector<2x2x128xbf16>, vector<2x1x128xbf16> -> vector<2x4x128xbf16>
    %cst_58 = arith.constant 0.000000e+00 : bf16
    %294 = vector.broadcast %cst_58 : bf16 to vector<1x4x128xbf16>
    %295 = tpu.concatenate %294, %293, %294 in 0 : vector<1x4x128xbf16>, vector<2x4x128xbf16>, vector<1x4x128xbf16> -> vector<4x4x128xbf16>
    %296 = vector.extract_strided_slice %295 {offsets = [0, 0, 0], sizes = [2, 2, 128], strides = [1, 1, 1]} : vector<4x4x128xbf16> to vector<2x2x128xbf16>
    %297 = vector.shape_cast %296 : vector<2x2x128xbf16> to vector<4x128xbf16>
    %298 = vector.extract_strided_slice %295 {offsets = [0, 1, 0], sizes = [2, 2, 128], strides = [1, 1, 1]} : vector<4x4x128xbf16> to vector<2x2x128xbf16>
    %299 = vector.shape_cast %298 : vector<2x2x128xbf16> to vector<4x128xbf16>
    %300 = vector.extract_strided_slice %295 {offsets = [0, 2, 0], sizes = [2, 2, 128], strides = [1, 1, 1]} : vector<4x4x128xbf16> to vector<2x2x128xbf16>
    %301 = vector.shape_cast %300 : vector<2x2x128xbf16> to vector<4x128xbf16>
    %302 = vector.extract_strided_slice %295 {offsets = [1, 0, 0], sizes = [2, 2, 128], strides = [1, 1, 1]} : vector<4x4x128xbf16> to vector<2x2x128xbf16>
    %303 = vector.shape_cast %302 : vector<2x2x128xbf16> to vector<4x128xbf16>
    %304 = vector.extract_strided_slice %295 {offsets = [1, 1, 0], sizes = [2, 2, 128], strides = [1, 1, 1]} : vector<4x4x128xbf16> to vector<2x2x128xbf16>
    %305 = vector.shape_cast %304 : vector<2x2x128xbf16> to vector<4x128xbf16>
    %306 = vector.extract_strided_slice %295 {offsets = [1, 2, 0], sizes = [2, 2, 128], strides = [1, 1, 1]} : vector<4x4x128xbf16> to vector<2x2x128xbf16>
    %307 = vector.shape_cast %306 : vector<2x2x128xbf16> to vector<4x128xbf16>
    %308 = vector.extract_strided_slice %295 {offsets = [2, 0, 0], sizes = [2, 2, 128], strides = [1, 1, 1]} : vector<4x4x128xbf16> to vector<2x2x128xbf16>
    %309 = vector.shape_cast %308 : vector<2x2x128xbf16> to vector<4x128xbf16>
    %310 = vector.extract_strided_slice %295 {offsets = [2, 1, 0], sizes = [2, 2, 128], strides = [1, 1, 1]} : vector<4x4x128xbf16> to vector<2x2x128xbf16>
    %311 = vector.shape_cast %310 : vector<2x2x128xbf16> to vector<4x128xbf16>
    %312 = vector.extract_strided_slice %295 {offsets = [2, 2, 0], sizes = [2, 2, 128], strides = [1, 1, 1]} : vector<4x4x128xbf16> to vector<2x2x128xbf16>
    %313 = vector.shape_cast %312 : vector<2x2x128xbf16> to vector<4x128xbf16>
    %314 = tpu.concatenate %297, %299, %301, %303, %305, %307, %309, %311, %313 in 1 : vector<4x128xbf16>, vector<4x128xbf16>, vector<4x128xbf16>, vector<4x128xbf16>, vector<4x128xbf16>, vector<4x128xbf16>, vector<4x128xbf16>, vector<4x128xbf16>, vector<4x128xbf16> -> vector<4x1152xbf16>
    %c0_59 = arith.constant 0 : index
    %c0_60 = arith.constant 0 : index
    %315 = vector.load %arg14[%c0_59, %c0_60] : memref<1152x128xbf16, #tpu.memory_space<vmem>>, vector<1152x128xbf16>
    %cst_61 = arith.constant dense<0.000000e+00> : vector<4x128xf32>
    %316 = tpu.matmul %314, %315, %cst_61 {dimension_numbers = #tpu.dot_dimension_numbers<[1], [0], [0], [1], [0, 0, 1, 1], [], []>} : vector<4x1152xbf16>, vector<1152x128xbf16>, vector<4x128xf32> -> vector<4x128xf32>
    %c0_62 = arith.constant 0 : index
    %c0_63 = arith.constant 0 : index
    %317 = vector.load %arg15[%c0_62, %c0_63] : memref<1x128xf32, #tpu.memory_space<vmem>>, vector<1x128xf32>
    %318 = vector.broadcast %317 : vector<1x128xf32> to vector<4x128xf32>
    %319 = arith.addf %316, %318 : vector<4x128xf32>
    %cst_64 = arith.constant 0.000000e+00 : f32
    %320 = vector.broadcast %cst_64 : f32 to vector<4x128xf32>
    %321 = arith.maximumf %319, %320 : vector<4x128xf32>
    %322 = vector.shape_cast %321 : vector<4x128xf32> to vector<2x2x128xf32>
    %323 = arith.truncf %322 : vector<2x2x128xf32> to vector<2x2x128xbf16>
    %cst_65 = arith.constant 0.000000e+00 : bf16
    %324 = vector.broadcast %cst_65 : bf16 to vector<2x1x128xbf16>
    %325 = tpu.concatenate %324, %323, %324 in 1 : vector<2x1x128xbf16>, vector<2x2x128xbf16>, vector<2x1x128xbf16> -> vector<2x4x128xbf16>
    %cst_66 = arith.constant 0.000000e+00 : bf16
    %326 = vector.broadcast %cst_66 : bf16 to vector<1x4x128xbf16>
    %327 = tpu.concatenate %326, %325, %326 in 0 : vector<1x4x128xbf16>, vector<2x4x128xbf16>, vector<1x4x128xbf16> -> vector<4x4x128xbf16>
    %328 = vector.extract_strided_slice %327 {offsets = [0, 0, 0], sizes = [2, 2, 128], strides = [1, 1, 1]} : vector<4x4x128xbf16> to vector<2x2x128xbf16>
    %329 = vector.shape_cast %328 : vector<2x2x128xbf16> to vector<4x128xbf16>
    %330 = vector.extract_strided_slice %327 {offsets = [0, 1, 0], sizes = [2, 2, 128], strides = [1, 1, 1]} : vector<4x4x128xbf16> to vector<2x2x128xbf16>
    %331 = vector.shape_cast %330 : vector<2x2x128xbf16> to vector<4x128xbf16>
    %332 = vector.extract_strided_slice %327 {offsets = [0, 2, 0], sizes = [2, 2, 128], strides = [1, 1, 1]} : vector<4x4x128xbf16> to vector<2x2x128xbf16>
    %333 = vector.shape_cast %332 : vector<2x2x128xbf16> to vector<4x128xbf16>
    %334 = vector.extract_strided_slice %327 {offsets = [1, 0, 0], sizes = [2, 2, 128], strides = [1, 1, 1]} : vector<4x4x128xbf16> to vector<2x2x128xbf16>
    %335 = vector.shape_cast %334 : vector<2x2x128xbf16> to vector<4x128xbf16>
    %336 = vector.extract_strided_slice %327 {offsets = [1, 1, 0], sizes = [2, 2, 128], strides = [1, 1, 1]} : vector<4x4x128xbf16> to vector<2x2x128xbf16>
    %337 = vector.shape_cast %336 : vector<2x2x128xbf16> to vector<4x128xbf16>
    %338 = vector.extract_strided_slice %327 {offsets = [1, 2, 0], sizes = [2, 2, 128], strides = [1, 1, 1]} : vector<4x4x128xbf16> to vector<2x2x128xbf16>
    %339 = vector.shape_cast %338 : vector<2x2x128xbf16> to vector<4x128xbf16>
    %340 = vector.extract_strided_slice %327 {offsets = [2, 0, 0], sizes = [2, 2, 128], strides = [1, 1, 1]} : vector<4x4x128xbf16> to vector<2x2x128xbf16>
    %341 = vector.shape_cast %340 : vector<2x2x128xbf16> to vector<4x128xbf16>
    %342 = vector.extract_strided_slice %327 {offsets = [2, 1, 0], sizes = [2, 2, 128], strides = [1, 1, 1]} : vector<4x4x128xbf16> to vector<2x2x128xbf16>
    %343 = vector.shape_cast %342 : vector<2x2x128xbf16> to vector<4x128xbf16>
    %344 = vector.extract_strided_slice %327 {offsets = [2, 2, 0], sizes = [2, 2, 128], strides = [1, 1, 1]} : vector<4x4x128xbf16> to vector<2x2x128xbf16>
    %345 = vector.shape_cast %344 : vector<2x2x128xbf16> to vector<4x128xbf16>
    %346 = tpu.concatenate %329, %331, %333, %335, %337, %339, %341, %343, %345 in 1 : vector<4x128xbf16>, vector<4x128xbf16>, vector<4x128xbf16>, vector<4x128xbf16>, vector<4x128xbf16>, vector<4x128xbf16>, vector<4x128xbf16>, vector<4x128xbf16>, vector<4x128xbf16> -> vector<4x1152xbf16>
    %c0_67 = arith.constant 0 : index
    %c0_68 = arith.constant 0 : index
    %347 = vector.load %arg16[%c0_67, %c0_68] : memref<1152x128xbf16, #tpu.memory_space<vmem>>, vector<1152x128xbf16>
    %cst_69 = arith.constant dense<0.000000e+00> : vector<4x128xf32>
    %348 = tpu.matmul %346, %347, %cst_69 {dimension_numbers = #tpu.dot_dimension_numbers<[1], [0], [0], [1], [0, 0, 1, 1], [], []>} : vector<4x1152xbf16>, vector<1152x128xbf16>, vector<4x128xf32> -> vector<4x128xf32>
    %c0_70 = arith.constant 0 : index
    %c0_71 = arith.constant 0 : index
    %349 = vector.load %arg17[%c0_70, %c0_71] : memref<1x128xf32, #tpu.memory_space<vmem>>, vector<1x128xf32>
    %350 = vector.broadcast %349 : vector<1x128xf32> to vector<4x128xf32>
    %351 = arith.addf %348, %350 : vector<4x128xf32>
    %cst_72 = arith.constant 0.000000e+00 : f32
    %352 = vector.broadcast %cst_72 : f32 to vector<4x128xf32>
    %353 = arith.maximumf %351, %352 : vector<4x128xf32>
    %354 = vector.shape_cast %353 : vector<4x128xf32> to vector<2x2x128xf32>
    %355 = arith.truncf %354 : vector<2x2x128xf32> to vector<2x2x128xbf16>
    %cst_73 = arith.constant 0.000000e+00 : bf16
    %356 = vector.broadcast %cst_73 : bf16 to vector<2x1x128xbf16>
    %357 = tpu.concatenate %356, %355, %356 in 1 : vector<2x1x128xbf16>, vector<2x2x128xbf16>, vector<2x1x128xbf16> -> vector<2x4x128xbf16>
    %cst_74 = arith.constant 0.000000e+00 : bf16
    %358 = vector.broadcast %cst_74 : bf16 to vector<1x4x128xbf16>
    %359 = tpu.concatenate %358, %357, %358 in 0 : vector<1x4x128xbf16>, vector<2x4x128xbf16>, vector<1x4x128xbf16> -> vector<4x4x128xbf16>
    %360 = vector.extract_strided_slice %359 {offsets = [0, 0, 0], sizes = [2, 2, 128], strides = [1, 1, 1]} : vector<4x4x128xbf16> to vector<2x2x128xbf16>
    %361 = vector.shape_cast %360 : vector<2x2x128xbf16> to vector<4x128xbf16>
    %362 = vector.extract_strided_slice %359 {offsets = [0, 1, 0], sizes = [2, 2, 128], strides = [1, 1, 1]} : vector<4x4x128xbf16> to vector<2x2x128xbf16>
    %363 = vector.shape_cast %362 : vector<2x2x128xbf16> to vector<4x128xbf16>
    %364 = vector.extract_strided_slice %359 {offsets = [0, 2, 0], sizes = [2, 2, 128], strides = [1, 1, 1]} : vector<4x4x128xbf16> to vector<2x2x128xbf16>
    %365 = vector.shape_cast %364 : vector<2x2x128xbf16> to vector<4x128xbf16>
    %366 = vector.extract_strided_slice %359 {offsets = [1, 0, 0], sizes = [2, 2, 128], strides = [1, 1, 1]} : vector<4x4x128xbf16> to vector<2x2x128xbf16>
    %367 = vector.shape_cast %366 : vector<2x2x128xbf16> to vector<4x128xbf16>
    %368 = vector.extract_strided_slice %359 {offsets = [1, 1, 0], sizes = [2, 2, 128], strides = [1, 1, 1]} : vector<4x4x128xbf16> to vector<2x2x128xbf16>
    %369 = vector.shape_cast %368 : vector<2x2x128xbf16> to vector<4x128xbf16>
    %370 = vector.extract_strided_slice %359 {offsets = [1, 2, 0], sizes = [2, 2, 128], strides = [1, 1, 1]} : vector<4x4x128xbf16> to vector<2x2x128xbf16>
    %371 = vector.shape_cast %370 : vector<2x2x128xbf16> to vector<4x128xbf16>
    %372 = vector.extract_strided_slice %359 {offsets = [2, 0, 0], sizes = [2, 2, 128], strides = [1, 1, 1]} : vector<4x4x128xbf16> to vector<2x2x128xbf16>
    %373 = vector.shape_cast %372 : vector<2x2x128xbf16> to vector<4x128xbf16>
    %374 = vector.extract_strided_slice %359 {offsets = [2, 1, 0], sizes = [2, 2, 128], strides = [1, 1, 1]} : vector<4x4x128xbf16> to vector<2x2x128xbf16>
    %375 = vector.shape_cast %374 : vector<2x2x128xbf16> to vector<4x128xbf16>
    %376 = vector.extract_strided_slice %359 {offsets = [2, 2, 0], sizes = [2, 2, 128], strides = [1, 1, 1]} : vector<4x4x128xbf16> to vector<2x2x128xbf16>
    %377 = vector.shape_cast %376 : vector<2x2x128xbf16> to vector<4x128xbf16>
    %378 = tpu.concatenate %361, %363, %365, %367, %369, %371, %373, %375, %377 in 1 : vector<4x128xbf16>, vector<4x128xbf16>, vector<4x128xbf16>, vector<4x128xbf16>, vector<4x128xbf16>, vector<4x128xbf16>, vector<4x128xbf16>, vector<4x128xbf16>, vector<4x128xbf16> -> vector<4x1152xbf16>
    %c0_75 = arith.constant 0 : index
    %c0_76 = arith.constant 0 : index
    %379 = vector.load %arg18[%c0_75, %c0_76] : memref<1152x256xbf16, #tpu.memory_space<vmem>>, vector<1152x256xbf16>
    %cst_77 = arith.constant dense<0.000000e+00> : vector<4x256xf32>
    %380 = tpu.matmul %378, %379, %cst_77 {dimension_numbers = #tpu.dot_dimension_numbers<[1], [0], [0], [1], [0, 0, 1, 1], [], []>} : vector<4x1152xbf16>, vector<1152x256xbf16>, vector<4x256xf32> -> vector<4x256xf32>
    %c0_78 = arith.constant 0 : index
    %c0_79 = arith.constant 0 : index
    %381 = vector.load %arg19[%c0_78, %c0_79] : memref<1x256xf32, #tpu.memory_space<vmem>>, vector<1x256xf32>
    %382 = vector.broadcast %381 : vector<1x256xf32> to vector<4x256xf32>
    %383 = arith.addf %380, %382 : vector<4x256xf32>
    %cst_80 = arith.constant 0.000000e+00 : f32
    %384 = vector.broadcast %cst_80 : f32 to vector<4x256xf32>
    %385 = arith.maximumf %383, %384 : vector<4x256xf32>
    %386 = vector.shape_cast %385 : vector<4x256xf32> to vector<2x2x256xf32>
    %387 = arith.truncf %386 : vector<2x2x256xf32> to vector<2x2x256xbf16>
    %cst_81 = arith.constant 0.000000e+00 : bf16
    %388 = vector.broadcast %cst_81 : bf16 to vector<2x1x256xbf16>
    %389 = tpu.concatenate %388, %387, %388 in 1 : vector<2x1x256xbf16>, vector<2x2x256xbf16>, vector<2x1x256xbf16> -> vector<2x4x256xbf16>
    %cst_82 = arith.constant 0.000000e+00 : bf16
    %390 = vector.broadcast %cst_82 : bf16 to vector<1x4x256xbf16>
    %391 = tpu.concatenate %390, %389, %390 in 0 : vector<1x4x256xbf16>, vector<2x4x256xbf16>, vector<1x4x256xbf16> -> vector<4x4x256xbf16>
    %392 = vector.extract_strided_slice %391 {offsets = [0, 0, 0], sizes = [2, 2, 256], strides = [1, 1, 1]} : vector<4x4x256xbf16> to vector<2x2x256xbf16>
    %393 = vector.shape_cast %392 : vector<2x2x256xbf16> to vector<4x256xbf16>
    %394 = vector.extract_strided_slice %391 {offsets = [0, 1, 0], sizes = [2, 2, 256], strides = [1, 1, 1]} : vector<4x4x256xbf16> to vector<2x2x256xbf16>
    %395 = vector.shape_cast %394 : vector<2x2x256xbf16> to vector<4x256xbf16>
    %396 = vector.extract_strided_slice %391 {offsets = [0, 2, 0], sizes = [2, 2, 256], strides = [1, 1, 1]} : vector<4x4x256xbf16> to vector<2x2x256xbf16>
    %397 = vector.shape_cast %396 : vector<2x2x256xbf16> to vector<4x256xbf16>
    %398 = vector.extract_strided_slice %391 {offsets = [1, 0, 0], sizes = [2, 2, 256], strides = [1, 1, 1]} : vector<4x4x256xbf16> to vector<2x2x256xbf16>
    %399 = vector.shape_cast %398 : vector<2x2x256xbf16> to vector<4x256xbf16>
    %400 = vector.extract_strided_slice %391 {offsets = [1, 1, 0], sizes = [2, 2, 256], strides = [1, 1, 1]} : vector<4x4x256xbf16> to vector<2x2x256xbf16>
    %401 = vector.shape_cast %400 : vector<2x2x256xbf16> to vector<4x256xbf16>
    %402 = vector.extract_strided_slice %391 {offsets = [1, 2, 0], sizes = [2, 2, 256], strides = [1, 1, 1]} : vector<4x4x256xbf16> to vector<2x2x256xbf16>
    %403 = vector.shape_cast %402 : vector<2x2x256xbf16> to vector<4x256xbf16>
    %404 = vector.extract_strided_slice %391 {offsets = [2, 0, 0], sizes = [2, 2, 256], strides = [1, 1, 1]} : vector<4x4x256xbf16> to vector<2x2x256xbf16>
    %405 = vector.shape_cast %404 : vector<2x2x256xbf16> to vector<4x256xbf16>
    %406 = vector.extract_strided_slice %391 {offsets = [2, 1, 0], sizes = [2, 2, 256], strides = [1, 1, 1]} : vector<4x4x256xbf16> to vector<2x2x256xbf16>
    %407 = vector.shape_cast %406 : vector<2x2x256xbf16> to vector<4x256xbf16>
    %408 = vector.extract_strided_slice %391 {offsets = [2, 2, 0], sizes = [2, 2, 256], strides = [1, 1, 1]} : vector<4x4x256xbf16> to vector<2x2x256xbf16>
    %409 = vector.shape_cast %408 : vector<2x2x256xbf16> to vector<4x256xbf16>
    %410 = tpu.concatenate %393, %395, %397, %399, %401, %403, %405, %407, %409 in 1 : vector<4x256xbf16>, vector<4x256xbf16>, vector<4x256xbf16>, vector<4x256xbf16>, vector<4x256xbf16>, vector<4x256xbf16>, vector<4x256xbf16>, vector<4x256xbf16>, vector<4x256xbf16> -> vector<4x2304xbf16>
    %c0_83 = arith.constant 0 : index
    %c0_84 = arith.constant 0 : index
    %411 = vector.load %arg20[%c0_83, %c0_84] : memref<2304x128xbf16, #tpu.memory_space<vmem>>, vector<2304x128xbf16>
    %cst_85 = arith.constant dense<0.000000e+00> : vector<4x128xf32>
    %412 = tpu.matmul %410, %411, %cst_85 {dimension_numbers = #tpu.dot_dimension_numbers<[1], [0], [0], [1], [0, 0, 1, 1], [], []>} : vector<4x2304xbf16>, vector<2304x128xbf16>, vector<4x128xf32> -> vector<4x128xf32>
    %c0_86 = arith.constant 0 : index
    %c0_87 = arith.constant 0 : index
    %413 = vector.load %arg21[%c0_86, %c0_87] : memref<1x128xf32, #tpu.memory_space<vmem>>, vector<1x128xf32>
    %414 = vector.broadcast %413 : vector<1x128xf32> to vector<4x128xf32>
    %415 = arith.addf %412, %414 : vector<4x128xf32>
    %416 = vector.shape_cast %415 : vector<4x128xf32> to vector<2x2x128xf32>
    %c0_88 = arith.constant 0 : index
    %c0_89 = arith.constant 0 : index
    %c0_90 = arith.constant 0 : index
    %c0_91 = arith.constant 0 : index
    %417 = vector.load %arg22[%c0_88, %c0_89, %c0_90, %c0_91] : memref<1x2x2x128xf32, #tpu.memory_space<vmem>>, vector<1x2x2x128xf32>
    %418 = vector.shape_cast %417 : vector<1x2x2x128xf32> to vector<2x2x128xf32>
    %419 = vector.shape_cast %416 : vector<2x2x128xf32> to vector<1x2x2x128xf32>
    tpu.vector_store %arg22[%c0_88, %c0_89, %c0_90, %c0_91], %419 {strides = array<i32>} : memref<1x2x2x128xf32, #tpu.memory_space<vmem>>, vector<1x2x2x128xf32>,
    return
  }
  func.func @transform_0(%arg0: i32) -> (i32, i32, i32) {
    %c0_i32 = arith.constant 0 : i32
    %c0_i32_0 = arith.constant 0 : i32
    %c0_i32_1 = arith.constant 0 : i32
    return %arg0, %c0_i32, %c0_i32_0 : i32, i32, i32
  }
  func.func @transform_1(%arg0: i32) -> (i32, i32) {
    %c0_i32 = arith.constant 0 : i32
    %c0_i32_0 = arith.constant 0 : i32
    %c0_i32_1 = arith.constant 0 : i32
    return %c0_i32, %c0_i32_0 : i32, i32
  }
  func.func @transform_2(%arg0: i32) -> (i32, i32) {
    %c0_i32 = arith.constant 0 : i32
    %c0_i32_0 = arith.constant 0 : i32
    %c0_i32_1 = arith.constant 0 : i32
    return %c0_i32, %c0_i32_0 : i32, i32
  }
  func.func @transform_3(%arg0: i32) -> (i32, i32) {
    %c0_i32 = arith.constant 0 : i32
    %c0_i32_0 = arith.constant 0 : i32
    %c0_i32_1 = arith.constant 0 : i32
    return %c0_i32, %c0_i32_0 : i32, i32
  }
  func.func @transform_4(%arg0: i32) -> (i32, i32) {
    %c0_i32 = arith.constant 0 : i32
    %c0_i32_0 = arith.constant 0 : i32
    %c0_i32_1 = arith.constant 0 : i32
    return %c0_i32, %c0_i32_0 : i32, i32
  }
  func.func @transform_5(%arg0: i32) -> (i32, i32) {
    %c0_i32 = arith.constant 0 : i32
    %c0_i32_0 = arith.constant 0 : i32
    %c0_i32_1 = arith.constant 0 : i32
    return %c0_i32, %c0_i32_0 : i32, i32
  }
  func.func @transform_6(%arg0: i32) -> (i32, i32) {
    %c0_i32 = arith.constant 0 : i32
    %c0_i32_0 = arith.constant 0 : i32
    %c0_i32_1 = arith.constant 0 : i32
    return %c0_i32, %c0_i32_0 : i32, i32
  }
  func.func @transform_7(%arg0: i32) -> (i32, i32) {
    %c0_i32 = arith.constant 0 : i32
    %c0_i32_0 = arith.constant 0 : i32
    %c0_i32_1 = arith.constant 0 : i32
    return %c0_i32, %c0_i32_0 : i32, i32
  }
  func.func @transform_8(%arg0: i32) -> (i32, i32) {
    %c0_i32 = arith.constant 0 : i32
    %c0_i32_0 = arith.constant 0 : i32
    %c0_i32_1 = arith.constant 0 : i32
    return %c0_i32, %c0_i32_0 : i32, i32
  }
  func.func @transform_9(%arg0: i32) -> (i32, i32) {
    %c0_i32 = arith.constant 0 : i32
    %c0_i32_0 = arith.constant 0 : i32
    %c0_i32_1 = arith.constant 0 : i32
    return %c0_i32, %c0_i32_0 : i32, i32
  }
  func.func @transform_10(%arg0: i32) -> (i32, i32) {
    %c0_i32 = arith.constant 0 : i32
    %c0_i32_0 = arith.constant 0 : i32
    %c0_i32_1 = arith.constant 0 : i32
    return %c0_i32, %c0_i32_0 : i32, i32
  }
  func.func @transform_11(%arg0: i32) -> (i32, i32) {
    %c0_i32 = arith.constant 0 : i32
    %c0_i32_0 = arith.constant 0 : i32
    %c0_i32_1 = arith.constant 0 : i32
    return %c0_i32, %c0_i32_0 : i32, i32
  }
  func.func @transform_12(%arg0: i32) -> (i32, i32) {
    %c0_i32 = arith.constant 0 : i32
    %c0_i32_0 = arith.constant 0 : i32
    %c0_i32_1 = arith.constant 0 : i32
    return %c0_i32, %c0_i32_0 : i32, i32
  }
  func.func @transform_13(%arg0: i32) -> (i32, i32) {
    %c0_i32 = arith.constant 0 : i32
    %c0_i32_0 = arith.constant 0 : i32
    %c0_i32_1 = arith.constant 0 : i32
    return %c0_i32, %c0_i32_0 : i32, i32
  }
  func.func @transform_14(%arg0: i32) -> (i32, i32) {
    %c0_i32 = arith.constant 0 : i32
    %c0_i32_0 = arith.constant 0 : i32
    %c0_i32_1 = arith.constant 0 : i32
    return %c0_i32, %c0_i32_0 : i32, i32
  }
  func.func @transform_15(%arg0: i32) -> (i32, i32) {
    %c0_i32 = arith.constant 0 : i32
    %c0_i32_0 = arith.constant 0 : i32
    %c0_i32_1 = arith.constant 0 : i32
    return %c0_i32, %c0_i32_0 : i32, i32
  }
  func.func @transform_16(%arg0: i32) -> (i32, i32) {
    %c0_i32 = arith.constant 0 : i32
    %c0_i32_0 = arith.constant 0 : i32
    %c0_i32_1 = arith.constant 0 : i32
    return %c0_i32, %c0_i32_0 : i32, i32
  }
  func.func @transform_17(%arg0: i32) -> (i32, i32) {
    %c0_i32 = arith.constant 0 : i32
    %c0_i32_0 = arith.constant 0 : i32
    %c0_i32_1 = arith.constant 0 : i32
    return %c0_i32, %c0_i32_0 : i32, i32
  }
  func.func @transform_18(%arg0: i32) -> (i32, i32) {
    %c0_i32 = arith.constant 0 : i32
    %c0_i32_0 = arith.constant 0 : i32
    %c0_i32_1 = arith.constant 0 : i32
    return %c0_i32, %c0_i32_0 : i32, i32
  }
  func.func @transform_19(%arg0: i32) -> (i32, i32) {
    %c0_i32 = arith.constant 0 : i32
    %c0_i32_0 = arith.constant 0 : i32
    %c0_i32_1 = arith.constant 0 : i32
    return %c0_i32, %c0_i32_0 : i32, i32
  }
  func.func @transform_20(%arg0: i32) -> (i32, i32) {
    %c0_i32 = arith.constant 0 : i32
    %c0_i32_0 = arith.constant 0 : i32
    %c0_i32_1 = arith.constant 0 : i32
    return %c0_i32, %c0_i32_0 : i32, i32
  }
  func.func @transform_21(%arg0: i32) -> (i32, i32, i32, i32) {
    %c0_i32 = arith.constant 0 : i32
    %c0_i32_0 = arith.constant 0 : i32
    %c0_i32_1 = arith.constant 0 : i32
    %c0_i32_2 = arith.constant 0 : i32
    return %arg0, %c0_i32, %c0_i32_0, %c0_i32_1 : i32, i32, i32, i32
  }
}

</mosaic_0001>

<bundles_post_ra>
// kernel: _lambda_.1
= control target key start
LH: loop header
LB: loop body
LE: loop exit
PB: predicated region body
PF: predicated region fallthrough
CT: control target
= control target key end

     0   :  { %s22087_s0 = inlined_call_operand.hbm [shape: f32[2,16,16], index: 0, kind: input, shape index: {}]   ;;  %s22088_s1 = inlined_call_operand.vmem [shape: f32[9,64], index: 1, kind: input, shape index: {}]   ;;  %s22089_s2 = inlined_call_operand.vmem [shape: f32[1,64], index: 2, kind: input, shape index: {}]   ;;  %s22090_s3 = inlined_call_operand.hbm [shape: bf16[576,64], index: 3, kind: input, shape index: {}]   ;;  %s22091_s4 = inlined_call_operand.vmem [shape: f32[1,64], index: 4, kind: input, shape index: {}]   ;;  %s22092_s5 = inlined_call_operand.hbm [shape: bf16[576,64], index: 5, kind: input, shape index: {}]   ;;  %s22093_s6 = inlined_call_operand.vmem [shape: f32[1,64], index: 6, kind: input, shape index: {}]   ;;  %s22094_s7 = inlined_call_operand.hbm [shape: bf16[576,64], index: 7, kind: input, shape index: {}]   ;;  %s22095_s8 = inlined_call_operand.vmem [shape: f32[1,64], index: 8, kind: input, shape index: {}]   ;;  %s22096_s9 = inlined_call_operand.hbm [shape: bf16[576,128], index: 9, kind: input, shape index: {}]   ;;  %s22097_s10 = inlined_call_operand.vmem [shape: f32[1,128], index: 10, kind: input, shape index: {}]   ;;  %s22098_s11 = inlined_call_operand.hbm [shape: bf16[1152,128], index: 11, kind: input, shape index: {}]   ;;  %s22099_s12 = inlined_call_operand.vmem [shape: f32[1,128], index: 12, kind: input, shape index: {}]   ;;  %s22100_s13 = inlined_call_operand.hbm [shape: bf16[1152,128], index: 13, kind: input, shape index: {}]   ;;  %s22101_s14 = inlined_call_operand.hbm [shape: f32[1,128], index: 14, kind: input, shape index: {}]   ;;  %s22102_s15 = inlined_call_operand.hbm [shape: bf16[1152,128], index: 15, kind: input, shape index: {}]   ;;  %s22103_s16 = inlined_call_operand.hbm [shape: f32[1,128], index: 16, kind: input, shape index: {}]   ;;  %s22104_s17 = inlined_call_operand.hbm [shape: bf16[1152,256], index: 17, kind: input, shape index: {}]   ;;  %s22105_s18 = inlined_call_operand.vmem [shape: f32[1,256], index: 18, kind: input, shape index: {}]   ;;  %s22106_s19 = inlined_call_operand.hbm [shape: bf16[2304,128], index: 19, kind: input, shape index: {}]   ;;  %s22107_s20 = inlined_call_operand.vmem [shape: f32[1,128], index: 20, kind: input, shape index: {}]   ;;  %s22108_s21 = inlined_call_operand.vmem [shape: f32[2,2,2,128], index: 21, kind: output, shape index: {}]  }
   0x1   :  { %22159 = sst [smem:[#allocation53_spill]] %s22087_s0 }
   0x2   :  { %22160 = sst [smem:[#allocation54_spill]] %s22088_s1 }
   0x3   :  { %22161 = sst [smem:[#allocation55_spill]] %s22089_s2 }
   0x4   :  { %22162 = sst [smem:[#allocation56_spill]] %s22090_s3 }
   0x5   :  { %22163 = sst [smem:[#allocation57_spill]] %s22091_s4 }
   0x6   :  { %22164 = sst [smem:[#allocation58_spill]] %s22092_s5 }
   0x7   :  { %22165 = sst [smem:[#allocation59_spill]] %s22094_s7 }
   0x8   :  { %22166 = sst [smem:[#allocation60_spill]] %s22096_s9 }
   0x9   :  { %22167 = sst [smem:[#allocation61_spill]] %s22098_s11 }
   0xa   :  { %22168 = sst [smem:[#allocation62_spill]] %s22105_s18 }
   0xb   :  { %22169 = sst [smem:[#allocation63_spill]] %s22107_s20 }
   0xc   :  { %22170 = sst [smem:[#allocation64_spill]] %s22108_s21 }
   0xd   :  { %26 = vsyncpa [#allocation3], 0 }
   0xe   :  { %28 = vsyncpa [#allocation3 + $0x1], 0 }
   0xf   :  { %29 = vsyncpa [#allocation5], 0 }
  0x10   :  { %30 = vsyncpa [#allocation8], 0 }
  0x11   :  { %31 = vsyncpa [#allocation11], 0 }
  0x12   :  { %32 = vsyncpa [#allocation14], 0 }
  0x13   :  { %33 = vsyncpa [#allocation17], 0 }
  0x14   :  { %34 = vsyncpa [#allocation20], 0  ;;  %s18354_s2 = smov 0   ;;  %s18356_s25 = smov 0  }
  0x15   :  { %s18358_s26 = smov 0   ;;  %s18360_s27 = smov 0  }
  0x16 LB: > { %s18221_s3 = smov [#allocation4]   ;;  %s18375_s29 = sadd.s32 4294967295, %s18219_s27   ;;  %s18219_s27 = sphi %s18360_s27, %s22351_s27   ;;  %s18215_s26 = sphi %s18358_s26, %s22350_s26   ;;  %s18211_s25 = sphi %s18356_s25, %s22349_s25   ;;  %s18207_s2 = sphi %s18354_s2, %s22348_s2  }
  0x17   : > { %s535_s28 = sshll.u32 %s18221_s3, 4  ;;  %p14821_p0 = scmp.ge.s32.totalorder %s18219_s27, 1  ;;  %s536_s28 = int_to_ptr.vmem [resolvable:$true] %s535_s28 }
  0x18   : > { %p22112_p1 = scmp.eq.s32.totalorder %s18375_s29, 0  ;;  %p517_p2 = scmp.lt.s32.totalorder %s18219_s27, 3 }
  0x19   : > { %s18222_s4 = smov [#allocation7]   ;;  %s18223_s22 = smov [#allocation10]  }
  0x1a   : > { %p18380_p3 = pnand %p14821_p0, %p517_p2  ;;  %s567_s30 = sshll.u32 %s18222_s4, 4  ;;  %s18392_s30 = int_to_ptr.vmem [resolvable:$true] %s567_s30 }
  0x1b   : > { %s599_s23 = sshll.u32 %s18223_s22, 4  ;;  %s17858_s24 = scalar_lea.vmem %s536_s28, 4608  ;;  %s18394_s23 = int_to_ptr.vmem [resolvable:$true] %s599_s23 }
  0x1c   : > { %s22171_s0 = scalar_select %p18380_p3, 1, 0 }
  0x1d   : > { %p16992_p4 = pneg %p18380_p3  ;;  %p17859_p7 = scmp.ne.s32.totalorder %s536_s28, %s17858_s24 }
  0x1e   : > { %p17866_p10 = scmp.lt.s32.totalorder %s536_s28, %s536_s28  ;;  %p17867_p11 = scmp.lt.s32.totalorder %s17858_s24, %s17858_s24 }
  0x1f   : > { %p18388_p5 = pnand %p16992_p4, %p22112_p1 }
  0x20   : > { %p17868_p12 = por %p17867_p11, %p17866_p10 }
  0x21   : > { %p18398_p6 = pneg %p18388_p5 }
  0x23   : > { %p17861_p8 = pnand %p17859_p7, %p18398_p6 }
  0x25   : > { %p17862_p9 = pneg %p17861_p8 }
  0x27   : > { %p17869_p13 = pnand %p17868_p12, %p17862_p9 }
  0x29   : > { %17872 = shalt.err (!%p17869_p13)
}
  0x2a   : > { %s22113_s3 = smov 64   ;;  %s18225_s4 = smov 4  }
  0x2b   : > { %s22174_s20 = sld [smem:[#allocation56_spill]]  ;;  %s17884_s18 = scalar_lea.vmem %s18392_s30, 4608 }
  0x2c   : > { %p17885_p0 = scmp.ne.s32.totalorder %s18392_s30, %s17884_s18  ;;  %p17892_p7 = scmp.lt.s32.totalorder %s18392_s30, %s18392_s30 }
  0x2d   : > { %p17893_p8 = scmp.lt.s32.totalorder %s17884_s18, %s17884_s18 }
  0x2e   : > { %p17887_p2 = pnand %p17885_p0, %p18398_p6 }
  0x2f   : > { %p17894_p9 = por %p17893_p8, %p17892_p7 }
  0x30   : > { %p17888_p4 = pneg %p17887_p2 }
  0x31   : > { %16995 = dma.hbm_to_vmem [thread:$0]  (!%p18388_p5), %s22174_s20, 4608, %s536_s28, [#allocation5], %s22113_s3, %s22113_s3, %s18225_s4  }
  0x32   : > { %p17895_p10 = pnand %p17894_p9, %p17888_p4 }
  0x34   : > { %17898 = shalt.err (!%p17895_p10)
}
  0x35   : > { %s22175_s7 = sld [smem:[#allocation59_spill]]  ;;  %s17910_s20 = scalar_lea.vmem %s18394_s23, 9216 }
  0x36   : > { %p17911_p11 = scmp.ne.s32.totalorder %s18394_s23, %s17910_s20  ;;  %p17918_p0 = scmp.lt.s32.totalorder %s18394_s23, %s18394_s23 }
  0x37   : > { %p17919_p2 = scmp.lt.s32.totalorder %s17910_s20, %s17910_s20 }
  0x38   : > { %p17913_p12 = pnand %p17911_p11, %p18398_p6 }
  0x39   : > { %p17920_p4 = por %p17919_p2, %p17918_p0 }
  0x3a   : > { %p17914_p13 = pneg %p17913_p12 }
  0x3b   : > { %17001 = dma.hbm_to_vmem [thread:$0]  (!%p18388_p5), %s22175_s7, 4608, %s18392_s30, [#allocation8], %s22113_s3, %s22113_s3, %s18225_s4  }
  0x3c   : > { %p17921_p7 = pnand %p17920_p4, %p17914_p13 }
  0x3e   : > { %17924 = shalt.err (!%p17921_p7)
}
  0x3f   : > { %s22176_s11 = sld [smem:[#allocation61_spill]]  ;;  %s18226_s30 = smov [#allocation13]  }
  0x40   : > { %s629_s22 = sshll.u32 %s18226_s30, 4  ;;  %s18227_s24 = smov [#allocation16]   ;;  %s630_s22 = int_to_ptr.vmem [resolvable:$true] %s629_s22 }
  0x41   : > { %s653_s21 = sshll.u32 %s18227_s24, 4  ;;  %s17936_s20 = scalar_lea.vmem %s630_s22, 16  ;;  %s654_s21 = int_to_ptr.vmem [resolvable:$true] %s653_s21 }
  0x42   : > { %p17937_p8 = scmp.ne.s32.totalorder %s630_s22, %s17936_s20  ;;  %s17943_s7 = scalar_lea.vmem %s630_s22, 32 }
  0x43   : > { %p17944_p11 = scmp.lt.s32.totalorder %s630_s22, %s630_s22  ;;  %p17945_p12 = scmp.lt.s32.totalorder %s17943_s7, %s17936_s20 }
  0x44   : > { %p17939_p9 = pnand %p17937_p8, %p18398_p6 }
  0x45   : > { %17007 = dma.hbm_to_vmem [thread:$0]  (!%p18388_p5), %s22176_s11, 9216, %s18394_s23, [#allocation11], %s22113_s3, %s22113_s3, %s18225_s4  }
  0x46   : > { %p17940_p10 = pneg %p17939_p9  ;;  %p17946_p13 = por %p17945_p12, %p17944_p11 }
  0x48   : > { %p17947_p0 = pnand %p17946_p13, %p17940_p10 }
  0x4a   : > { %17950 = shalt.err (!%p17947_p0)
}
  0x4b   : > { %17013 = dma.hbm_to_vmem [thread:$0]  (!%p18388_p5), %s22101_s14, 16, %s630_s22, [#allocation14]  }
  0x4c   : > { %s17962_s28 = scalar_lea.vmem %s654_s21, 16  ;;  %s17969_s30 = scalar_lea.vmem %s654_s21, 32 }
  0x4d   : > { %p17963_p2 = scmp.ne.s32.totalorder %s654_s21, %s17962_s28  ;;  %p17970_p8 = scmp.lt.s32.totalorder %s654_s21, %s654_s21 }
  0x4e   : > { %p17971_p9 = scmp.lt.s32.totalorder %s17969_s30, %s17962_s28 }
  0x4f   : > { %p17965_p4 = pnand %p17963_p2, %p18398_p6 }
  0x50   : > { %p17972_p1 = por %p17971_p9, %p17970_p8 }
  0x51   : > { %p17966_p7 = pneg %p17965_p4 }
  0x53   : > { %p17973_p11 = pnand %p17972_p1, %p17966_p7 }
  0x55   : > { %17976 = shalt.err (!%p17973_p11)
}
  0x56   : > { %17019 = dma.hbm_to_vmem [thread:$0]  (!%p18388_p5), %s22103_s16, 16, %s654_s21, [#allocation17]  }
  0x57   : > { %s18228_s22 = smov [#allocation6]   ;;  %s18229_s18 = smov [#allocation9]  }
  0x58   : > { %s551_s20 = sshll.u32 %s18228_s22, 4  ;;  %s583_s23 = sshll.u32 %s18229_s18, 4  ;;  %s552_s20 = int_to_ptr.vmem [resolvable:$true] %s551_s20  ;;  %s584_s23 = int_to_ptr.vmem [resolvable:$true] %s583_s23 }
  0x59   : > { %s17988_s3 = scalar_lea.vmem %s552_s20, 4608  ;;  %p17996_p0 = scmp.lt.s32.totalorder %s552_s20, %s552_s20 }
  0x5a   : > { %p17989_p10 = scmp.ne.s32.totalorder %s552_s20, %s17988_s3  ;;  %p17997_p1 = scmp.lt.s32.totalorder %s17988_s3, %s17988_s3 }
  0x5c   : > { %p17991_p12 = pnand %p17989_p10, %p18398_p6  ;;  %p17998_p2 = por %p17997_p1, %p17996_p0 }
  0x5e   : > { %p17992_p13 = pneg %p17991_p12 }
  0x60   : > { %p17999_p4 = pnand %p17998_p2, %p17992_p13 }
  0x62   : > { %18002 = shalt.err (!%p17999_p4)
}
  0x63   : > { %s22177_s28 = smov 64   ;;  %s22178_s7 = sld [smem:[#allocation58_spill]] }
  0x64   : > { %s18014_s24 = scalar_lea.vmem %s584_s23, 4608  ;;  %p18022_p11 = scmp.lt.s32.totalorder %s584_s23, %s584_s23 }
  0x65   : > { %p18015_p7 = scmp.ne.s32.totalorder %s584_s23, %s18014_s24  ;;  %p18023_p10 = scmp.lt.s32.totalorder %s18014_s24, %s18014_s24 }
  0x67   : > { %p18017_p8 = pnand %p18015_p7, %p18398_p6  ;;  %p18024_p12 = por %p18023_p10, %p18022_p11 }
  0x69   : > { %16998 = dma.hbm_to_vmem [thread:$0]  (!%p18388_p5), %s22178_s7, 4608, %s552_s20, [#allocation5], %s22177_s28, %s22177_s28, %s18225_s4  }
  0x6a   : > { %p18018_p9 = pneg %p18017_p8 }
  0x6c   : > { %p18025_p13 = pnand %p18024_p12, %p18018_p9 }
  0x6e   : > { %18028 = shalt.err (!%p18025_p13)
}
  0x6f   : > { %s22179_s9 = sld [smem:[#allocation60_spill]]  ;;  %s18230_s20 = smov [#allocation12]  }
  0x70   : > { %s615_s18 = sshll.u32 %s18230_s20, 4  ;;  %s18231_s21 = smov [#allocation15]   ;;  %s616_s18 = int_to_ptr.vmem [resolvable:$true] %s615_s18 }
  0x71   : > { %s639_s30 = sshll.u32 %s18231_s21, 4  ;;  %s18040_s7 = scalar_lea.vmem %s616_s18, 9216  ;;  %s640_s30 = int_to_ptr.vmem [resolvable:$true] %s639_s30 }
  0x72   : > { %p18041_p0 = scmp.ne.s32.totalorder %s616_s18, %s18040_s7  ;;  %p18048_p4 = scmp.lt.s32.totalorder %s616_s18, %s616_s18 }
  0x73   : > { %p18049_p7 = scmp.lt.s32.totalorder %s18040_s7, %s18040_s7 }
  0x74   : > { %p18043_p1 = pnand %p18041_p0, %p18398_p6 }
  0x75   : > { %17004 = dma.hbm_to_vmem [thread:$0]  (!%p18388_p5), %s22179_s9, 4608, %s584_s23, [#allocation8], %s22177_s28, %s22177_s28, %s18225_s4  }
  0x76   : > { %p18044_p2 = pneg %p18043_p1  ;;  %p18050_p8 = por %p18049_p7, %p18048_p4 }
  0x78   : > { %p18051_p9 = pnand %p18050_p8, %p18044_p2 }
  0x7a   : > { %18054 = shalt.err (!%p18051_p9)
}
  0x7b   : > { %17010 = dma.hbm_to_vmem [thread:$0]  (!%p18388_p5), %s22100_s13, 9216, %s616_s18, [#allocation11], %s22177_s28, %s22177_s28, %s18225_s4  }
  0x7c   : > { %s18066_s3 = scalar_lea.vmem %s640_s30, 9216  ;;  %p18074_p13 = scmp.lt.s32.totalorder %s640_s30, %s640_s30 }
  0x7d   : > { %p18067_p11 = scmp.ne.s32.totalorder %s640_s30, %s18066_s3  ;;  %p18075_p0 = scmp.lt.s32.totalorder %s18066_s3, %s18066_s3 }
  0x7f   : > { %p18069_p10 = pnand %p18067_p11, %p18398_p6  ;;  %p18076_p1 = por %p18075_p0, %p18074_p13 }
  0x81   : > { %p18070_p12 = pneg %p18069_p10 }
  0x83   : > { %p18077_p2 = pnand %p18076_p1, %p18070_p12 }
  0x85   : > { %18080 = shalt.err (!%p18077_p2)
}
  0x86   : > { %17016 = dma.hbm_to_vmem [thread:$0]  (!%p18388_p5), %s22102_s15, 9216, %s640_s30, [#allocation14], %s22177_s28, %s22177_s28, %s18225_s4  }
  0x87   : > { %s18232_s18 = smov [#allocation18]  }
  0x88   : > { %s663_s21 = sshll.u32 %s18232_s18, 4  ;;  %s664_s21 = int_to_ptr.vmem [resolvable:$true] %s663_s21 }
  0x89   : > { %s18092_s7 = scalar_lea.vmem %s664_s21, 18432  ;;  %p18100_p9 = scmp.lt.s32.totalorder %s664_s21, %s664_s21 }
  0x8a   : > { %p18093_p4 = scmp.ne.s32.totalorder %s664_s21, %s18092_s7  ;;  %p18101_p11 = scmp.lt.s32.totalorder %s18092_s7, %s18092_s7 }
  0x8c   : > { %p18095_p7 = pnand %p18093_p4, %p18398_p6  ;;  %p18102_p10 = por %p18101_p11, %p18100_p9 }
  0x8e   : > { %p18096_p8 = pneg %p18095_p7 }
  0x90   : > { %p18103_p12 = pnand %p18102_p10, %p18096_p8 }
  0x92   : > { %18106 = shalt.err (!%p18103_p12)
}
  0x93   : > { %s22115_s23 = smov 128   ;;  %s22116_s24 = smov 8  }
  0x94   : > { %17022 = dma.hbm_to_vmem [thread:$0]  (!%p18388_p5), %s22104_s17, 18432, %s664_s21, [#allocation17], %s22115_s23, %s22115_s23, %s22116_s24  }
  0x95   : > { %s18235_s22 = smov [#allocation19]  }
  0x96   : > { %s679_s20 = sshll.u32 %s18235_s22, 4  ;;  %s680_s20 = int_to_ptr.vmem [resolvable:$true] %s679_s20 }
  0x97   : > { %s18118_s18 = scalar_lea.vmem %s680_s20, 18432  ;;  %p18126_p2 = scmp.lt.s32.totalorder %s680_s20, %s680_s20 }
  0x98   : > { %p18119_p13 = scmp.ne.s32.totalorder %s680_s20, %s18118_s18  ;;  %p18127_p4 = scmp.lt.s32.totalorder %s18118_s18, %s18118_s18 }
  0x9a   : > { %p18121_p0 = pnand %p18119_p13, %p18398_p6  ;;  %p18128_p7 = por %p18127_p4, %p18126_p2 }
  0x9c   : > { %p18122_p1 = pneg %p18121_p0 }
  0x9e   : > { %p18129_p8 = pnand %p18128_p7, %p18122_p1 }
  0xa0   : > { %18132 = shalt.err (!%p18129_p8)
}
  0xa1   : > { %17025 = dma.hbm_to_vmem [thread:$0]  (!%p18388_p5), %s22106_s19, 18432, %s680_s20, [#allocation20], %s22177_s28, %s22177_s28, %s18225_s4  }
  0xa2   : > { %s18517_s5 = sadd.s32 1, %s18219_s27   ;;  %s47_s30 = sadd.s32 1, %s18215_s26 }
  0xa3   : > { %s44_s1 = ssub.s32 %s18219_s27, %s18517_s5  ;;  %p54_p9 = scmp.ne.s32.totalorder %s18215_s26, %s18211_s25 }
  0xa4   : > { %p45_p6 = scmp.eq.s32.totalorder %s44_s1, 0  ;;  %p55_p11 = scmp.eq.s32.totalorder %s18219_s27, 0 }
  0xa5   : > { %p60_p10 = scmp.ne.s32.totalorder %s18211_s25, %s18207_s2  ;;  %p22180_p13 = scmp.eq.s32.totalorder %s18375_s29, 0 }
  0xa6   : > { %s18528_s3 = scalar_select %p45_p6, %s18215_s26, %s47_s30  }
  0xa7   : > { %p56_p12 = por %p55_p11, %p54_p9  ;;  %p18532_p0 = por %p22180_p13, %p60_p10 }
  0xa8   : > { %p17041_p1 = scmp.lt.s32.totalorder %s18219_s27, 2  ;;  %s696_s18 = sand.u32 1, %s18215_s26  }
  0xa9   : > { %s22181_s22 = scalar_select %p18532_p0, 1, 0 }
  0xaa   : > { %s14834_s4 = sshll.u32 %s696_s18, 4  ;;  %s15842_s28 = sshll.u32 %s18219_s27, 8 }
  0xab   : > { %s22182_s21 = sld [smem:[#allocation53_spill]]  ;;  %s700_s2 = scalar_lea.vmem [#allocation2], %s14834_s4 }
  0xac   : > { %s707_s1 = sshll.u32 %s700_s2, 4  ;;  %p18546_p5 = pnand %p17041_p1, %p56_p12  ;;  %s18544_s1 = int_to_ptr.vmem [resolvable:$true] %s707_s1 }
  0xad   : > { %s18550_s24 = scalar_lea.sflag [#allocation3], %s696_s18 }
  0xae   : > { %p18135_p4 = pneg %p18546_p5 }
  0xb1   : > { %s18542_s23 = scalar_lea.hbm %s22182_s21, %s15842_s28  ;;  %s18138_s4 = scalar_lea.hbm %s22182_s21, 512 }
  0xb2   : > { %s18133_s27 = scalar_lea.hbm %s18542_s23, 256  ;;  %p18139_p6 = scmp.lt.s32.totalorder %s18542_s23, %s22182_s21 }
  0xb3   : > { %p18134_p2 = scmp.ne.s32.totalorder %s18542_s23, %s18133_s27  ;;  %p18140_p9 = scmp.lt.s32.totalorder %s18138_s4, %s18133_s27 }
  0xb5   : > { %p18136_p7 = pnand %p18135_p4, %p18134_p2  ;;  %p18141_p11 = por %p18140_p9, %p18139_p6 }
  0xb7   : > { %p18137_p8 = pneg %p18136_p7 }
  0xb9   : > { %p18142_p10 = pnand %p18141_p11, %p18137_p8 }
  0xbb   : > { %18145 = shalt.err (!%p18142_p10)
}
  0xbc   : > { %s18146_s18 = scalar_lea.vmem %s18544_s1, 256  ;;  %s18236_s9 = smov [#allocation2]  }
  0xbd   : > { %p18147_p12 = scmp.ne.s32.totalorder %s18544_s1, %s18146_s18  ;;  %s18151_s11 = sshll.u32 %s18236_s9, 4  ;;  %s18152_s11 = int_to_ptr.vmem [resolvable:$false] %s18151_s11 }
  0xbe   : > { %s18153_s28 = scalar_lea.vmem %s18152_s11, 512  ;;  %p18154_p2 = scmp.lt.s32.totalorder %s18544_s1, %s18152_s11 }
  0xbf   : > { %p18149_p13 = pnand %p18147_p12, %p18135_p4  ;;  %p18155_p7 = scmp.lt.s32.totalorder %s18153_s28, %s18146_s18 }
  0xc1   : > { %p18150_p1 = pneg %p18149_p13  ;;  %p18156_p0 = por %p18155_p7, %p18154_p2 }
  0xc3   : > { %p18157_p3 = pnand %p18156_p0, %p18150_p1 }
  0xc5   : > { %18160 = shalt.err (!%p18157_p3)
}
  0xc6   : > { %s22184_s27 = smov 8   ;;  %s22185_s20 = smov 128  }
  0xc7   : > { %17029 = dma.hbm_to_vmem [thread:$0]  (!%p18546_p5), %s18542_s23, 256, %s18544_s1, %s18550_s24, %s22185_s20, %s22185_s20, %s22184_s27  }
  0xc8   : > { %p22186_p4 = scmp.ne.s32.totalorder %s22171_s0, 0 }
  0xca   : > { %719 = sbr.rel (%p22186_p4) target bundleno = 3990 (0xf96), region = 104 }
  0xcf   : > { %s721_s9 = sand.u32 1, %s18211_s25   ;;  %p22187_p0 = scmp.ne.s32.totalorder %s22181_s22, 0 }
  0xd0   : > { %s14838_s11 = sshll.u32 %s721_s9, 4  ;;  %s722_s4 = scalar_lea.sflag [#allocation3], %s721_s9 }
  0xd1   : > { %s725_s7 = scalar_lea.vmem [#allocation2], %s14838_s11 }
  0xd2   : > { %18178 = dma.done.wait (%p22187_p0), %s722_s4, 256  }
  0xd3   : > { %18180 = vsyncadd (%p22187_p0), %s722_s4, 4294967040  ;;  %p22188_p3 = scmp.eq.s32.totalorder %s18375_s29, 0 }
  0xd5   : > { %18182 = dma.done.wait (%p22188_p3), [#allocation5], 9216   ;;  %p22189_p8 = pmov %p22188_p3 }
  0xd6   : > { %p22190_p5 = pmov %p22188_p3 }
  0xd7   : > { %18184 = vsyncadd (%p22189_p8), [#allocation5], 4294958080 }
  0xd8   : > { %18186 = dma.done.wait (%p22190_p5), [#allocation8], 9216   ;;  %p22191_p6 = pmov %p22188_p3 }
  0xd9   : > { %p22192_p9 = pmov %p22188_p3 }
  0xda   : > { %18188 = vsyncadd (%p22191_p6), [#allocation8], 4294958080 }
  0xdb   : > { %18190 = dma.done.wait (%p22192_p9), [#allocation11], 18432   ;;  %p22193_p11 = pmov %p22188_p3 }
  0xdc   : > { %p22194_p10 = pmov %p22188_p3 }
  0xdd   : > { %18192 = vsyncadd (%p22193_p11), [#allocation11], 4294948864 }
  0xde   : > { %18194 = dma.done.wait (%p22194_p10), [#allocation14], 9232   ;;  %p22195_p12 = pmov %p22188_p3 }
  0xdf   : > { %p22196_p13 = pmov %p22188_p3 }
  0xe0   : > { %18196 = vsyncadd (%p22195_p12), [#allocation14], 4294958064 }
  0xe1   : > { %18198 = dma.done.wait (%p22196_p13), [#allocation17], 18448   ;;  %p22197_p1 = pmov %p22188_p3 }
  0xe3   : > { %18200 = vsyncadd (%p22197_p1), [#allocation17], 4294948848  ;;  %p22198_p2 = pmov %p22197_p1 }
  0xe4   : > { %p22199_p7 = pmov %p22197_p1 }
  0xe5   : > { %18202 = dma.done.wait (%p22198_p2), [#allocation20], 18432  }
  0xe6   : > { %18204 = vsyncadd (%p22199_p7), [#allocation20], 4294948864  ;;  %v861_v0 = vlaneseq  ;;  %v834_v1 = vld [vmem:[%s725_s7] sm:$0xff]  ;;  %v835_v2 = vld [vmem:[%s725_s7 + $0x8] sm:$0xff]  ;;  %s18237_s0 = smov 1   ;;  %vm844_vm0 = vcmask 7168  }
  0xe7   : > { %838 = vrot.lane.b32.xlu0 %v834_v1, %s18237_s0  ;;  %vm847_vm1 = vcmask 138240   ;;  %vm852_vm2 = vcmask 1040384   ;;  %s22203_s22 = sld [smem:[#allocation54_spill]]  ;;  %s18239_s27 = smov 64   ;;  %vm2200_vm3 = vsmask.f32 256 }
  0xe8   : > { %v18605_v3 = vshrl.u32 %v861_v0, 7  ;;  %s22204_s28 = sld [smem:[#allocation55_spill]]  ;;  %vm18822_vm4 = vmand %vm852_vm2, %vm2200_vm3  ;;  %vm2234_vm5 = vsmask.f32 7424  ;;  %vm2454_vm6 = vcmask 1046528   ;;  %vm2617_vm7 = vcmask 523264  }
  0xe9   : > { %vm19655_vm8 = vmneg %vm2617_vm7  ;;  %s22277_s23 = sld [smem:[#allocation57_spill]]  ;;  %vm5114_vm9 = vcmask 1042434   ;;  %vm5117_vm10 = vcmask 1043459   ;;  %vm5120_vm11 = vcmask 1044484   ;;  %vm5123_vm12 = vcmask 1045509   ;;  %p828_p4 = scmp.lt.s32.totalorder %s18375_s29, 1 }
  0xea   : > { %22200 = vst [vmem:[#allocation28_spill] sm:$0xff] %v18605_v3  ;;  %v18608_v4 = vsub.s32 0, %v18605_v3  ;;  %v18611_v5 = vsub.s32 1, %v18605_v3  ;;  %v885_v6 = vsub.s32 2, %v18605_v3  ;;  %v929_v12 = vsub.s32 6, %v18605_v3  ;;  %s22343_s7 = sld [smem:[#allocation62_spill]] }
  0xeb   : > { %840 = vrot.lane.b32.xlu0 %v835_v2, %s18237_s0  ;;  %v940_v13 = vsub.s32 7, %v18605_v3  ;;  %v896_v19 = vsub.s32 3, %v18605_v3  ;;  %v907_v20 = vsub.s32 4, %v18605_v3  ;;  %v918_v24 = vsub.s32 5, %v18605_v3  ;;  %s22346_s24 = sld [smem:[#allocation63_spill]]  ;;  %s22353_s29 = smov (!%p828_p4, %s18375_s29), 1 }
  0xec   : > { %22201 = vst [vmem:[#allocation29_spill] sm:$0xff] %v18608_v4  ;;  %22202 = vst [vmem:[#allocation30_spill] sm:$0xff] %v18611_v5  ;;  %vm5126_vm13 = vcmask 1046534   ;;  %vm5129_vm14 = vcmask 1047559   ;;  %vm5246_vm15 = vcmask 1044480   ;;  %s15843_s1 = sshll.u32 %s22353_s29, 2 }
  0xed   : > { %v18661_v46 = vld [vmem:[%s22203_s22] ss:$0 sm:$0xff]  ;;  %v18666_v47 = vld [vmem:[%s22203_s22 + $0x1] ss:$0 sm:$0xff]  ;;  %v18673_v50 = vld [vmem:[%s22203_s22 + $0x2] ss:$0 sm:$0xff] }
  0xee   : > { %v18680_v51 = vld [vmem:[%s22203_s22 + $0x3] ss:$0 sm:$0xff]  ;;  %v18688_v57 = vld [vmem:[%s22203_s22 + $0x4] ss:$0 sm:$0xff]  ;;  %v18698_v61 = vld [vmem:[%s22203_s22 + $0x5] ss:$0 sm:$0xff] }
 0x159   : > { %v839_v7 = vpop.permute.xlu0 %838 }
 0x15a   : > { %v845_v8 = vsel %vm844_vm0, 0.0, %v839_v7  ;;  %v18706_v7 = vld [vmem:[%s22203_s22 + $0x6] ss:$0 sm:$0xff] }
 0x15b   : > { %v848_v9 = vsel %vm847_vm1, %v845_v8, 0.0 }
 0x15c   : > { %v853_v10 = vrot.slane %v848_v9, 7 }
 0x15d   : > { %v841_v11 = vpop.permute.xlu0 %840 }
 0x15e   : > { %v859_v14 = vsel %vm852_vm2, 0.0, %v853_v10  ;;  %v846_v15 = vsel %vm844_vm0, 0.0, %v841_v11  ;;  %vm5247_vm0 = vsmask.f32 4352 }
 0x15f   : > { %v18617_v16 = vsel %vm847_vm1, %v846_v15, 0.0  ;;  %v864_v17 = vrot.slane %v859_v14, %v18608_v4  ;;  %v930_v21 = vrot.slane %v859_v14, %v929_v12  ;;  %v941_v22 = vrot.slane %v859_v14, %v940_v13  ;;  %vm20613_vm1 = vmand %vm5246_vm15, %vm5247_vm0 }
 0x160   : > { %v854_v18 = vrot.slane %v18617_v16, 7  ;;  %v875_v31 = vrot.slane %v859_v14, %v18611_v5  ;;  %v886_v32 = vrot.slane %v859_v14, %v885_v6  ;;  %v897_v33 = vrot.slane %v859_v14, %v896_v19 }
 0x161   : > { %1108 = vbcast.lane.b32.xlu0 %v864_v17, 257  ;;  %866 = vbcast.lane.b32.xlu1 %v864_v17, 256  ;;  %v908_v34 = vrot.slane %v859_v14, %v907_v20  ;;  %v919_v35 = vrot.slane %v859_v14, %v918_v24  ;;  %v22119_v16 = vmov 0   ;;  %vm5411_vm15 = vcmask 1042432  }
 0x162   : > { %v18626_v23 = vsel %vm852_vm2, %v853_v10, %v854_v18  ;;  %vm5412_vm0 = vcmask 1046532  }
 0x163   : > { %v18630_v25 = vrot.slane %v18626_v23, %v885_v6  ;;  %v18633_v26 = vrot.slane %v18626_v23, %v896_v19  ;;  %v18636_v27 = vrot.slane %v18626_v23, %v907_v20  ;;  %v18639_v28 = vrot.slane %v18626_v23, %v918_v24 }
 0x164   : > { %v18642_v29 = vrot.slane %v18626_v23, %v929_v12  ;;  %v18645_v30 = vrot.slane %v18626_v23, %v940_v13  ;;  %v952_v36 = vrot.slane %v18626_v23, %v18608_v4  ;;  %v963_v37 = vrot.slane %v18626_v23, %v18611_v5  ;;  %v18715_v12 = vld [vmem:[%s22203_s22 + $0x7] ss:$0 sm:$0xff] }
 0x165   : > { %1305 = vbcast.lane.b32.xlu0 %v864_v17, 258  ;;  %870 = vbcast.lane.b32.xlu1 %v864_v17, 264 }
 0x169   : > { %877 = vbcast.lane.b32.xlu0 %v875_v31, 256  ;;  %1112 = vbcast.lane.b32.xlu1 %v864_v17, 265 }
 0x16d   : > { %1116 = vbcast.lane.b32.xlu0 %v875_v31, 257  ;;  %1309 = vbcast.lane.b32.xlu1 %v864_v17, 266 }
 0x171   : > { %1313 = vbcast.lane.b32.xlu0 %v875_v31, 258  ;;  %881 = vbcast.lane.b32.xlu1 %v875_v31, 264 }
 0x175   : > { %888 = vbcast.lane.b32.xlu0 %v886_v32, 256  ;;  %1120 = vbcast.lane.b32.xlu1 %v875_v31, 265 }
 0x179   : > { %1124 = vbcast.lane.b32.xlu0 %v886_v32, 257  ;;  %1317 = vbcast.lane.b32.xlu1 %v875_v31, 266 }
 0x17d   : > { %1321 = vbcast.lane.b32.xlu0 %v886_v32, 258  ;;  %892 = vbcast.lane.b32.xlu1 %v886_v32, 264 }
 0x181   : > { %899 = vbcast.lane.b32.xlu0 %v897_v33, 256  ;;  %1128 = vbcast.lane.b32.xlu1 %v886_v32, 265 }
 0x185   : > { %1132 = vbcast.lane.b32.xlu0 %v897_v33, 257  ;;  %1325 = vbcast.lane.b32.xlu1 %v886_v32, 266 }
 0x189   : > { %1329 = vbcast.lane.b32.xlu0 %v897_v33, 258  ;;  %903 = vbcast.lane.b32.xlu1 %v897_v33, 264 }
 0x18d   : > { %910 = vbcast.lane.b32.xlu0 %v908_v34, 256  ;;  %1136 = vbcast.lane.b32.xlu1 %v897_v33, 265 }
 0x191   : > { %1140 = vbcast.lane.b32.xlu0 %v908_v34, 257  ;;  %1333 = vbcast.lane.b32.xlu1 %v897_v33, 266 }
 0x195   : > { %1337 = vbcast.lane.b32.xlu0 %v908_v34, 258  ;;  %914 = vbcast.lane.b32.xlu1 %v908_v34, 264 }
 0x199   : > { %921 = vbcast.lane.b32.xlu0 %v919_v35, 256  ;;  %1144 = vbcast.lane.b32.xlu1 %v908_v34, 265 }
 0x19d   : > { %1148 = vbcast.lane.b32.xlu0 %v919_v35, 257  ;;  %1341 = vbcast.lane.b32.xlu1 %v908_v34, 266  ;;  %v18734_v34 = vsel %vm852_vm2, %v854_v18, 0.0  ;;  %v18744_v18 = vrot.slane %v22119_v16, 1 }
 0x1a1   : > { %1345 = vbcast.lane.b32.xlu0 %v919_v35, 258  ;;  %925 = vbcast.lane.b32.xlu1 %v919_v35, 264 }
 0x1a5   : > { %932 = vbcast.lane.b32.xlu0 %v930_v21, 256  ;;  %1152 = vbcast.lane.b32.xlu1 %v919_v35, 265 }
 0x1a9   : > { %1156 = vbcast.lane.b32.xlu0 %v930_v21, 257  ;;  %1349 = vbcast.lane.b32.xlu1 %v919_v35, 266 }
 0x1ad   : > { %1353 = vbcast.lane.b32.xlu0 %v930_v21, 258  ;;  %936 = vbcast.lane.b32.xlu1 %v930_v21, 264 }
 0x1b1   : > { %943 = vbcast.lane.b32.xlu0 %v941_v22, 256  ;;  %1160 = vbcast.lane.b32.xlu1 %v930_v21, 265 }
 0x1b5   : > { %1164 = vbcast.lane.b32.xlu0 %v941_v22, 257  ;;  %1357 = vbcast.lane.b32.xlu1 %v930_v21, 266 }
 0x1b9   : > { %1361 = vbcast.lane.b32.xlu0 %v941_v22, 258  ;;  %947 = vbcast.lane.b32.xlu1 %v941_v22, 264 }
 0x1bd   : > { %1168 = vbcast.lane.b32.xlu1 %v941_v22, 265  ;;  %954 = vbcast.lane.b32.xlu0 %v952_v36, 256 }
 0x1c1   : > { %1365 = vbcast.lane.b32.xlu1 %v941_v22, 266  ;;  %1172 = vbcast.lane.b32.xlu0 %v952_v36, 257  ;;  %v18723_v22 = vld [vmem:[%s22203_s22 + $0x8] ss:$0 sm:$0xff] }
 0x1c5   : > { %958 = vbcast.lane.b32.xlu1 %v952_v36, 264  ;;  %1369 = vbcast.lane.b32.xlu0 %v952_v36, 258 }
 0x1c9   : > { %1176 = vbcast.lane.b32.xlu1 %v952_v36, 265  ;;  %965 = vbcast.lane.b32.xlu0 %v963_v37, 256 }
 0x1cd   : > { %1373 = vbcast.lane.b32.xlu1 %v952_v36, 266  ;;  %1180 = vbcast.lane.b32.xlu0 %v963_v37, 257 }
 0x1d1   : > { %969 = vbcast.lane.b32.xlu1 %v963_v37, 264  ;;  %1377 = vbcast.lane.b32.xlu0 %v963_v37, 258 }
 0x1d3   : > { %v867_v38 = vpop.permute.xlu1 %866  ;;  %v1109_v39 = vpop.permute.xlu0 %1108 }
 0x1d4   : > { %v1042_v52 = vmul.f32 %v18661_v46, %v867_v38  ;;  %v1239_v53 = vmul.f32 %v18666_v47, %v1109_v39 }
 0x1d5   : > { %1184 = vbcast.lane.b32.xlu1 %v963_v37, 265  ;;  %976 = vbcast.lane.b32.xlu0 %v18630_v25, 256 }
 0x1d6   : > { %v1271_v62 = vadd.f32 %v1239_v53, %v1042_v52 }
 0x1d7   : > { %v871_v40 = vpop.permute.xlu1 %870  ;;  %v1306_v41 = vpop.permute.xlu0 %1305 }
 0x1d8   : > { %v1436_v58 = vmul.f32 %v18673_v50, %v1306_v41  ;;  %v1043_v59 = vmul.f32 %v18661_v46, %v871_v40 }
 0x1d9   : > { %1381 = vbcast.lane.b32.xlu1 %v963_v37, 266  ;;  %1188 = vbcast.lane.b32.xlu0 %v18630_v25, 257 }
 0x1da   : > { %v1468_v8 = vadd.f32 %v1436_v58, %v1271_v62 }
 0x1db   : > { %v1113_v42 = vpop.permute.xlu1 %1112  ;;  %v878_v43 = vpop.permute.xlu0 %877 }
 0x1dc   : > { %v1240_v56 = vmul.f32 %v18666_v47, %v1113_v42  ;;  %v1516_v63 = vmul.f32 %v18680_v51, %v878_v43 }
 0x1dd   : > { %980 = vbcast.lane.b32.xlu1 %v18630_v25, 264  ;;  %1385 = vbcast.lane.b32.xlu0 %v18630_v25, 258 }
 0x1de   : > { %v1272_v2 = vadd.f32 %v1240_v56, %v1043_v59  ;;  %v1548_v13 = vadd.f32 %v1516_v63, %v1468_v8 }
 0x1df   : > { %v1310_v44 = vpop.permute.xlu1 %1309  ;;  %v1117_v45 = vpop.permute.xlu0 %1116 }
 0x1e0   : > { %v1437_v60 = vmul.f32 %v18673_v50, %v1310_v44  ;;  %v1593_v9 = vmul.f32 %v18688_v57, %v1117_v45  ;;  %v1241_v19 = vmul.f32 %v18666_v47, %v1117_v45 }
 0x1e1   : > { %1192 = vbcast.lane.b32.xlu1 %v18630_v25, 265  ;;  %987 = vbcast.lane.b32.xlu0 %v18633_v26, 256 }
 0x1e2   : > { %v1469_v10 = vadd.f32 %v1437_v60, %v1272_v2  ;;  %v1625_v23 = vadd.f32 %v1593_v9, %v1548_v13 }
 0x1e3   : > { %v18668_v48 = vpop.permute.xlu1 %881  ;;  %v1314_v49 = vpop.permute.xlu0 %1313 }
 0x1e4   : > { %v1517_v6 = vmul.f32 %v18680_v51, %v18668_v48  ;;  %v1670_v14 = vmul.f32 %v18698_v61, %v1314_v49  ;;  %v1438_v31 = vmul.f32 %v18673_v50, %v1314_v49  ;;  %v1045_v45 = vmul.f32 %v18661_v46, %v18668_v48  ;;  %v18756_v48 = vld [vmem:[%s22204_s28] ss:$0 sm:$0xff] }
 0x1e5   : > { %1389 = vbcast.lane.b32.xlu1 %v18630_v25, 266  ;;  %1196 = vbcast.lane.b32.xlu0 %v18633_v26, 257  ;;  %v1044_v25 = vmul.f32 %v18661_v46, %v878_v43 }
 0x1e6   : > { %v1549_v20 = vadd.f32 %v1517_v6, %v1469_v10  ;;  %v1702_v35 = vadd.f32 %v1670_v14, %v1625_v23 }
 0x1e7   : > { %v1121_v54 = vpop.permute.xlu1 %1120  ;;  %v889_v55 = vpop.permute.xlu0 %888 }
 0x1e8   : > { %v1594_v11 = vmul.f32 %v18688_v57, %v1121_v54  ;;  %v1750_v24 = vmul.f32 %v18706_v7, %v889_v55  ;;  %v1242_v39 = vmul.f32 %v18666_v47, %v1121_v54  ;;  %v1518_v42 = vmul.f32 %v18680_v51, %v889_v55 }
 0x1e9   : > { %991 = vbcast.lane.b32.xlu1 %v18633_v26, 264  ;;  %1393 = vbcast.lane.b32.xlu0 %v18633_v26, 258  ;;  %v1046_v54 = vmul.f32 %v18661_v46, %v889_v55 }
 0x1ea   : > { %v1626_v32 = vadd.f32 %v1594_v11, %v1549_v20  ;;  %v1782_v43 = vadd.f32 %v1750_v24, %v1702_v35  ;;  %v1274_v63 = vadd.f32 %v1242_v39, %v1045_v45 }
 0x1eb   : > { %v1318_v0 = vpop.permute.xlu1 %1317  ;;  %v1125_v1 = vpop.permute.xlu0 %1124 }
 0x1ec   : > { %v1671_v21 = vmul.f32 %v18698_v61, %v1318_v0  ;;  %v1827_v36 = vmul.f32 %v18715_v12, %v1125_v1  ;;  %v1439_v52 = vmul.f32 %v18673_v50, %v1318_v0  ;;  %v1243_v56 = vmul.f32 %v18666_v47, %v1125_v1 }
 0x1ed   : > { %1200 = vbcast.lane.b32.xlu1 %v18633_v26, 265  ;;  %1002 = vbcast.lane.b32.xlu0 %v18636_v27, 264  ;;  %v1595_v58 = vmul.f32 %v18688_v57, %v1125_v1  ;;  %v18765_v1 = vrot.slane %v18734_v34, %v18608_v4 }
 0x1ee   : > { %v1703_v40 = vadd.f32 %v1671_v21, %v1626_v32  ;;  %v1859_v59 = vadd.f32 %v1827_v36, %v1782_v43  ;;  %v1471_v10 = vadd.f32 %v1439_v52, %v1274_v63  ;;  %v1275_v14 = vadd.f32 %v1243_v56, %v1046_v54 }
 0x1ef   : > { %v893_v15 = vpop.permute.xlu1 %892  ;;  %v1322_v17 = vpop.permute.xlu0 %1321 }
 0x1f0   : > { %v1751_v33 = vmul.f32 %v18706_v7, %v893_v15  ;;  %v1904_v44 = vmul.f32 %v18723_v22, %v1322_v17  ;;  %v1519_v2 = vmul.f32 %v18680_v51, %v893_v15  ;;  %v1672_v55 = vmul.f32 %v18698_v61, %v1322_v17 }
 0x1f1   : > { %1397 = vbcast.lane.b32.xlu1 %v18633_v26, 266  ;;  %1204 = vbcast.lane.b32.xlu0 %v18636_v27, 257  ;;  %v1273_v26 = vadd.f32 %v1241_v19, %v1044_v25  ;;  %v1047_v20 = vmul.f32 %v18661_v46, %v893_v15  ;;  %v1440_v21 = vmul.f32 %v18673_v50, %v1322_v17 }
 0x1f2   : > { %v1783_v53 = vadd.f32 %v1751_v33, %v1703_v40  ;;  %v1936_v9 = vadd.f32 %v1904_v44, %v1859_v59  ;;  %v1551_v25 = vadd.f32 %v1519_v2, %v1471_v10 }
 0x1f3   : > { %v1129_v37 = vpop.permute.xlu1 %1128  ;;  %v900_v38 = vpop.permute.xlu0 %899  ;;  %v1470_v49 = vadd.f32 %v1438_v31, %v1273_v26 }
 0x1f4   : > { %v1828_v41 = vmul.f32 %v18715_v12, %v1129_v37  ;;  %v1596_v11 = vmul.f32 %v18688_v57, %v1129_v37  ;;  %v1752_v31 = vmul.f32 %v18706_v7, %v900_v38  ;;  %v1975_v36 = vadd.f32 %v18756_v48, %v1936_v9 }
 0x1f5   : > { %998 = vbcast.lane.b32.xlu1 %v18636_v27, 256  ;;  %1401 = vbcast.lane.b32.xlu0 %v18636_v27, 258  ;;  %v1550_v8 = vadd.f32 %v1518_v42, %v1470_v49  ;;  %v1520_v26 = vmul.f32 %v18680_v51, %v900_v38  ;;  %v1244_v15 = vmul.f32 %v18666_v47, %v1129_v37 }
 0x1f6   : > { %v1860_v6 = vadd.f32 %v1828_v41, %v1783_v53  ;;  %v1628_v17 = vadd.f32 %v1596_v11, %v1551_v25  ;;  %v1472_v41 = vadd.f32 %v1440_v21, %v1275_v14  ;;  %v1048_v42 = vmul.f32 %v18661_v46, %v900_v38 }
 0x1f7   : > { %v1326_v60 = vpop.permute.xlu1 %1325  ;;  %v1133_v62 = vpop.permute.xlu0 %1132  ;;  %v1627_v19 = vadd.f32 %v1595_v58, %v1550_v8  ;;  %v2007_v56 = vmax.f32 %v1975_v36, 0.0  ;;  %v1276_v38 = vadd.f32 %v1244_v15, %v1047_v20  ;;  %v17107_v8 = vld [vmem:[#allocation4 + $0x78] sm:$0xff]  }
 0x1f8   : > { %v1905_v0 = vmul.f32 %v18723_v22, %v1326_v60  ;;  %v1673_v32 = vmul.f32 %v18698_v61, %v1326_v60  ;;  %v1829_v39 = vmul.f32 %v18715_v12, %v1133_v62  ;;  %v1597_v44 = vmul.f32 %v18688_v57, %v1133_v62  ;;  %15844 = vmatprep.subr.bf16.mxu0 %v17107_v8 }
 0x1f9   : > { %2519 = vrot.lane.b32.xlu1 %v18744_v18, %s18239_s27  ;;  %1013 = vbcast.lane.b32.xlu0 %v18639_v28, 264  ;;  %v1704_v35 = vadd.f32 %v1672_v55, %v1627_v19  ;;  %v1552_v58 = vadd.f32 %v1520_v26, %v1472_v41  ;;  %v1441_v59 = vmul.f32 %v18673_v50, %v1326_v60  ;;  %v17108_v55 = vld [vmem:[#allocation4 + $0x38] sm:$0xff]  }
 0x1fa   : > { %v1937_v13 = vadd.f32 %v1905_v0, %v1860_v6  ;;  %v1705_v53 = vadd.f32 %v1673_v32, %v1628_v17  ;;  %v1245_v63 = vmul.f32 %v18666_v47, %v1133_v62  ;;  %v17110_v32 = vld [vmem:[#allocation4 + $0x30] sm:$0xff]   ;;  %15845 = vmatpush3.bf16.msra.mxu0 %v17108_v55 }
 0x1fb   : > { %v904_v23 = vpop.permute.xlu1 %903  ;;  %v1330_v24 = vpop.permute.xlu0 %1329  ;;  %v1784_v52 = vadd.f32 %v1752_v31, %v1704_v35  ;;  %v1629_v9 = vadd.f32 %v1597_v44, %v1552_v58  ;;  %v1473_v21 = vadd.f32 %v1441_v59, %v1276_v38 }
 0x1fc   : > { %v1976_v33 = vadd.f32 %v18756_v48, %v1937_v13  ;;  %v1753_v40 = vmul.f32 %v18706_v7, %v904_v23  ;;  %v1906_v54 = vmul.f32 %v18723_v22, %v1330_v24  ;;  %v1674_v0 = vmul.f32 %v18698_v61, %v1330_v24 }
 0x1fd   : > { %1208 = vbcast.lane.b32.xlu1 %v18636_v27, 265  ;;  %1212 = vbcast.lane.b32.xlu0 %v18639_v28, 257  ;;  %v1861_v2 = vadd.f32 %v1829_v39, %v1784_v52  ;;  %v1521_v10 = vmul.f32 %v18680_v51, %v904_v23  ;;  %v1442_v11 = vmul.f32 %v18673_v50, %v1330_v24  ;;  %v17109_v24 = vld [vmem:[#allocation4 + $0x70] sm:$0xff]  }
 0x1fe   : > { %v2008_v43 = vmax.f32 %v1976_v33, 0.0  ;;  %v1785_v6 = vadd.f32 %v1753_v40, %v1705_v53  ;;  %v1277_v25 = vadd.f32 %v1245_v63, %v1048_v42  ;;  %v1049_v31 = vmul.f32 %v18661_v46, %v904_v23  ;;  %15846 = vmatprep.subr.bf16.mxu0 %v17109_v24 }
 0x1ff   : > { %v1137_v45 = vpop.permute.xlu1 %1136  ;;  %v18782_v49 = vpop.permute.xlu0 %910  ;;  %v1938_v62 = vadd.f32 %v1906_v54, %v1861_v2  ;;  %v1706_v33 = vadd.f32 %v1674_v0, %v1629_v9  ;;  %v1553_v15 = vadd.f32 %v1521_v10, %v1473_v21  ;;  %15847 = vmatpush3.bf16.msra.mxu0 %v17110_v32  ;;  %v17113_v21 = vld [vmem:[#allocation4 + $0x60] sm:$0xff]  }
 0x200   : > { %v1830_v37 = vmul.f32 %v18715_v12, %v1137_v45  ;;  %v18793_v14 = vpack.c.bf16 %v2008_v43, %v2007_v56  ;;  %v1754_v19 = vmul.f32 %v18706_v7, %v18782_v49  ;;  %v1598_v35 = vmul.f32 %v18688_v57, %v1137_v45  ;;  %v17112_v56 = vld [vmem:[#allocation4 + $0x28] sm:$0xff]  }
 0x201   : > { %1405 = vbcast.lane.b32.xlu1 %v18636_v27, 266  ;;  %1409 = vbcast.lane.b32.xlu0 %v18639_v28, 258  ;;  %v1474_v17 = vadd.f32 %v1442_v11, %v1277_v25  ;;  %v1246_v39 = vmul.f32 %v18666_v47, %v1137_v45  ;;  %v1977_v42 = vadd.f32 %v18756_v48, %v1938_v62  ;;  %v17111_v45 = vld [vmem:[#allocation4 + $0x68] sm:$0xff]   ;;  %v17114_v25 = vld [vmem:[#allocation4 + $0x20] sm:$0xff]  }
 0x202   : > { %v1862_v27 = vadd.f32 %v1830_v37, %v1785_v6  ;;  %v2056_v23 = vshrl.u32 %v18793_v14, 16  ;;  %v1522_v43 = vmul.f32 %v18680_v51, %v18782_v49  ;;  %v1786_v44 = vadd.f32 %v1754_v19, %v1706_v33  ;;  %15848 = vmatprep.subr.bf16.mxu0 %v17111_v45 }
 0x203   : > { %v1334_v13 = vpop.permute.xlu1 %1333  ;;  %v1141_v60 = vpop.permute.xlu0 %1140  ;;  %v1630_v58 = vadd.f32 %v1598_v35, %v1553_v15  ;;  %v1278_v2 = vadd.f32 %v1246_v39, %v1049_v31  ;;  %v1050_v6 = vmul.f32 %v18661_v46, %v18782_v49  ;;  %v2009_v10 = vmax.f32 %v1977_v42, 0.0  ;;  %15849 = vmatpush3.bf16.msra.mxu0 %v17112_v56  ;;  %v17115_v35 = vld [vmem:[#allocation4 + $0x58] sm:$0xff]  }
 0x204   : > { %v1907_v20 = vmul.f32 %v18723_v22, %v1334_v13  ;;  %v1831_v26 = vmul.f32 %v18715_v12, %v1141_v60  ;;  %v1675_v52 = vmul.f32 %v18698_v61, %v1334_v13  ;;  %v1443_v53 = vmul.f32 %v18673_v50, %v1334_v13  ;;  %15850 = vmatprep.subr.bf16.mxu0 %v17113_v21  ;;  %v17118_v21 = vld [vmem:[#allocation4 + $0x10] sm:$0xff]  }
 0x205   : > { %1009 = vbcast.lane.b32.xlu1 %v18639_v28, 256  ;;  %1024 = vbcast.lane.b32.xlu0 %v18642_v29, 264  ;;  %v1247_v59 = vmul.f32 %v18666_v47, %v1141_v60  ;;  %v1599_v0 = vmul.f32 %v18688_v57, %v1141_v60  ;;  %v2058_v9 = vrot.slane %v2056_v23, 7  ;;  %v1554_v19 = vadd.f32 %v1522_v43, %v1474_v17 }
 0x206   : > { %v1939_v36 = vadd.f32 %v1907_v20, %v1862_v27  ;;  %v1863_v63 = vadd.f32 %v1831_v26, %v1786_v44  ;;  %v1707_v11 = vadd.f32 %v1675_v52, %v1630_v58  ;;  %v22205_v27 = vmov 0  ;;  %v17116_v52 = vld [vmem:[#allocation4 + $0x18] sm:$0xff]  }
 0x207   : > { %v915_v40 = vpop.permute.xlu1 %914  ;;  %v1338_v41 = vpop.permute.xlu0 %1337  ;;  %v22206_v27 = vsel %vm18822_vm4, 4294967295, %v22205_v27  ;;  %v1475_v20 = vadd.f32 %v1443_v53, %v1278_v2  ;;  %v2059_v60 = vshll.u32 %v18793_v14, 16  ;;  %v1279_v31 = vadd.f32 %v1247_v59, %v1050_v6  ;;  %15851 = vmatpush3.bf16.msra.mxu0 %v17114_v25 }
 0x208   : > { %v1978_v54 = vadd.f32 %v18756_v48, %v1939_v36  ;;  %v1908_v37 = vmul.f32 %v18723_v22, %v1338_v41  ;;  %v1755_v38 = vmul.f32 %v18706_v7, %v915_v40  ;;  %22207 = vst [vmem:[#allocation31_spill] sm:$0xff] %v22206_v27  ;;  %v1523_v24 = vmul.f32 %v18680_v51, %v915_v40 }
 0x209   : > { %1216 = vbcast.lane.b32.xlu1 %v18639_v28, 265  ;;  %1220 = vbcast.lane.b32.xlu0 %v18642_v29, 257  ;;  %v1444_v33 = vmul.f32 %v18673_v50, %v1338_v41  ;;  %v1631_v36 = vadd.f32 %v1599_v0, %v1554_v19  ;;  %v1051_v26 = vmul.f32 %v18661_v46, %v915_v40  ;;  %v18839_v43 = vsel %vm18822_vm4, %v2058_v9, 0 }
 0x20a   : > { %v1940_v13 = vadd.f32 %v1908_v37, %v1863_v63  ;;  %v2010_v49 = vmax.f32 %v1978_v54, 0.0  ;;  %v1787_v32 = vadd.f32 %v1755_v38, %v1707_v11  ;;  %v1676_v15 = vmul.f32 %v18698_v61, %v1338_v41  ;;  %15852 = vmatprep.subr.bf16.mxu0 %v17115_v35 }
 0x20b   : > { %v1145_v8 = vpop.permute.xlu1 %1144  ;;  %v922_v55 = vpop.permute.xlu0 %921  ;;  %v2061_v39 = vor.u32 %v2059_v60, %v2058_v9  ;;  %v1555_v53 = vadd.f32 %v1523_v24, %v1475_v20  ;;  %v1476_v54 = vadd.f32 %v1444_v33, %v1279_v31  ;;  %v2251_v2 = vshll.u32 %v18839_v43, 16  ;;  %15853 = vmatpush3.bf16.msra.mxu0 %v17116_v52  ;;  %v17117_v60 = vld [vmem:[#allocation4 + $0x50] sm:$0xff]  }
 0x20c   : > { %v1832_v62 = vmul.f32 %v18715_v12, %v1145_v8  ;;  %v18834_v14 = vadd.f32 %v18756_v48, %v1940_v13  ;;  %v1248_v44 = vmul.f32 %v18666_v47, %v1145_v8  ;;  %v1600_v40 = vmul.f32 %v18688_v57, %v1145_v8  ;;  %15854 = vmatprep.subr.bf16.mxu0 %v17117_v60  ;;  %v17122_v60 = vld [vmem:[#allocation4] sm:$0xff]  }
 0x20d   : > { %1413 = vbcast.lane.b32.xlu1 %v18639_v28, 266  ;;  %1417 = vbcast.lane.b32.xlu0 %v18642_v29, 258  ;;  %v18845_v41 = vpack.c.bf16 %v2010_v49, %v2009_v10  ;;  %v1756_v37 = vmul.f32 %v18706_v7, %v922_v55  ;;  %v1708_v56 = vadd.f32 %v1676_v15, %v1631_v36  ;;  %v18851_v38 = vsel %vm18822_vm4, 0, %v2061_v39 }
 0x20e   : > { %v1864_v23 = vadd.f32 %v1832_v62, %v1787_v32  ;;  %v1052_v58 = vmul.f32 %v18661_v46, %v922_v55  ;;  %v2011_v6 = vmax.f32 %v18834_v14, 0.0  ;;  %v1524_v0 = vmul.f32 %v18680_v51, %v922_v55 }
 0x20f   : > { %v1342_v28 = vpop.permute.xlu1 %1341  ;;  %v1149_v17 = vpop.permute.xlu0 %1148  ;;  %v1280_v10 = vadd.f32 %v1248_v44, %v1051_v26  ;;  %v1632_v11 = vadd.f32 %v1600_v40, %v1555_v53  ;;  %v2063_v62 = vshrl.u32 %v18845_v41, 16  ;;  %v1788_v19 = vadd.f32 %v1756_v37, %v1708_v56  ;;  %15855 = vmatpush3.bf16.msra.mxu0 %v17118_v21  ;;  %v17119_v53 = vld [vmem:[#allocation4 + $0x48] sm:$0xff]  }
 0x210   : > { %v1909_v42 = vmul.f32 %v18723_v22, %v1342_v28  ;;  %v1677_v8 = vmul.f32 %v18698_v61, %v1342_v28  ;;  %v1833_v13 = vmul.f32 %v18715_v12, %v1149_v17  ;;  %v1445_v20 = vmul.f32 %v18673_v50, %v1342_v28  ;;  %15856 = vmatprep.subr.bf16.mxu0 %v17119_v53 }
 0x211   : > { %1020 = vbcast.lane.b32.xlu1 %v18642_v29, 256  ;;  %1035 = vbcast.lane.b32.xlu0 %v18645_v30, 264  ;;  %v2244_v55 = vshrl.u32 %v18851_v38, 16  ;;  %v1249_v31 = vmul.f32 %v18666_v47, %v1149_v17  ;;  %v2246_v35 = vshll.u32 %v18851_v38, 16  ;;  %v1601_v26 = vmul.f32 %v18688_v57, %v1149_v17 }
 0x212   : > { %v1941_v45 = vadd.f32 %v1909_v42, %v1864_v23  ;;  %v1709_v36 = vadd.f32 %v1677_v8, %v1632_v11  ;;  %v2066_v28 = vshll.u32 %v18845_v41, 16  ;;  %v1556_v39 = vadd.f32 %v1524_v0, %v1476_v54  ;;  %v17120_v41 = vld [vmem:[#allocation4 + $0x8] sm:$0xff]  }
 0x213   : > { %v926_v59 = vpop.permute.xlu1 %925  ;;  %v1346_v63 = vpop.permute.xlu0 %1345  ;;  %v1865_v14 = vadd.f32 %v1833_v13, %v1788_v19  ;;  %v18876_v42 = vrot.slane %v2063_v62, 7  ;;  %v1477_v44 = vadd.f32 %v1445_v20, %v1280_v10  ;;  %v1281_v37 = vadd.f32 %v1249_v31, %v1052_v58  ;;  %15857 = vmatpush3.bf16.msra.mxu0 %v17120_v41 }
 0x214   : > { %v1980_v9 = vadd.f32 %v18756_v48, %v1941_v45  ;;  %v1757_v49 = vmul.f32 %v18706_v7, %v926_v59  ;;  %v1910_v24 = vmul.f32 %v18723_v22, %v1346_v63  ;;  %v1525_v23 = vmul.f32 %v18680_v51, %v926_v59 }
 0x215   : > { %1224 = vbcast.lane.b32.xlu1 %v18642_v29, 265  ;;  %1228 = vbcast.lane.b32.xlu0 %v18645_v30, 257  ;;  %v1446_v52 = vmul.f32 %v18673_v50, %v1346_v63  ;;  %v1678_v17 = vmul.f32 %v18698_v61, %v1346_v63  ;;  %v2248_v0 = vrot.slane %v2246_v35, 1  ;;  %v1633_v8 = vadd.f32 %v1601_v26, %v1556_v39 }
 0x216   : > { %v2012_v25 = vmax.f32 %v1980_v9, 0.0  ;;  %v1789_v40 = vadd.f32 %v1757_v49, %v1709_v36  ;;  %v1942_v54 = vadd.f32 %v1910_v24, %v1865_v14  ;;  %v1053_v9 = vmul.f32 %v18661_v46, %v926_v59  ;;  %v17121_v49 = vld [vmem:[#allocation4 + $0x40] sm:$0xff]  }
 0x217   : > { %v1153_v32 = vpop.permute.xlu1 %1152  ;;  %v18867_v33 = vpop.permute.xlu0 %932  ;;  %v1557_v13 = vadd.f32 %v1525_v23, %v1477_v44  ;;  %v2068_v58 = vor.u32 %v2066_v28, %v18876_v42  ;;  %v1710_v19 = vadd.f32 %v1678_v17, %v1633_v8  ;;  %v2249_v35 = vor.u32 %v2248_v0, %v2244_v55  ;;  %15858 = vmatprep.subr.bf16.mxu0 %v17121_v49 }
 0x218   : > { %v1834_v15 = vmul.f32 %v18715_v12, %v1153_v32  ;;  %v1758_v63 = vmul.f32 %v18706_v7, %v18867_v33  ;;  %v1602_v59 = vmul.f32 %v18688_v57, %v1153_v32  ;;  %v1981_v21 = vadd.f32 %v18756_v48, %v1942_v54  ;;  %15859 = vmatpush3.bf16.msra.mxu0 %v17122_v60 }
 0x219   : > { %1421 = vbcast.lane.b32.xlu1 %v18642_v29, 266  ;;  %1425 = vbcast.lane.b32.xlu0 %v18645_v30, 258  ;;  %v2041_v29 = vpack.c.bf16 %v2012_v25, %v2011_v6  ;;  %v1478_v6 = vadd.f32 %v1446_v52, %v1281_v37  ;;  %v1250_v26 = vmul.f32 %v18666_v47, %v1153_v32  ;;  %v18903_v55 = vsel %vm18822_vm4, 0, %v2068_v58 }
 0x21a   : > { %v1866_v11 = vadd.f32 %v1834_v15, %v1789_v40  ;;  %v1526_v15 = vmul.f32 %v18680_v51, %v18867_v33  ;;  %v1790_v14 = vadd.f32 %v1758_v63, %v1710_v19  ;;  %v1634_v44 = vadd.f32 %v1602_v59, %v1557_v13 }
 0x21b   : > { %v1350_v45 = vpop.permute.xlu1 %1349  ;;  %v1157_v56 = vpop.permute.xlu0 %1156  ;;  %v2070_v62 = vshrl.u32 %v2041_v29, 16  ;;  %v2073_v32 = vshll.u32 %v2041_v29, 16  ;;  %v2253_v52 = vrot.slane %v2251_v2, 1  ;;  %v2013_v17 = vmax.f32 %v1981_v21, 0.0  ;;  %v18946_v21 = vld [vmem:[%s22203_s22] ss:$0 sm:$0xff] }
 0x21c   : > { %v1911_v10 = vmul.f32 %v18723_v22, %v1350_v45  ;;  %v1835_v25 = vmul.f32 %v18715_v12, %v1157_v56  ;;  %v1679_v28 = vmul.f32 %v18698_v61, %v1350_v45  ;;  %v1447_v53 = vmul.f32 %v18673_v50, %v1350_v45 }
 0x21d   : > { %1031 = vbcast.lane.b32.xlu1 %v18645_v30, 256  ;;  %2551 = vrot.lane.b32.xlu0 %v18851_v38, %s18239_s27  ;;  %v18891_v36 = vrot.slane %v2070_v62, 7  ;;  %v1251_v29 = vmul.f32 %v18666_v47, %v1157_v56  ;;  %v1282_v13 = vadd.f32 %v1250_v26, %v1053_v9  ;;  %v1054_v2 = vmul.f32 %v18661_v46, %v18867_v33  ;;  %v18958_v26 = vld [vmem:[%s22203_s22 + $0x2] ss:$0 sm:$0xff] }
 0x21e   : > { %v1943_v20 = vadd.f32 %v1911_v10, %v1866_v11  ;;  %v1867_v41 = vadd.f32 %v1835_v25, %v1790_v14  ;;  %v1711_v8 = vadd.f32 %v1679_v28, %v1634_v44  ;;  %v1603_v11 = vmul.f32 %v18688_v57, %v1157_v56  ;;  %v18964_v14 = vld [vmem:[%s22203_s22 + $0x1] ss:$0 sm:$0xff] }
 0x21f   : > { %v937_v31 = vpop.permute.xlu1 %936  ;;  %v1354_v24 = vpop.permute.xlu0 %1353  ;;  %v2075_v0 = vor.u32 %v2073_v32, %v18891_v36  ;;  %v18923_v50 = vsel %vm18822_vm4, %v18876_v42, 0  ;;  %v1558_v47 = vadd.f32 %v1526_v15, %v1478_v6  ;;  %v18926_v57 = vsel %vm2234_vm5, %v2249_v35, %v2253_v52  ;;  %v18952_v35 = vld [vmem:[%s22203_s22 + $0x3] ss:$0 sm:$0xff] }
 0x220   : > { %v1982_v39 = vadd.f32 %v18756_v48, %v1943_v20  ;;  %v1912_v23 = vmul.f32 %v18723_v22, %v1354_v24  ;;  %v1759_v51 = vmul.f32 %v18706_v7, %v937_v31  ;;  %22208 = vst [vmem:[#allocation32_spill] sm:$0xff] %v18926_v57  ;;  %v1479_v9 = vadd.f32 %v1447_v53, %v1282_v13 }
 0x221   : > { %1232 = vbcast.lane.b32.xlu1 %v18645_v30, 265  ;;  %1509 = vbcast.lane.b32.xlu0 %v18765_v1, 264  ;;  %v1680_v46 = vmul.f32 %v18698_v61, %v1354_v24  ;;  %v2256_v62 = vshrl.u32 %v18903_v55, 16  ;;  %v1283_v19 = vadd.f32 %v1251_v29, %v1054_v2  ;;  %v1635_v42 = vadd.f32 %v1603_v11, %v1558_v47 }
 0x222   : > { %v2014_v40 = vmax.f32 %v1982_v39, 0.0  ;;  %v1944_v63 = vadd.f32 %v1912_v23, %v1867_v41  ;;  %v1791_v45 = vadd.f32 %v1759_v51, %v1711_v8  ;;  %v2258_v60 = vshll.u32 %v18903_v55, 16  ;;  %v18972_v51 = vld [vmem:[%s22203_s22 + $0x4] ss:$0 sm:$0xff] }
 0x223   : > { %v1161_v37 = vpop.permute.xlu1 %1160  ;;  %v18909_v54 = vpop.permute.xlu0 %943  ;;  %v1055_v25 = vmul.f32 %v18946_v21, %v937_v31  ;;  %v1448_v15 = vmul.f32 %v18958_v26, %v1354_v24  ;;  %v1712_v39 = vadd.f32 %v1680_v46, %v1635_v42  ;;  %v2263_v13 = vshll.u32 %v18923_v50, 16 }
 0x224   : > { %v1836_v10 = vmul.f32 %v18715_v12, %v1161_v37  ;;  %v2042_v56 = vpack.c.bf16 %v2014_v40, %v2013_v17  ;;  %v18936_v20 = vadd.f32 %v18756_v48, %v1944_v63  ;;  %v1760_v49 = vmul.f32 %v18706_v7, %v18909_v54  ;;  %v18991_v63 = vld [vmem:[%s22203_s22 + $0x5] ss:$0 sm:$0xff] }
 0x225   : > { %1429 = vbcast.lane.b32.xlu1 %v18645_v30, 266  ;;  %2553 = vrot.lane.b32.xlu0 %v18903_v55, %s18239_s27  ;;  %v18931_v30 = vsel %vm18822_vm4, 0, %v2075_v0  ;;  %v1527_v7 = vmul.f32 %v18952_v35, %v937_v31  ;;  %v1252_v23 = vmul.f32 %v18964_v14, %v1161_v37  ;;  %v1604_v24 = vmul.f32 %v18972_v51, %v1161_v37 }
 0x226   : > { %22209 = vst [vmem:[#allocation33_spill] sm:$0xff] %v18931_v30  ;;  %v1868_v59 = vadd.f32 %v1836_v10, %v1791_v45  ;;  %v2077_v61 = vshrl.u32 %v2042_v56, 16  ;;  %v2080_v31 = vshll.u32 %v2042_v56, 16  ;;  %v1528_v52 = vmul.f32 %v18952_v35, %v18909_v54 }
 0x227   : > { %v1358_v33 = vpop.permute.xlu1 %1357  ;;  %v1165_v58 = vpop.permute.xlu0 %1164  ;;  %v2015_v41 = vmax.f32 %v18936_v20, 0.0  ;;  %v1792_v0 = vadd.f32 %v1760_v49, %v1712_v39  ;;  %v2260_v29 = vrot.slane %v2258_v60, 1  ;;  %v1480_v2 = vadd.f32 %v1448_v15, %v1283_v19 }
 0x228   : > { %v1913_v6 = vmul.f32 %v18723_v22, %v1358_v33  ;;  %v18967_v40 = vrot.slane %v2077_v61, 7  ;;  %v1837_v53 = vmul.f32 %v18715_v12, %v1165_v58  ;;  %v1449_v8 = vmul.f32 %v18958_v26, %v1358_v33 }
 0x229   : > { %1505 = vbcast.lane.b32.xlu1 %v18765_v1, 256  ;;  %1582 = vbcast.lane.b32.xlu0 %v18765_v1, 257  ;;  %v1559_v12 = vadd.f32 %v1527_v7, %v1479_v9  ;;  %v1681_v47 = vmul.f32 %v18991_v63, %v1358_v33  ;;  %v1284_v46 = vadd.f32 %v1252_v23, %v1055_v25  ;;  %v19001_v9 = vld [vmem:[%s22203_s22 + $0x6] ss:$0 sm:$0xff]  ;;  %v19016_v7 = vld [vmem:[%s22203_s22 + $0x7] ss:$0 sm:$0xff] }
 0x22a   : > { %v1945_v28 = vadd.f32 %v1913_v6, %v1868_v59  ;;  %v2082_v10 = vor.u32 %v2080_v31, %v18967_v40  ;;  %v1253_v42 = vmul.f32 %v18964_v14, %v1165_v58  ;;  %v1869_v59 = vadd.f32 %v1837_v53, %v1792_v0  ;;  %v19024_v53 = vld [vmem:[%s22203_s22 + $0x8] ss:$0 sm:$0xff] }
 0x22b   : > { %v948_v32 = vpop.permute.xlu1 %947  ;;  %v1362_v44 = vpop.permute.xlu0 %1361  ;;  %v1636_v6 = vadd.f32 %v1604_v24, %v1559_v12  ;;  %v2261_v20 = vor.u32 %v2260_v29, %v2256_v62  ;;  %v1056_v49 = vmul.f32 %v18946_v21, %v18909_v54  ;;  %v1481_v61 = vadd.f32 %v1449_v8, %v1284_v46 }
 0x22c   : > { %v1984_v17 = vadd.f32 %v18756_v48, %v1945_v28  ;;  %v1914_v11 = vmul.f32 %v18723_v22, %v1362_v44  ;;  %v1605_v22 = vmul.f32 %v18972_v51, %v1165_v58  ;;  %v1761_v19 = vmul.f32 %v19001_v9, %v948_v32 }
 0x22d   : > { %2521 = vrot.lane.b32.xlu1 %v18926_v57, %s18239_s27  ;;  %2555 = vrot.lane.b32.xlu0 %v18931_v30, %s18239_s27  ;;  %v19007_v33 = vsel %vm18822_vm4, 0, %v2082_v10  ;;  %v1560_v58 = vadd.f32 %v1528_v52, %v1480_v2  ;;  %v1713_v25 = vadd.f32 %v1681_v47, %v1636_v6  ;;  %v2265_v62 = vrot.slane %v2263_v13, 1 }
 0x22e   : > { %v2016_v37 = vmax.f32 %v1984_v17, 0.0  ;;  %22210 = vst [vmem:[#allocation34_spill] sm:$0xff] %v19007_v33  ;;  %v1946_v60 = vadd.f32 %v1914_v11, %v1869_v59  ;;  %v1285_v31 = vadd.f32 %v1253_v42, %v1056_v49  ;;  %v1529_v24 = vmul.f32 %v18952_v35, %v948_v32 }
 0x22f   : > { %v1169_v45 = vpop.permute.xlu1 %1168  ;;  %v18994_v56 = vpop.permute.xlu0 %954  ;;  %v1637_v54 = vadd.f32 %v1605_v22, %v1560_v58  ;;  %v1450_v52 = vmul.f32 %v18958_v26, %v1362_v44  ;;  %v1793_v17 = vadd.f32 %v1761_v19, %v1713_v25  ;;  %v19028_v8 = vsel %vm2234_vm5, %v2261_v20, %v2265_v62 }
 0x230   : > { %v1838_v15 = vmul.f32 %v19016_v7, %v1169_v45  ;;  %v2043_v23 = vpack.c.bf16 %v2016_v37, %v2015_v41  ;;  %22211 = vst [vmem:[#allocation35_spill] sm:$0xff] %v19028_v8  ;;  %v1057_v41 = vmul.f32 %v18946_v21, %v948_v32  ;;  %v1682_v37 = vmul.f32 %v18991_v63, %v1362_v44 }
 0x231   : > { %1586 = vbcast.lane.b32.xlu1 %v18765_v1, 265  ;;  %2557 = vrot.lane.b32.xlu0 %v19007_v33, %s18239_s27  ;;  %v19033_v11 = vadd.f32 %v18756_v48, %v1946_v60  ;;  %v1254_v10 = vmul.f32 %v18964_v14, %v1169_v45  ;;  %v1606_v13 = vmul.f32 %v18972_v51, %v1169_v45 }
 0x232   : > { %v2084_v29 = vshrl.u32 %v2043_v23, 16  ;;  %v1870_v12 = vadd.f32 %v1838_v15, %v1793_v17  ;;  %v2087_v42 = vshll.u32 %v2043_v23, 16  ;;  %v1561_v22 = vadd.f32 %v1529_v24, %v1481_v61 }
 0x233   : > { %v1366_v28 = vpop.permute.xlu1 %1365  ;;  %v1173_v39 = vpop.permute.xlu0 %1172  ;;  %v1482_v32 = vadd.f32 %v1450_v52, %v1285_v31  ;;  %v1530_v44 = vmul.f32 %v18952_v35, %v18994_v56  ;;  %v1762_v48 = vmul.f32 %v19001_v9, %v18994_v56  ;;  %v1714_v20 = vadd.f32 %v1682_v37, %v1637_v54 }
 0x234   : > { %v1915_v0 = vmul.f32 %v19024_v53, %v1366_v28  ;;  %v19039_v46 = vrot.slane %v2084_v29, 7  ;;  %v1451_v59 = vmul.f32 %v18958_v26, %v1366_v28  ;;  %v1683_v6 = vmul.f32 %v18991_v63, %v1366_v28  ;;  %v19074_v29 = vld [vmem:[%s22204_s28] ss:$0 sm:$0xff] }
 0x235   : > { %2523 = vrot.lane.b32.xlu1 %v19028_v8, %s18239_s27  ;;  %v1255_v58 = vmul.f32 %v18964_v14, %v1173_v39  ;;  %v1607_v61 = vmul.f32 %v18972_v51, %v1173_v39  ;;  %v1286_v60 = vadd.f32 %v1254_v10, %v1057_v41  ;;  %v1638_v25 = vadd.f32 %v1606_v13, %v1561_v22  ;;  %v17123_v13 = vld [vmem:[#allocation4 + $0xf8] sm:$0xff]  }
 0x236   : > { %v1947_v19 = vadd.f32 %v1915_v0, %v1870_v12  ;;  %v2089_v45 = vor.u32 %v2087_v42, %v19039_v46  ;;  %v19061_v23 = vsel %vm18822_vm4, %v18891_v36, 0  ;;  %v19065_v31 = vrot.slane %v18734_v34, %v18611_v5  ;;  %v17124_v12 = vld [vmem:[#allocation4 + $0xb8] sm:$0xff]   ;;  %15956 = vmatprep.subr.bf16.mxu1 %v17123_v13 }
 0x237   : > { %v959_v2 = vpop.permute.xlu1 %958  ;;  %v1370_v47 = vpop.permute.xlu0 %1369  ;;  %v1058_v54 = vmul.f32 %v18946_v21, %v18994_v56  ;;  %v1562_v24 = vadd.f32 %v1530_v44, %v1482_v32  ;;  %v1794_v52 = vadd.f32 %v1762_v48, %v1714_v20  ;;  %v1483_v17 = vadd.f32 %v1451_v59, %v1286_v60  ;;  %15957 = vmatpush3.bf16.msra.mxu1 %v17124_v12 }
 0x238   : > { %v19054_v15 = vsel %vm18822_vm4, 0, %v2089_v45  ;;  %v1715_v0 = vadd.f32 %v1683_v6, %v1638_v25  ;;  %v1986_v36 = vadd.f32 %v19074_v29, %v1947_v19  ;;  %v1839_v34 = vmul.f32 %v19016_v7, %v1173_v39 }
 0x239   : > { %1663 = vbcast.lane.b32.xlu1 %v18765_v1, 266  ;;  %2559 = vrot.lane.b32.xlu0 %v19054_v15, %s18239_s27  ;;  %v1287_v41 = vadd.f32 %v1255_v58, %v1058_v54  ;;  %v1639_v37 = vadd.f32 %v1607_v61, %v1562_v24  ;;  %v1763_v56 = vmul.f32 %v19001_v9, %v959_v2  ;;  %v2270_v10 = vshll.u32 %v18931_v30, 16 }
 0x23a   : > { %v1684_v42 = vmul.f32 %v18991_v63, %v1370_v47  ;;  %v1916_v22 = vmul.f32 %v19024_v53, %v1370_v47  ;;  %v2268_v32 = vshrl.u32 %v18931_v30, 16  ;;  %v2275_v44 = vshll.u32 %v19061_v23, 16 }
 0x23b   : > { %v1177_v62 = vpop.permute.xlu1 %1176  ;;  %v19056_v28 = vpop.permute.xlu0 %965  ;;  %v1531_v39 = vmul.f32 %v18952_v35, %v959_v2  ;;  %v1452_v6 = vmul.f32 %v18958_v26, %v1370_v47  ;;  %v2272_v45 = vrot.slane %v2270_v10, 1  ;;  %v2018_v20 = vmax.f32 %v1986_v36, 0.0  ;;  %v17125_v36 = vld [vmem:[#allocation4 + $0xf0] sm:$0xff]  }
 0x23c   : > { %v1840_v19 = vmul.f32 %v19016_v7, %v1177_v62  ;;  %v1871_v58 = vadd.f32 %v1839_v34, %v1794_v52  ;;  %v1764_v61 = vmul.f32 %v19001_v9, %v19056_v28  ;;  %v2277_v60 = vrot.slane %v2275_v44, 1  ;;  %15958 = vmatprep.subr.bf16.mxu1 %v17125_v36 }
 0x23d   : > { %1659 = vbcast.lane.b32.xlu0 %v18765_v1, 258  ;;  %v1059_v25 = vmul.f32 %v18946_v21, %v959_v2  ;;  %v1795_v54 = vadd.f32 %v1763_v56, %v1715_v0  ;;  %v2273_v24 = vor.u32 %v2272_v45, %v2268_v32  ;;  %v1716_v47 = vadd.f32 %v1684_v42, %v1639_v37 }
 0x23e   : > { %v1948_v49 = vadd.f32 %v1916_v22, %v1871_v58  ;;  %v1256_v10 = vmul.f32 %v18964_v14, %v1177_v62  ;;  %v1563_v34 = vadd.f32 %v1531_v39, %v1483_v17  ;;  %v1484_v44 = vadd.f32 %v1452_v6, %v1287_v41  ;;  %v17126_v17 = vld [vmem:[#allocation4 + $0xb0] sm:$0xff]  }
 0x23f   : > { %v1374_v48 = vpop.permute.xlu1 %1373  ;;  %v1181_v59 = vpop.permute.xlu0 %1180  ;;  %v1872_v12 = vadd.f32 %v1840_v19, %v1795_v54  ;;  %v19099_v2 = vsel %vm2234_vm5, %v2273_v24, %v2277_v60  ;;  %v1608_v0 = vmul.f32 %v18972_v51, %v1177_v62  ;;  %v1796_v56 = vadd.f32 %v1764_v61, %v1716_v47  ;;  %15959 = vmatpush3.bf16.msra.mxu1 %v17126_v17  ;;  %v17128_v17 = vld [vmem:[#allocation4 + $0xa8] sm:$0xff]  }
 0x240   : > { %v1917_v16 = vmul.f32 %v19024_v53, %v1374_v48  ;;  %v1841_v1 = vmul.f32 %v19016_v7, %v1181_v59  ;;  %22212 = vst [vmem:[#allocation36_spill] sm:$0xff] %v19099_v2  ;;  %2525 = vrot.lane.b32.xlu1 %v19099_v2, %s18239_s27  ;;  %v19109_v42 = vsel %vm18822_vm4, %v18967_v40, 0  ;;  %v1060_v41 = vmul.f32 %v18946_v21, %v19056_v28 }
 0x241   : > { %v2280_v32 = vshrl.u32 %v19007_v33, 16  ;;  %v2282_v62 = vshll.u32 %v19007_v33, 16  ;;  %v19116_v39 = vadd.f32 %v19074_v29, %v1948_v49  ;;  %v1288_v6 = vadd.f32 %v1256_v10, %v1059_v25 }
 0x242   : > { %v1949_v22 = vadd.f32 %v1917_v16, %v1872_v12  ;;  %v1532_v19 = vmul.f32 %v18952_v35, %v19056_v28  ;;  %v1873_v45 = vadd.f32 %v1841_v1, %v1796_v56  ;;  %v1453_v61 = vmul.f32 %v18958_v26, %v1374_v48  ;;  %v17127_v56 = vld [vmem:[#allocation4 + $0xe8] sm:$0xff]  }
 0x243   : > { %v19094_v13 = vpop.permute.xlu1 %969  ;;  %v19096_v52 = vpop.permute.xlu0 %1377  ;;  %v2284_v16 = vrot.slane %v2282_v62, 1  ;;  %v2287_v60 = vshll.u32 %v19109_v42, 16  ;;  %v22213_v54 = vmax.f32 %v19033_v11, 0.0  ;;  %v1640_v47 = vadd.f32 %v1608_v0, %v1563_v34  ;;  %15960 = vmatprep.subr.bf16.mxu1 %v17127_v56 }
 0x244   : > { %v1918_v37 = vmul.f32 %v19024_v53, %v19096_v52  ;;  %v1685_v49 = vmul.f32 %v18991_v63, %v1374_v48  ;;  %v1257_v25 = vmul.f32 %v18964_v14, %v1181_v59  ;;  %1739 = vbcast.lane.b32.xlu1 %v19065_v31, 256  ;;  %v19130_v10 = vadd.f32 %v19074_v29, %v1949_v22 }
 0x245   : > { %v2044_v24 = vpack.c.bf16 %v2018_v20, %v22213_v54  ;;  %v2285_v1 = vor.u32 %v2284_v16, %v2280_v32  ;;  %v2289_v36 = vrot.slane %v2287_v60, 1  ;;  %v1564_v11 = vadd.f32 %v1532_v19, %v1484_v44  ;;  %15961 = vmatpush3.bf16.msra.mxu1 %v17128_v17 }
 0x246   : > { %v1950_v28 = vadd.f32 %v1918_v37, %v1873_v45  ;;  %v1609_v20 = vmul.f32 %v18972_v51, %v1181_v59  ;;  %v1765_v48 = vmul.f32 %v19001_v9, %v19094_v13  ;;  %v1485_v54 = vadd.f32 %v1453_v61, %v1288_v6 }
 0x247   : > { %v1185_v40 = vpop.permute.xlu1 %1184  ;;  %v19120_v58 = vpop.permute.xlu0 %976  ;;  %v2091_v12 = vshrl.u32 %v2044_v24, 16  ;;  %v19137_v37 = vsel %vm2234_vm5, %v2285_v1, %v2289_v36  ;;  %v2094_v32 = vshll.u32 %v2044_v24, 16  ;;  %v1717_v45 = vadd.f32 %v1685_v49, %v1640_v47  ;;  %v17130_v24 = vld [vmem:[#allocation4 + $0xa0] sm:$0xff]  }
 0x248   : > { %22214 = vst [vmem:[#allocation37_spill] sm:$0xff] %v19137_v37  ;;  %v1289_v16 = vadd.f32 %v1257_v25, %v1060_v41  ;;  %v1533_v44 = vmul.f32 %v18952_v35, %v19094_v13  ;;  %v19144_v59 = vadd.f32 %v19074_v29, %v1950_v28  ;;  %2527 = vrot.lane.b32.xlu1 %v19137_v37, %s18239_s27  ;;  %v17129_v41 = vld [vmem:[#allocation4 + $0xe0] sm:$0xff]  }
 0x249   : > { %v19139_v22 = vrot.slane %v2091_v12, 7  ;;  %v1454_v19 = vmul.f32 %v18958_v26, %v19096_v52  ;;  %v1842_v60 = vmul.f32 %v19016_v7, %v1185_v40  ;;  %v1641_v47 = vadd.f32 %v1609_v20, %v1564_v11  ;;  %15962 = vmatprep.subr.bf16.mxu1 %v17129_v41 }
 0x24a   : > { %v1061_v49 = vmul.f32 %v18946_v21, %v19094_v13  ;;  %v1797_v25 = vadd.f32 %v1765_v48, %v1717_v45  ;;  %v1686_v28 = vmul.f32 %v18991_v63, %v19096_v52  ;;  %v1258_v56 = vmul.f32 %v18964_v14, %v1185_v40  ;;  %15963 = vmatpush3.bf16.msra.mxu1 %v17130_v24 }
 0x24b   : > { %v1382_v34 = vpop.permute.xlu1 %1381  ;;  %v1189_v0 = vpop.permute.xlu0 %1188  ;;  %v2096_v61 = vor.u32 %v2094_v32, %v19139_v22  ;;  %v19168_v11 = vsel %vm18822_vm4, %v19039_v46, 0  ;;  %v1565_v13 = vadd.f32 %v1533_v44, %v1485_v54  ;;  %v2294_v20 = vshll.u32 %v19054_v15, 16 }
 0x24c   : > { %v1919_v17 = vmul.f32 %v19024_v53, %v1382_v34  ;;  %1820 = vbcast.lane.b32.xlu1 %v19065_v31, 265  ;;  %v2299_v48 = vshll.u32 %v19168_v11, 16  ;;  %v1486_v32 = vadd.f32 %v1454_v19, %v1289_v16  ;;  %v1610_v45 = vmul.f32 %v18972_v51, %v1185_v40 }
 0x24d   : > { %v19161_v12 = vsel %vm18822_vm4, 0, %v2096_v61  ;;  %v1874_v61 = vadd.f32 %v1842_v60, %v1797_v25  ;;  %v1534_v46 = vmul.f32 %v18952_v35, %v19120_v58  ;;  %v1766_v54 = vmul.f32 %v19001_v9, %v19120_v58 }
 0x24e   : > { %2561 = vrot.lane.b32.xlu0 %v19161_v12, %s18239_s27  ;;  %v1455_v44 = vmul.f32 %v18958_v26, %v1382_v34  ;;  %v2292_v41 = vshrl.u32 %v19054_v15, 16  ;;  %v2296_v52 = vrot.slane %v2294_v20, 1  ;;  %v1718_v5 = vadd.f32 %v1686_v28, %v1641_v47 }
 0x24f   : > { %v981_v1 = vpop.permute.xlu1 %980  ;;  %v19157_v36 = vpop.permute.xlu0 %1385  ;;  %v1290_v16 = vadd.f32 %v1258_v56, %v1061_v49  ;;  %v1687_v40 = vmul.f32 %v18991_v63, %v1382_v34  ;;  %v1951_v19 = vadd.f32 %v1919_v17, %v1874_v61  ;;  %v1259_v60 = vmul.f32 %v18964_v14, %v1189_v0 }
 0x250   : > { %v1843_v24 = vmul.f32 %v19016_v7, %v1189_v0  ;;  %v2297_v25 = vor.u32 %v2296_v52, %v2292_v41  ;;  %v2301_v4 = vrot.slane %v2299_v48, 1  ;;  %v1642_v3 = vadd.f32 %v1610_v45, %v1565_v13 }
 0x251   : > { %v1062_v20 = vmul.f32 %v18946_v21, %v19120_v58  ;;  %v1566_v37 = vadd.f32 %v1534_v46, %v1486_v32  ;;  %v1611_v2 = vmul.f32 %v18972_v51, %v1189_v0  ;;  %v1798_v47 = vadd.f32 %v1766_v54, %v1718_v5 }
 0x252   : > { %1743 = vbcast.lane.b32.xlu0 %v19065_v31, 264  ;;  %v1487_v49 = vadd.f32 %v1455_v44, %v1290_v16  ;;  %v19193_v34 = vsel %vm2234_vm5, %v2297_v25, %v2301_v4  ;;  %v1920_v28 = vmul.f32 %v19024_v53, %v19157_v36  ;;  %v1719_v52 = vadd.f32 %v1687_v40, %v1642_v3  ;;  %v17133_v25 = vld [vmem:[#allocation4 + $0xd0] sm:$0xff]  }
 0x253   : > { %v1193_v6 = vpop.permute.xlu1 %1192  ;;  %v19183_v62 = vpop.permute.xlu0 %987  ;;  %22215 = vst [vmem:[#allocation38_spill] sm:$0xff] %v19193_v34  ;;  %v19202_v13 = vadd.f32 %v19074_v29, %v1951_v19  ;;  %2529 = vrot.lane.b32.xlu1 %v19193_v34, %s18239_s27  ;;  %v1767_v5 = vmul.f32 %v19001_v9, %v981_v1  ;;  %v19210_v4 = vsel %vm18822_vm4, %v19139_v22, 0  ;;  %v1291_v58 = vadd.f32 %v1259_v60, %v1062_v20 }
 0x254   : > { %v1875_v0 = vadd.f32 %v1843_v24, %v1798_v47  ;;  %v2306_v48 = vshll.u32 %v19161_v12, 16  ;;  %v2311_v3 = vshll.u32 %v19210_v4, 16  ;;  %v1643_v32 = vadd.f32 %v1611_v2, %v1566_v37  ;;  %v17132_v24 = vld [vmem:[#allocation4 + $0x98] sm:$0xff]  }
 0x255   : > { %v1063_v45 = vmul.f32 %v18946_v21, %v981_v1  ;;  %v1535_v61 = vmul.f32 %v18952_v35, %v981_v1  ;;  %v22216_v46 = vmax.f32 %v19116_v39, 0.0  ;;  %v22217_v54 = vmax.f32 %v19130_v10, 0.0  ;;  %v17131_v10 = vld [vmem:[#allocation4 + $0xd8] sm:$0xff]  }
 0x256   : > { %1816 = vbcast.lane.b32.xlu0 %v19065_v31, 257  ;;  %v1952_v22 = vadd.f32 %v1920_v28, %v1875_v0  ;;  %v1844_v41 = vmul.f32 %v19016_v7, %v1193_v6  ;;  %v2304_v16 = vshrl.u32 %v19161_v12, 16  ;;  %v2308_v40 = vrot.slane %v2306_v48, 1  ;;  %15964 = vmatprep.subr.bf16.mxu1 %v17131_v10 }
 0x257   : > { %v19197_v56 = vpop.permute.xlu1 %1389  ;;  %v19199_v17 = vpop.permute.xlu0 %1196  ;;  %v2045_v44 = vpack.c.bf16 %v22217_v54, %v22216_v46  ;;  %v2022_v2 = vmax.f32 %v19202_v13, 0.0  ;;  %v1799_v37 = vadd.f32 %v1767_v5, %v1719_v52  ;;  %v1456_v1 = vmul.f32 %v18958_v26, %v19157_v36  ;;  %1897 = vbcast.lane.b32.xlu1 %v19065_v31, 266  ;;  %15965 = vmatpush3.bf16.msra.mxu1 %v17132_v24 }
 0x258   : > { %v1688_v20 = vmul.f32 %v18991_v63, %v19157_v36  ;;  %v2309_v47 = vor.u32 %v2308_v40, %v2304_v16  ;;  %v2313_v28 = vrot.slane %v2311_v3, 1  ;;  %v1921_v13 = vmul.f32 %v19024_v53, %v19197_v56  ;;  %v17134_v40 = vld [vmem:[#allocation4 + $0x90] sm:$0xff]   ;;  %15966 = vmatprep.subr.bf16.mxu1 %v17133_v25  ;;  %v17139_v25 = vld [vmem:[#allocation4 + $0x80] sm:$0xff]  }
 0x259   : > { %v2098_v39 = vshrl.u32 %v2045_v44, 16  ;;  %v1260_v52 = vmul.f32 %v18964_v14, %v1193_v6  ;;  %v1612_v5 = vmul.f32 %v18972_v51, %v1193_v6  ;;  %v2101_v48 = vshll.u32 %v2045_v44, 16  ;;  %v19250_v6 = vld [vmem:[#allocation4 + $0x118] sm:$0xff]  }
 0x25a   : > { %1893 = vbcast.lane.b32.xlu0 %v19065_v31, 258  ;;  %v19239_v46 = vadd.f32 %v19074_v29, %v1952_v22  ;;  %v1876_v54 = vadd.f32 %v1844_v41, %v1799_v37  ;;  %v1536_v36 = vmul.f32 %v18952_v35, %v19183_v62  ;;  %v19244_v31 = vsel %vm2234_vm5, %v2309_v47, %v2313_v28 }
 0x25b   : > { %v19223_v19 = vpop.permute.xlu1 %991  ;;  %v19225_v60 = vpop.permute.xlu0 %1393  ;;  %v2100_v0 = vrot.slane %v2098_v39, 7  ;;  %22218 = vst [vmem:[#allocation39_spill] sm:$0xff] %v19244_v31  ;;  %v1567_v44 = vadd.f32 %v1535_v61, %v1487_v49  ;;  %v1768_v22 = vmul.f32 %v19001_v9, %v19183_v62  ;;  %2531 = vrot.lane.b32.xlu1 %v19244_v31, %s18239_s27  ;;  %v17135_v39 = vld [vmem:[#allocation4 + $0xc8] sm:$0xff]   ;;  %v1488_v10 = vadd.f32 %v1456_v1, %v1291_v58 }
 0x25c   : > { %v1720_v47 = vadd.f32 %v1688_v20, %v1643_v32  ;;  %v1689_v24 = vmul.f32 %v18991_v63, %v19197_v56  ;;  %v1953_v28 = vadd.f32 %v1921_v13, %v1876_v54  ;;  %16802 = vmatprep.subr.bf16.mxu0 %v19250_v6  ;;  %v1292_v49 = vadd.f32 %v1260_v52, %v1063_v45 }
 0x25d   : > { %v2103_v41 = vor.u32 %v2101_v48, %v2100_v0  ;;  %v19258_v37 = vsel %vm18822_vm4, %v2100_v0, 0  ;;  %v1064_v61 = vmul.f32 %v18946_v21, %v19183_v62  ;;  %v1644_v58 = vadd.f32 %v1612_v5, %v1567_v44  ;;  %15967 = vmatpush3.bf16.msra.mxu1 %v17134_v40  ;;  %v17136_v21 = vld [vmem:[#allocation4 + $0x88] sm:$0xff]   ;;  %v17137_v62 = vld [vmem:[#allocation4 + $0xc0] sm:$0xff]  }
 0x25e   : > { %22219 = vst [vmem:[#allocation40_spill] sm:$0xff] %v19258_v37  ;;  %v2323_v0 = vshll.u32 %v19258_v37, 16  ;;  %v1568_v32 = vadd.f32 %v1536_v36, %v1488_v10  ;;  %v1800_v13 = vadd.f32 %v1768_v22, %v1720_v47  ;;  %v1845_v52 = vmul.f32 %v19016_v7, %v19199_v17  ;;  %15968 = vmatprep.subr.bf16.mxu1 %v17135_v39 }
 0x25f   : > { %v19246_v3 = vpop.permute.xlu1 %1200  ;;  %v19248_v16 = vpop.permute.xlu0 %1002  ;;  %v19267_v48 = vsel %vm18822_vm4, 0, %v2103_v41  ;;  %v1769_v5 = vmul.f32 %v19001_v9, %v19223_v19  ;;  %v22220_v54 = vmax.f32 %v19144_v59, 0.0  ;;  %v1721_v44 = vadd.f32 %v1689_v24, %v1644_v58 }
 0x260   : > { %2563 = vrot.lane.b32.xlu0 %v19267_v48, %s18239_s27  ;;  %v2318_v1 = vshll.u32 %v19267_v48, 16  ;;  %v19285_v41 = vadd.f32 %v19074_v29, %v1953_v28  ;;  %v2316_v10 = vshrl.u32 %v19267_v48, 16  ;;  %v2325_v22 = vrot.slane %v2323_v0, 1 }
 0x261   : > { %v2046_v36 = vpack.c.bf16 %v2022_v2, %v22220_v54  ;;  %v1922_v47 = vmul.f32 %v19024_v53, %v19225_v60  ;;  %v1846_v34 = vmul.f32 %v19016_v7, %v19246_v3  ;;  %v1457_v59 = vmul.f32 %v18958_v26, %v19197_v56  ;;  %15969 = vmatpush3.bf16.msra.mxu1 %v17136_v21 }
 0x262   : > { %v2320_v40 = vrot.slane %v2318_v1, 1  ;;  %v1261_v2 = vmul.f32 %v18964_v14, %v19199_v17  ;;  %v1613_v39 = vmul.f32 %v18972_v51, %v19199_v17  ;;  %v1877_v58 = vadd.f32 %v1845_v52, %v1800_v13  ;;  %15970 = vmatprep.subr.bf16.mxu1 %v17137_v62 }
 0x263   : > { %v19274_v20 = vpop.permute.xlu1 %1397  ;;  %v19276_v45 = vpop.permute.xlu0 %1204  ;;  %v2105_v31 = vshrl.u32 %v2046_v36, 16  ;;  %v1801_v1 = vadd.f32 %v1769_v5, %v1721_v44  ;;  %v2108_v8 = vshll.u32 %v2046_v36, 16  ;;  %v2024_v57 = vmax.f32 %v19285_v41, 0.0 }
 0x264   : > { %v2321_v24 = vor.u32 %v2320_v40, %v2316_v10  ;;  %v1537_v14 = vmul.f32 %v18952_v35, %v19223_v19  ;;  %v2457_v17 = vrot.slane %v18851_v38, 1  ;;  %v1954_v10 = vadd.f32 %v1922_v47, %v1877_v58 }
 0x265   : > { %v2107_v54 = vrot.slane %v2105_v31, 7  ;;  %v1878_v13 = vadd.f32 %v1846_v34, %v1801_v1  ;;  %v1923_v31 = vmul.f32 %v19024_v53, %v19274_v20  ;;  %v1489_v62 = vadd.f32 %v1457_v59, %v1292_v49  ;;  %15971 = vmatpush3.bf16.msra.mxu1 %v17139_v25 }
 0x266   : > { %v19304_v56 = vsel %vm2234_vm5, %v2321_v24, %v2325_v22  ;;  %v1293_v52 = vadd.f32 %v1261_v2, %v1064_v61  ;;  %v1690_v5 = vmul.f32 %v18991_v63, %v19225_v60  ;;  %v1645_v35 = vadd.f32 %v1613_v39, %v1568_v32 }
 0x267   : > { %v19298_v28 = vpop.permute.xlu1 %998  ;;  %v19300_v0 = vpop.permute.xlu0 %1401  ;;  %22221 = vst [vmem:[#allocation41_spill] sm:$0xff] %v19304_v56  ;;  %2533 = vrot.lane.b32.xlu1 %v19304_v56, %s18239_s27  ;;  %v2110_v21 = vor.u32 %v2108_v8, %v2107_v54  ;;  %v1955_v8 = vadd.f32 %v1923_v31, %v1878_v13  ;;  %v19325_v34 = vsel %vm18822_vm4, %v2107_v54, 0  ;;  %v1614_v49 = vmul.f32 %v18972_v51, %v19246_v3 }
 0x268   : > { %22223 = vst [vmem:[#allocation43_spill] sm:$0xff] %v19325_v34  ;;  %v2458_v61 = vrot.slane %v18839_v43, 1  ;;  %v2335_v32 = vshll.u32 %v19325_v34, 16  ;;  %v1569_v40 = vadd.f32 %v1537_v14, %v1489_v62  ;;  %v1458_v22 = vmul.f32 %v18958_v26, %v19225_v60  ;;  %v19351_v26 = vld [vmem:[%s22203_s22] ss:$0 sm:$0xff] }
 0x269   : > { %v19321_v41 = vsel %vm18822_vm4, 0, %v2110_v21  ;;  %v19337_v47 = vadd.f32 %v19074_v29, %v1954_v10  ;;  %v1770_v59 = vmul.f32 %v19001_v9, %v19298_v28  ;;  %v1722_v2 = vadd.f32 %v1690_v5, %v1645_v35 }
 0x26a   : > { %22222 = vst [vmem:[#allocation42_spill] sm:$0xff] %v19321_v41  ;;  %2565 = vrot.lane.b32.xlu0 %v19321_v41, %s18239_s27  ;;  %v2330_v25 = vshll.u32 %v19321_v41, 16  ;;  %v1691_v51 = vmul.f32 %v18991_v63, %v19274_v20  ;;  %v2328_v43 = vshrl.u32 %v19321_v41, 16  ;;  %v1065_v60 = vmul.f32 %v19351_v26, %v19223_v19  ;;  %v19369_v19 = vld [vmem:[%s22203_s22 + $0x1] ss:$0 sm:$0xff] }
 0x26b   : > { %v19315_v36 = vpop.permute.xlu1 %2519  ;;  %v19317_v44 = vpop.permute.xlu0 %1013  ;;  %v19356_v1 = vsel %vm2454_vm6, %v2457_v17, %v2458_v61  ;;  %v19359_v63 = vadd.f32 %v19074_v29, %v1955_v8  ;;  %v2337_v54 = vrot.slane %v2335_v32, 1  ;;  %v1646_v14 = vadd.f32 %v1614_v49, %v1569_v40 }
 0x26c   : > { %v2332_v39 = vrot.slane %v2330_v25, 1  ;;  %v1802_v21 = vadd.f32 %v1770_v59, %v1722_v2  ;;  %v22224_v13 = vmax.f32 %v19239_v46, 0.0  ;;  %v1490_v62 = vadd.f32 %v1458_v22, %v1293_v52 }
 0x26d   : > { %v2025_v5 = vmax.f32 %v19337_v47, 0.0  ;;  %v1262_v17 = vmul.f32 %v19369_v19, %v19246_v3  ;;  %v19375_v35 = vmul.f32 %v19351_v26, %v19248_v16  ;;  %v1723_v8 = vadd.f32 %v1691_v51, %v1646_v14  ;;  %v19391_v3 = vld [vmem:[%s22203_s22 + $0x2] ss:$0 sm:$0xff] }
 0x26e   : > { %2583 = vrot.lane.b32.xlu0 %v19356_v1, %s18239_s27  ;;  %v2333_v10 = vor.u32 %v2332_v39, %v2328_v43  ;;  %v2047_v31 = vpack.c.bf16 %v2024_v57, %v22224_v13  ;;  %v1847_v46 = vmul.f32 %v19016_v7, %v19276_v45  ;;  %v1771_v25 = vmul.f32 %v19001_v9, %v19248_v16  ;;  %v19405_v43 = vld [vmem:[%s22203_s22 + $0x3] ss:$0 sm:$0xff] }
 0x26f   : > { %v19344_v24 = vpop.permute.xlu1 %1208  ;;  %v19346_v58 = vpop.permute.xlu0 %1212  ;;  %v1459_v32 = vmul.f32 %v19391_v3, %v19274_v20  ;;  %v2026_v40 = vmax.f32 %v19359_v63, 0.0  ;;  %v1066_v22 = vmul.f32 %v19351_v26, %v19298_v28  ;;  %v1294_v51 = vadd.f32 %v1262_v17, %v1065_v60 }
 0x270   : > { %v19380_v57 = vsel %vm2234_vm5, %v2333_v10, %v2337_v54  ;;  %v2112_v52 = vshrl.u32 %v2047_v31, 16  ;;  %v1879_v47 = vadd.f32 %v1847_v46, %v1802_v21  ;;  %v2115_v2 = vshll.u32 %v2047_v31, 16  ;;  %v19416_v54 = vld [vmem:[%s22203_s22 + $0x4] ss:$0 sm:$0xff] }
 0x271   : > { %22225 = vst [vmem:[#allocation44_spill] sm:$0xff] %v19380_v57  ;;  %v1848_v9 = vmul.f32 %v19016_v7, %v19344_v24  ;;  %v1539_v20 = vmul.f32 %v19405_v43, %v19248_v16  ;;  %v1263_v39 = vmul.f32 %v19369_v19, %v19276_v45  ;;  %v1538_v63 = vmul.f32 %v19405_v43, %v19298_v28 }
 0x272   : > { %2535 = vrot.lane.b32.xlu0 %v19380_v57, %s18239_s27  ;;  %v2114_v59 = vrot.slane %v2112_v52, 7  ;;  %v1615_v7 = vmul.f32 %v19416_v54, %v19276_v45  ;;  %v1924_v60 = vmul.f32 %v19024_v53, %v19300_v0  ;;  %v1803_v10 = vadd.f32 %v1771_v25, %v1723_v8 }
 0x273   : > { %v19382_v49 = vpop.permute.xlu1 %1405  ;;  %v19384_v61 = vpop.permute.xlu0 %1409  ;;  %v1491_v13 = vadd.f32 %v1459_v32, %v1294_v51  ;;  %v1295_v31 = vadd.f32 %v1263_v39, %v1066_v22  ;;  %v2460_v28 = vrot.slane %v18903_v55, 1  ;;  %v1570_v25 = vadd.f32 %v1538_v63, %v1490_v62 }
 0x274   : > { %v2117_v14 = vor.u32 %v2115_v2, %v2114_v59  ;;  %v19429_v17 = vsel %vm18822_vm4, %v2114_v59, 0  ;;  %v1956_v46 = vadd.f32 %v1924_v60, %v1879_v47  ;;  %v1880_v52 = vadd.f32 %v1848_v9, %v1803_v10  ;;  %v19446_v47 = vld [vmem:[%s22203_s22 + $0x5] ss:$0 sm:$0xff] }
 0x275   : > { %22226 = vst [vmem:[#allocation45_spill] sm:$0xff] %v19429_v17  ;;  %v1925_v8 = vmul.f32 %v19024_v53, %v19382_v49  ;;  %v1460_v32 = vmul.f32 %v19391_v3, %v19300_v0  ;;  %v2347_v59 = vshll.u32 %v19429_v17, 16  ;;  %v1692_v2 = vmul.f32 %v19446_v47, %v19300_v0 }
 0x276   : > { %v19433_v45 = vsel %vm18822_vm4, 0, %v2117_v14  ;;  %v2461_v53 = vrot.slane %v18923_v50, 1  ;;  %v1616_v62 = vmul.f32 %v19416_v54, %v19344_v24  ;;  %v1571_v63 = vadd.f32 %v1539_v20, %v1491_v13 }
 0x277   : > { %v19422_v16 = vpop.permute.xlu1 %1009  ;;  %v19424_v21 = vpop.permute.xlu0 %1024  ;;  %22227 = vst [vmem:[#allocation46_spill] sm:$0xff] %v19433_v45  ;;  %2567 = vrot.lane.b32.xlu1 %v19433_v45, %s18239_s27  ;;  %v2342_v22 = vshll.u32 %v19433_v45, 16  ;;  %v1957_v9 = vadd.f32 %v1925_v8, %v1880_v52  ;;  %v2340_v60 = vshrl.u32 %v19433_v45, 16  ;;  %v2048_v10 = vpack.c.bf16 %v2026_v40, %v2025_v5 }
 0x278   : > { %v19459_v57 = vadd.f32 %v19074_v29, %v1956_v46  ;;  %v19462_v0 = vsel %vm2454_vm6, %v2460_v28, %v2461_v53  ;;  %v1540_v52 = vmul.f32 %v19405_v43, %v19422_v16  ;;  %v1264_v20 = vmul.f32 %v19369_v19, %v19344_v24 }
 0x279   : > { %v2344_v14 = vrot.slane %v2342_v22, 1  ;;  %v19465_v50 = vadd.f32 %v19074_v29, %v1957_v9  ;;  %v2349_v5 = vrot.slane %v2347_v59, 1  ;;  %v2119_v40 = vshrl.u32 %v2048_v10, 16 }
 0x27a   : > { %v1647_v46 = vadd.f32 %v1615_v7, %v1570_v25  ;;  %v1492_v8 = vadd.f32 %v1460_v32, %v1295_v31  ;;  %v1648_v22 = vadd.f32 %v1616_v62, %v1571_v63  ;;  %v1693_v28 = vmul.f32 %v19446_v47, %v19382_v49  ;;  %v19489_v25 = vld [vmem:[%s22203_s22 + $0x6] ss:$0 sm:$0xff] }
 0x27b   : > { %v19453_v51 = vpop.permute.xlu1 %1216  ;;  %v19455_v39 = vpop.permute.xlu0 %1220  ;;  %2585 = vrot.lane.b32.xlu1 %v19462_v0, %s18239_s27  ;;  %v2345_v13 = vor.u32 %v2344_v14, %v2340_v60  ;;  %v1461_v56 = vmul.f32 %v19391_v3, %v19382_v49  ;;  %v2121_v24 = vrot.slane %v2119_v40, 7  ;;  %v2122_v60 = vshll.u32 %v2048_v10, 16 }
 0x27c   : > { %v1572_v31 = vadd.f32 %v1540_v52, %v1492_v8  ;;  %v1772_v32 = vmul.f32 %v19489_v25, %v19422_v16  ;;  %v1069_v62 = vmul.f32 %v19351_v26, %v19317_v44  ;;  %v1541_v49 = vmul.f32 %v19405_v43, %v19317_v44 }
 0x27d   : > { %v19480_v9 = vsel %vm2234_vm5, %v2345_v13, %v2349_v5  ;;  %v1296_v63 = vadd.f32 %v1264_v20, %v19375_v35  ;;  %v2124_v14 = vor.u32 %v2122_v60, %v2121_v24  ;;  %v1724_v10 = vadd.f32 %v1692_v2, %v1647_v46  ;;  %v19511_v35 = vld [vmem:[%s22203_s22 + $0x7] ss:$0 sm:$0xff] }
 0x27e   : > { %22228 = vst [vmem:[#allocation47_spill] sm:$0xff] %v19480_v9  ;;  %v1773_v52 = vmul.f32 %v19489_v25, %v19317_v44  ;;  %v1617_v13 = vmul.f32 %v19416_v54, %v19346_v58  ;;  %v1725_v5 = vadd.f32 %v1693_v28, %v1648_v22  ;;  %v1849_v20 = vmul.f32 %v19511_v35, %v19346_v58 }
 0x27f   : > { %v19475_v29 = vpop.permute.xlu1 %1413  ;;  %v19477_v53 = vpop.permute.xlu0 %1417  ;;  %2537 = vrot.lane.b32.xlu1 %v19480_v9, %s18239_s27  ;;  %v1493_v2 = vadd.f32 %v1461_v56, %v1296_v63  ;;  %v19517_v44 = vsel %vm18822_vm4, 0, %v2124_v14  ;;  %v2463_v46 = vrot.slane %v18931_v30, 1  ;;  %v1804_v28 = vadd.f32 %v1772_v32, %v1724_v10 }
 0x280   : > { %22229 = vst [vmem:[#allocation48_spill] sm:$0xff] %v19517_v44  ;;  %2569 = vrot.lane.b32.xlu0 %v19517_v44, %s18239_s27  ;;  %v1649_v22 = vadd.f32 %v1617_v13, %v1572_v31  ;;  %v1850_v60 = vmul.f32 %v19511_v35, %v19453_v51  ;;  %v19526_v7 = vsel %vm18822_vm4, %v2121_v24, 0  ;;  %v2464_v56 = vrot.slane %v19061_v23, 1 }
 0x281   : > { %22230 = vst [vmem:[#allocation49_spill] sm:$0xff] %v19526_v7  ;;  %v2352_v63 = vshrl.u32 %v19517_v44, 16  ;;  %v2354_v14 = vshll.u32 %v19517_v44, 16  ;;  %v2359_v59 = vshll.u32 %v19526_v7, 16  ;;  %v1694_v9 = vmul.f32 %v19446_v47, %v19384_v61  ;;  %v19548_v7 = vld [vmem:[%s22203_s22 + $0x8] ss:$0 sm:$0xff] }
 0x282   : > { %v1068_v31 = vmul.f32 %v19351_v26, %v19422_v16  ;;  %v1618_v32 = vmul.f32 %v19416_v54, %v19453_v51  ;;  %v1805_v10 = vadd.f32 %v1773_v52, %v1725_v5  ;;  %v19543_v23 = vsel %vm2454_vm6, %v2463_v46, %v2464_v56 }
 0x283   : > { %v19504_v40 = vpop.permute.xlu1 %1020  ;;  %v19506_v8 = vpop.permute.xlu0 %1035  ;;  %22231 = vst [vmem:[#allocation50_spill] sm:$0xff] %v19543_v23  ;;  %v2356_v17 = vrot.slane %v2354_v14, 1  ;;  %v2361_v45 = vrot.slane %v2359_v59, 1  ;;  %v1927_v16 = vmul.f32 %v19548_v7, %v19475_v29  ;;  %v1881_v44 = vadd.f32 %v1849_v20, %v1804_v28 }
 0x284   : > { %2587 = vrot.lane.b32.xlu0 %v19543_v23, %s18239_s27  ;;  %v1266_v52 = vmul.f32 %v19369_v19, %v19453_v51  ;;  %v1573_v5 = vadd.f32 %v1541_v49, %v1493_v2  ;;  %v1882_v46 = vadd.f32 %v1850_v60, %v1805_v10  ;;  %v1695_v59 = vmul.f32 %v19446_v47, %v19475_v29 }
 0x285   : > { %v2357_v56 = vor.u32 %v2356_v17, %v2352_v63  ;;  %v1726_v14 = vadd.f32 %v1694_v9, %v1649_v22  ;;  %v1774_v34 = vmul.f32 %v19489_v25, %v19504_v40  ;;  %v1265_v41 = vmul.f32 %v19369_v19, %v19346_v58 }
 0x286   : > { %v1462_v20 = vmul.f32 %v19391_v3, %v19384_v61  ;;  %v1926_v28 = vmul.f32 %v19548_v7, %v19384_v61  ;;  %v1650_v51 = vadd.f32 %v1618_v32, %v1573_v5  ;;  %v1463_v9 = vmul.f32 %v19391_v3, %v19475_v29 }
 0x287   : > { %v19538_v24 = vpop.permute.xlu1 %1224  ;;  %v19540_v13 = vpop.permute.xlu0 %1228  ;;  %v19571_v2 = vsel %vm2234_vm5, %v2357_v56, %v2361_v45  ;;  %v1959_v22 = vadd.f32 %v1927_v16, %v1882_v46  ;;  %v1806_v60 = vadd.f32 %v1774_v34, %v1726_v14  ;;  %v1297_v58 = vadd.f32 %v1265_v41, %v1068_v31 }
 0x288   : > { %22232 = vst [vmem:[#allocation51_spill] sm:$0xff] %v19571_v2  ;;  %v19577_v63 = vmul.f32 %v19351_v26, %v19424_v21  ;;  %v1851_v61 = vmul.f32 %v19511_v35, %v19455_v39  ;;  %2539 = vrot.lane.b32.xlu0 %v19571_v2, %s18239_s27  ;;  %v22233_v32 = vmax.f32 %v19459_v57, 0.0  ;;  %v22234_v45 = vmax.f32 %v19465_v50, 0.0 }
 0x289   : > { %v1958_v5 = vadd.f32 %v1926_v28, %v1881_v44  ;;  %v1543_v34 = vmul.f32 %v19405_v43, %v19424_v21  ;;  %v1298_v41 = vadd.f32 %v1266_v52, %v1069_v62  ;;  %v1727_v29 = vadd.f32 %v1695_v59, %v1650_v51  ;;  %v19602_v62 = vld [vmem:[%s22204_s28] ss:$0 sm:$0xff] }
 0x28a   : > { %v2049_v10 = vpack.c.bf16 %v22234_v45, %v22233_v32  ;;  %v1775_v31 = vmul.f32 %v19489_v25, %v19424_v21  ;;  %v1542_v16 = vmul.f32 %v19405_v43, %v19504_v40  ;;  %v1883_v46 = vadd.f32 %v1851_v61, %v1806_v60 }
 0x28b   : > { %v19566_v49 = vpop.permute.xlu1 %1421  ;;  %v19568_v17 = vpop.permute.xlu0 %1425  ;;  %v19597_v50 = vmul.f32 %v19369_v19, %v19455_v39  ;;  %v1495_v44 = vadd.f32 %v1463_v9, %v1298_v41  ;;  %v1998_v21 = vadd.f32 %v19602_v62, %v1959_v22  ;;  %v1852_v52 = vmul.f32 %v19511_v35, %v19538_v24 }
 0x28c   : > { %v2126_v56 = vshrl.u32 %v2049_v10, 16  ;;  %v1928_v59 = vmul.f32 %v19548_v7, %v19477_v53  ;;  %v1494_v28 = vadd.f32 %v1462_v20, %v1297_v58  ;;  %v2129_v60 = vshll.u32 %v2049_v10, 16 }
 0x28d   : > { %v1997_v61 = vadd.f32 %v19602_v62, %v1958_v5  ;;  %v1619_v9 = vmul.f32 %v19416_v54, %v19455_v39  ;;  %v1807_v32 = vadd.f32 %v1775_v31, %v1727_v29  ;;  %v1929_v45 = vmul.f32 %v19548_v7, %v19566_v49 }
 0x28e   : > { %v2128_v51 = vrot.slane %v2126_v56, 7  ;;  %v1574_v41 = vadd.f32 %v1542_v16, %v1494_v28  ;;  %v1960_v22 = vadd.f32 %v1928_v59, %v1883_v46  ;;  %v1620_v30 = vmul.f32 %v19416_v54, %v19538_v24 }
 0x28f   : > { %v19593_v14 = vpop.permute.xlu1 %1031  ;;  %v2552_v57 = vpop.permute.xlu0 %2551  ;;  %v2030_v58 = vmax.f32 %v1998_v21, 0.0  ;;  %v1696_v10 = vmul.f32 %v19446_v47, %v19477_v53  ;;  %v1884_v5 = vadd.f32 %v1852_v52, %v1807_v32  ;;  %v2466_v39 = vrot.slane %v19007_v33, 1 }
 0x290   : > { %v2131_v2 = vor.u32 %v2129_v60, %v2128_v51  ;;  %v1575_v31 = vadd.f32 %v1543_v34, %v1495_v44  ;;  %v1697_v16 = vmul.f32 %v19446_v47, %v19566_v49  ;;  %v19631_v46 = vsel %vm18822_vm4, %v2128_v51, 0 }
 0x291   : > { %22235 = vst [vmem:[#allocation52_spill] sm:$0xff] %v19631_v46  ;;  %v2467_v56 = vrot.slane %v19109_v42, 1  ;;  %v1961_v21 = vadd.f32 %v1929_v45, %v1884_v5  ;;  %v2371_v59 = vshll.u32 %v19631_v46, 16  ;;  %v1999_v44 = vadd.f32 %v19602_v62, %v1960_v22  ;;  %v17140_v46 = vld [vmem:[#allocation4 + $0x110] sm:$0xff]  }
 0x292   : > { %v19625_v29 = vsel %vm18822_vm4, 0, %v2131_v2  ;;  %v1070_v2 = vmul.f32 %v19351_v26, %v19504_v40  ;;  %v1652_v34 = vadd.f32 %v1620_v30, %v1575_v31  ;;  %v1651_v28 = vadd.f32 %v1619_v9, %v1574_v41 }
 0x293   : > { %v19616_v37 = vpop.permute.xlu1 %1232  ;;  %v19618_v20 = vpop.permute.xlu0 %1509  ;;  %2571 = vrot.lane.b32.xlu1 %v19625_v29, %s18239_s27  ;;  %v2366_v52 = vshll.u32 %v19625_v29, 16  ;;  %v19644_v51 = vsel %vm2454_vm6, %v2466_v39, %v2467_v56  ;;  %v2364_v32 = vshrl.u32 %v19625_v29, 16  ;;  %v1776_v45 = vmul.f32 %v19489_v25, %v19593_v14 }
 0x294   : > { %v1729_v33 = vadd.f32 %v1697_v16, %v1652_v34  ;;  %v1728_v23 = vadd.f32 %v1696_v10, %v1651_v28  ;;  %v2029_v40 = vmax.f32 %v1997_v61, 0.0  ;;  %v2000_v30 = vadd.f32 %v19602_v62, %v1961_v21 }
 0x295   : > { %v2368_v42 = vrot.slane %v2366_v52, 1  ;;  %v2373_v41 = vrot.slane %v2371_v59, 1  ;;  %v2668_v22 = vsel %vm2617_vm7, %v18744_v18, %v2552_v57  ;;  %v1268_v10 = vmul.f32 %v19369_v19, %v19538_v24 }
 0x296   : > { %v1853_v61 = vmul.f32 %v19511_v35, %v19540_v13  ;;  %v1808_v31 = vadd.f32 %v1776_v45, %v1728_v23  ;;  %v2050_v16 = vpack.c.bf16 %v2030_v58, %v2029_v40  ;;  %3157 = vmatprep.mubr.bf16.mxu0 %v2668_v22  ;;  %v1464_v21 = vmul.f32 %v19391_v3, %v19477_v53 }
 0x297   : > { %v19641_v60 = vpop.permute.xlu1 %1429  ;;  %v2554_v5 = vpop.permute.xlu0 %2553  ;;  %2589 = vrot.lane.b32.xlu1 %v19644_v51, %s18239_s27  ;;  %v2369_v9 = vor.u32 %v2368_v42, %v2364_v32  ;;  %v1777_v57 = vmul.f32 %v19489_v25, %v19506_v8  ;;  %v1465_v52 = vmul.f32 %v19391_v3, %v19566_v49  ;;  %14900 = vmatmul.mubr.msk.bf16.vlgmr.msra.gmra.mxu0 %vm19655_vm8, %v19315_v36  ;;  %v2031_v49 = vmax.f32 %v1999_v44, 0.0 }
 0x298   : > { %v1930_v24 = vmul.f32 %v19548_v7, %v19568_v17  ;;  %v1885_v23 = vadd.f32 %v1853_v61, %v1808_v31  ;;  %v2133_v58 = vshrl.u32 %v2050_v16, 16  ;;  %v1854_v53 = vmul.f32 %v19511_v35, %v19616_v37  ;;  %16803 = vmatpush3.bf16.msra.mxu0 %v19250_v6 }
 0x299   : > { %v19672_v59 = vsel %vm2234_vm5, %v2369_v9, %v2373_v41  ;;  %v1299_v34 = vadd.f32 %v19597_v50, %v1070_v2  ;;  %v2032_v28 = vmax.f32 %v2000_v30, 0.0  ;;  %v1809_v32 = vadd.f32 %v1777_v57, %v1729_v33  ;;  %16804 = vmatprep.subr.bf16.mxu0 %v17140_v46 }
 0x29a   : > { %v1300_v45 = vadd.f32 %v1268_v10, %v19577_v63  ;;  %v1962_v40 = vadd.f32 %v1930_v24, %v1885_v23  ;;  %v2135_v9 = vrot.slane %v2133_v58, 7  ;;  %v2136_v41 = vshll.u32 %v2050_v16, 16  ;;  %v17141_v10 = vld [vmem:[#allocation4 + $0x108] sm:$0xff]  }
 0x29b   : > { %v19663_v56 = vpop.permute.xlu1 %1505  ;;  %2541 = vrot.lane.b32.xlu1 %v19672_v59, %s18239_s27  ;;  %v19685_v42 = vpop.permute.xlu0 %1582  ;;  %v1544_v6 = vmul.f32 %v19405_v43, %v19593_v14  ;;  %v1886_v61 = vadd.f32 %v1854_v53, %v1809_v32  ;;  %v1931_v50 = vmul.f32 %v19548_v7, %v19641_v60  ;;  %v2672_v2 = vsel %vm2617_vm7, %v19356_v1, %v2554_v5 }
 0x29c   : > { %v1497_v33 = vadd.f32 %v1465_v52, %v1300_v45  ;;  %v2001_v44 = vadd.f32 %v19602_v62, %v1962_v40  ;;  %v2138_v30 = vor.u32 %v2136_v41, %v2135_v9  ;;  %v19697_v63 = vsel %vm18822_vm4, %v2135_v9, 0  ;;  %3165 = vmatprep.mubr.bf16.mxu0 %v2672_v2  ;;  %16805 = vmatpush3.bf16.msra.mxu0 %v17140_v46 }
 0x29d   : > { %v1545_v31 = vmul.f32 %v19405_v43, %v19506_v8  ;;  %v2051_v16 = vpack.c.bf16 %v2032_v28, %v2031_v49  ;;  %v1496_v57 = vadd.f32 %v1464_v21, %v1299_v34  ;;  %v1963_v24 = vadd.f32 %v1931_v50, %v1886_v61  ;;  %16806 = vmatprep.subr.bf16.mxu0 %v17141_v10 }
 0x29e   : > { %v19703_v1 = vsel %vm18822_vm4, 0, %v2138_v30  ;;  %v1622_v5 = vmul.f32 %v19416_v54, %v19616_v37  ;;  %v2469_v52 = vrot.slane %v19054_v15, 1  ;;  %v2383_v23 = vshll.u32 %v19697_v63, 16 }
 0x29f   : > { %v2522_v22 = vpop.permute.xlu1 %2521  ;;  %v1576_v46 = vadd.f32 %v1544_v6, %v1496_v57  ;;  %2573 = vrot.lane.b32.xlu0 %v19703_v1, %s18239_s27  ;;  %v2002_v21 = vadd.f32 %v19602_v62, %v1963_v24  ;;  %v2378_v53 = vshll.u32 %v19703_v1, 16  ;;  %v2556_v34 = vpop.permute.xlu0 %2555  ;;  %v1577_v49 = vadd.f32 %v1545_v31, %v1497_v33 }
 0x2a0   : > { %v2470_v28 = vrot.slane %v19168_v11, 1  ;;  %v1699_v32 = vmul.f32 %v19446_v47, %v19641_v60  ;;  %v2033_v45 = vmax.f32 %v2001_v44, 0.0  ;;  %16807 = vmatpush3.bf16.msra.mxu0 %v17141_v10  ;;  %v2376_v9 = vshrl.u32 %v19703_v1, 16 }
 0x2a1   : > { %v2034_v40 = vmax.f32 %v2002_v21, 0.0  ;;  %v2380_v41 = vrot.slane %v2378_v53, 1  ;;  %v2140_v6 = vshrl.u32 %v2051_v16, 16  ;;  %v1621_v61 = vmul.f32 %v19416_v54, %v19540_v13 }
 0x2a2   : > { %v1654_v50 = vadd.f32 %v1622_v5, %v1577_v49  ;;  %v19722_v2 = vsel %vm2454_vm6, %v2469_v52, %v2470_v28  ;;  %v2385_v33 = vrot.slane %v2383_v23, 1  ;;  %v2143_v10 = vshll.u32 %v2051_v16, 16 }
 0x2a3   : > { %v19709_v58 = vpop.permute.xlu1 %1586  ;;  %2591 = vrot.lane.b32.xlu0 %v19722_v2, %s18239_s27  ;;  %v2052_v11 = vpack.c.bf16 %v2034_v40, %v2033_v45  ;;  %v2381_v30 = vor.u32 %v2380_v41, %v2376_v9  ;;  %v2142_v44 = vrot.slane %v2140_v6, 7  ;;  %v1653_v57 = vadd.f32 %v1621_v61, %v1576_v46  ;;  %v2558_v49 = vpop.permute.xlu0 %2557 }
 0x2a4   : > { %v2622_v24 = vsel %vm2617_vm7, %v18851_v38, %v2522_v22  ;;  %v2676_v21 = vsel %vm2617_vm7, %v19462_v0, %v2556_v34  ;;  %v1698_v5 = vmul.f32 %v19446_v47, %v19568_v17  ;;  %v1731_v52 = vadd.f32 %v1699_v32, %v1654_v50 }
 0x2a5   : > { %v19733_v23 = vsel %vm2234_vm5, %v2381_v30, %v2385_v33  ;;  %v2145_v53 = vor.u32 %v2143_v10, %v2142_v44  ;;  %3166 = vmatmul.mubr.bf16.gmra.mxu0 %v2622_v24  ;;  %v1779_v16 = vmul.f32 %v19489_v25, %v19618_v20  ;;  %v1778_v46 = vmul.f32 %v19489_v25, %v19663_v56 }
 0x2a6   : > { %3173 = vmatprep.mubr.bf16.mxu0 %v2676_v21  ;;  %v19741_v38 = vsel %vm18822_vm4, %v2142_v44, 0  ;;  %v2472_v28 = vrot.slane %v19161_v12, 1  ;;  %v1856_v32 = vmul.f32 %v19511_v35, %v19709_v58  ;;  %v2147_v45 = vshrl.u32 %v2052_v11, 16  ;;  %v17142_v44 = vld [vmem:[#allocation4 + $0x100] sm:$0xff]  }
 0x2a7   : > { %v2524_v31 = vpop.permute.xlu1 %2523  ;;  %2543 = vrot.lane.b32.xlu0 %v19733_v23, %s18239_s27  ;;  %v19749_v34 = vsel %vm18822_vm4, 0, %v2145_v53  ;;  %v1730_v9 = vadd.f32 %v1698_v5, %v1653_v57  ;;  %v2395_v41 = vshll.u32 %v19741_v38, 16  ;;  %v2473_v6 = vrot.slane %v19210_v4, 1  ;;  %16808 = vmatprep.subr.bf16.mxu0 %v17142_v44 }
 0x2a8   : > { %v2625_v22 = vsel %vm2617_vm7, %v18903_v55, %v2524_v31  ;;  %2575 = vrot.lane.b32.xlu1 %v19749_v34, %s18239_s27  ;;  %v2390_v55 = vshll.u32 %v19749_v34, 16  ;;  %v1811_v61 = vadd.f32 %v1779_v16, %v1731_v52  ;;  %v2149_v50 = vrot.slane %v2147_v45, 7  ;;  %16809 = vmatpush3.bf16.msra.mxu0 %v17142_v44 }
 0x2a9   : > { %3318 = vmatprep.mubr.bf16.mxu1 %v2625_v22  ;;  %v2150_v33 = vshll.u32 %v2052_v11, 16  ;;  %v2388_v10 = vshrl.u32 %v19749_v34, 16  ;;  %v1810_v24 = vadd.f32 %v1778_v46, %v1730_v9  ;;  %v19765_v21 = vsel %vm2454_vm6, %v2472_v28, %v2473_v6  ;;  %v22239_v6 = vld [vmem:[#allocation40_spill] sm:$0xff] }
 0x2aa   : > { %v2392_v31 = vrot.slane %v2390_v55, 1  ;;  %v1888_v5 = vadd.f32 %v1856_v32, %v1811_v61  ;;  %v2397_v11 = vrot.slane %v2395_v41, 1  ;;  %v2475_v52 = vrot.slane %v19267_v48, 1  ;;  %v22238_v32 = vld [vmem:[#allocation50_spill] sm:$0xff] }
 0x2ab   : > { %v19754_v40 = vpop.permute.xlu1 %1663  ;;  %v2560_v30 = vpop.permute.xlu0 %2559  ;;  %v2152_v53 = vor.u32 %v2150_v33, %v2149_v50  ;;  %v19772_v16 = vsel %vm18822_vm4, %v2149_v50, 0  ;;  %v1855_v46 = vmul.f32 %v19511_v35, %v19685_v42  ;;  %v2680_v45 = vsel %vm2617_vm7, %v22238_v32, %v2558_v49 }
 0x2ac   : > { %v1933_v57 = vmul.f32 %v19548_v7, %v19754_v40  ;;  %2593 = vrot.lane.b32.xlu1 %v19765_v21, %s18239_s27  ;;  %v2393_v4 = vor.u32 %v2392_v31, %v2388_v10  ;;  %v2476_v61 = vrot.slane %v22239_v6, 1  ;;  %v2407_v49 = vshll.u32 %v19772_v16, 16 }
 0x2ad   : > { %v19778_v28 = vsel %vm18822_vm4, 0, %v2152_v53  ;;  %3174 = vmatmul.mubr.bf16.gmra.mxu0 %v2625_v22  ;;  %v1887_v50 = vadd.f32 %v1855_v46, %v1810_v24  ;;  %v22240_v46 = vld [vmem:[#allocation33_spill] sm:$0xff] }
 0x2ae   : > { %v1965_v9 = vadd.f32 %v1933_v57, %v1888_v5  ;;  %v19785_v41 = vsel %vm2234_vm5, %v2393_v4, %v2397_v11  ;;  %2577 = vrot.lane.b32.xlu0 %v19778_v28, %s18239_s27  ;;  %3181 = vmatprep.mubr.bf16.mxu0 %v2680_v45  ;;  %v2402_v22 = vshll.u32 %v19778_v28, 16  ;;  %v19797_v44 = vsel %vm2454_vm6, %v2475_v52, %v2476_v61 }
 0x2af   : > { %v19782_v55 = vpop.permute.xlu0 %1659  ;;  %v2400_v57 = vshrl.u32 %v19778_v28, 16  ;;  %v2409_v11 = vrot.slane %v2407_v49, 1  ;;  %v2684_v61 = vsel %vm2617_vm7, %v19644_v51, %v2560_v30  ;;  %v1269_v30 = vmul.f32 %v19369_v19, %v19540_v13 }
 0x2b0   : > { %v1932_v33 = vmul.f32 %v19548_v7, %v19782_v55  ;;  %2545 = vrot.lane.b32.xlu1 %v19785_v41, %s18239_s27  ;;  %v2004_v10 = vadd.f32 %v19602_v62, %v1965_v9  ;;  %v2404_v5 = vrot.slane %v2402_v22, 1  ;;  %v1072_v22 = vmul.f32 %v19351_v26, %v19593_v14 }
 0x2b2   : > { %v1964_v31 = vadd.f32 %v1932_v33, %v1887_v50  ;;  %2595 = vrot.lane.b32.xlu0 %v19797_v44, %s18239_s27  ;;  %v2526_v24 = vpop.permute.xlu1 %2525  ;;  %v2405_v4 = vor.u32 %v2404_v5, %v2400_v57  ;;  %v2036_v52 = vmax.f32 %v2004_v10, 0.0  ;;  %v1270_v50 = vmul.f32 %v19369_v19, %v19616_v37 }
 0x2b3   : > { %v19806_v45 = vsel %vm2617_vm7, %v22240_v46, %v2526_v24  ;;  %v1073_v10 = vmul.f32 %v19351_v26, %v19506_v8  ;;  %v1301_v24 = vadd.f32 %v1269_v30, %v1072_v22  ;;  %v1466_v26 = vmul.f32 %v19391_v3, %v19568_v17 }
 0x2b4   : > { %v2003_v53 = vadd.f32 %v19602_v62, %v1964_v31  ;;  %v19809_v9 = vsel %vm2234_vm5, %v2405_v4, %v2409_v11  ;;  %v1467_v31 = vmul.f32 %v19391_v3, %v19641_v60  ;;  %v1546_v8 = vmul.f32 %v19405_v43, %v19663_v56 }
 0x2b5   : > { %3182 = vmatmul.mubr.bf16.gmra.mxu0 %v19806_v45  ;;  %v1302_v37 = vadd.f32 %v1270_v50, %v1073_v10  ;;  %v1547_v60 = vmul.f32 %v19405_v43, %v19618_v20  ;;  %v22242_v50 = vld [vmem:[#allocation42_spill] sm:$0xff]  ;;  %v1701_v10 = vmul.f32 %v19446_v47, %v19754_v40  ;;  %v1700_v40 = vmul.f32 %v19446_v47, %v19782_v55 }
 0x2b6   : > { %v2035_v6 = vmax.f32 %v2003_v53, 0.0  ;;  %2547 = vrot.lane.b32.xlu0 %v19809_v9, %s18239_s27  ;;  %3189 = vmatprep.mubr.bf16.mxu0 %v2684_v61  ;;  %v1740_v33 = vpop.permute.xlu1 %1739  ;;  %v22241_v53 = vld [vmem:[#allocation34_spill] sm:$0xff]  ;;  %v1498_v61 = vadd.f32 %v1466_v26, %v1301_v24  ;;  %v2478_v22 = vrot.slane %v22242_v50, 1 }
 0x2b7   : > { %v1499_v46 = vadd.f32 %v1467_v31, %v1302_v37  ;;  %v22243_v31 = vld [vmem:[#allocation43_spill] sm:$0xff] }
 0x2b8   : > { %v2053_v49 = vpack.c.bf16 %v2036_v52, %v2035_v6  ;;  %v1624_v52 = vmul.f32 %v19416_v54, %v19709_v58  ;;  %v1578_v58 = vadd.f32 %v1546_v8, %v1498_v61  ;;  %v2479_v30 = vrot.slane %v22243_v31, 1 }
 0x2ba   : > { %v2154_v57 = vshrl.u32 %v2053_v49, 16  ;;  %v2528_v5 = vpop.permute.xlu1 %2527  ;;  %v2157_v14 = vshll.u32 %v2053_v49, 16  ;;  %v1579_v49 = vadd.f32 %v1547_v60, %v1499_v46  ;;  %v1780_v60 = vmul.f32 %v19489_v25, %v1740_v33 }
 0x2bb   : > { %v19828_v4 = vsel %vm2617_vm7, %v22241_v53, %v2528_v5  ;;  %v1623_v53 = vmul.f32 %v19416_v54, %v19685_v42 }
 0x2bc   : > { %v2156_v11 = vrot.slane %v2154_v57, 7  ;;  %v1656_v57 = vadd.f32 %v1624_v52, %v1579_v49 }
 0x2bd   : > { %3190 = vmatmul.mubr.bf16.gmra.mxu0 %v19828_v4 }
 0x2be   : > { %v2159_v19 = vor.u32 %v2157_v14, %v2156_v11  ;;  %v19837_v13 = vsel %vm18822_vm4, %v2156_v11, 0  ;;  %v1821_v17 = vpop.permute.xlu1 %1820  ;;  %v19864_v14 = vsel %vm2454_vm6, %v2478_v22, %v2479_v30  ;;  %v1733_v46 = vadd.f32 %v1701_v10, %v1656_v57  ;;  %v22245_v10 = vld [vmem:[#allocation49_spill] sm:$0xff] }
 0x2bf   : > { %v2419_v20 = vshll.u32 %v19837_v13, 16  ;;  %v1858_v49 = vmul.f32 %v19511_v35, %v1821_v17 }
 0x2c0   : > { %v2562_v6 = vpop.permute.xlu0 %2561  ;;  %v19847_v56 = vsel %vm18822_vm4, 0, %v2159_v19  ;;  %v1655_v19 = vadd.f32 %v1623_v53, %v1578_v58 }
 0x2c1   : > { %v2688_v3 = vsel %vm2617_vm7, %v19722_v2, %v2562_v6  ;;  %2579 = vrot.lane.b32.xlu1 %v19847_v56, %s18239_s27  ;;  %v2414_v43 = vshll.u32 %v19847_v56, 16  ;;  %v2412_v5 = vshrl.u32 %v19847_v56, 16  ;;  %v2421_v8 = vrot.slane %v2419_v20, 1 }
 0x2c2   : > { %3197 = vmatprep.mubr.bf16.mxu0 %v2688_v3  ;;  %v1732_v55 = vadd.f32 %v1700_v40, %v1655_v19  ;;  %v22244_v3 = vld [vmem:[#allocation48_spill] sm:$0xff] }
 0x2c3   : > { %v2416_v24 = vrot.slane %v2414_v43, 1  ;;  %v2484_v22 = vrot.slane %v22244_v3, 1 }
 0x2c4   : > { %v1744_v37 = vpop.permute.xlu0 %1743 }
 0x2c5   : > { %v1781_v11 = vmul.f32 %v19489_v25, %v1744_v37  ;;  %2597 = vrot.lane.b32.xlu1 %v19864_v14, %s18239_s27  ;;  %v2417_v26 = vor.u32 %v2416_v24, %v2412_v5  ;;  %v2530_v52 = vpop.permute.xlu1 %2529  ;;  %v1812_v25 = vadd.f32 %v1780_v60, %v1732_v55  ;;  %v2490_v37 = vrot.slane %v19703_v1, 1 }
 0x2c6   : > { %v19871_v47 = vsel %vm2617_vm7, %v19054_v15, %v2530_v52  ;;  %v2485_v15 = vrot.slane %v22245_v10, 1  ;;  %v2491_v24 = vrot.slane %v19697_v63, 1 }
 0x2c7   : > { %v1813_v6 = vadd.f32 %v1781_v11, %v1733_v46  ;;  %v19874_v42 = vsel %vm2234_vm5, %v2417_v26, %v2421_v8  ;;  %3198 = vmatmul.mubr.bf16.gmra.mxu0 %v19871_v47 }
 0x2c8   : > { %v1817_v54 = vpop.permute.xlu0 %1816  ;;  %v19886_v57 = vsel %vm2454_vm6, %v2484_v22, %v2485_v15  ;;  %v19895_v11 = vsel %vm2454_vm6, %v2490_v37, %v2491_v24  ;;  %v22246_v15 = vld [vmem:[#allocation46_spill] sm:$0xff] }
 0x2c9   : > { %v1857_v61 = vmul.f32 %v19511_v35, %v1817_v54  ;;  %2549 = vrot.lane.b32.xlu1 %v19874_v42, %s18239_s27  ;;  %v1898_v33 = vpop.permute.xlu1 %1897  ;;  %v1890_v43 = vadd.f32 %v1858_v49, %v1813_v6  ;;  %v2499_v6 = vrot.slane %v19847_v56, 1  ;;  %v2500_v54 = vrot.slane %v19837_v13, 1 }
 0x2ca   : > { %v1935_v20 = vmul.f32 %v19548_v7, %v1898_v33  ;;  %v2481_v13 = vrot.slane %v22246_v15, 1 }
 0x2cb   : > { %v1889_v31 = vadd.f32 %v1857_v61, %v1812_v25  ;;  %v19916_v22 = vsel %vm2454_vm6, %v2499_v6, %v2500_v54 }
 0x2cc   : > { %v1894_v58 = vpop.permute.xlu0 %1893  ;;  %v1967_v35 = vadd.f32 %v1935_v20, %v1890_v43  ;;  %v22247_v20 = vld [vmem:[#allocation45_spill] sm:$0xff] }
 0x2cd   : > { %v1934_v30 = vmul.f32 %v19548_v7, %v1894_v58  ;;  %2601 = vrot.lane.b32.xlu1 %v19886_v57, %s18239_s27  ;;  %v2532_v5 = vpop.permute.xlu1 %2531  ;;  %v2496_v7 = vrot.slane %v19778_v28, 1  ;;  %v2482_v58 = vrot.slane %v22247_v20, 1 }
 0x2ce   : > { %v2006_v53 = vadd.f32 %v19602_v62, %v1967_v35  ;;  %v19900_v8 = vsel %vm2617_vm7, %v19161_v12, %v2532_v5 }
 0x2cf   : > { %v1966_v17 = vadd.f32 %v1934_v30, %v1889_v31  ;;  %v22248_v30 = vld [vmem:[#allocation32_spill] sm:$0xff]  ;;  %v19938_v35 = vsel %vm2454_vm6, %v2481_v13, %v2482_v58 }
 0x2d0   : > { %v2038_v46 = vmax.f32 %v2006_v53, 0.0 }
 0x2d1   : > { %v2005_v40 = vadd.f32 %v19602_v62, %v1966_v17  ;;  %2605 = vrot.lane.b32.xlu1 %v19895_v11, %s18239_s27  ;;  %v2497_v62 = vrot.slane %v19772_v16, 1  ;;  %v2487_v17 = vrot.slane %v19625_v29, 1 }
 0x2d2   : > { %v2564_v26 = vpop.permute.xlu0 %2563 }
 0x2d3   : > { %v2037_v19 = vmax.f32 %v2005_v40, 0.0  ;;  %v2692_v63 = vsel %vm2617_vm7, %v19765_v21, %v2564_v26  ;;  %v19909_v52 = vsel %vm2454_vm6, %v2496_v7, %v2497_v62  ;;  %v2493_v7 = vrot.slane %v19749_v34, 1 }
 0x2d4   : > { %3205 = vmatprep.mubr.bf16.mxu0 %v2692_v63  ;;  %v2494_v26 = vrot.slane %v19741_v38, 1 }
 0x2d5   : > { %v2054_v60 = vpack.c.bf16 %v2038_v46, %v2037_v19  ;;  %3206 = vmatmul.mubr.bf16.gmra.mxu0 %v19900_v8  ;;  %2609 = vrot.lane.b32.xlu1 %v19909_v52, %s18239_s27 }
 0x2d7   : > { %v2161_v12 = vshrl.u32 %v2054_v60, 16  ;;  %v2164_v61 = vshll.u32 %v2054_v60, 16  ;;  %v19957_v60 = vsel %vm2454_vm6, %v2493_v7, %v2494_v26 }
 0x2d9   : > { %v2163_v55 = vrot.slane %v2161_v12, 7  ;;  %2611 = vrot.lane.b32.xlu1 %v19916_v22, %s18239_s27  ;;  %v2534_v16 = vpop.permute.xlu1 %2533 }
 0x2da   : > { %v19929_v43 = vsel %vm2617_vm7, %v19267_v48, %v2534_v16  ;;  %v22249_v48 = vld [vmem:[#allocation52_spill] sm:$0xff] }
 0x2db   : > { %v2166_v49 = vor.u32 %v2164_v61, %v2163_v55  ;;  %v2488_v24 = vrot.slane %v22249_v48, 1  ;;  %v2233_v53 = vsel %vm18822_vm4, %v2163_v55, 0 }
 0x2dc   : > { %v2566_v25 = vpop.permute.xlu0 %2565  ;;  %v2510_v63 = vshll.u32 %v2233_v53, 16 }
 0x2dd   : > { %v2696_v33 = vsel %vm2617_vm7, %v19797_v44, %v2566_v25  ;;  %v19924_v10 = vsel %vm18822_vm4, 0, %v2166_v49  ;;  %v19949_v40 = vsel %vm2454_vm6, %v2487_v17, %v2488_v24  ;;  %v22250_v49 = vld [vmem:[#allocation35_spill] sm:$0xff] }
 0x2de   : > { %3213 = vmatprep.mubr.bf16.mxu0 %v2696_v33  ;;  %2581 = vrot.lane.b32.xlu0 %v19924_v10, %s18239_s27  ;;  %v2505_v5 = vshll.u32 %v19924_v10, 16  ;;  %v2503_v19 = vshrl.u32 %v19924_v10, 16  ;;  %v2512_v38 = vrot.slane %v2510_v63, 1  ;;  %v2516_v16 = vrot.slane %v19924_v10, 1 }
 0x2df   : > { %3214 = vmatmul.mubr.bf16.gmra.mxu0 %v19929_v43  ;;  %v2517_v33 = vrot.slane %v2233_v53, 1 }
 0x2e0   : > { %v2584_v31 = vpop.permute.xlu0 %2583  ;;  %v2507_v46 = vrot.slane %v2505_v5, 1 }
 0x2e1   : > { %v2732_v37 = vsel %vm2617_vm7, %v22248_v30, %v2584_v31 }
 0x2e2   : > { %3319 = vmatmul.mubr.bf16.vlgmr.msra.gmra.mxu1 %v2732_v37  ;;  %2599 = vrot.lane.b32.xlu0 %v19938_v35, %s18239_s27  ;;  %v2508_v6 = vor.u32 %v2507_v46, %v2503_v19  ;;  %v22251_v37 = vld [vmem:[#allocation36_spill] sm:$0xff] }
 0x2e3   : > { %3326 = vmatprep.mubr.bf16.mxu1 %v19806_v45 }
 0x2e4   : > { %v2536_v45 = vpop.permute.xlu0 %2535  ;;  %v19966_v61 = vsel %vm2234_vm5, %v2508_v6, %v2512_v38  ;;  %vm5296_vm5 = vsmask.f32 3328 }
 0x2e5   : > { %v2643_v54 = vsel %vm2617_vm7, %v22242_v50, %v2536_v45  ;;  %v19975_v50 = vsel %vm2454_vm6, %v2516_v16, %v2517_v33  ;;  %vm5297_vm6 = vsmask.f32 7440 }
 0x2e6   : > { %2603 = vrot.lane.b32.xlu0 %v19949_v40, %s18239_s27 }
 0x2e9   : > { %v2568_v62 = vpop.permute.xlu1 %2567 }
 0x2ea   : > { %v2700_v12 = vsel %vm2617_vm7, %v19864_v14, %v2568_v62  ;;  %2607 = vrot.lane.b32.xlu0 %v19957_v60, %s18239_s27 }
 0x2eb   : > { %3221 = vmatprep.mubr.bf16.mxu0 %v2700_v12 }
 0x2ec   : > { %3222 = vmatmul.mubr.bf16.gmra.mxu0 %v2643_v54 }
 0x2ed   : > { %v2586_v55 = vpop.permute.xlu1 %2585 }
 0x2ee   : > { %v2736_v25 = vsel %vm2617_vm7, %v22250_v49, %v2586_v55  ;;  %2615 = vrot.lane.b32.xlu0 %v19966_v61, %s18239_s27 }
 0x2ef   : > { %3327 = vmatmul.mubr.bf16.gmra.mxu1 %v2736_v25 }
 0x2f0   : > { %3334 = vmatprep.mubr.bf16.mxu1 %v19828_v4 }
 0x2f1   : > { %v2538_v13 = vpop.permute.xlu1 %2537 }
 0x2f2   : > { %2613 = vrot.lane.b32.xlu0 %v19975_v50, %s18239_s27  ;;  %v2570_v20 = vpop.permute.xlu0 %2569  ;;  %v2646_v31 = vsel %vm2617_vm7, %v22246_v15, %v2538_v13  ;;  %v22252_v15 = vld [vmem:[#allocation37_spill] sm:$0xff] }
 0x2f3   : > { %v2704_v58 = vsel %vm2617_vm7, %v19938_v35, %v2570_v20  ;;  %v22255_v13 = vld [vmem:[#allocation41_spill] sm:$0xff] }
 0x2f4   : > { %3229 = vmatprep.mubr.bf16.mxu0 %v2704_v58 }
 0x2f5   : > { %3230 = vmatmul.mubr.bf16.gmra.mxu0 %v2646_v31 }
 0x2f6   : > { %v2588_v30 = vpop.permute.xlu0 %2587 }
 0x2f7   : > { %v2740_v4 = vsel %vm2617_vm7, %v22251_v37, %v2588_v30 }
 0x2f8   : > { %3335 = vmatmul.mubr.bf16.gmra.mxu1 %v2740_v4  ;;  %v22256_v4 = vld [vmem:[#allocation44_spill] sm:$0xff] }
 0x2f9   : > { %3342 = vmatprep.mubr.bf16.mxu1 %v19871_v47 }
 0x2fa   : > { %v2540_v17 = vpop.permute.xlu0 %2539 }
 0x2fb   : > { %v2649_v24 = vsel %vm2617_vm7, %v22244_v3, %v2540_v17  ;;  %v22253_v3 = vld [vmem:[#allocation38_spill] sm:$0xff] }
 0x305   : > { %v2572_v5 = vpop.permute.xlu1 %2571 }
 0x306   : > { %v2708_v48 = vsel %vm2617_vm7, %v19886_v57, %v2572_v5 }
 0x307   : > { %3237 = vmatprep.mubr.bf16.mxu0 %v2708_v48 }
 0x308   : > { %3238 = vmatmul.mubr.bf16.gmra.mxu0 %v2649_v24 }
 0x309   : > { %v2590_v53 = vpop.permute.xlu1 %2589 }
 0x30a   : > { %v2744_v7 = vsel %vm2617_vm7, %v22252_v15, %v2590_v53  ;;  %v22257_v53 = vld [vmem:[#allocation47_spill] sm:$0xff] }
 0x30b   : > { %3343 = vmatmul.mubr.bf16.gmra.mxu1 %v2744_v7 }
 0x30c   : > { %3350 = vmatprep.mubr.bf16.mxu1 %v19900_v8 }
 0x30d   : > { %v2542_v46 = vpop.permute.xlu1 %2541 }
 0x30e   : > { %v2652_v19 = vsel %vm2617_vm7, %v19625_v29, %v2542_v46  ;;  %v22254_v29 = vld [vmem:[#allocation39_spill] sm:$0xff] }
 0x311   : > { %v2574_v26 = vpop.permute.xlu0 %2573 }
 0x312   : > { %v2712_v47 = vsel %vm2617_vm7, %v19949_v40, %v2574_v26  ;;  %v22258_v26 = vld [vmem:[#allocation51_spill] sm:$0xff] }
 0x313   : > { %3245 = vmatprep.mubr.bf16.mxu0 %v2712_v47 }
 0x314   : > { %3246 = vmatmul.mubr.bf16.gmra.mxu0 %v2652_v19 }
 0x315   : > { %v2592_v63 = vpop.permute.xlu0 %2591 }
 0x316   : > { %v2748_v45 = vsel %vm2617_vm7, %v22253_v3, %v2592_v63 }
 0x317   : > { %3351 = vmatmul.mubr.bf16.gmra.mxu1 %v2748_v45 }
 0x318   : > { %3358 = vmatprep.mubr.bf16.mxu1 %v19929_v43 }
 0x319   : > { %v2544_v62 = vpop.permute.xlu0 %2543 }
 0x31a   : > { %v2576_v6 = vpop.permute.xlu1 %2575  ;;  %v2655_v12 = vsel %vm2617_vm7, %v19703_v1, %v2544_v62 }
 0x31b   : > { %v2716_v8 = vsel %vm2617_vm7, %v19895_v11, %v2576_v6 }
 0x31c   : > { %3253 = vmatprep.mubr.bf16.mxu0 %v2716_v8 }
 0x31d   : > { %3254 = vmatmul.mubr.bf16.gmra.mxu0 %v2655_v12 }
 0x31e   : > { %v2594_v38 = vpop.permute.xlu1 %2593 }
 0x31f   : > { %v2752_v55 = vsel %vm2617_vm7, %v22254_v29, %v2594_v38 }
 0x320   : > { %3359 = vmatmul.mubr.bf16.gmra.mxu1 %v2752_v55  ;;  %v2578_v16 = vpop.permute.xlu0 %2577 }
 0x321   : > { %3366 = vmatprep.mubr.bf16.mxu1 %v2643_v54  ;;  %v2720_v43 = vsel %vm2617_vm7, %v19957_v60, %v2578_v16 }
 0x322   : > { %v2546_v49 = vpop.permute.xlu1 %2545  ;;  %3261 = vmatprep.mubr.bf16.mxu0 %v2720_v43 }
 0x323   : > { %v2658_v25 = vsel %vm2617_vm7, %v19749_v34, %v2546_v49 }
 0x324   : > { %v2596_v33 = vpop.permute.xlu0 %2595 }
 0x325   : > { %3262 = vmatmul.mubr.bf16.gmra.mxu0 %v2658_v25  ;;  %v2756_v1 = vsel %vm2617_vm7, %v22255_v13, %v2596_v33 }
 0x328   : > { %3367 = vmatmul.mubr.bf16.gmra.mxu1 %v2756_v1  ;;  %v2548_v20 = vpop.permute.xlu0 %2547 }
 0x329   : > { %3374 = vmatprep.mubr.bf16.mxu1 %v2646_v31  ;;  %v2661_v30 = vsel %vm2617_vm7, %v19778_v28, %v2548_v20 }
 0x333   : > { %v2580_v58 = vpop.permute.xlu1 %2579 }
 0x334   : > { %v2724_v54 = vsel %vm2617_vm7, %v19909_v52, %v2580_v58 }
 0x335   : > { %3269 = vmatprep.mubr.bf16.mxu0 %v2724_v54 }
 0x336   : > { %3270 = vmatmul.mubr.bf16.gmra.mxu0 %v2661_v30 }
 0x337   : > { %v2598_v37 = vpop.permute.xlu1 %2597 }
 0x338   : > { %v2760_v34 = vsel %vm2617_vm7, %v22256_v4, %v2598_v37 }
 0x339   : > { %3375 = vmatmul.mubr.bf16.gmra.mxu1 %v2760_v34 }
 0x33a   : > { %3382 = vmatprep.mubr.bf16.mxu1 %v2649_v24 }
 0x33b   : > { %v2550_v17 = vpop.permute.xlu1 %2549 }
 0x33c   : > { %v2664_v48 = vsel %vm2617_vm7, %v19847_v56, %v2550_v17 }
 0x33f   : > { %v2602_v7 = vpop.permute.xlu1 %2601 }
 0x343   : > { %v2606_v45 = vpop.permute.xlu1 %2605 }
 0x347   : > { %v2610_v16 = vpop.permute.xlu1 %2609 }
 0x34b   : > { %v2612_v1 = vpop.permute.xlu1 %2611 }
 0x350   : > { %v2582_v5 = vpop.permute.xlu0 %2581 }
 0x351   : > { %v2728_v31 = vsel %vm2617_vm7, %v19916_v22, %v2582_v5 }
 0x352   : > { %3277 = vmatprep.mubr.bf16.mxu0 %v2728_v31 }
 0x353   : > { %3278 = vmatmul.mubr.bf16.gmra.mxu0 %v2664_v48 }
 0x354   : > { %16810 = vmatprep.mubr.msk.bf16.mxu0 %vm2617_vm7, %v19462_v0  ;;  %v2600_v28 = vpop.permute.xlu0 %2599  ;;  %v2768_v0 = vsel %vm2617_vm7, %v22258_v26, %v2602_v7 }
 0x355   : > { %v2764_v15 = vsel %vm2617_vm7, %v22257_v53, %v2600_v28 }
 0x356   : > { %3383 = vmatmul.mubr.bf16.gmra.mxu1 %v2764_v15 }
 0x357   : > { %3390 = vmatprep.mubr.bf16.mxu1 %v2652_v19  ;;  %v15860_v24 = vpop.f32.mrf.mxu0 }
 0x358   : > { %v2604_v63 = vpop.permute.xlu0 %2603 }
 0x359   : > { %v15861_v46 = vpop.f32.mrf.mxu0 }
 0x35a   : > { %v20030_v56 = vadd.f32 %v15861_v46, %v15860_v24 }
 0x35b   : > { %16811 = vmatmul.mubr.msk.bf16.vlgmr.msra.gmra.mxu0 %vm2617_vm7, %v22238_v32  ;;  %v20034_v47 = vpop.f32.mrf.mxu0 }
 0x35c   : > { %16814 = vmatprep.mubr.msk.bf16.mxu0 %vm2617_vm7, %v19644_v51  ;;  %v2772_v51 = vsel %vm2617_vm7, %v19672_v59, %v2604_v63 }
 0x35d   : > { %v20040_v32 = vpop.f32.mrf.mxu0 }
 0x35e   : > { %3391 = vmatmul.mubr.bf16.gmra.mxu1 %v2768_v0 }
 0x35f   : > { %3398 = vmatprep.mubr.bf16.mxu1 %v2655_v12  ;;  %v2608_v12 = vpop.permute.xlu0 %2607 }
 0x363   : > { %16815 = vmatmul.mubr.msk.bf16.gmra.mxu0 %vm2617_vm7, %v19722_v2  ;;  %v2776_v2 = vsel %vm2617_vm7, %v19733_v23, %v2606_v45  ;;  %v2780_v23 = vsel %vm2617_vm7, %v19785_v41, %v2608_v12  ;;  %v2616_v49 = vpop.permute.xlu0 %2615  ;;  %v2784_v41 = vsel %vm2617_vm7, %v19809_v9, %v2610_v16  ;;  %v2788_v9 = vsel %vm2617_vm7, %v19874_v42, %v2612_v1 }
 0x364   : > { %16818 = vmatprep.mubr.msk.bf16.mxu0 %vm2617_vm7, %v19765_v21 }
 0x365   : > { %v15866_v19 = vpop.f32.mrf.mxu0 }
 0x366   : > { %3399 = vmatmul.mubr.bf16.gmra.mxu1 %v2772_v51 }
 0x367   : > { %3406 = vmatprep.mubr.bf16.mxu1 %v2658_v25  ;;  %v15867_v3 = vpop.f32.mrf.mxu0  ;;  %v2795_v25 = vsel %vm2617_vm7, %v19924_v10, %v2616_v49  ;;  %v2614_v58 = vpop.permute.xlu0 %2613 }
 0x368   : > { %v20044_v62 = vadd.f32 %v15867_v3, %v15866_v19  ;;  %v2792_v42 = vsel %vm2617_vm7, %v19966_v61, %v2614_v58 }
 0x369   : > { %v20048_v6 = vpop.f32.mrf.mxu0 }
 0x36b   : > { %16819 = vmatmul.mubr.msk.bf16.gmra.mxu0 %vm2617_vm7, %v19797_v44  ;;  %v20054_v21 = vpop.f32.mrf.mxu0 }
 0x36c   : > { %16822 = vmatprep.mubr.msk.bf16.mxu0 %vm2617_vm7, %v19864_v14 }
 0x36d   : > { %v15872_v59 = vpop.f32.mrf.mxu0 }
 0x36e   : > { %3407 = vmatmul.mubr.bf16.gmra.mxu1 %v2776_v2 }
 0x36f   : > { %3414 = vmatprep.mubr.bf16.mxu1 %v2661_v30  ;;  %v15873_v8 = vpop.f32.mrf.mxu0 }
 0x370   : > { %v20056_v38 = vadd.f32 %v15873_v8, %v15872_v59 }
 0x371   : > { %v20060_v44 = vpop.f32.mrf.mxu0 }
 0x373   : > { %16823 = vmatmul.mubr.msk.bf16.gmra.mxu0 %vm2617_vm7, %v19938_v35  ;;  %v20066_v14 = vpop.f32.mrf.mxu0 }
 0x374   : > { %16826 = vmatprep.mubr.msk.bf16.mxu0 %vm2617_vm7, %v19886_v57 }
 0x375   : > { %v15878_v29 = vpop.f32.mrf.mxu0 }
 0x376   : > { %3415 = vmatmul.mubr.bf16.gmra.mxu1 %v2780_v23 }
 0x377   : > { %3422 = vmatprep.mubr.bf16.mxu1 %v2664_v48  ;;  %v15879_v55 = vpop.f32.mrf.mxu0 }
 0x378   : > { %v20068_v43 = vadd.f32 %v15879_v55, %v15878_v29 }
 0x379   : > { %v20072_v35 = vpop.f32.mrf.mxu0 }
 0x37b   : > { %16827 = vmatmul.mubr.msk.bf16.gmra.mxu0 %vm2617_vm7, %v19949_v40  ;;  %v20078_v57 = vpop.f32.mrf.mxu0 }
 0x37c   : > { %16830 = vmatprep.mubr.msk.bf16.mxu0 %vm2617_vm7, %v19895_v11 }
 0x37d   : > { %v15884_v33 = vpop.f32.mrf.mxu0 }
 0x37e   : > { %3423 = vmatmul.mubr.bf16.gmra.mxu1 %v2784_v41 }
 0x37f   : > { %3430 = vmatprep.mubr.bf16.mxu1 %v2795_v25  ;;  %v15885_v13 = vpop.f32.mrf.mxu0 }
 0x380   : > { %v20082_v20 = vadd.f32 %v15885_v13, %v15884_v33 }
 0x381   : > { %v20086_v40 = vpop.f32.mrf.mxu0 }
 0x383   : > { %16831 = vmatmul.mubr.msk.bf16.gmra.mxu0 %vm2617_vm7, %v19957_v60  ;;  %v20092_v11 = vpop.f32.mrf.mxu0 }
 0x384   : > { %16834 = vmatprep.mubr.msk.bf16.mxu0 %vm2617_vm7, %v19909_v52 }
 0x386   : > { %3431 = vmatmul.mubr.bf16.gmra.mxu1 %v2788_v9 }
 0x387   : > { %14902 = vmatprep.mubr.msk.bf16.mxu1 %vm19655_vm8, %v19315_v36  ;;  %v15890_v10 = vpop.f32.mrf.mxu0  ;;  %vm20690_vm8 = vmor %vm5296_vm5, %vm5297_vm6  ;;  %vm7448_vm6 = vsmask.f32 1280 }
 0x388   : > { %vm20771_vm5 = vmor %vm5411_vm15, %vm5412_vm0  ;;  %vm7453_vm0 = vsmask.f32 7448 }
 0x389   : > { %v15891_v60 = vpop.f32.mrf.mxu0 }
 0x38a   : > { %v20099_v54 = vadd.f32 %v15891_v60, %v15890_v10 }
 0x38b   : > { %16835 = vmatmul.mubr.msk.bf16.gmra.mxu0 %vm2617_vm7, %v19916_v22  ;;  %v20103_v52 = vpop.f32.mrf.mxu0 }
 0x38c   : > { %16838 = vmatprep.mubr.msk.bf16.mxu0 %vm2617_vm7, %v19975_v50 }
 0x38d   : > { %v20107_v30 = vpop.f32.mrf.mxu0 }
 0x38e   : > { %3439 = vmatmul.mubr.bf16.gmra.mxu1 %v2792_v42 }
 0x393   : > { %16839 = vmatmul.mubr.msk.bf16.gmra.mxu0 %vm2617_vm7, %v18744_v18 }
 0x395   : > { %v15896_v36 = vpop.f32.mrf.mxu0 }
 0x397   : > { %v15897_v39 = vpop.f32.mrf.mxu0 }
 0x398   : > { %v20111_v22 = vadd.f32 %v15897_v39, %v15896_v36 }
 0x399   : > { %v20113_v37 = vpop.f32.mrf.mxu0 }
 0x39b   : > { %v20115_v4 = vpop.f32.mrf.mxu0 }
 0x39f   : > { %v15902_v50 = vpop.f32.mrf.mxu0 }
 0x3a1   : > { %v15903_v34 = vpop.f32.mrf.mxu0 }
 0x3a2   : > { %v20117_v17 = vadd.f32 %v15903_v34, %v15902_v50  ;;  %v20119_v5 = vpop.f32.mrf.mxu1 }
 0x3a3   : > { %v20121_v61 = vpop.f32.mrf.mxu0 }
 0x3a4   : > { %v20123_v31 = vpop.f32.mrf.mxu1 }
 0x3a5   : > { %v20125_v48 = vpop.f32.mrf.mxu0 }
 0x3a6   : > { %v20127_v28 = vpop.f32.mrf.mxu1 }
 0x3a8   : > { %v20133_v7 = vpop.f32.mrf.mxu1 }
 0x3ac   : > { %v15908_v18 = vpop.f32.mrf.mxu0 }
 0x3ae   : > { %v15909_v53 = vpop.f32.mrf.mxu0 }
 0x3af   : > { %v20129_v15 = vadd.f32 %v15909_v53, %v15908_v18  ;;  %v20135_v46 = vpop.f32.mrf.mxu1 }
 0x3b0   : > { %v20131_v24 = vpop.f32.mrf.mxu0 }
 0x3b1   : > { %v20139_v63 = vpop.f32.mrf.mxu1 }
 0x3b2   : > { %v20137_v26 = vpop.f32.mrf.mxu0 }
 0x3b3   : > { %v20143_v3 = vpop.f32.mrf.mxu1 }
 0x3b5   : > { %v15914_v0 = vpop.f32.mrf.mxu0  ;;  %v20145_v45 = vpop.f32.mrf.mxu1 }
 0x3b7   : > { %v15915_v51 = vpop.f32.mrf.mxu0 }
 0x3b8   : > { %v20141_v19 = vadd.f32 %v15915_v51, %v15914_v0  ;;  %v20147_v2 = vpop.f32.mrf.mxu1 }
 0x3b9   : > { %v20149_v59 = vpop.f32.mrf.mxu0 }
 0x3ba   : > { %v20151_v8 = vpop.f32.mrf.mxu1 }
 0x3bb   : > { %v20153_v12 = vpop.f32.mrf.mxu0 }
 0x3bc   : > { %v20155_v29 = vpop.f32.mrf.mxu1 }
 0x3be   : > { %v20159_v49 = vpop.f32.mrf.mxu1 }
 0x3c8   : > { %v15920_v23 = vpop.f32.mrf.mxu0 }
 0x3ca   : > { %v15921_v55 = vpop.f32.mrf.mxu0 }
 0x3cb   : > { %v20157_v16 = vadd.f32 %v15921_v55, %v15920_v23  ;;  %v20161_v41 = vpop.f32.mrf.mxu1 }
 0x3cc   : > { %v20163_v25 = vpop.f32.mrf.mxu0 }
 0x3cd   : > { %22259 = vst [vmem:[#allocation50_spill] sm:$0xff] %v20157_v16  ;;  %v20165_v33 = vpop.f32.mrf.mxu1 }
 0x3ce   : > { %v20167_v13 = vpop.f32.mrf.mxu0 }
 0x3cf   : > { %v20169_v9 = vpop.f32.mrf.mxu1 }
 0x3d1   : > { %v20175_v42 = vpop.f32.mrf.mxu1 }
 0x3d4   : > { %v15926_v1 = vpop.f32.mrf.mxu0 }
 0x3d6   : > { %v15927_v10 = vpop.f32.mrf.mxu0 }
 0x3d7   : > { %v20171_v58 = vadd.f32 %v15927_v10, %v15926_v1  ;;  %v20179_v39 = vpop.f32.mrf.mxu1 }
 0x3d8   : > { %v20173_v60 = vpop.f32.mrf.mxu0 }
 0x3d9   : > { %22260 = vst [vmem:[#allocation40_spill] sm:$0xff] %v20171_v58  ;;  %22261 = vst [vmem:[#allocation33_spill] sm:$0xff] %v20173_v60  ;;  %v20181_v18 = vpop.f32.mrf.mxu1 }
 0x3da   : > { %v20177_v36 = vpop.f32.mrf.mxu0 }
 0x3db   : > { %22262 = vst [vmem:[#allocation34_spill] sm:$0xff] %v20177_v36  ;;  %v20189_v23 = vpop.f32.mrf.mxu1 }
 0x3dc   : > { %22266 = vst [vmem:[#allocation49_spill] sm:$0xff] %v20189_v23 }
 0x3dd   : > { %v15932_v50 = vpop.f32.mrf.mxu0  ;;  %v20191_v10 = vpop.f32.mrf.mxu1 }
 0x3df   : > { %v15933_v34 = vpop.f32.mrf.mxu0 }
 0x3e0   : > { %v20183_v53 = vadd.f32 %v15933_v34, %v15932_v50  ;;  %v20195_v58 = vpop.f32.mrf.mxu1 }
 0x3e1   : > { %v20185_v0 = vpop.f32.mrf.mxu0  ;;  %22268 = vst [vmem:[#allocation45_spill] sm:$0xff] %v20195_v58 }
 0x3e2   : > { %22263 = vst [vmem:[#allocation42_spill] sm:$0xff] %v20183_v53  ;;  %22264 = vst [vmem:[#allocation43_spill] sm:$0xff] %v20185_v0  ;;  %v20197_v16 = vpop.f32.mrf.mxu1 }
 0x3e3   : > { %v20187_v51 = vpop.f32.mrf.mxu0  ;;  %22269 = vst [vmem:[#allocation32_spill] sm:$0xff] %v20197_v16 }
 0x3e4   : > { %22265 = vst [vmem:[#allocation48_spill] sm:$0xff] %v20187_v51  ;;  %v20201_v50 = vpop.f32.mrf.mxu1 }
 0x3e5   : > { %v15938_v55 = vpop.f32.mrf.mxu0  ;;  %22271 = vst [vmem:[#allocation35_spill] sm:$0xff] %v20201_v50 }
 0x3e6   : > { %v20205_v51 = vpop.f32.mrf.mxu1 }
 0x3e7   : > { %v15939_v1 = vpop.f32.mrf.mxu0 }
 0x3e8   : > { %v20193_v27 = vadd.f32 %v15939_v1, %v15938_v55  ;;  %v20207_v23 = vpop.f32.mrf.mxu1 }
 0x3e9   : > { %v20199_v36 = vpop.f32.mrf.mxu0  ;;  %22273 = vst [vmem:[#allocation37_spill] sm:$0xff] %v20207_v23  ;;  %v20224_v23 = vld [vmem:[%s22277_s23] ss:$0 sm:$0xff] }
 0x3ea   : > { %22267 = vst [vmem:[#allocation46_spill] sm:$0xff] %v20193_v27  ;;  %22270 = vst [vmem:[#allocation52_spill] sm:$0xff] %v20199_v36  ;;  %v20211_v55 = vpop.f32.mrf.mxu1  ;;  %v18240_v27 = vmov 1983009808  }
 0x3eb   : > { %v20203_v34 = vpop.f32.mrf.mxu0  ;;  %v3674_v16 = vunpack.c.l.s4 %v18240_v27  ;;  %v15883_v27 = vadd.f32 %v20078_v57, %v20072_v35 }
 0x3ec   : > { %22272 = vst [vmem:[#allocation36_spill] sm:$0xff] %v20203_v34  ;;  %v20213_v1 = vpop.f32.mrf.mxu1  ;;  %v15865_v34 = vadd.f32 %v20040_v32, %v20034_v47  ;;  %v3160_v47 = vadd.f32 %v20030_v56, %v20224_v23  ;;  %v3176_v56 = vadd.f32 %v20056_v38, %v20224_v23 }
 0x3ed   : > { %v3675_v36 = vunpack.c.0.s8 %v3674_v16  ;;  %v22278_v16 = vld [vmem:[#allocation28_spill] sm:$0xff] }
 0x3ee   : > { %v20215_v58 = vpop.f32.mrf.mxu1  ;;  %v3163_v32 = vadd.f32 %v15865_v34, %v20224_v23 }
 0x3ef   : > { %22275 = vst [vmem:[#allocation39_spill] sm:$0xff] %v20215_v58 }
 0x3f6   : > { %v15944_v53 = vpop.f32.mrf.mxu0 }
 0x3f8   : > { %v15945_v0 = vpop.f32.mrf.mxu0 }
 0x3f9   : > { %v20209_v60 = vadd.f32 %v15945_v0, %v15944_v53  ;;  %v20219_v50 = vpop.f32.mrf.mxu1  ;;  %v15871_v53 = vadd.f32 %v20054_v21, %v20048_v6  ;;  %v15877_v0 = vadd.f32 %v20066_v14, %v20060_v44  ;;  %v3168_v6 = vadd.f32 %v20044_v62, %v20224_v23 }
 0x3fa   : > { %22276 = vst [vmem:[#allocation41_spill] sm:$0xff] %v20219_v50  ;;  %v15889_v50 = vadd.f32 %v20092_v11, %v20086_v40  ;;  %v15895_v44 = vadd.f32 %v20107_v30, %v20103_v52  ;;  %v15901_v14 = vadd.f32 %v20115_v4, %v20113_v37  ;;  %v20249_v35 = vpop.f32.mrf.mxu0  ;;  %v15974_v40 = vadd.f32 %v20123_v31, %v20119_v5 }
 0x3fb   : > { %22274 = vst [vmem:[#allocation38_spill] sm:$0xff] %v20209_v60  ;;  %v20233_v60 = vsub.s32 %v3675_v36, %v22278_v16  ;;  %v20240_v58 = vpop.f32.mrf.mxu1  ;;  %v3171_v21 = vadd.f32 %v15871_v53, %v20224_v23  ;;  %v3179_v57 = vadd.f32 %v15877_v0, %v20224_v23  ;;  %v15907_v62 = vadd.f32 %v20125_v48, %v20121_v61  ;;  %v22280_v53 = vld [vmem:[#allocation33_spill] sm:$0xff]  ;;  %v22281_v0 = vld [vmem:[#allocation34_spill] sm:$0xff] }
 0x3fc   : > { %v3184_v11 = vadd.f32 %v20068_v43, %v20224_v23  ;;  %v3187_v52 = vadd.f32 %v15883_v27, %v20224_v23  ;;  %v3192_v30 = vadd.f32 %v20082_v20, %v20224_v23  ;;  %v15977_v37 = vadd.f32 %v20133_v7, %v20127_v28  ;;  %v15948_v7 = vpop.f32.mrf.mxu0 }
 0x3fd   : > { %22279 = vst [vmem:[#allocation44_spill] sm:$0xff] %v20233_v60  ;;  %v3195_v38 = vadd.f32 %v15889_v50, %v20224_v23  ;;  %v3200_v4 = vadd.f32 %v20099_v54, %v20224_v23  ;;  %v15980_v5 = vadd.f32 %v20139_v63, %v20135_v46  ;;  %v15913_v61 = vadd.f32 %v20137_v26, %v20131_v24  ;;  %v16017_v43 = vpop.f32.mrf.mxu1 }
 0x3fe   : > { %v3203_v31 = vadd.f32 %v15895_v44, %v20224_v23  ;;  %v3208_v20 = vadd.f32 %v20111_v22, %v20224_v23  ;;  %v20276_v48 = vadd.f32 %v15901_v14, %v20224_v23  ;;  %v15983_v28 = vadd.f32 %v20145_v45, %v20143_v3  ;;  %v22287_v14 = vld [vmem:[#allocation48_spill] sm:$0xff] }
 0x3ff   : > { %v20282_v54 = vadd.f32 %v20117_v17, %v20224_v23  ;;  %v20285_v46 = vadd.f32 %v15907_v62, %v20224_v23  ;;  %v15986_v24 = vadd.f32 %v20151_v8, %v20147_v2  ;;  %v3321_v26 = vadd.f32 %v15974_v40, %v3160_v47  ;;  %v22288_v40 = vld [vmem:[#allocation35_spill] sm:$0xff] }
 0x400   : > { %v20291_v22 = vadd.f32 %v20129_v15, %v20224_v23  ;;  %v15919_v63 = vadd.f32 %v20153_v12, %v20149_v59  ;;  %v15989_v3 = vadd.f32 %v20159_v49, %v20155_v29  ;;  %v20297_v17 = vadd.f32 %v15977_v37, %v3163_v32  ;;  %v16018_v15 = vpop.f32.mrf.mxu1 }
 0x401   : > { %v20300_v36 = vadd.f32 %v15913_v61, %v20224_v23  ;;  %v15992_v2 = vadd.f32 %v20165_v33, %v20161_v41  ;;  %v15925_v8 = vadd.f32 %v20167_v13, %v20163_v25  ;;  %v3329_v50 = vadd.f32 %v15980_v5, %v3168_v6  ;;  %v22282_v33 = vld [vmem:[#allocation49_spill] sm:$0xff]  ;;  %v22289_v61 = vld [vmem:[#allocation40_spill] sm:$0xff] }
 0x402   : > { %v20308_v59 = vadd.f32 %v20141_v19, %v20224_v23  ;;  %v15995_v12 = vadd.f32 %v20175_v42, %v20169_v9  ;;  %v15998_v29 = vadd.f32 %v20181_v18, %v20179_v39  ;;  %v3332_v34 = vadd.f32 %v15983_v28, %v3171_v21  ;;  %v22283_v9 = vld [vmem:[#allocation50_spill] sm:$0xff]  ;;  %v22284_v39 = vld [vmem:[#allocation45_spill] sm:$0xff]  ;;  %v22285_v18 = vld [vmem:[#allocation32_spill] sm:$0xff] }
 0x403   : > { %v15931_v41 = vadd.f32 %v22281_v0, %v22280_v53  ;;  %v16001_v25 = vadd.f32 %v20191_v10, %v22282_v33  ;;  %v20318_v47 = vadd.f32 %v15986_v24, %v3176_v56  ;;  %v20321_v19 = vadd.f32 %v15919_v63, %v20224_v23  ;;  %v22286_v10 = vld [vmem:[#allocation43_spill] sm:$0xff]  ;;  %v22290_v24 = vld [vmem:[#allocation37_spill] sm:$0xff] }
 0x404   : > { %v20325_v42 = vadd.f32 %v22283_v9, %v20224_v23  ;;  %v16004_v32 = vadd.f32 %v22285_v18, %v22284_v39  ;;  %v20329_v21 = vadd.f32 %v15989_v3, %v3179_v57  ;;  %v20332_v44 = vadd.f32 %v15925_v8, %v20224_v23  ;;  %v22294_v9 = vld [vmem:[#allocation42_spill] sm:$0xff] }
 0x405   : > { %v15937_v56 = vadd.f32 %v22287_v14, %v22286_v10  ;;  %v16007_v62 = vadd.f32 %v20205_v51, %v22288_v40  ;;  %v20338_v5 = vadd.f32 %v15992_v2, %v3184_v11  ;;  %v20342_v28 = vadd.f32 %v22289_v61, %v20224_v23  ;;  %v22292_v51 = vld [vmem:[#allocation36_spill] sm:$0xff]  ;;  %v22293_v11 = vld [vmem:[#allocation39_spill] sm:$0xff] }
 0x406   : > { %v16010_v57 = vadd.f32 %v20211_v55, %v22290_v24  ;;  %v20346_v3 = vadd.f32 %v15995_v12, %v3187_v52  ;;  %v20351_v8 = vadd.f32 %v15931_v41, %v20224_v23  ;;  %v16013_v2 = vadd.f32 %v22293_v11, %v20213_v1  ;;  %v22295_v52 = vld [vmem:[#allocation41_spill] sm:$0xff]  ;;  %v22296_v1 = vld [vmem:[#allocation46_spill] sm:$0xff] }
 0x407   : > { %v20357_v33 = vadd.f32 %v16001_v25, %v3195_v38  ;;  %v20361_v55 = vadd.f32 %v22294_v9, %v20224_v23  ;;  %v15949_v12 = vadd.f32 %v15948_v7, %v20249_v35  ;;  %v20366_v41 = vadd.f32 %v16004_v32, %v3200_v4 }
 0x408   : > { %v20369_v39 = vadd.f32 %v15937_v56, %v20224_v23  ;;  %v20373_v18 = vadd.f32 %v22296_v1, %v20224_v23  ;;  %v20375_v10 = vadd.f32 %v16007_v62, %v3203_v31  ;;  %v16019_v14 = vadd.f32 %v16018_v15, %v16017_v43 }
 0x409   : > { %v20377_v24 = vadd.f32 %v16010_v57, %v3208_v20  ;;  %v20383_v56 = vadd.f32 %v16013_v2, %v20276_v48  ;;  %v20390_v43 = vadd.f32 %v15949_v12, %v20224_v23 }
 0x40b   : > { %22299 = vst [vmem:[#allocation51_spill] sm:$0xff] %v20390_v43 }
 0x413   : > { %v15950_v45 = vpop.f32.mrf.mxu0 }
 0x415   : > { %v15951_v49 = vpop.f32.mrf.mxu0 }
 0x416   : > { %v15952_v13 = vadd.f32 %v15951_v49, %v15950_v45  ;;  %v16020_v27 = vpop.f32.mrf.mxu1  ;;  %v20348_v45 = vadd.f32 %v15998_v29, %v3192_v30  ;;  %v22291_v49 = vld [vmem:[#allocation52_spill] sm:$0xff]  ;;  %v16016_v30 = vadd.f32 %v20240_v58, %v22295_v52 }
 0x417   : > { %v15953_v6 = vpop.f32.mrf.mxu0  ;;  %v15943_v53 = vadd.f32 %v22292_v51, %v22291_v49  ;;  %v20403_v51 = vadd.f32 %v16019_v14, %v20285_v46 }
 0x418   : > { %v16021_v37 = vpop.f32.mrf.mxu1  ;;  %v20393_v20 = vadd.f32 %v16016_v30, %v20282_v54  ;;  %v20397_v48 = vadd.f32 %v15952_v13, %v20224_v23 }
 0x419   : > { %v15954_v63 = vpop.f32.mrf.mxu0  ;;  %v16022_v40 = vadd.f32 %v16021_v37, %v16020_v27  ;;  %v20380_v35 = vadd.f32 %v15943_v53, %v20224_v23 }
 0x41a   : > { %v16023_v0 = vpop.f32.mrf.mxu1  ;;  %v15955_v61 = vadd.f32 %v15954_v63, %v15953_v6  ;;  %22300 = vst [vmem:[#allocation33_spill] sm:$0xff] %v20397_v48 }
 0x41b   : > { %v16812_v29 = vpop.f32.mrf.mxu0  ;;  %v20406_v53 = vadd.f32 %v16022_v40, %v20291_v22 }
 0x41c   : > { %v3490_v38 = vadd.f32 %v16812_v29, %v3329_v50  ;;  %v16024_v25 = vpop.f32.mrf.mxu1  ;;  %v22297_v50 = vld [vmem:[#allocation38_spill] sm:$0xff]  ;;  %v20400_v57 = vadd.f32 %v15955_v61, %v20224_v23 }
 0x41d   : > { %v3481_v58 = vpop.f32.mrf.mxu0  ;;  %v20387_v49 = vadd.f32 %v22297_v50, %v20224_v23  ;;  %v16025_v31 = vadd.f32 %v16024_v25, %v16023_v0 }
 0x41e   : > { %v3610_v4 = vmax.f32 %v3490_v38, 0.0  ;;  %v3482_v7 = vadd.f32 %v3481_v58, %v3321_v26  ;;  %v16026_v32 = vpop.f32.mrf.mxu1  ;;  %22301 = vst [vmem:[#allocation34_spill] sm:$0xff] %v20400_v57 }
 0x41f   : > { %22298 = vst [vmem:[#allocation47_spill] sm:$0xff] %v20387_v49  ;;  %v16813_v15 = vpop.f32.mrf.mxu0  ;;  %v20413_v23 = vadd.f32 %v16025_v31, %v20300_v36 }
 0x420   : > { %v3706_v27 = vcombine.high %v3610_v4, %v3610_v4  ;;  %v3713_v6 = vrot.slane %v3610_v4, %v20233_v60  ;;  %v3608_v26 = vmax.f32 %v3482_v7, 0.0  ;;  %v3493_v62 = vadd.f32 %v16813_v15, %v3332_v34  ;;  %v16027_v37 = vpop.f32.mrf.mxu1 }
 0x421   : > { %v3484_v63 = vpop.f32.mrf.mxu0  ;;  %v20410_v13 = vadd.f32 %v16027_v37, %v16026_v32 }
 0x422   : > { %v3720_v54 = vrot.slane %v3706_v27, %v20233_v60  ;;  %v3721_v11 = vcombine.high %v3713_v6, %v3713_v6  ;;  %v14983_v2 = vrot.slane %v3713_v6, 9  ;;  %v3672_v0 = vcombine.high %v3608_v26, %v3608_v26 }
 0x423   : > { %v3679_v34 = vrot.slane %v3608_v26, %v20233_v60  ;;  %v3611_v9 = vmax.f32 %v3493_v62, 0.0  ;;  %v3485_v12 = vadd.f32 %v3484_v63, %v20297_v17  ;;  %v16816_v32 = vpop.f32.mrf.mxu0 }
 0x424   : > { %v3722_v52 = vcombine.high %v3720_v54, %v3720_v54  ;;  %v14984_v30 = vrot.slane %v3721_v11, 9  ;;  %v14985_v46 = vrot.slane %v3720_v54, 9  ;;  %v3686_v22 = vrot.slane %v3672_v0, %v20233_v60 }
 0x425   : > { %v3687_v29 = vcombine.high %v3679_v34, %v3679_v34  ;;  %v14919_v1 = vrot.slane %v3679_v34, 9  ;;  %v3723_v38 = vcombine.high %v3611_v9, %v3611_v9  ;;  %v4792_v14 = vmax.f32 %v3713_v6, %v14983_v2 }
 0x426   : > { %v14986_v25 = vrot.slane %v3722_v52, 9  ;;  %v4793_v40 = vmax.f32 %v3721_v11, %v14984_v30  ;;  %v3730_v61 = vrot.slane %v3611_v9, %v20233_v60  ;;  %v3688_v58 = vcombine.high %v3686_v22, %v3686_v22 }
 0x427   : > { %v14920_v4 = vrot.slane %v3687_v29, 9  ;;  %v14921_v7 = vrot.slane %v3686_v22, 9  ;;  %v4536_v36 = vmax.f32 %v3679_v34, %v14919_v1  ;;  %v4794_v50 = vmax.f32 %v3720_v54, %v14985_v46  ;;  %v20419_v1 = vpop.f32.mrf.mxu0 }
 0x428   : > { %v3737_v31 = vrot.slane %v3723_v38, %v20233_v60  ;;  %v3738_v17 = vcombine.high %v3730_v61, %v3730_v61  ;;  %v14987_v15 = vrot.slane %v3730_v61, 9  ;;  %v14922_v27 = vrot.slane %v3688_v58, 9 }
 0x429   : > { %v4537_v26 = vmax.f32 %v3687_v29, %v14920_v4  ;;  %v4538_v62 = vmax.f32 %v3686_v22, %v14921_v7  ;;  %v4856_v37 = vmax.f32 %v4536_v36, %v4792_v14  ;;  %v4795_v6 = vmax.f32 %v3722_v52, %v14986_v25  ;;  %v16029_v4 = vpop.f32.mrf.mxu1 }
 0x42a   : > { %v3739_v63 = vcombine.high %v3737_v31, %v3737_v31  ;;  %v14988_v11 = vrot.slane %v3738_v17, 9  ;;  %v14989_v2 = vrot.slane %v3737_v31, 9  ;;  %v4539_v0 = vmax.f32 %v3688_v58, %v14922_v27 }
 0x42b   : > { %v4857_v9 = vmax.f32 %v4537_v26, %v4793_v40  ;;  %v4858_v34 = vmax.f32 %v4538_v62, %v4794_v50  ;;  %v4920_v30 = vpack.c.bf16 %v4856_v37, %v4856_v37  ;;  %v4796_v46 = vmax.f32 %v3730_v61, %v14987_v15  ;;  %v16817_v26 = vpop.f32.mrf.mxu0 }
 0x42c   : > { %v14990_v54 = vrot.slane %v3739_v63, 9  ;;  %v4797_v38 = vmax.f32 %v3738_v17, %v14988_v11  ;;  %v3609_v16 = vmax.f32 %v3485_v12, 0.0  ;;  %v4859_v57 = vmax.f32 %v4539_v0, %v4795_v6 }
 0x42d   : > { %v4921_v29 = vpack.c.bf16 %v4857_v9, %v4857_v9  ;;  %v4922_v22 = vpack.c.bf16 %v4858_v34, %v4858_v34  ;;  %v5048_v14 = vunpack.c.l.b16 %v4920_v30  ;;  %v4798_v7 = vmax.f32 %v3737_v31, %v14989_v2  ;;  %v16030_v31 = vpop.f32.mrf.mxu1  ;;  %v3500_v34 = vpop.f32.mrf.mxu0 }
 0x42e   : > { %v3689_v52 = vcombine.high %v3609_v16, %v3609_v16  ;;  %v3696_v25 = vrot.slane %v3609_v16, %v20233_v60  ;;  %v3506_v58 = vadd.f32 %v16816_v32, %v20338_v5  ;;  %v4923_v40 = vpack.c.bf16 %v4859_v57, %v4859_v57 }
 0x42f   : > { %v5049_v36 = vunpack.c.l.b16 %v4921_v29  ;;  %v5050_v50 = vunpack.c.l.b16 %v4922_v22  ;;  %v4799_v27 = vmax.f32 %v3739_v63, %v14990_v54  ;;  %v5112_v37 = vrot.slane %v5048_v14, 7  ;;  %v16820_v49 = vpop.f32.mrf.mxu0 }
 0x430   : > { %v3703_v61 = vrot.slane %v3689_v52, %v20233_v60  ;;  %v3704_v17 = vcombine.high %v3696_v25, %v3696_v25  ;;  %v14923_v12 = vrot.slane %v3696_v25, 9  ;;  %v3614_v15 = vmax.f32 %v3506_v58, 0.0 }
 0x431   : > { %v5051_v62 = vunpack.c.l.b16 %v4923_v40  ;;  %v5113_v6 = vrot.slane %v5049_v36, 6  ;;  %v5116_v11 = vrot.slane %v5050_v50, 5 }
 0x432   : > { %v3705_v2 = vcombine.high %v3703_v61, %v3703_v61  ;;  %v14924_v0 = vrot.slane %v3704_v17, 9  ;;  %v14925_v16 = vrot.slane %v3703_v61, 9  ;;  %v4540_v9 = vmax.f32 %v3696_v25, %v14923_v12  ;;  %v16032_v25 = vpop.f32.mrf.mxu1 }
 0x433   : > { %v5115_v5 = vsel %vm5114_vm9, %v5113_v6, %v5112_v37  ;;  %v5119_v57 = vrot.slane %v5051_v62, 4  ;;  %v3774_v32 = vcombine.high %v3614_v15, %v3614_v15  ;;  %v3781_v63 = vrot.slane %v3614_v15, %v20233_v60 }
 0x434   : > { %v5118_v30 = vsel %vm5117_vm10, %v5116_v11, %v5115_v5  ;;  %v14926_v54 = vrot.slane %v3705_v2, 9  ;;  %v4541_v29 = vmax.f32 %v3704_v17, %v14924_v0  ;;  %v4542_v22 = vmax.f32 %v3703_v61, %v14925_v16 }
 0x435   : > { %v4860_v14 = vmax.f32 %v4540_v9, %v4796_v46  ;;  %v5121_v52 = vsel %vm5120_vm11, %v5119_v57, %v5118_v30  ;;  %v3788_v58 = vrot.slane %v3774_v32, %v20233_v60  ;;  %v3789_v40 = vcombine.high %v3781_v63, %v3781_v63 }
 0x436   : > { %v4543_v36 = vmax.f32 %v3705_v2, %v14926_v54  ;;  %v4861_v50 = vmax.f32 %v4541_v29, %v4797_v38  ;;  %v4862_v12 = vmax.f32 %v4542_v22, %v4798_v7  ;;  %v14991_v62 = vrot.slane %v3781_v63, 9  ;;  %v16033_v38 = vpop.f32.mrf.mxu1 }
 0x437   : > { %v4924_v37 = vpack.c.bf16 %v4860_v14, %v4860_v14  ;;  %v3790_v6 = vcombine.high %v3788_v58, %v3788_v58  ;;  %v14992_v15 = vrot.slane %v3789_v40, 9  ;;  %v14993_v43 = vrot.slane %v3788_v58, 9 }
 0x438   : > { %v4863_v11 = vmax.f32 %v4543_v36, %v4799_v27  ;;  %v4925_v5 = vpack.c.bf16 %v4861_v50, %v4861_v50  ;;  %v4926_v17 = vpack.c.bf16 %v4862_v12, %v4862_v12  ;;  %v20431_v46 = vadd.f32 %v20410_v13, %v20308_v59  ;;  %v3513_v13 = vpop.f32.mrf.mxu0 }
 0x439   : > { %v5052_v61 = vunpack.c.l.b16 %v4924_v37  ;;  %v14994_v0 = vrot.slane %v3790_v6, 9  ;;  %v4800_v16 = vmax.f32 %v3781_v63, %v14991_v62  ;;  %v20433_v9 = vadd.f32 %v16030_v31, %v16029_v4 }
 0x43a   : > { %v4927_v7 = vpack.c.bf16 %v4863_v11, %v4863_v11  ;;  %v20435_v2 = vunpack.c.l.b16 %v4925_v5  ;;  %v4801_v57 = vmax.f32 %v3789_v40, %v14992_v15  ;;  %v3498_v32 = vadd.f32 %v20419_v1, %v20318_v47 }
 0x43b   : > { %v20439_v27 = vunpack.c.l.b16 %v4926_v17  ;;  %v5122_v30 = vrot.slane %v5052_v61, 3  ;;  %v4802_v54 = vmax.f32 %v3788_v58, %v14993_v43  ;;  %v3509_v59 = vadd.f32 %v16817_v26, %v20346_v3 }
 0x43c   : > { %v20442_v29 = vunpack.c.l.b16 %v4927_v7  ;;  %v4803_v63 = vmax.f32 %v3790_v6, %v14994_v0  ;;  %v3612_v4 = vmax.f32 %v3498_v32, 0.0  ;;  %v20444_v31 = vadd.f32 %v16033_v38, %v16032_v25 }
 0x43d   : > { %v20447_v22 = vsel %vm5123_vm12, %v5122_v30, %v5121_v52  ;;  %v3615_v14 = vmax.f32 %v3509_v59, 0.0  ;;  %v3501_v40 = vadd.f32 %v3500_v34, %v20329_v21  ;;  %v3522_v47 = vadd.f32 %v16820_v49, %v20366_v41 }
 0x43e   : > { %v3740_v43 = vcombine.high %v3612_v4, %v3612_v4  ;;  %v3747_v3 = vrot.slane %v3612_v4, %v20233_v60  ;;  %v3514_v26 = vadd.f32 %v3513_v13, %v20348_v45 }
 0x43f   : > { %v3791_v58 = vcombine.high %v3615_v14, %v3615_v14  ;;  %v3798_v36 = vrot.slane %v3615_v14, %v20233_v60  ;;  %v3613_v25 = vmax.f32 %v3501_v40, 0.0  ;;  %v20455_v50 = vmax.f32 %v3522_v47, 0.0  ;;  %v20462_v40 = vpop.f32.mrf.mxu0 }
 0x440   : > { %v3754_v52 = vrot.slane %v3740_v43, %v20233_v60  ;;  %v3755_v12 = vcombine.high %v3747_v3, %v3747_v3  ;;  %v14927_v62 = vrot.slane %v3747_v3, 9  ;;  %v20458_v21 = vmax.f32 %v3514_v26, 0.0 }
 0x441   : > { %v3805_v41 = vrot.slane %v3791_v58, %v20233_v60  ;;  %v3806_v49 = vcombine.high %v3798_v36, %v3798_v36  ;;  %v14995_v34 = vrot.slane %v3798_v36, 9  ;;  %v3757_v37 = vcombine.high %v3613_v25, %v3613_v25 }
 0x442   : > { %v3756_v6 = vcombine.high %v3754_v52, %v3754_v52  ;;  %v14928_v15 = vrot.slane %v3755_v12, 9  ;;  %v14929_v45 = vrot.slane %v3754_v52, 9  ;;  %v4544_v11 = vmax.f32 %v3747_v3, %v14927_v62 }
 0x443   : > { %v3807_v5 = vcombine.high %v3805_v41, %v3805_v41  ;;  %v14996_v17 = vrot.slane %v3806_v49, 9  ;;  %v14997_v61 = vrot.slane %v3805_v41, 9  ;;  %v4804_v0 = vmax.f32 %v3798_v36, %v14995_v34 }
 0x444   : > { %v14930_v38 = vrot.slane %v3756_v6, 9  ;;  %v4545_v7 = vmax.f32 %v3755_v12, %v14928_v15  ;;  %v4546_v32 = vmax.f32 %v3754_v52, %v14929_v45  ;;  %v4864_v30 = vmax.f32 %v4544_v11, %v4800_v16 }
 0x445   : > { %v14998_v59 = vrot.slane %v3807_v5, 9  ;;  %v4805_v13 = vmax.f32 %v3806_v49, %v14996_v17  ;;  %v4806_v4 = vmax.f32 %v3805_v41, %v14997_v61  ;;  %v3764_v14 = vrot.slane %v3613_v25, %v20233_v60  ;;  %v3516_v25 = vpop.f32.mrf.mxu0 }
 0x446   : > { %v4547_v47 = vmax.f32 %v3756_v6, %v14930_v38  ;;  %v4865_v43 = vmax.f32 %v4545_v7, %v4801_v57  ;;  %v4866_v26 = vmax.f32 %v4546_v32, %v4802_v54  ;;  %v4928_v58 = vpack.c.bf16 %v4864_v30, %v4864_v30 }
 0x447   : > { %v4807_v3 = vmax.f32 %v3807_v5, %v14998_v59  ;;  %v3771_v62 = vrot.slane %v3757_v37, %v20233_v60  ;;  %v3772_v1 = vcombine.high %v3764_v14, %v3764_v14  ;;  %v14931_v36 = vrot.slane %v3764_v14, 9 }
 0x448   : > { %v4867_v34 = vmax.f32 %v4547_v47, %v4803_v63  ;;  %v4929_v12 = vpack.c.bf16 %v4865_v43, %v4865_v43  ;;  %v4930_v52 = vpack.c.bf16 %v4866_v26, %v4866_v26  ;;  %v5056_v16 = vunpack.c.l.b16 %v4928_v58  ;;  %v16035_v63 = vpop.f32.mrf.mxu1  ;;  %v16824_v26 = vpop.f32.mrf.mxu0 }
 0x449   : > { %v3773_v15 = vcombine.high %v3771_v62, %v3771_v62  ;;  %v14932_v49 = vrot.slane %v3772_v1, 9  ;;  %v14933_v41 = vrot.slane %v3771_v62, 9  ;;  %v4548_v45 = vmax.f32 %v3764_v14, %v14931_v36 }
 0x44a   : > { %v4931_v11 = vpack.c.bf16 %v4867_v34, %v4867_v34  ;;  %v5057_v17 = vunpack.c.l.b16 %v4929_v12  ;;  %v5058_v6 = vunpack.c.l.b16 %v4930_v52  ;;  %v5131_v57 = vrot.slane %v5056_v16, 7 }
 0x44b   : > { %v14934_v54 = vrot.slane %v3773_v15, 9  ;;  %v4549_v61 = vmax.f32 %v3772_v1, %v14932_v49  ;;  %v4550_v5 = vmax.f32 %v3771_v62, %v14933_v41  ;;  %v4868_v38 = vmax.f32 %v4548_v45, %v4804_v0  ;;  %v16036_v49 = vpop.f32.mrf.mxu1 }
 0x44c   : > { %v5059_v37 = vunpack.c.l.b16 %v4931_v11  ;;  %v5132_v7 = vrot.slane %v5057_v17, 6  ;;  %v5134_v32 = vrot.slane %v5058_v6, 5  ;;  %v3842_v30 = vcombine.high %v20455_v50, %v20455_v50 }
 0x44d   : > { %v4551_v59 = vmax.f32 %v3773_v15, %v14934_v54  ;;  %v4869_v47 = vmax.f32 %v4549_v61, %v4805_v13  ;;  %v4870_v43 = vmax.f32 %v4550_v5, %v4806_v4  ;;  %v4932_v14 = vpack.c.bf16 %v4868_v38, %v4868_v38 }
 0x44e   : > { %v5133_v58 = vsel %vm5114_vm9, %v5132_v7, %v5131_v57  ;;  %v5136_v36 = vrot.slane %v5059_v37, 4  ;;  %v3849_v1 = vrot.slane %v20455_v50, %v20233_v60  ;;  %v3856_v0 = vrot.slane %v3842_v30, %v20233_v60  ;;  %v3529_v50 = vpop.f32.mrf.mxu0 }
 0x44f   : > { %v5135_v62 = vsel %vm5117_vm10, %v5134_v32, %v5133_v58  ;;  %v4871_v34 = vmax.f32 %v4551_v59, %v4807_v3  ;;  %v4933_v12 = vpack.c.bf16 %v4869_v47, %v4869_v47  ;;  %v4934_v52 = vpack.c.bf16 %v4870_v43, %v4870_v43 }
 0x450   : > { %v5060_v16 = vunpack.c.l.b16 %v4932_v14  ;;  %v5137_v15 = vsel %vm5120_vm11, %v5136_v36, %v5135_v62  ;;  %v3857_v13 = vcombine.high %v3849_v1, %v3849_v1  ;;  %v3858_v4 = vcombine.high %v3856_v0, %v3856_v0  ;;  %v16825_v36 = vpop.f32.mrf.mxu0 }
 0x451   : > { %v4935_v41 = vpack.c.bf16 %v4871_v34, %v4871_v34  ;;  %v20473_v45 = vunpack.c.l.b16 %v4933_v12  ;;  %v20475_v11 = vunpack.c.l.b16 %v4934_v52  ;;  %v14999_v17 = vrot.slane %v3849_v1, 9 }
 0x452   : > { %v5138_v6 = vrot.slane %v5060_v16, 3  ;;  %v15000_v57 = vrot.slane %v3857_v13, 9  ;;  %v15001_v54 = vrot.slane %v3856_v0, 9  ;;  %v15002_v61 = vrot.slane %v3858_v4, 9 }
 0x453   : > { %v20478_v5 = vunpack.c.l.b16 %v4935_v41  ;;  %v20481_v37 = vadd.f32 %v16036_v49, %v16035_v63  ;;  %v4808_v30 = vmax.f32 %v3849_v1, %v14999_v17  ;;  %v3808_v43 = vcombine.high %v20458_v21, %v20458_v21  ;;  %v17143_v63 = vld [vmem:[#allocation6 + $0x118] sm:$0xff]  }
 0x454   : > { %v20484_v7 = vsel %vm5123_vm12, %v5138_v6, %v5137_v15  ;;  %v4809_v59 = vmax.f32 %v3857_v13, %v15000_v57  ;;  %v4810_v47 = vmax.f32 %v3856_v0, %v15001_v54  ;;  %v3815_v14 = vrot.slane %v20458_v21, %v20233_v60  ;;  %16842 = vmatprep.subr.bf16.mxu0 %v17143_v63  ;;  %v20506_v54 = vpop.f32.mrf.mxu1 }
 0x455   : > { %v3525_v58 = vadd.f32 %v20462_v40, %v20375_v10  ;;  %v4811_v62 = vmax.f32 %v3858_v4, %v15002_v61  ;;  %v3517_v34 = vadd.f32 %v3516_v25, %v20357_v33  ;;  %v3538_v12 = vadd.f32 %v16824_v26, %v20393_v20  ;;  %16843 = vmatpush3.bf16.msra.mxu0 %v17143_v63 }
 0x456   : > { %v3530_v1 = vadd.f32 %v3529_v50, %v20377_v24  ;;  %v3822_v0 = vrot.slane %v3808_v43, %v20233_v60  ;;  %v3823_v52 = vcombine.high %v3815_v14, %v3815_v14  ;;  %v14935_v16 = vrot.slane %v3815_v14, 9 }
 0x457   : > { %v3619_v15 = vmax.f32 %v3525_v58, 0.0  ;;  %v3617_v13 = vmax.f32 %v3517_v34, 0.0  ;;  %v20497_v21 = vmax.f32 %v3538_v12, 0.0  ;;  %v20502_v10 = vadd.f32 %v16825_v36, %v20403_v51 }
 0x458   : > { %v20499_v49 = vmax.f32 %v3530_v1, 0.0  ;;  %v3824_v33 = vcombine.high %v3822_v0, %v3822_v0  ;;  %v14936_v40 = vrot.slane %v3823_v52, 9  ;;  %v14937_v20 = vrot.slane %v3822_v0, 9 }
 0x459   : > { %v4552_v25 = vmax.f32 %v3815_v14, %v14935_v16  ;;  %v3859_v24 = vcombine.high %v3619_v15, %v3619_v15  ;;  %v3866_v26 = vrot.slane %v3619_v15, %v20233_v60  ;;  %v3825_v4 = vcombine.high %v3617_v13, %v3617_v13 }
 0x45a   : > { %v3832_v41 = vrot.slane %v3617_v13, %v20233_v60  ;;  %v14938_v17 = vrot.slane %v3824_v33, 9  ;;  %v4553_v50 = vmax.f32 %v3823_v52, %v14936_v40  ;;  %v4554_v6 = vmax.f32 %v3822_v0, %v14937_v20 }
 0x45b   : > { %v4872_v57 = vmax.f32 %v4552_v25, %v4808_v30  ;;  %v3873_v51 = vrot.slane %v3859_v24, %v20233_v60  ;;  %v3874_v61 = vcombine.high %v3866_v26, %v3866_v26  ;;  %v15003_v43 = vrot.slane %v3866_v26, 9  ;;  %v16039_v24 = vpop.f32.mrf.mxu1 }
 0x45c   : > { %v3839_v58 = vrot.slane %v3825_v4, %v20233_v60  ;;  %v4555_v36 = vmax.f32 %v3824_v33, %v14938_v17  ;;  %v4873_v14 = vmax.f32 %v4553_v50, %v4809_v59  ;;  %v4874_v63 = vmax.f32 %v4554_v6, %v4810_v47 }
 0x45d   : > { %v4936_v34 = vpack.c.bf16 %v4872_v57, %v4872_v57  ;;  %v3875_v12 = vcombine.high %v3873_v51, %v3873_v51  ;;  %v15004_v1 = vrot.slane %v3874_v61, 9  ;;  %v15005_v16 = vrot.slane %v3873_v51, 9 }
 0x45e   : > { %v4812_v15 = vmax.f32 %v3866_v26, %v15003_v43  ;;  %v4875_v13 = vmax.f32 %v4555_v36, %v4811_v62  ;;  %v4937_v52 = vpack.c.bf16 %v4873_v14, %v4873_v14  ;;  %v4938_v0 = vpack.c.bf16 %v4874_v63, %v4874_v63  ;;  %v16041_v63 = vpop.f32.mrf.mxu1 }
 0x45f   : > { %v5064_v30 = vunpack.c.l.b16 %v4936_v34  ;;  %v15006_v40 = vrot.slane %v3875_v12, 9  ;;  %v4813_v20 = vmax.f32 %v3874_v61, %v15004_v1  ;;  %v4814_v25 = vmax.f32 %v3873_v51, %v15005_v16  ;;  %v17144_v61 = vld [vmem:[#allocation6 + $0x78] sm:$0xff]  }
 0x460   : > { %v3840_v32 = vcombine.high %v3832_v41, %v3832_v41  ;;  %v4939_v38 = vpack.c.bf16 %v4875_v13, %v4875_v13  ;;  %v5065_v3 = vunpack.c.l.b16 %v4937_v52  ;;  %v5066_v4 = vunpack.c.l.b16 %v4938_v0  ;;  %16088 = vmatprep.subr.bf16.mxu1 %v17144_v61 }
 0x461   : > { %v5144_v33 = vrot.slane %v5064_v30, 7  ;;  %v4815_v59 = vmax.f32 %v3875_v12, %v15006_v40  ;;  %v3841_v47 = vcombine.high %v3839_v58, %v3839_v58  ;;  %v14939_v17 = vrot.slane %v3832_v41, 9 }
 0x462   : > { %v14940_v50 = vrot.slane %v3840_v32, 9  ;;  %v5067_v6 = vunpack.c.l.b16 %v4939_v38  ;;  %v5145_v57 = vrot.slane %v5065_v3, 6  ;;  %v5147_v26 = vrot.slane %v5066_v4, 5 }
 0x463   : > { %v14941_v62 = vrot.slane %v3839_v58, 9  ;;  %v14942_v43 = vrot.slane %v3841_v47, 9  ;;  %v4556_v36 = vmax.f32 %v3832_v41, %v14939_v17  ;;  %v3910_v51 = vcombine.high %v20497_v21, %v20497_v21  ;;  %v16042_v17 = vpop.f32.mrf.mxu1 }
 0x464   : > { %v4557_v14 = vmax.f32 %v3840_v32, %v14940_v50  ;;  %v5146_v34 = vsel %vm5114_vm9, %v5145_v57, %v5144_v33  ;;  %v5149_v1 = vrot.slane %v5067_v6, 4  ;;  %v3917_v12 = vrot.slane %v20497_v21, %v20233_v60 }
 0x465   : > { %v4558_v16 = vmax.f32 %v3839_v58, %v14941_v62  ;;  %v5148_v3 = vsel %vm5117_vm10, %v5147_v26, %v5146_v34  ;;  %v4559_v38 = vmax.f32 %v3841_v47, %v14942_v43  ;;  %v4876_v13 = vmax.f32 %v4556_v36, %v4812_v15 }
 0x466   : > { %v4877_v52 = vmax.f32 %v4557_v14, %v4813_v20  ;;  %v5150_v41 = vsel %vm5120_vm11, %v5149_v1, %v5148_v3  ;;  %v3924_v0 = vrot.slane %v3910_v51, %v20233_v60  ;;  %v3925_v30 = vcombine.high %v3917_v12, %v3917_v12 }
 0x467   : > { %v4878_v32 = vmax.f32 %v4558_v16, %v4814_v25  ;;  %v4879_v40 = vmax.f32 %v4559_v38, %v4815_v59  ;;  %v4940_v4 = vpack.c.bf16 %v4876_v13, %v4876_v13  ;;  %v15007_v33 = vrot.slane %v3917_v12, 9  ;;  %v16044_v38 = vpop.f32.mrf.mxu1 }
 0x468   : > { %v4941_v58 = vpack.c.bf16 %v4877_v52, %v4877_v52  ;;  %v3926_v50 = vcombine.high %v3924_v0, %v3924_v0  ;;  %v15008_v6 = vrot.slane %v3925_v30, 9  ;;  %v15009_v57 = vrot.slane %v3924_v0, 9 }
 0x469   : > { %v4942_v21 = vpack.c.bf16 %v4878_v32, %v4878_v32  ;;  %v20519_v15 = vadd.f32 %v16039_v24, %v20506_v54  ;;  %v4943_v20 = vpack.c.bf16 %v4879_v40, %v4879_v40  ;;  %v5068_v25 = vunpack.c.l.b16 %v4940_v4  ;;  %v3532_v40 = vpop.f32.mrf.mxu0 }
 0x46a   : > { %v5069_v47 = vunpack.c.l.b16 %v4941_v58  ;;  %v15010_v62 = vrot.slane %v3926_v50, 9  ;;  %v4816_v43 = vmax.f32 %v3917_v12, %v15007_v33  ;;  %v20521_v36 = vadd.f32 %v16042_v17, %v16041_v63 }
 0x46b   : > { %v5070_v26 = vunpack.c.l.b16 %v4942_v21  ;;  %v5151_v59 = vrot.slane %v5068_v25, 3  ;;  %v4817_v51 = vmax.f32 %v3925_v30, %v15008_v6  ;;  %v3876_v61 = vcombine.high %v20499_v49, %v20499_v49 }
 0x46c   : > { %v5153_v14 = vrot.slane %v5069_v47, 2  ;;  %v4818_v1 = vmax.f32 %v3924_v0, %v15009_v57  ;;  %v3883_v54 = vrot.slane %v20499_v49, %v20233_v60  ;;  %v3623_v24 = vmax.f32 %v20502_v10, 0.0 }
 0x46d   : > { %v5155_v34 = vrot.slane %v5070_v26, 1  ;;  %v20528_v16 = vunpack.c.l.b16 %v4943_v20  ;;  %v5152_v3 = vsel %vm5123_vm12, %v5151_v59, %v5150_v41  ;;  %v4819_v12 = vmax.f32 %v3926_v50, %v15010_v62  ;;  %v16045_v20 = vpop.f32.mrf.mxu1  ;;  %v16828_v59 = vpop.f32.mrf.mxu0 }
 0x46e   : > { %v3890_v63 = vrot.slane %v3876_v61, %v20233_v60  ;;  %v5154_v13 = vsel %vm5126_vm13, %v5153_v14, %v5152_v3  ;;  %v3891_v52 = vcombine.high %v3883_v54, %v3883_v54  ;;  %v14943_v32 = vrot.slane %v3883_v54, 9  ;;  %v17146_v3 = vld [vmem:[#allocation6 + $0x110] sm:$0xff]  }
 0x46f   : > { %v3927_v30 = vcombine.high %v3623_v24, %v3623_v24  ;;  %v20534_v0 = vsel %vm5129_vm14, %v5155_v34, %v5154_v13  ;;  %v3934_v10 = vrot.slane %v3623_v24, %v20233_v60  ;;  %v3533_v62 = vadd.f32 %v3532_v40, %v20383_v56  ;;  %16844 = vmatprep.subr.bf16.mxu0 %v17146_v3 }
 0x470   : > { %v3892_v49 = vcombine.high %v3890_v63, %v3890_v63  ;;  %v14945_v4 = vrot.slane %v3890_v63, 9  ;;  %v14944_v58 = vrot.slane %v3891_v52, 9  ;;  %v4560_v33 = vmax.f32 %v3883_v54, %v14943_v32  ;;  %16845 = vmatpush3.bf16.msra.mxu0 %v17146_v3 }
 0x471   : > { %v3941_v17 = vrot.slane %v3927_v30, %v20233_v60  ;;  %v3942_v6 = vcombine.high %v3934_v10, %v3934_v10  ;;  %v15011_v57 = vrot.slane %v3934_v10, 9  ;;  %v20541_v30 = vadd.f32 %v16045_v20, %v16044_v38 }
 0x472   : > { %v14946_v21 = vrot.slane %v3892_v49, 9  ;;  %v4562_v50 = vmax.f32 %v3890_v63, %v14945_v4  ;;  %v4561_v25 = vmax.f32 %v3891_v52, %v14944_v58  ;;  %v4880_v47 = vmax.f32 %v4560_v33, %v4816_v43  ;;  %v17145_v52 = vld [vmem:[#allocation6 + $0x38] sm:$0xff]  }
 0x473   : > { %v3943_v26 = vcombine.high %v3941_v17, %v3941_v17  ;;  %v15012_v34 = vrot.slane %v3942_v6, 9  ;;  %v15013_v24 = vrot.slane %v3941_v17, 9  ;;  %v4820_v41 = vmax.f32 %v3934_v10, %v15011_v57  ;;  %16089 = vmatpush3.bf16.msra.mxu1 %v17145_v52 }
 0x474   : > { %v4563_v14 = vmax.f32 %v3892_v49, %v14946_v21  ;;  %v4882_v61 = vmax.f32 %v4562_v50, %v4818_v1  ;;  %v4881_v13 = vmax.f32 %v4561_v25, %v4817_v51  ;;  %v4944_v54 = vpack.c.bf16 %v4880_v47, %v4880_v47  ;;  %v3545_v49 = vpop.f32.mrf.mxu0 }
 0x475   : > { %v15014_v32 = vrot.slane %v3943_v26, 9  ;;  %v4821_v48 = vmax.f32 %v3942_v6, %v15012_v34  ;;  %v4822_v56 = vmax.f32 %v3941_v17, %v15013_v24  ;;  %v3621_v40 = vmax.f32 %v3533_v62, 0.0 }
 0x476   : > { %v4883_v63 = vmax.f32 %v4563_v14, %v4819_v12  ;;  %v4946_v4 = vpack.c.bf16 %v4882_v61, %v4882_v61  ;;  %v4945_v43 = vpack.c.bf16 %v4881_v13, %v4881_v13  ;;  %v5072_v58 = vunpack.c.l.b16 %v4944_v54  ;;  %v16047_v61 = vpop.f32.mrf.mxu1 }
 0x477   : > { %v4823_v21 = vmax.f32 %v3943_v26, %v15014_v32  ;;  %v3554_v51 = vadd.f32 %v16828_v59, %v20431_v46  ;;  %v3893_v12 = vcombine.high %v3621_v40, %v3621_v40  ;;  %v3900_v10 = vrot.slane %v3621_v40, %v20233_v60 }
 0x478   : > { %v4947_v1 = vpack.c.bf16 %v4883_v63, %v4883_v63  ;;  %v5074_v33 = vunpack.c.l.b16 %v4946_v4  ;;  %v5073_v38 = vunpack.c.l.b16 %v4945_v43  ;;  %v5157_v50 = vrot.slane %v5072_v58, 7 }
 0x479   : > { %v3626_v20 = vmax.f32 %v3554_v51, 0.0  ;;  %v3546_v25 = vadd.f32 %v3545_v49, %v20406_v53  ;;  %v3907_v47 = vrot.slane %v3893_v12, %v20233_v60  ;;  %v3908_v62 = vcombine.high %v3900_v10, %v3900_v10  ;;  %v16048_v49 = vpop.f32.mrf.mxu1 }
 0x47a   : > { %v5075_v6 = vunpack.c.l.b16 %v4947_v1  ;;  %v5160_v57 = vrot.slane %v5074_v33, 5  ;;  %v5158_v17 = vrot.slane %v5073_v38, 6  ;;  %v14947_v14 = vrot.slane %v3900_v10, 9 }
 0x47b   : > { %v3978_v34 = vcombine.high %v3626_v20, %v3626_v20  ;;  %v3985_v46 = vrot.slane %v3626_v20, %v20233_v60  ;;  %v3624_v59 = vmax.f32 %v3546_v25, 0.0  ;;  %v3909_v3 = vcombine.high %v3907_v47, %v3907_v47 }
 0x47c   : > { %v5162_v26 = vrot.slane %v5075_v6, 4  ;;  %v5159_v24 = vsel %vm5114_vm9, %v5158_v17, %v5157_v50  ;;  %v14948_v13 = vrot.slane %v3908_v62, 9  ;;  %v14949_v54 = vrot.slane %v3907_v47, 9 }
 0x47d   : > { %v5161_v32 = vsel %vm5117_vm10, %v5160_v57, %v5159_v24  ;;  %v4564_v63 = vmax.f32 %v3900_v10, %v14947_v14  ;;  %v3992_v53 = vrot.slane %v3978_v34, %v20233_v60  ;;  %v3993_v4 = vcombine.high %v3985_v46, %v3985_v46  ;;  %v16829_v24 = vpop.f32.mrf.mxu0 }
 0x47e   : > { %v14950_v52 = vrot.slane %v3909_v3, 9  ;;  %v4565_v43 = vmax.f32 %v3908_v62, %v14948_v13  ;;  %v4566_v58 = vmax.f32 %v3907_v47, %v14949_v54  ;;  %v5163_v40 = vsel %vm5120_vm11, %v5162_v26, %v5161_v32 }
 0x47f   : > { %v4884_v1 = vmax.f32 %v4564_v63, %v4820_v41  ;;  %v3994_v33 = vcombine.high %v3992_v53, %v3992_v53  ;;  %v15015_v51 = vrot.slane %v3985_v46, 9  ;;  %v15016_v38 = vrot.slane %v3993_v4, 9 }
 0x480   : > { %v4567_v50 = vmax.f32 %v3909_v3, %v14950_v52  ;;  %v4885_v12 = vmax.f32 %v4565_v43, %v4821_v48  ;;  %v4886_v6 = vmax.f32 %v4566_v58, %v4822_v56  ;;  %v15017_v20 = vrot.slane %v3992_v53, 9  ;;  %v17147_v3 = vld [vmem:[#allocation6 + $0x108] sm:$0xff]   ;;  %v17148_v48 = vld [vmem:[#allocation6 + $0x100] sm:$0xff]   ;;  %v17149_v56 = vld [vmem:[#allocation6 + $0x70] sm:$0xff]  }
 0x481   : > { %v22302_v10 = vpack.c.b16 %v20528_v16, %v20534_v0  ;;  %v4948_v17 = vpack.c.bf16 %v4884_v1, %v4884_v1  ;;  %v15018_v47 = vrot.slane %v3994_v33, 9  ;;  %v20559_v62 = vadd.f32 %v16048_v49, %v16047_v61  ;;  %v17150_v0 = vld [vmem:[#allocation6 + $0x30] sm:$0xff]   ;;  %16846 = vmatprep.subr.bf16.mxu0 %v17147_v3  ;;  %16090 = vmatprep.subr.bf16.mxu1 %v17149_v56 }
 0x482   : > { %v4887_v14 = vmax.f32 %v4567_v50, %v4823_v21  ;;  %v4949_v41 = vpack.c.bf16 %v4885_v12, %v4885_v12  ;;  %v4950_v26 = vpack.c.bf16 %v4886_v6, %v4886_v6  ;;  %v4824_v34 = vmax.f32 %v3985_v46, %v15015_v51  ;;  %16847 = vmatpush3.bf16.msra.mxu0 %v17147_v3 }
 0x483   : > { %v20557_v25 = vsel %vm18822_vm4, 0, %v22302_v10  ;;  %v5076_v13 = vunpack.c.l.b16 %v4948_v17  ;;  %v4825_v54 = vmax.f32 %v3993_v4, %v15016_v38  ;;  %v3944_v32 = vcombine.high %v3624_v59, %v3624_v59  ;;  %16091 = vmatpush3.bf16.msra.mxu1 %v17150_v0  ;;  %v3548_v38 = vpop.f32.mrf.mxu0  ;;  %16848 = vmatprep.subr.bf16.mxu0 %v17148_v48 }
 0x484   : > { %v3951_v16 = vrot.slane %v3624_v59, %v20233_v60  ;;  %v4951_v63 = vpack.c.bf16 %v4887_v14, %v4887_v14  ;;  %v5077_v52 = vunpack.c.l.b16 %v4949_v41  ;;  %v4826_v43 = vmax.f32 %v3992_v53, %v15017_v20 }
 0x485   : > { %v3396_v61 = vadd.f32 %v20433_v9, %v20321_v19  ;;  %v5164_v21 = vrot.slane %v5076_v13, 3  ;;  %v3958_v46 = vrot.slane %v3944_v32, %v20233_v60  ;;  %v20565_v4 = vunpack.c.l.b16 %v4950_v26 }
 0x486   : > { %v3959_v58 = vcombine.high %v3951_v16, %v3951_v16  ;;  %v14951_v49 = vrot.slane %v3951_v16, 9  ;;  %v5166_v1 = vrot.slane %v5077_v52, 2  ;;  %v4827_v59 = vmax.f32 %v3994_v33, %v15018_v47  ;;  %16849 = vmatpush3.bf16.msra.mxu0 %v17148_v48 }
 0x487   : > { %v3557_v51 = vadd.f32 %v16829_v24, %v3396_v61  ;;  %v5165_v53 = vsel %vm5123_vm12, %v5164_v21, %v5163_v40  ;;  %v3960_v50 = vcombine.high %v3958_v46, %v3958_v46  ;;  %v14953_v9 = vrot.slane %v3958_v46, 9  ;;  %v17151_v61 = vld [vmem:[#allocation6 + $0x68] sm:$0xff]  }
 0x488   : > { %v14952_v19 = vrot.slane %v3959_v58, 9  ;;  %v20568_v12 = vunpack.c.l.b16 %v4951_v63  ;;  %v20571_v6 = vsel %vm5126_vm13, %v5166_v1, %v5165_v53  ;;  %v4568_v20 = vmax.f32 %v3951_v16, %v14951_v49  ;;  %v17152_v21 = vld [vmem:[#allocation6 + $0x28] sm:$0xff]   ;;  %16092 = vmatprep.subr.bf16.mxu1 %v17151_v61  ;;  %v16050_v61 = vpop.f32.mrf.mxu1 }
 0x489   : > { %v3627_v10 = vmax.f32 %v3557_v51, 0.0  ;;  %v14954_v17 = vrot.slane %v3960_v50, 9  ;;  %v4570_v41 = vmax.f32 %v3958_v46, %v14953_v9  ;;  %v3549_v33 = vadd.f32 %v3548_v38, %v20413_v23  ;;  %16093 = vmatpush3.bf16.msra.mxu1 %v17152_v21 }
 0x48a   : > { %v4569_v14 = vmax.f32 %v3959_v58, %v14952_v19  ;;  %v5168_v47 = vrot.slane %v20565_v4, 1  ;;  %v4888_v26 = vmax.f32 %v4568_v20, %v4824_v34  ;;  %v3409_v53 = vadd.f32 %v20519_v15, %v20342_v28 }
 0x48b   : > { %v3995_v40 = vcombine.high %v3627_v10, %v3627_v10  ;;  %v4002_v24 = vrot.slane %v3627_v10, %v20233_v60  ;;  %v4571_v3 = vmax.f32 %v3960_v50, %v14954_v17  ;;  %v4890_v13 = vmax.f32 %v4570_v41, %v4826_v43  ;;  %v16832_v50 = vpop.f32.mrf.mxu0 }
 0x48c   : > { %v4889_v56 = vmax.f32 %v4569_v14, %v4825_v54  ;;  %v3625_v32 = vmax.f32 %v3549_v33, 0.0  ;;  %v4952_v0 = vpack.c.bf16 %v4888_v26, %v4888_v26 }
 0x48d   : > { %v4009_v16 = vrot.slane %v3995_v40, %v20233_v60  ;;  %v4010_v63 = vcombine.high %v4002_v24, %v4002_v24  ;;  %v15019_v52 = vrot.slane %v4002_v24, 9  ;;  %v4891_v46 = vmax.f32 %v4571_v3, %v4827_v59  ;;  %v3561_v21 = vpop.f32.mrf.mxu0 }
 0x48e   : > { %v4953_v23 = vpack.c.bf16 %v4889_v56, %v4889_v56  ;;  %v4954_v48 = vpack.c.bf16 %v4890_v13, %v4890_v13  ;;  %v3961_v58 = vcombine.high %v3625_v32, %v3625_v32  ;;  %v5080_v49 = vunpack.c.l.b16 %v4952_v0 }
 0x48f   : > { %v4011_v34 = vcombine.high %v4009_v16, %v4009_v16  ;;  %v15020_v1 = vrot.slane %v4010_v63, 9  ;;  %v15021_v51 = vrot.slane %v4009_v16, 9  ;;  %v4955_v38 = vpack.c.bf16 %v4891_v46, %v4891_v46 }
 0x490   : > { %v5081_v54 = vunpack.c.l.b16 %v4953_v23  ;;  %v5082_v43 = vunpack.c.l.b16 %v4954_v48  ;;  %v5170_v19 = vrot.slane %v5080_v49, 7  ;;  %v4828_v20 = vmax.f32 %v4002_v24, %v15019_v52 }
 0x491   : > { %v15022_v9 = vrot.slane %v4011_v34, 9  ;;  %v4829_v59 = vmax.f32 %v4010_v63, %v15020_v1  ;;  %v5083_v10 = vunpack.c.l.b16 %v4955_v38  ;;  %v3968_v41 = vrot.slane %v3625_v32, %v20233_v60 }
 0x492   : > { %v5171_v17 = vrot.slane %v5081_v54, 6  ;;  %v5173_v14 = vrot.slane %v5082_v43, 5  ;;  %v4830_v33 = vmax.f32 %v4009_v16, %v15021_v51  ;;  %v3975_v40 = vrot.slane %v3961_v58, %v20233_v60 }
 0x493   : > { %v4831_v26 = vmax.f32 %v4011_v34, %v15022_v9  ;;  %v3570_v3 = vadd.f32 %v16832_v50, %v3409_v53  ;;  %v5175_v13 = vrot.slane %v5083_v10, 4  ;;  %v3976_v28 = vcombine.high %v3968_v41, %v3968_v41  ;;  %v16051_v53 = vpop.f32.mrf.mxu1 }
 0x494   : > { %v5172_v56 = vsel %vm5114_vm9, %v5171_v17, %v5170_v19  ;;  %v14955_v15 = vrot.slane %v3968_v41, 9  ;;  %v3977_v24 = vcombine.high %v3975_v40, %v3975_v40  ;;  %v14957_v63 = vrot.slane %v3975_v40, 9 }
 0x495   : > { %v5174_v0 = vsel %vm5117_vm10, %v5173_v14, %v5172_v56  ;;  %v3630_v52 = vmax.f32 %v3570_v3, 0.0  ;;  %v14956_v46 = vrot.slane %v3976_v28, 9  ;;  %v3401_v16 = vadd.f32 %v20444_v31, %v20325_v42 }
 0x496   : > { %v4572_v23 = vmax.f32 %v3968_v41, %v14955_v15  ;;  %v5176_v32 = vsel %vm5120_vm11, %v5175_v13, %v5174_v0  ;;  %v14958_v48 = vrot.slane %v3977_v24, 9  ;;  %v4574_v58 = vmax.f32 %v3975_v40, %v14957_v63  ;;  %v17155_v63 = vld [vmem:[#allocation6 + $0x58] sm:$0xff]  }
 0x497   : > { %v4046_v49 = vcombine.high %v3630_v52, %v3630_v52  ;;  %v4053_v34 = vrot.slane %v3630_v52, %v20233_v60  ;;  %v4573_v1 = vmax.f32 %v3976_v28, %v14956_v46  ;;  %v3562_v38 = vadd.f32 %v3561_v21, %v3401_v16 }
 0x498   : > { %v4892_v51 = vmax.f32 %v4572_v23, %v4828_v20  ;;  %v22304_v54 = vrot.slane %v20435_v2, 2  ;;  %v4575_v50 = vmax.f32 %v3977_v24, %v14958_v48  ;;  %v4894_v19 = vmax.f32 %v4574_v58, %v4830_v33  ;;  %v17153_v24 = vld [vmem:[#allocation6 + $0x60] sm:$0xff]  }
 0x499   : > { %v4060_v9 = vrot.slane %v4046_v49, %v20233_v60  ;;  %v4061_v10 = vcombine.high %v4053_v34, %v4053_v34  ;;  %v4893_v42 = vmax.f32 %v4573_v1, %v4829_v59  ;;  %v15023_v17 = vrot.slane %v4053_v34, 9  ;;  %v17154_v59 = vld [vmem:[#allocation6 + $0x20] sm:$0xff]   ;;  %16094 = vmatprep.subr.bf16.mxu1 %v17153_v24  ;;  %v16053_v1 = vpop.f32.mrf.mxu1 }
 0x49a   : > { %v5127_v43 = vsel %vm5126_vm13, %v22304_v54, %v20447_v22  ;;  %v4956_v31 = vpack.c.bf16 %v4892_v51, %v4892_v51  ;;  %v3628_v14 = vmax.f32 %v3562_v38, 0.0  ;;  %v4895_v41 = vmax.f32 %v4575_v50, %v4831_v26  ;;  %16095 = vmatpush3.bf16.msra.mxu1 %v17154_v59  ;;  %v17156_v54 = vld [vmem:[#allocation6 + $0x18] sm:$0xff]  }
 0x49b   : > { %v4958_v20 = vpack.c.bf16 %v4894_v19, %v4894_v19  ;;  %v4062_v40 = vcombine.high %v4060_v9, %v4060_v9  ;;  %v15024_v3 = vrot.slane %v4061_v10, 9  ;;  %v20592_v56 = vadd.f32 %v16051_v53, %v16050_v61  ;;  %16096 = vmatprep.subr.bf16.mxu1 %v17155_v63 }
 0x49c   : > { %v4957_v2 = vpack.c.bf16 %v4893_v42, %v4893_v42  ;;  %v5084_v22 = vunpack.c.l.b16 %v4956_v31  ;;  %v15025_v13 = vrot.slane %v4060_v9, 9  ;;  %v4959_v28 = vpack.c.bf16 %v4895_v41, %v4895_v41 }
 0x49d   : > { %v5086_v33 = vunpack.c.l.b16 %v4958_v20  ;;  %v15026_v15 = vrot.slane %v4062_v40, 9  ;;  %v4832_v0 = vmax.f32 %v4053_v34, %v15023_v17  ;;  %v4833_v46 = vmax.f32 %v4061_v10, %v15024_v3 }
 0x49e   : > { %v5085_v52 = vunpack.c.l.b16 %v4957_v2  ;;  %v5177_v21 = vrot.slane %v5084_v22, 3  ;;  %v4012_v23 = vcombine.high %v3628_v14, %v3628_v14  ;;  %v5087_v26 = vunpack.c.l.b16 %v4959_v28  ;;  %v16054_v2 = vpop.f32.mrf.mxu1  ;;  %16097 = vmatpush3.bf16.msra.mxu1 %v17156_v54  ;;  %v17161_v54 = vld [vmem:[#allocation6 + $0x40] sm:$0xff]  }
 0x49f   : > { %v5181_v16 = vrot.slane %v5086_v33, 1  ;;  %v4834_v48 = vmax.f32 %v4060_v9, %v15025_v13  ;;  %v4019_v61 = vrot.slane %v3628_v14, %v20233_v60  ;;  %v22305_v34 = vrot.slane %v20439_v27, 1  ;;  %v17158_v13 = vld [vmem:[#allocation6 + $0x10] sm:$0xff]  }
 0x4a0   : > { %v5178_v58 = vsel %vm5123_vm12, %v5177_v21, %v5176_v32  ;;  %v5179_v49 = vrot.slane %v5085_v52, 2  ;;  %v4026_v51 = vrot.slane %v4012_v23, %v20233_v60  ;;  %v22306_v19 = vrot.slane %v20473_v45, 2  ;;  %v17157_v32 = vld [vmem:[#allocation6 + $0x50] sm:$0xff]   ;;  %v16833_v21 = vpop.f32.mrf.mxu0 }
 0x4a1   : > { %v5130_v38 = vsel %vm5129_vm14, %v22305_v34, %v5127_v43  ;;  %v4027_v53 = vcombine.high %v4019_v61, %v4019_v61  ;;  %v14959_v50 = vrot.slane %v4019_v61, 9  ;;  %v22307_v27 = vrot.slane %v20475_v11, 1  ;;  %16098 = vmatprep.subr.bf16.mxu1 %v17157_v32 }
 0x4a2   : > { %v5141_v9 = vsel %vm5126_vm13, %v22306_v19, %v20484_v7  ;;  %v5222_v10 = vpack.c.b16 %v20442_v29, %v5130_v38  ;;  %v5180_v42 = vsel %vm5126_vm13, %v5179_v49, %v5178_v58  ;;  %v4028_v31 = vcombine.high %v4026_v51, %v4026_v51  ;;  %16099 = vmatpush3.bf16.msra.mxu1 %v17158_v13  ;;  %v3564_v32 = vpop.f32.mrf.mxu0 }
 0x4a3   : > { %v14961_v17 = vrot.slane %v4026_v51, 9  ;;  %v5143_v43 = vsel %vm5129_vm14, %v22307_v27, %v5141_v9  ;;  %v5182_v14 = vsel %vm5129_vm14, %v5181_v16, %v5180_v42  ;;  %v14960_v41 = vrot.slane %v4027_v53, 9  ;;  %v20651_v9 = vpop.f32.mrf.mxu1 }
 0x4a4   : > { %v4576_v20 = vmax.f32 %v4019_v61, %v14959_v50  ;;  %v5223_v45 = vpack.c.b16 %v20478_v5, %v5143_v43  ;;  %v5226_v3 = vpack.c.b16 %v5087_v26, %v5182_v14  ;;  %v4835_v7 = vmax.f32 %v4062_v40, %v15026_v15  ;;  %v17159_v40 = vld [vmem:[#allocation6 + $0x48] sm:$0xff]  }
 0x4a5   : > { %v14962_v29 = vrot.slane %v4028_v31, 9  ;;  %v4578_v22 = vmax.f32 %v4026_v51, %v14961_v17  ;;  %v4577_v11 = vmax.f32 %v4027_v53, %v14960_v41  ;;  %v5238_v24 = vsel %vm18822_vm4, 0, %v5222_v10  ;;  %v17160_v51 = vld [vmem:[#allocation6 + $0x8] sm:$0xff]   ;;  %16100 = vmatprep.subr.bf16.mxu1 %v17159_v40 }
 0x4a6   : > { %v4896_v33 = vmax.f32 %v4576_v20, %v4832_v0  ;;  %v5239_v5 = vsel %vm18822_vm4, 0, %v5223_v45  ;;  %v5242_v15 = vsel %vm18822_vm4, 0, %v5226_v3  ;;  %v20631_v23 = vadd.f32 %v16054_v2, %v16053_v1  ;;  %16101 = vmatpush3.bf16.msra.mxu1 %v17160_v51 }
 0x4a7   : > { %v4579_v59 = vmax.f32 %v4028_v31, %v14962_v29  ;;  %v4898_v63 = vmax.f32 %v4578_v22, %v4834_v48  ;;  %v20625_v52 = vsel %vm20613_vm1, %v5239_v5, 0  ;;  %v20629_v0 = vsel %vm20613_vm1, %v5242_v15, 0  ;;  %16102 = vmatprep.subr.bf16.mxu1 %v17161_v54  ;;  %v16057_v29 = vpop.f32.mrf.mxu1 }
 0x4a8   : > { %22310 = vst [vmem:[#allocation49_spill] sm:$0xff] %v20625_v52  ;;  %v4897_v26 = vmax.f32 %v4577_v11, %v4833_v46  ;;  %v4960_v16 = vpack.c.bf16 %v4896_v33, %v4896_v33  ;;  %v20635_v49 = vsel %vm20613_vm1, %v5238_v24, 0  ;;  %v20639_v48 = vcombine.low %v20625_v52, %v20625_v52 }
 0x4a9   : > { %v4899_v61 = vmax.f32 %v4579_v59, %v4835_v7  ;;  %v4962_v58 = vpack.c.bf16 %v4898_v63, %v4898_v63  ;;  %v20643_v34 = vcombine.low %v20629_v0, %v20629_v0  ;;  %v15086_v46 = vcombine.low %v20635_v49, %v20625_v52 }
 0x4aa   : > { %v4961_v1 = vpack.c.bf16 %v4897_v26, %v4897_v26  ;;  %v5088_v38 = vunpack.c.l.b16 %v4960_v16  ;;  %v20649_v53 = vcombine.high %v20629_v0, %v20629_v0  ;;  %v3412_v10 = vadd.f32 %v20521_v36, %v20351_v8  ;;  %v17162_v8 = vld [vmem:[#allocation6] sm:$0xff]  }
 0x4ab   : > { %v4963_v50 = vpack.c.bf16 %v4899_v61, %v4899_v61  ;;  %v5090_v19 = vunpack.c.l.b16 %v4962_v58  ;;  %5509 = vrot.lane.b32.xlu1 %v15086_v46, %s18239_s27  ;;  %v20658_v31 = vcombine.low %v20635_v49, %v20635_v49  ;;  %v3404_v17 = vadd.f32 %v20481_v37, %v20332_v44  ;;  %16103 = vmatpush3.bf16.msra.mxu1 %v17162_v8 }
 0x4ac   : > { %v5089_v42 = vunpack.c.l.b16 %v4961_v1  ;;  %v22311_v27 = vmov 0   ;;  %v5183_v41 = vrot.slane %v5088_v38, 7  ;;  %v3573_v45 = vadd.f32 %v16833_v21, %v3412_v10  ;;  %v16059_v1 = vpop.f32.mrf.mxu1 }
 0x4ad   : > { %v20664_v43 = vcombine.low %v22311_v27, %v22311_v27  ;;  %v5091_v14 = vunpack.c.l.b16 %v4963_v50  ;;  %v5186_v20 = vrot.slane %v5090_v19, 5  ;;  %v3565_v3 = vadd.f32 %v3564_v32, %v3404_v17 }
 0x4ae   : > { %v5184_v36 = vrot.slane %v5089_v42, 6  ;;  %v20668_v7 = vcombine.high %v22311_v27, %v22311_v27  ;;  %v20672_v2 = vcombine.high %v20635_v49, %v20635_v49  ;;  %v3631_v37 = vmax.f32 %v3573_v45, 0.0 }
 0x4af   : > { %v5188_v44 = vrot.slane %v5091_v14, 4  ;;  %v5300_v22 = vshrl.u32 %v20664_v43, 16  ;;  %v3629_v11 = vmax.f32 %v3565_v3, 0.0  ;;  %v5303_v33 = vshll.u32 %v20664_v43, 16 }
 0x4b0   : > { %v5185_v13 = vsel %vm5114_vm9, %v5184_v36, %v5183_v41  ;;  %v4063_v5 = vcombine.high %v3631_v37, %v3631_v37  ;;  %v4070_v40 = vrot.slane %v3631_v37, %v20233_v60  ;;  %v5309_v51 = vshll.u32 %v20668_v7, 16  ;;  %v16060_v37 = vpop.f32.mrf.mxu1 }
 0x4b1   : > { %v5187_v24 = vsel %vm5117_vm10, %v5186_v20, %v5185_v13  ;;  %v5302_v15 = vrot.slane %v5300_v22, 4  ;;  %v4029_v59 = vcombine.high %v3629_v11, %v3629_v11  ;;  %v4036_v63 = vrot.slane %v3629_v11, %v20233_v60 }
 0x4b2   : > { %v20681_v21 = vsel %vm5120_vm11, %v5188_v44, %v5187_v24  ;;  %v5305_v26 = vrot.slane %v5303_v33, 5  ;;  %v4077_v16 = vrot.slane %v4063_v5, %v20233_v60  ;;  %v4078_v61 = vcombine.high %v4070_v40, %v4070_v40  ;;  %v16836_v44 = vpop.f32.mrf.mxu0 }
 0x4b3   : > { %v15027_v58 = vrot.slane %v4070_v40, 9  ;;  %v4043_v38 = vrot.slane %v4029_v59, %v20233_v60  ;;  %v4044_v46 = vcombine.high %v4036_v63, %v4036_v63  ;;  %v14963_v54 = vrot.slane %v4036_v63, 9 }
 0x4b4   : > { %v5306_v50 = vor.u32 %v5305_v26, %v5302_v15  ;;  %v4079_v19 = vcombine.high %v4077_v16, %v4077_v16  ;;  %v15028_v10 = vrot.slane %v4078_v61, 9  ;;  %v15029_v32 = vrot.slane %v4077_v16, 9 }
 0x4b5   : > { %v4836_v42 = vmax.f32 %v4070_v40, %v15027_v58  ;;  %v4045_v17 = vcombine.high %v4043_v38, %v4043_v38  ;;  %v14964_v14 = vrot.slane %v4044_v46, 9  ;;  %v14965_v41 = vrot.slane %v4043_v38, 9 }
 0x4b6   : > { %v4580_v20 = vmax.f32 %v4036_v63, %v14963_v54  ;;  %v15030_v45 = vrot.slane %v4079_v19, 9  ;;  %v4837_v8 = vmax.f32 %v4078_v61, %v15028_v10  ;;  %v4838_v36 = vmax.f32 %v4077_v16, %v15029_v32  ;;  %v3577_v54 = vpop.f32.mrf.mxu0 }
 0x4b7   : > { %v5311_v3 = vrot.slane %v5309_v51, 5  ;;  %v14966_v22 = vrot.slane %v4045_v17, 9  ;;  %v4581_v13 = vmax.f32 %v4044_v46, %v14964_v14  ;;  %v4582_v11 = vmax.f32 %v4043_v38, %v14965_v41 }
 0x4b8   : > { %v4900_v33 = vmax.f32 %v4580_v20, %v4836_v42  ;;  %v4839_v24 = vmax.f32 %v4079_v19, %v15030_v45  ;;  %v5307_v5 = vrot.slane %v5306_v50, 4  ;;  %v5314_v15 = vshrl.u32 %v20658_v31, 16  ;;  %v16062_v50 = vpop.f32.mrf.mxu1 }
 0x4b9   : > { %v5317_v40 = vshll.u32 %v20658_v31, 16  ;;  %v4583_v59 = vmax.f32 %v4045_v17, %v14966_v22  ;;  %v4901_v26 = vmax.f32 %v4581_v13, %v4837_v8  ;;  %v4902_v58 = vmax.f32 %v4582_v11, %v4838_v36 }
 0x4ba   : > { %v4964_v63 = vpack.c.bf16 %v4900_v33, %v4900_v33  ;;  %v5316_v61 = vrot.slane %v5314_v15, 4  ;;  %v5323_v38 = vshll.u32 %v20672_v2, 16  ;;  %v3425_v46 = vadd.f32 %v20592_v56, %v20373_v18  ;;  %v16837_v33 = vpop.f32.mrf.mxu0 }
 0x4bb   : > { %v5319_v51 = vrot.slane %v5317_v40, 5  ;;  %v4903_v19 = vmax.f32 %v4583_v59, %v4839_v24  ;;  %v4965_v10 = vpack.c.bf16 %v4901_v26, %v4901_v26  ;;  %v4966_v32 = vpack.c.bf16 %v4902_v58, %v4902_v58 }
 0x4bc   : > { %v5092_v42 = vunpack.c.l.b16 %v4964_v63  ;;  %v20698_v17 = vadd.f32 %v16057_v29, %v20651_v9  ;;  %v20702_v14 = vsel %vm20690_vm8, %v5307_v5, %v5311_v3  ;;  %v3586_v20 = vadd.f32 %v16836_v44, %v3425_v46  ;;  %v16063_v9 = vpop.f32.mrf.mxu1 }
 0x4bd   : > { %v5320_v41 = vor.u32 %v5319_v51, %v5316_v61  ;;  %v5093_v45 = vunpack.c.l.b16 %v4965_v10  ;;  %v5325_v36 = vrot.slane %v5323_v38, 5  ;;  %v20704_v22 = vadd.f32 %v16060_v37, %v16059_v1  ;;  %v3580_v51 = vpop.f32.mrf.mxu0  ;;  %v22315_v38 = vld [vmem:[#allocation33_spill] sm:$0xff] }
 0x4be   : > { %v5190_v8 = vrot.slane %v5092_v42, 3  ;;  %v4967_v18 = vpack.c.bf16 %v4903_v19, %v4903_v19  ;;  %v3634_v13 = vmax.f32 %v3586_v20, 0.0  ;;  %v3417_v11 = vadd.f32 %v20541_v30, %v20361_v55 }
 0x4bf   : > { %v5321_v56 = vrot.slane %v5320_v41, 4  ;;  %v20708_v29 = vunpack.c.l.b16 %v4966_v32  ;;  %v5192_v24 = vrot.slane %v5093_v45, 2  ;;  %v3428_v44 = vadd.f32 %v20631_v23, %v20380_v35 }
 0x4c0   : > { %v5191_v3 = vsel %vm5123_vm12, %v5190_v8, %v20681_v21  ;;  %v4114_v37 = vcombine.high %v3634_v13, %v3634_v13  ;;  %v4121_v5 = vrot.slane %v3634_v13, %v20233_v60  ;;  %v3578_v15 = vadd.f32 %v3577_v54, %v3417_v11 }
 0x4c1   : > { %v20716_v1 = vsel %vm20690_vm8, %v5321_v56, %v5325_v36  ;;  %v20720_v55 = vsel %vm5126_vm13, %v5192_v24, %v5191_v3  ;;  %v3589_v40 = vadd.f32 %v16837_v33, %v3428_v44  ;;  %v16064_v21 = vadd.f32 %v16063_v9, %v16062_v50 }
 0x4c2   : > { %22314 = vst [vmem:[#allocation50_spill] sm:$0xff] %v20716_v1  ;;  %v15078_v30 = vcombine.low %v20702_v14, %v20716_v1  ;;  %v4128_v59 = vrot.slane %v4114_v37, %v20233_v60  ;;  %v4129_v26 = vcombine.high %v4121_v5, %v4121_v5  ;;  %v15031_v35 = vrot.slane %v4121_v5, 9 }
 0x4c3   : > { %v3632_v23 = vmax.f32 %v3578_v15, 0.0  ;;  %v20725_v58 = vunpack.c.l.b16 %v4967_v18  ;;  %v3635_v63 = vmax.f32 %v3589_v40, 0.0  ;;  %v3420_v61 = vadd.f32 %v20559_v62, %v20369_v39 }
 0x4c4   : > { %5485 = vrot.lane.b32.xlu0 %v15078_v30, %s18239_s27  ;;  %v3441_v46 = vadd.f32 %v16064_v21, %v22315_v38  ;;  %v4130_v54 = vcombine.high %v4128_v59, %v4128_v59  ;;  %v15032_v19 = vrot.slane %v4129_v26, 9  ;;  %v15033_v10 = vrot.slane %v4128_v59, 9 }
 0x4c5   : > { %v4840_v50 = vmax.f32 %v4121_v5, %v15031_v35  ;;  %v4080_v32 = vcombine.high %v3632_v23, %v3632_v23  ;;  %v4087_v42 = vrot.slane %v3632_v23, %v20233_v60  ;;  %v4131_v41 = vcombine.high %v3635_v63, %v3635_v63 }
 0x4c6   : > { %v4138_v20 = vrot.slane %v3635_v63, %v20233_v60  ;;  %v15034_v45 = vrot.slane %v4130_v54, 9  ;;  %v4841_v8 = vmax.f32 %v4129_v26, %v15032_v19  ;;  %v4842_v36 = vmax.f32 %v4128_v59, %v15033_v10  ;;  %v16840_v63 = vpop.f32.mrf.mxu0 }
 0x4c7   : > { %v3581_v18 = vadd.f32 %v3580_v51, %v3420_v61  ;;  %v4094_v56 = vrot.slane %v4080_v32, %v20233_v60  ;;  %v4095_v39 = vcombine.high %v4087_v42, %v4087_v42  ;;  %v14967_v62 = vrot.slane %v4087_v42, 9 }
 0x4c8   : > { %v4145_v13 = vrot.slane %v4131_v41, %v20233_v60  ;;  %v4843_v11 = vmax.f32 %v4130_v54, %v15034_v45  ;;  %v4146_v33 = vcombine.high %v4138_v20, %v4138_v20  ;;  %v15035_v9 = vrot.slane %v4138_v20, 9 }
 0x4c9   : > { %v3633_v3 = vmax.f32 %v3581_v18, 0.0  ;;  %v4096_v24 = vcombine.high %v4094_v56, %v4094_v56  ;;  %v14968_v44 = vrot.slane %v4095_v39, 9  ;;  %v14969_v37 = vrot.slane %v4094_v56, 9 }
 0x4ca   : > { %v4584_v5 = vmax.f32 %v4087_v42, %v14967_v62  ;;  %v4147_v15 = vcombine.high %v4145_v13, %v4145_v13  ;;  %v15036_v30 = vrot.slane %v4146_v33, 9  ;;  %v15037_v40 = vrot.slane %v4145_v13, 9 }
 0x4cb   : > { %v4844_v21 = vmax.f32 %v4138_v20, %v15035_v9  ;;  %v14970_v59 = vrot.slane %v4096_v24, 9  ;;  %v4585_v26 = vmax.f32 %v4095_v39, %v14968_v44  ;;  %v4586_v35 = vmax.f32 %v4094_v56, %v14969_v37 }
 0x4cc   : > { %v4904_v23 = vmax.f32 %v4584_v5, %v4840_v50  ;;  %v15038_v61 = vrot.slane %v4147_v15, 9  ;;  %v4845_v51 = vmax.f32 %v4146_v33, %v15036_v30  ;;  %v4846_v38 = vmax.f32 %v4145_v13, %v15037_v40 }
 0x4cd   : > { %v4097_v54 = vcombine.high %v3633_v3, %v3633_v3  ;;  %v4587_v19 = vmax.f32 %v4096_v24, %v14970_v59  ;;  %v4905_v10 = vmax.f32 %v4585_v26, %v4841_v8  ;;  %v4906_v32 = vmax.f32 %v4586_v35, %v4842_v36 }
 0x4ce   : > { %v4968_v41 = vpack.c.bf16 %v4904_v23, %v4904_v23  ;;  %v4847_v45 = vmax.f32 %v4147_v15, %v15038_v61  ;;  %v4104_v42 = vrot.slane %v3633_v3, %v20233_v60  ;;  %v3602_v62 = vadd.f32 %v16840_v63, %v3441_v46 }
 0x4cf   : > { %v4111_v18 = vrot.slane %v4097_v54, %v20233_v60  ;;  %v4907_v20 = vmax.f32 %v4587_v19, %v4843_v11  ;;  %v4969_v9 = vpack.c.bf16 %v4905_v10, %v4905_v10  ;;  %v4970_v39 = vpack.c.bf16 %v4906_v32, %v4906_v32 }
 0x4d0   : > { %v5096_v56 = vunpack.c.l.b16 %v4968_v41  ;;  %v4112_v50 = vcombine.high %v4104_v42, %v4104_v42  ;;  %v14971_v37 = vrot.slane %v4104_v42, 9  ;;  %v3638_v46 = vmax.f32 %v3602_v62, 0.0 }
 0x4d1   : > { %v4113_v44 = vcombine.high %v4111_v18, %v4111_v18  ;;  %v14973_v33 = vrot.slane %v4111_v18, 9  ;;  %v4971_v13 = vpack.c.bf16 %v4907_v20, %v4907_v20  ;;  %v5097_v5 = vunpack.c.l.b16 %v4969_v9 }
 0x4d2   : > { %v5098_v24 = vunpack.c.l.b16 %v4970_v39  ;;  %v5196_v8 = vrot.slane %v5096_v56, 7  ;;  %v14972_v36 = vrot.slane %v4112_v50, 9  ;;  %v4588_v15 = vmax.f32 %v4104_v42, %v14971_v37  ;;  %v3593_v56 = vpop.f32.mrf.mxu0 }
 0x4d3   : > { %v14974_v30 = vrot.slane %v4113_v44, 9  ;;  %v4590_v40 = vmax.f32 %v4111_v18, %v14973_v33  ;;  %v5099_v3 = vunpack.c.l.b16 %v4971_v13  ;;  %v5197_v59 = vrot.slane %v5097_v5, 6 }
 0x4d4   : > { %v5199_v26 = vrot.slane %v5098_v24, 5  ;;  %v4589_v11 = vmax.f32 %v4112_v50, %v14972_v36  ;;  %v4908_v23 = vmax.f32 %v4588_v15, %v4844_v21  ;;  %v4182_v19 = vcombine.high %v3638_v46, %v3638_v46 }
 0x4d5   : > { %v4591_v35 = vmax.f32 %v4113_v44, %v14974_v30  ;;  %v4910_v63 = vmax.f32 %v4590_v40, %v4846_v38  ;;  %v5198_v61 = vsel %vm5114_vm9, %v5197_v59, %v5196_v8  ;;  %v5201_v54 = vrot.slane %v5099_v3, 4  ;;  %v16065_v44 = vpop.f32.mrf.mxu1  ;;  %v16841_v59 = vpop.f32.mrf.mxu0 }
 0x4d6   : > { %v4189_v10 = vrot.slane %v3638_v46, %v20233_v60  ;;  %v5200_v32 = vsel %vm5117_vm10, %v5199_v26, %v5198_v61  ;;  %v4909_v41 = vmax.f32 %v4589_v11, %v4845_v51  ;;  %v4972_v42 = vpack.c.bf16 %v4908_v23, %v4908_v23 }
 0x4d7   : > { %v4911_v20 = vmax.f32 %v4591_v35, %v4847_v45  ;;  %v4974_v18 = vpack.c.bf16 %v4910_v63, %v4910_v63  ;;  %v5202_v9 = vsel %vm5120_vm11, %v5201_v54, %v5200_v32  ;;  %v4196_v62 = vrot.slane %v4182_v19, %v20233_v60  ;;  %v16066_v35 = vpop.f32.mrf.mxu1 }
 0x4d8   : > { %v4197_v39 = vcombine.high %v4189_v10, %v4189_v10  ;;  %v4973_v21 = vpack.c.bf16 %v4909_v41, %v4909_v41  ;;  %v5100_v50 = vunpack.c.l.b16 %v4972_v42  ;;  %v15039_v37 = vrot.slane %v4189_v10, 9 }
 0x4d9   : > { %v4975_v38 = vpack.c.bf16 %v4911_v20, %v4911_v20  ;;  %v5102_v33 = vunpack.c.l.b16 %v4974_v18  ;;  %v4198_v13 = vcombine.high %v4196_v62, %v4196_v62  ;;  %v20745_v51 = vsel %vm20613_vm1, %v20557_v25, 0  ;;  %v22319_v18 = vld [vmem:[#allocation47_spill] sm:$0xff] }
 0x4da   : > { %v15040_v5 = vrot.slane %v4197_v39, 9  ;;  %22316 = vst [vmem:[#allocation45_spill] sm:$0xff] %v20745_v51  ;;  %v5101_v24 = vunpack.c.l.b16 %v4973_v21  ;;  %v5203_v8 = vrot.slane %v5100_v50, 3  ;;  %v15041_v36 = vrot.slane %v4196_v62, 9 }
 0x4db   : > { %v5103_v30 = vunpack.c.l.b16 %v4975_v38  ;;  %v5207_v15 = vrot.slane %v5102_v33, 1  ;;  %v15042_v40 = vrot.slane %v4198_v13, 9  ;;  %v20748_v3 = vmax.f32 %v4189_v10, %v15039_v37  ;;  %v22320_v37 = vld [vmem:[#allocation51_spill] sm:$0xff] }
 0x4dc   : > { %v5204_v26 = vsel %vm5123_vm12, %v5203_v8, %v5202_v9  ;;  %v5205_v46 = vrot.slane %v5101_v24, 2  ;;  %v20753_v11 = vcombine.high %v20625_v52, %v20625_v52  ;;  %v20757_v25 = vcombine.low %v20745_v51, %v20745_v51  ;;  %v22321_v24 = vld [vmem:[#allocation34_spill] sm:$0xff] }
 0x4dd   : > { %v20759_v23 = vmax.f32 %v4197_v39, %v15040_v5  ;;  %v20763_v63 = vcombine.high %v20745_v51, %v20745_v51  ;;  %v15065_v54 = vrot.slane %v20639_v48, 9  ;;  %v16067_v42 = vadd.f32 %v16066_v35, %v16065_v44  ;;  %v3596_v39 = vpop.f32.mrf.mxu0 }
 0x4de   : > { %v5206_v61 = vsel %vm5126_vm13, %v5205_v46, %v5204_v26  ;;  %v5424_v19 = vrot.slane %v20753_v11, 5  ;;  %v15066_v10 = vrot.slane %v20757_v25, 9  ;;  %v3433_v9 = vadd.f32 %v20698_v17, %v22319_v18 }
 0x4df   : > { %v5208_v32 = vsel %vm5129_vm14, %v5207_v15, %v5206_v61  ;;  %v5428_v20 = vrot.slane %v20763_v63, 5  ;;  %v5169_v50 = vsel %vm5129_vm14, %v5168_v47, %v20571_v6  ;;  %v3436_v33 = vadd.f32 %v20704_v22, %v22320_v37 }
 0x4e0   : > { %v5228_v21 = vpack.c.b16 %v5103_v30, %v5208_v32  ;;  %v20780_v38 = vsel %vm20771_vm5, %v15065_v54, %v5424_v19  ;;  %v3594_v5 = vadd.f32 %v3593_v56, %v3433_v9  ;;  %v5225_v17 = vpack.c.b16 %v20568_v12, %v5169_v50 }
 0x4e1   : > { %v20790_v44 = vsel %vm20771_vm5, %v15066_v10, %v5428_v20  ;;  %v3444_v8 = vadd.f32 %v16067_v42, %v22321_v24  ;;  %v4850_v30 = vmax.f32 %v4196_v62, %v15041_v36  ;;  %v3597_v4 = vadd.f32 %v3596_v39, %v3436_v33 }
 0x4e2   : > { %v20796_v15 = vcombine.low %v20780_v38, %v20790_v44  ;;  %v5328_v6 = vshrl.u32 %v20639_v48, 16  ;;  %v4851_v47 = vmax.f32 %v4198_v13, %v15042_v40  ;;  %v3636_v26 = vmax.f32 %v3594_v5, 0.0 }
 0x4e3   : > { %v5241_v22 = vsel %vm18822_vm4, 0, %v5225_v17  ;;  %v3605_v46 = vadd.f32 %v16841_v59, %v3444_v8  ;;  %v20803_v56 = vsel %vm18822_vm4, 0, %v5228_v21  ;;  %v3637_v62 = vmax.f32 %v3597_v4, 0.0 }
 0x4e4   : > { %22322 = vst [vmem:[#allocation32_spill] sm:$0xff] %v20796_v15  ;;  %16850 = vmatprep.mubr.msk.bf16.mxu0 %vm2617_vm7, %v20796_v15  ;;  %v20809_v12 = vsel %vm20613_vm1, %v5241_v22, 0  ;;  %v5331_v36 = vshll.u32 %v20639_v48, 16  ;;  %v4148_v13 = vcombine.high %v3636_v26, %v3636_v26  ;;  %v4155_v40 = vrot.slane %v3636_v26, %v20233_v60 }
 0x4e5   : > { %22323 = vst [vmem:[#allocation43_spill] sm:$0xff] %v20809_v12  ;;  %v20813_v35 = vrot.slane %v5328_v6, 4  ;;  %v15087_v61 = vcombine.low %v20745_v51, %v20809_v12  ;;  %v3639_v54 = vmax.f32 %v3605_v46, 0.0  ;;  %v4165_v19 = vcombine.high %v3637_v62, %v3637_v62 }
 0x4e6   : > { %v4172_v10 = vrot.slane %v3637_v62, %v20233_v60  ;;  %v4162_v32 = vrot.slane %v4148_v13, %v20233_v60  ;;  %v4163_v20 = vcombine.high %v4155_v40, %v4155_v40  ;;  %v14975_v42 = vrot.slane %v4155_v40, 9 }
 0x4e7   : > { %v20822_v48 = vcombine.low %v20809_v12, %v20809_v12  ;;  %v20826_v18 = vcombine.high %v20809_v12, %v20809_v12  ;;  %5511 = vrot.lane.b32.xlu1 %v15087_v61, %s18239_s27  ;;  %v4199_v9 = vcombine.high %v3639_v54, %v3639_v54  ;;  %v4206_v39 = vrot.slane %v3639_v54, %v20233_v60 }
 0x4e8   : > { %v4179_v21 = vrot.slane %v4165_v19, %v20233_v60  ;;  %v4164_v50 = vcombine.high %v4162_v32, %v4162_v32  ;;  %v14976_v37 = vrot.slane %v4163_v20, 9  ;;  %v14977_v33 = vrot.slane %v4162_v32, 9 }
 0x4e9   : > { %v4592_v5 = vmax.f32 %v4155_v40, %v14975_v42  ;;  %v4213_v17 = vrot.slane %v4199_v9, %v20233_v60  ;;  %v4214_v24 = vcombine.high %v4206_v39, %v4206_v39  ;;  %v15043_v8 = vrot.slane %v4206_v39, 9 }
 0x4ea   : > { %v4180_v4 = vcombine.high %v4172_v10, %v4172_v10  ;;  %v14978_v6 = vrot.slane %v4164_v50, 9  ;;  %v4593_v26 = vmax.f32 %v4163_v20, %v14976_v37  ;;  %v4594_v22 = vmax.f32 %v4162_v32, %v14977_v33 }
 0x4eb   : > { %v4912_v46 = vmax.f32 %v4592_v5, %v20748_v3  ;;  %v4215_v62 = vcombine.high %v4213_v17, %v4213_v17  ;;  %v15044_v13 = vrot.slane %v4214_v24, 9  ;;  %v15045_v61 = vrot.slane %v4213_v17, 9 }
 0x4ec   : > { %v4852_v54 = vmax.f32 %v4206_v39, %v15043_v8  ;;  %v4595_v45 = vmax.f32 %v4164_v50, %v14978_v6  ;;  %v4913_v19 = vmax.f32 %v4593_v26, %v20759_v23  ;;  %v4914_v59 = vmax.f32 %v4594_v22, %v4850_v30 }
 0x4ed   : > { %v4976_v1 = vpack.c.bf16 %v4912_v46, %v4912_v46  ;;  %v15046_v40 = vrot.slane %v4215_v62, 9  ;;  %v4853_v42 = vmax.f32 %v4214_v24, %v15044_v13  ;;  %v4854_v9 = vmax.f32 %v4213_v17, %v15045_v61  ;;  %v17163_v61 = vld [vmem:[#allocation6 + $0xf8] sm:$0xff]  }
 0x4ee   : > { %v4181_v60 = vcombine.high %v4179_v21, %v4179_v21  ;;  %v4915_v12 = vmax.f32 %v4595_v45, %v4851_v47  ;;  %v4977_v52 = vpack.c.bf16 %v4913_v19, %v4913_v19  ;;  %v4978_v51 = vpack.c.bf16 %v4914_v59, %v4914_v59  ;;  %16128 = vmatprep.subr.bf16.mxu1 %v17163_v61 }
 0x4ef   : > { %v5104_v20 = vunpack.c.l.b16 %v4976_v1  ;;  %v4855_v32 = vmax.f32 %v4215_v62, %v15046_v40  ;;  %v14979_v37 = vrot.slane %v4172_v10, 9  ;;  %v14980_v3 = vrot.slane %v4180_v4, 9 }
 0x4f0   : > { %v14981_v33 = vrot.slane %v4179_v21, 9  ;;  %v4979_v5 = vpack.c.bf16 %v4915_v12, %v4915_v12  ;;  %v5105_v15 = vunpack.c.l.b16 %v4977_v52  ;;  %v5106_v39 = vunpack.c.l.b16 %v4978_v51 }
 0x4f1   : > { %v5209_v50 = vrot.slane %v5104_v20, 7  ;;  %v14982_v8 = vrot.slane %v4181_v60, 9  ;;  %v4596_v23 = vmax.f32 %v4172_v10, %v14979_v37  ;;  %v4597_v30 = vmax.f32 %v4180_v4, %v14980_v3 }
 0x4f2   : > { %v4598_v6 = vmax.f32 %v4179_v21, %v14981_v33  ;;  %v5107_v26 = vunpack.c.l.b16 %v4979_v5  ;;  %v5210_v24 = vrot.slane %v5105_v15, 6  ;;  %v5212_v17 = vrot.slane %v5106_v39, 5 }
 0x4f3   : > { %v5333_v22 = vrot.slane %v5331_v36, 5  ;;  %v4599_v45 = vmax.f32 %v4181_v60, %v14982_v8  ;;  %v4916_v47 = vmax.f32 %v4596_v23, %v4852_v54  ;;  %v4917_v59 = vmax.f32 %v4597_v30, %v4853_v42 }
 0x4f4   : > { %v4918_v1 = vmax.f32 %v4598_v6, %v4854_v9  ;;  %v5211_v46 = vsel %vm5114_vm9, %v5210_v24, %v5209_v50  ;;  %v5214_v62 = vrot.slane %v5107_v26, 4  ;;  %v15067_v12 = vrot.slane %v20822_v48, 9 }
 0x4f5   : > { %v5334_v52 = vor.u32 %v5333_v22, %v20813_v35  ;;  %v5213_v51 = vsel %vm5117_vm10, %v5212_v17, %v5211_v46  ;;  %v4919_v10 = vmax.f32 %v4599_v45, %v4855_v32  ;;  %v4980_v4 = vpack.c.bf16 %v4916_v47, %v4916_v47 }
 0x4f6   : > { %v4981_v21 = vpack.c.bf16 %v4917_v59, %v4917_v59  ;;  %v4982_v13 = vpack.c.bf16 %v4918_v1, %v4918_v1  ;;  %v5215_v15 = vsel %vm5120_vm11, %v5214_v62, %v5213_v51  ;;  %v5342_v60 = vshrl.u32 %v20757_v25, 16 }
 0x4f7   : > { %v5335_v36 = vrot.slane %v5334_v52, 4  ;;  %v5432_v54 = vrot.slane %v20826_v18, 5  ;;  %v5108_v19 = vunpack.c.l.b16 %v4980_v4  ;;  %v5345_v42 = vshll.u32 %v20757_v25, 16 }
 0x4f8   : > { %v5109_v40 = vunpack.c.l.b16 %v4981_v21  ;;  %v5110_v9 = vunpack.c.l.b16 %v4982_v13  ;;  %v22324_v35 = vshll.u32 %v20753_v11, 16  ;;  %v5344_v32 = vrot.slane %v5342_v60, 4 }
 0x4f9   : > { %v5351_v37 = vshll.u32 %v20763_v63, 16  ;;  %v4983_v3 = vpack.c.bf16 %v4919_v10, %v4919_v10  ;;  %v5216_v33 = vrot.slane %v5108_v19, 3  ;;  %v5347_v39 = vrot.slane %v5345_v42, 5 }
 0x4fa   : > { %v5339_v20 = vrot.slane %v22324_v35, 5  ;;  %v5218_v5 = vrot.slane %v5109_v40, 2  ;;  %v5220_v50 = vrot.slane %v5110_v9, 1  ;;  %v15068_v25 = vrot.slane %v20643_v34, 9 }
 0x4fb   : > { %v5353_v23 = vrot.slane %v5351_v37, 5  ;;  %v5217_v30 = vsel %vm5123_vm12, %v5216_v33, %v5215_v15  ;;  %v5348_v11 = vor.u32 %v5347_v39, %v5344_v32  ;;  %v5436_v6 = vrot.slane %v20649_v53, 5  ;;  %vm7512_vm12 = vmor %vm852_vm2, %vm5114_vm9 }
 0x4fc   : > { %v20847_v8 = vsel %vm20690_vm8, %v5335_v36, %v5339_v20  ;;  %v22325_v63 = vrot.slane %v20708_v29, 1  ;;  %v5219_v24 = vsel %vm5126_vm13, %v5218_v5, %v5217_v30  ;;  %v5356_v22 = vshrl.u32 %v20822_v48, 16 }
 0x4fd   : > { %v5359_v45 = vshll.u32 %v20822_v48, 16  ;;  %v5349_v47 = vrot.slane %v5348_v11, 4  ;;  %v20862_v59 = vsel %vm20771_vm5, %v15067_v12, %v5432_v54  ;;  %v20866_v1 = vsel %vm20771_vm5, %v15068_v25, %v5436_v6 }
 0x4fe   : > { %v5195_v26 = vsel %vm5129_vm14, %v22325_v63, %v20720_v55  ;;  %v5370_v29 = vshrl.u32 %v20643_v34, 16  ;;  %v20871_v55 = vcombine.low %v20862_v59, %v20866_v1  ;;  %v5358_v46 = vrot.slane %v5356_v22, 4 }
 0x4ff   : > { %v5227_v17 = vpack.c.b16 %v20725_v58, %v5195_v26  ;;  %v5361_v48 = vrot.slane %v5359_v45, 5  ;;  %v20877_v62 = vsel %vm20690_vm8, %v5349_v47, %v5353_v23  ;;  %v5365_v52 = vshll.u32 %v20826_v18, 16 }
 0x500   : > { %v5372_v51 = vrot.slane %v5370_v29, 4  ;;  %v15079_v10 = vcombine.low %v20847_v8, %v20877_v62  ;;  %16851 = vmatmul.mubr.msk.bf16.vlgmr.msra.gmra.mxu0 %vm2617_vm7, %v20871_v55  ;;  %v5373_v15 = vshll.u32 %v20643_v34, 16  ;;  %v5379_v36 = vshll.u32 %v20649_v53, 16 }
 0x501   : > { %v5243_v58 = vsel %vm18822_vm4, 0, %v5227_v17  ;;  %v5362_v13 = vor.u32 %v5361_v48, %v5358_v46  ;;  %v20897_v18 = vsel %vm20613_vm1, %v20803_v56, 0  ;;  %v5111_v61 = vunpack.c.l.b16 %v4983_v3 }
 0x502   : > { %v20881_v12 = vsel %vm20613_vm1, %v5243_v58, 0  ;;  %5487 = vrot.lane.b32.xlu0 %v15079_v10, %s18239_s27  ;;  %v15061_v54 = vcombine.low %v20897_v18, %v20897_v18  ;;  %v15062_v34 = vcombine.high %v20897_v18, %v20897_v18  ;;  %v5367_v19 = vrot.slane %v5365_v52, 5 }
 0x503   : > { %v15088_v4 = vcombine.low %v20629_v0, %v20881_v12  ;;  %v15059_v21 = vcombine.low %v20881_v12, %v20881_v12  ;;  %v15060_v60 = vcombine.high %v20881_v12, %v20881_v12  ;;  %v5375_v40 = vrot.slane %v5373_v15, 5 }
 0x504   : > { %v5221_v56 = vsel %vm5129_vm14, %v5220_v50, %v5219_v24  ;;  %v5363_v9 = vrot.slane %v5362_v13, 4  ;;  %v15070_v35 = vrot.slane %v15061_v54, 9  ;;  %v5444_v20 = vrot.slane %v15062_v34, 5  ;;  %vm7514_vm14 = vmor %vm7512_vm12, %vm5120_vm11 }
 0x505   : > { %5513 = vrot.lane.b32.xlu1 %v15088_v4, %s18239_s27  ;;  %v15069_v53 = vrot.slane %v15059_v21, 9  ;;  %v5440_v42 = vrot.slane %v15060_v60, 5  ;;  %v5229_v32 = vpack.c.b16 %v5111_v61, %v5221_v56  ;;  %v5376_v37 = vor.u32 %v5375_v40, %v5372_v51 }
 0x506   : > { %v5381_v3 = vrot.slane %v5379_v36, 5  ;;  %v5384_v33 = vshrl.u32 %v15059_v21, 16  ;;  %v5387_v5 = vshll.u32 %v15059_v21, 16  ;;  %v5445_v23 = vsel %vm20771_vm5, %v15070_v35, %v5444_v20 }
 0x507   : > { %v5441_v39 = vsel %vm20771_vm5, %v15069_v53, %v5440_v42  ;;  %v5245_v25 = vsel %vm18822_vm4, 0, %v5229_v32  ;;  %v5398_v30 = vshrl.u32 %v15061_v54, 16  ;;  %v5377_v11 = vrot.slane %v5376_v37, 4 }
 0x508   : > { %v20914_v50 = vcombine.low %v5441_v39, %v5445_v23  ;;  %v20918_v6 = vsel %vm20613_vm1, %v5245_v25, 0  ;;  %v5386_v63 = vrot.slane %v5384_v33, 4  ;;  %v20922_v26 = vsel %vm20690_vm8, %v5363_v9, %v5367_v19 }
 0x509   : > { %v15089_v24 = vcombine.low %v20897_v18, %v20918_v6  ;;  %v15071_v17 = vcombine.low %v20918_v6, %v20918_v6  ;;  %v5389_v22 = vrot.slane %v5387_v5, 5  ;;  %v20930_v45 = vsel %vm20690_vm8, %v5377_v11, %v5381_v3 }
 0x50a   : > { %16854 = vmatprep.mubr.msk.bf16.mxu0 %vm2617_vm7, %v20914_v50  ;;  %v5393_v47 = vshll.u32 %v15060_v60, 16  ;;  %v5400_v29 = vrot.slane %v5398_v30, 4  ;;  %v5401_v58 = vshll.u32 %v15061_v54, 16  ;;  %v15080_v46 = vcombine.low %v20922_v26, %v20930_v45 }
 0x50b   : > { %5515 = vrot.lane.b32.xlu1 %v15089_v24, %s18239_s27  ;;  %v5390_v48 = vor.u32 %v5389_v22, %v5386_v63  ;;  %v15064_v52 = vrot.slane %v20658_v31, 9  ;;  %v5420_v51 = vrot.slane %v20672_v2, 5  ;;  %v5407_v4 = vshll.u32 %v15062_v34, 16 }
 0x50c   : > { %v5403_v10 = vrot.slane %v5401_v58, 5  ;;  %v15063_v21 = vrot.slane %v20664_v43, 9  ;;  %v5416_v13 = vrot.slane %v20668_v7, 5  ;;  %5489 = vrot.lane.b32.xlu0 %v15080_v46, %s18239_s27  ;;  %v15072_v60 = vcombine.high %v20918_v6, %v20918_v6  ;;  %v17164_v58 = vld [vmem:[#allocation6 + $0xb8] sm:$0xff]  }
 0x50d   : > { %v5391_v15 = vrot.slane %v5390_v48, 4  ;;  %v5421_v36 = vsel %vm20771_vm5, %v15064_v52, %v5420_v51  ;;  %v15073_v61 = vrot.slane %v15071_v17, 9  ;;  %v15095_v2 = vcombine.low %v20790_v44, %v20862_v59  ;;  %v17165_v48 = vld [vmem:[#allocation6 + $0xf0] sm:$0xff]  }
 0x50e   : > { %v5404_v54 = vor.u32 %v5403_v10, %v5400_v29  ;;  %v15094_v31 = vcombine.low %v5421_v36, %v20780_v38  ;;  %v5395_v34 = vrot.slane %v5393_v47, 5  ;;  %v5467_v53 = vrot.slane %v15072_v60, 5  ;;  %v17166_v51 = vld [vmem:[#allocation6 + $0xb0] sm:$0xff]   ;;  %v17167_v10 = vld [vmem:[#allocation6 + $0xe8] sm:$0xff]  }
 0x50f   : > { %v5452_v19 = vshrl.u32 %v15071_v17, 16  ;;  %v5409_v40 = vrot.slane %v5407_v4, 5  ;;  %v20952_v42 = vsel %vm20771_vm5, %v15063_v21, %v5416_v13  ;;  %v5455_v56 = vshll.u32 %v15071_v17, 16  ;;  %v17168_v4 = vld [vmem:[#allocation6 + $0xa8] sm:$0xff]   ;;  %v17169_v21 = vld [vmem:[#allocation6 + $0xe0] sm:$0xff]  }
 0x510   : > { %v5405_v7 = vrot.slane %v5404_v54, 4  ;;  %5527 = vrot.lane.b32.xlu1 %v15094_v31, %s18239_s27  ;;  %v20956_v9 = vsel %vm20690_vm8, %v5391_v15, %v5395_v34  ;;  %v5468_v38 = vsel %vm20771_vm5, %v15073_v61, %v5467_v53  ;;  %v15096_v44 = vcombine.low %v20866_v1, %v5441_v39  ;;  %v17170_v13 = vld [vmem:[#allocation6 + $0xa0] sm:$0xff]   ;;  %v17171_v15 = vld [vmem:[#allocation6 + $0xd8] sm:$0xff]   ;;  %v17175_v61 = vld [vmem:[#allocation6 + $0xc8] sm:$0xff]  }
 0x511   : > { %v5454_v59 = vrot.slane %v5452_v19, 4  ;;  %v15100_v20 = vcombine.low %v5468_v38, %v20952_v42  ;;  %v5457_v32 = vrot.slane %v5455_v56, 5  ;;  %v5461_v37 = vshll.u32 %v15072_v60, 16  ;;  %v17174_v60 = vld [vmem:[#allocation6 + $0x90] sm:$0xff]   ;;  %v17176_v54 = vld [vmem:[#allocation6 + $0x88] sm:$0xff]   ;;  %v17177_v31 = vld [vmem:[#allocation6 + $0xc0] sm:$0xff]  }
 0x512   : > { %v20963_v35 = vsel %vm20690_vm8, %v5405_v7, %v5409_v40  ;;  %v15097_v33 = vcombine.low %v5445_v23, %v5468_v38  ;;  %v15077_v1 = vcombine.low %v20881_v12, %v20897_v18  ;;  %v15091_v39 = vcombine.low %v20877_v62, %v20922_v26  ;;  %v22326_v53 = vld [vmem:[#allocation32_spill] sm:$0xff]  ;;  %v22327_v7 = vld [vmem:[#allocation45_spill] sm:$0xff]  ;;  %v17179_v26 = vld [vmem:[#allocation7 + $0x78] sm:$0xff]  }
 0x513   : > { %v15081_v3 = vcombine.low %v20956_v9, %v20963_v35  ;;  %16855 = vmatmul.mubr.msk.bf16.gmra.mxu0 %vm2617_vm7, %v15100_v20  ;;  %v5458_v5 = vor.u32 %v5457_v32, %v5454_v59  ;;  %v15092_v25 = vcombine.low %v20930_v45, %v20956_v9  ;;  %v5463_v11 = vrot.slane %v5461_v37, 5  ;;  %v22328_v40 = vld [vmem:[#allocation49_spill] sm:$0xff]  ;;  %v22329_v37 = vld [vmem:[#allocation43_spill] sm:$0xff] }
 0x514   : > { %5531 = vrot.lane.b32.xlu1 %v15096_v44, %s18239_s27  ;;  %v15082_v17 = vcombine.low %v20952_v42, %v5421_v36  ;;  %v15074_v29 = vcombine.low %v22311_v27, %v20635_v49  ;;  %v17172_v49 = vld [vmem:[#allocation6 + $0x98] sm:$0xff]   ;;  %v17173_v36 = vld [vmem:[#allocation6 + $0xd0] sm:$0xff]   ;;  %v15075_v56 = vcombine.low %v22328_v40, %v22327_v7  ;;  %vm7407_vm2 = vsmask.f32 2304 }
 0x515   : > { %5491 = vrot.lane.b32.xlu0 %v15081_v3, %s18239_s27  ;;  %v5459_v30 = vrot.slane %v5458_v5, 4  ;;  %v15076_v3 = vcombine.low %v22329_v37, %v20629_v0  ;;  %v17182_v45 = vld [vmem:[#allocation7 + $0x30] sm:$0xff]   ;;  %v17188_v9 = vld [vmem:[#allocation7 + $0xb8] sm:$0xff]  }
 0x517   : > { %v20979_v23 = vsel %vm20690_vm8, %v5459_v30, %v5463_v11 }
 0x518   : > { %5533 = vrot.lane.b32.xlu1 %v15097_v33, %s18239_s27  ;;  %v15099_v63 = vcombine.low %v20979_v23, %v20702_v14  ;;  %v15093_v24 = vcombine.low %v20963_v35, %v20979_v23  ;;  %v17184_v35 = vld [vmem:[#allocation7 + $0x28] sm:$0xff]   ;;  %v17185_v23 = vld [vmem:[#allocation7 + $0x60] sm:$0xff]  }
 0x519   : > { %5529 = vrot.lane.b32.xlu0 %v15095_v2, %s18239_s27  ;;  %v17178_v2 = vld [vmem:[#allocation6 + $0x80] sm:$0xff]  }
 0x51d   : > { %5537 = vrot.lane.b32.xlu0 %v15099_v63, %s18239_s27  ;;  %v5510_v22 = vpop.permute.xlu1 %5509 }
 0x51e   : > { %v5558_v47 = vsel %vm2617_vm7, %v15082_v17, %v5510_v22  ;;  %v22330_v17 = vld [vmem:[#allocation50_spill] sm:$0xff] }
 0x51f   : > { %5928 = vmatprep.mubr.bf16.mxu1 %v5558_v47  ;;  %v15090_v0 = vcombine.low %v22330_v17, %v20847_v8 }
 0x536   : > { %v5486_v46 = vpop.permute.xlu0 %5485 }
 0x537   : > { %v5542_v52 = vsel %vm2617_vm7, %v15074_v29, %v5486_v46  ;;  %v17181_v46 = vld [vmem:[#allocation7 + $0x70] sm:$0xff]  }
 0x538   : > { %5929 = vmatmul.mubr.bf16.vlgmr.msra.gmra.mxu1 %v5542_v52  ;;  %v17192_v52 = vld [vmem:[#allocation7 + $0xb0] sm:$0xff]  }
 0x539   : > { %16129 = vmatpush3.bf16.msra.mxu1 %v17164_v58 }
 0x53a   : > { %16130 = vmatprep.subr.bf16.mxu1 %v17165_v48  ;;  %v17191_v48 = vld [vmem:[#allocation7 + $0xf0] sm:$0xff]  }
 0x53d   : > { %16131 = vmatpush3.bf16.msra.mxu1 %v17166_v51  ;;  %v17195_v51 = vld [vmem:[#allocation7 + $0xe8] sm:$0xff]  }
 0x53e   : > { %16132 = vmatprep.subr.bf16.mxu1 %v17167_v10  ;;  %v17186_v10 = vld [vmem:[#allocation7 + $0x20] sm:$0xff]  }
 0x541   : > { %16133 = vmatpush3.bf16.msra.mxu1 %v17168_v4 }
 0x542   : > { %16134 = vmatprep.subr.bf16.mxu1 %v17169_v21  ;;  %v17189_v21 = vld [vmem:[#allocation7 + $0x58] sm:$0xff]  }
 0x545   : > { %16135 = vmatpush3.bf16.msra.mxu1 %v17170_v13  ;;  %v17190_v13 = vld [vmem:[#allocation7 + $0x18] sm:$0xff]  }
 0x546   : > { %16136 = vmatprep.subr.bf16.mxu1 %v17171_v15 }
 0x549   : > { %16137 = vmatpush3.bf16.msra.mxu1 %v17172_v49  ;;  %v17193_v49 = vld [vmem:[#allocation7 + $0x50] sm:$0xff]  }
 0x54a   : > { %16138 = vmatprep.subr.bf16.mxu1 %v17173_v36  ;;  %v17194_v36 = vld [vmem:[#allocation7 + $0x10] sm:$0xff]  }
 0x54d   : > { %16139 = vmatpush3.bf16.msra.mxu1 %v17174_v60 }
 0x54e   : > { %16140 = vmatprep.subr.bf16.mxu1 %v17175_v61  ;;  %v17197_v61 = vld [vmem:[#allocation7 + $0x48] sm:$0xff]  }
 0x551   : > { %16141 = vmatpush3.bf16.msra.mxu1 %v17176_v54 }
 0x552   : > { %16142 = vmatprep.subr.bf16.mxu1 %v17177_v31 }
 0x555   : > { %16143 = vmatpush3.bf16.msra.mxu1 %v17178_v2 }
 0x556   : > { %16176 = vmatprep.subr.bf16.mxu1 %v17179_v26 }
 0x559   : > { %v5512_v34 = vpop.permute.xlu1 %5511 }
 0x55a   : > { %v5562_v19 = vsel %vm2617_vm7, %v22326_v53, %v5512_v34 }
 0x55b   : > { %5936 = vmatprep.mubr.bf16.mxu1 %v5562_v19 }
 0x574   : > { %v5488_v38 = vpop.permute.xlu0 %5487 }
 0x575   : > { %v5546_v59 = vsel %vm2617_vm7, %v15075_v56, %v5488_v38 }
 0x576   : > { %5937 = vmatmul.mubr.bf16.gmra.mxu1 %v5546_v59 }
 0x577   : > { %v5514_v44 = vpop.permute.xlu1 %5513 }
 0x578   : > { %v5566_v20 = vsel %vm2617_vm7, %v20871_v55, %v5514_v44 }
 0x579   : > { %5944 = vmatprep.mubr.bf16.mxu1 %v5566_v20 }
 0x57d   : > { %v5516_v32 = vpop.permute.xlu1 %5515 }
 0x57e   : > { %v5490_v33 = vpop.permute.xlu0 %5489  ;;  %v5570_v5 = vsel %vm2617_vm7, %v20914_v50, %v5516_v32 }
 0x57f   : > { %v5550_v30 = vsel %vm2617_vm7, %v15076_v3, %v5490_v33  ;;  %v21034_v3 = vld [vmem:[%s22093_s6] ss:$0 sm:$0xff] }
 0x580   : > { %5945 = vmatmul.mubr.bf16.gmra.mxu1 %v5550_v30 }
 0x581   : > { %5952 = vmatprep.mubr.bf16.mxu1 %v5570_v5 }
 0x582   : > { %v5528_v63 = vpop.permute.xlu1 %5527 }
 0x583   : > { %v5574_v22 = vsel %vm2617_vm7, %v15090_v0, %v5528_v63 }
 0x586   : > { %v5532_v12 = vpop.permute.xlu1 %5531 }
 0x587   : > { %v5492_v11 = vpop.permute.xlu0 %5491  ;;  %v5582_v8 = vsel %vm2617_vm7, %v15092_v25, %v5532_v12  ;;  %v17183_v25 = vld [vmem:[#allocation7 + $0x68] sm:$0xff]  }
 0x588   : > { %v5554_v55 = vsel %vm2617_vm7, %v15077_v1, %v5492_v11  ;;  %v15098_v1 = vcombine.low %v20918_v6, %v22311_v27  ;;  %v17187_v6 = vld [vmem:[#allocation7 + $0xf8] sm:$0xff]  }
 0x589   : > { %5953 = vmatmul.mubr.bf16.gmra.mxu1 %v5554_v55  ;;  %16216 = vmatprep.subr.bf16.mxu0 %v17187_v6 }
 0x58a   : > { %5993 = vmatprep.mubr.bf16.mxu1 %v5546_v59  ;;  %v5534_v58 = vpop.permute.xlu1 %5533  ;;  %16217 = vmatpush3.bf16.msra.mxu0 %v17188_v9 }
 0x58b   : > { %v5530_v50 = vpop.permute.xlu0 %5529  ;;  %v5586_v62 = vsel %vm2617_vm7, %v15093_v24, %v5534_v58  ;;  %16218 = vmatprep.subr.bf16.mxu0 %v17191_v48  ;;  %v17196_v24 = vld [vmem:[#allocation7 + $0xa8] sm:$0xff]  }
 0x58c   : > { %v5578_v47 = vsel %vm2617_vm7, %v15091_v39, %v5530_v50  ;;  %v17180_v39 = vld [vmem:[#allocation7 + $0x38] sm:$0xff]  }
 0x58e   : > { %16219 = vmatpush3.bf16.msra.mxu0 %v17192_v52 }
 0x58f   : > { %v5538_v18 = vpop.permute.xlu0 %5537  ;;  %16220 = vmatprep.subr.bf16.mxu0 %v17195_v51 }
 0x590   : > { %v5590_v29 = vsel %vm2617_vm7, %v15098_v1, %v5538_v18 }
 0x591   : > { %5994 = vmatmul.mubr.bf16.vlgmr.msra.gmra.mxu1 %v5574_v22 }
 0x592   : > { %6001 = vmatprep.mubr.bf16.mxu1 %v5550_v30  ;;  %16177 = vmatpush3.bf16.msra.mxu1 %v17180_v39 }
 0x593   : > { %16178 = vmatprep.subr.bf16.mxu1 %v17181_v46  ;;  %16221 = vmatpush3.bf16.msra.mxu0 %v17196_v24 }
 0x596   : > { %16179 = vmatpush3.bf16.msra.mxu1 %v17182_v45 }
 0x597   : > { %16180 = vmatprep.subr.bf16.mxu1 %v17183_v25 }
 0x599   : > { %6002 = vmatmul.mubr.bf16.gmra.mxu1 %v5578_v47 }
 0x59a   : > { %6009 = vmatprep.mubr.bf16.mxu1 %v5554_v55  ;;  %16181 = vmatpush3.bf16.msra.mxu1 %v17184_v35 }
 0x59b   : > { %16182 = vmatprep.subr.bf16.mxu1 %v17185_v23 }
 0x59e   : > { %16183 = vmatpush3.bf16.msra.mxu1 %v17186_v10 }
 0x59f   : > { %16184 = vmatprep.subr.bf16.mxu1 %v17189_v21 }
 0x5a1   : > { %6010 = vmatmul.mubr.bf16.gmra.mxu1 %v5582_v8 }
 0x5a2   : > { %6017 = vmatprep.mubr.bf16.mxu1 %v5590_v29  ;;  %16185 = vmatpush3.bf16.msra.mxu1 %v17190_v13 }
 0x5a3   : > { %16186 = vmatprep.subr.bf16.mxu1 %v17193_v49 }
 0x5a6   : > { %16187 = vmatpush3.bf16.msra.mxu1 %v17194_v36 }
 0x5a7   : > { %16188 = vmatprep.subr.bf16.mxu1 %v17197_v61 }
 0x5a9   : > { %6018 = vmatmul.mubr.bf16.gmra.mxu1 %v5586_v62 }
 0x5c0   : > { %v16852_v20 = vpop.f32.mrf.mxu0 }
 0x5c2   : > { %v6060_v5 = vpop.f32.mrf.mxu0 }
 0x5c4   : > { %v16853_v22 = vpop.f32.mrf.mxu0 }
 0x5c6   : > { %v6063_v62 = vpop.f32.mrf.mxu0 }
 0x5d3   : > { %v21039_v35 = vpop.f32.mrf.mxu0 }
 0x5f8   : > { %v16104_v4 = vpop.f32.mrf.mxu1 }
 0x5fa   : > { %v16105_v15 = vpop.f32.mrf.mxu1 }
 0x5fb   : > { %v16106_v37 = vadd.f32 %v16105_v15, %v16104_v4  ;;  %v17198_v4 = vld [vmem:[#allocation7 + $0x8] sm:$0xff]  }
 0x5fc   : > { %v16107_v60 = vpop.f32.mrf.mxu1  ;;  %16189 = vmatpush3.bf16.msra.mxu1 %v17198_v4 }
 0x5fd   : > { %v5931_v11 = vadd.f32 %v16106_v37, %v21034_v3 }
 0x5fe   : > { %v16108_v54 = vpop.f32.mrf.mxu1 }
 0x5ff   : > { %v16109_v55 = vadd.f32 %v16108_v54, %v16107_v60 }
 0x601   : > { %v5934_v47 = vadd.f32 %v16109_v55, %v21034_v3 }
 0x636   : > { %v16110_v31 = vpop.f32.mrf.mxu1 }
 0x638   : > { %v16111_v2 = vpop.f32.mrf.mxu1 }
 0x639   : > { %v16112_v12 = vadd.f32 %v16111_v2, %v16110_v31  ;;  %v17199_v31 = vld [vmem:[#allocation7 + $0xe0] sm:$0xff]  }
 0x63a   : > { %v16113_v34 = vpop.f32.mrf.mxu1  ;;  %v17200_v2 = vld [vmem:[#allocation7 + $0xa0] sm:$0xff]   ;;  %16222 = vmatprep.subr.bf16.mxu0 %v17199_v31  ;;  %v17207_v31 = vld [vmem:[#allocation7 + $0x90] sm:$0xff]  }
 0x63b   : > { %v5939_v39 = vadd.f32 %v16112_v12, %v21034_v3  ;;  %16223 = vmatpush3.bf16.msra.mxu0 %v17200_v2  ;;  %v17208_v2 = vld [vmem:[#allocation7 + $0xc8] sm:$0xff]  }
 0x63c   : > { %v16114_v53 = vpop.f32.mrf.mxu1 }
 0x63d   : > { %v16115_v9 = vadd.f32 %v16114_v53, %v16113_v34  ;;  %v17201_v34 = vld [vmem:[#allocation7 + $0x40] sm:$0xff]  }
 0x63e   : > { %16190 = vmatprep.subr.bf16.mxu1 %v17201_v34 }
 0x63f   : > { %v5942_v36 = vadd.f32 %v16115_v9, %v21034_v3 }
 0x640   : > { %v16116_v19 = vpop.f32.mrf.mxu1 }
 0x642   : > { %v16117_v7 = vpop.f32.mrf.mxu1 }
 0x643   : > { %v16118_v23 = vadd.f32 %v16117_v7, %v16116_v19  ;;  %v17202_v19 = vld [vmem:[#allocation7] sm:$0xff]   ;;  %v17203_v7 = vld [vmem:[#allocation7 + $0xd8] sm:$0xff]  }
 0x644   : > { %v16119_v40 = vpop.f32.mrf.mxu1  ;;  %16191 = vmatpush3.bf16.msra.mxu1 %v17202_v19  ;;  %16224 = vmatprep.subr.bf16.mxu0 %v17203_v7 }
 0x646   : > { %v16120_v56 = vpop.f32.mrf.mxu1 }
 0x647   : > { %v16121_v60 = vadd.f32 %v16120_v56, %v16119_v40 }
 0x649   : > { %v16122_v38 = vpop.f32.mrf.mxu1 }
 0x64b   : > { %v16123_v44 = vpop.f32.mrf.mxu1 }
 0x64c   : > { %v16124_v61 = vadd.f32 %v16123_v44, %v16122_v38 }
 0x64d   : > { %v21027_v59 = vpop.f32.mrf.mxu1 }
 0x64f   : > { %v21029_v32 = vpop.f32.mrf.mxu1 }
 0x651   : > { %v16144_v33 = vpop.f32.mrf.mxu1 }
 0x653   : > { %v16145_v30 = vpop.f32.mrf.mxu1 }
 0x654   : > { %v16146_v63 = vadd.f32 %v16145_v30, %v16144_v33  ;;  %v5947_v30 = vadd.f32 %v16118_v23, %v21034_v3  ;;  %v21071_v23 = vld [vmem:[#allocation7 + $0x118] sm:$0xff]  }
 0x655   : > { %v16147_v17 = vpop.f32.mrf.mxu1  ;;  %16858 = vmatprep.subr.bf16.mxu1 %v21071_v23 }
 0x656   : > { %v5996_v0 = vadd.f32 %v16146_v63, %v5931_v11  ;;  %v17204_v63 = vld [vmem:[#allocation7 + $0x98] sm:$0xff]  }
 0x657   : > { %v16148_v50 = vpop.f32.mrf.mxu1  ;;  %16225 = vmatpush3.bf16.msra.mxu0 %v17204_v63 }
 0x658   : > { %v6061_v18 = vadd.f32 %v6060_v5, %v5996_v0  ;;  %v16149_v1 = vadd.f32 %v16148_v50, %v16147_v17  ;;  %v6076_v5 = vpop.f32.mrf.mxu0  ;;  %v5950_v17 = vadd.f32 %v16121_v60, %v21034_v3  ;;  %v5955_v0 = vadd.f32 %v16124_v61, %v21034_v3 }
 0x659   : > { %v16150_v8 = vpop.f32.mrf.mxu1 }
 0x65a   : > { %v6091_v29 = vmax.f32 %v6061_v18, 0.0  ;;  %v5999_v58 = vadd.f32 %v16149_v1, %v5934_v47  ;;  %v16127_v18 = vadd.f32 %v21029_v32, %v21027_v59 }
 0x65b   : > { %v16151_v26 = vpop.f32.mrf.mxu1 }
 0x65c   : > { %v6099_v46 = vpack.c.bf16 %v6091_v29, %v6091_v29  ;;  %v6064_v6 = vadd.f32 %v6063_v62, %v5999_v58  ;;  %v16152_v45 = vadd.f32 %v16151_v26, %v16150_v8  ;;  %v21053_v58 = vpop.f32.mrf.mxu0 }
 0x65d   : > { %v16153_v25 = vpop.f32.mrf.mxu1 }
 0x65e   : > { %v6108_v48 = vshrl.u32 %v6099_v46, 16  ;;  %v6092_v52 = vmax.f32 %v6064_v6, 0.0  ;;  %v6004_v51 = vadd.f32 %v16152_v45, %v5939_v39  ;;  %v6111_v24 = vshll.u32 %v6099_v46, 16 }
 0x65f   : > { %v16154_v10 = vpop.f32.mrf.mxu1 }
 0x660   : > { %v6110_v21 = vrot.slane %v6108_v48, 7  ;;  %v6100_v13 = vpack.c.bf16 %v6092_v52, %v6092_v52  ;;  %v6069_v15 = vadd.f32 %v16852_v20, %v6004_v51  ;;  %v16155_v49 = vadd.f32 %v16154_v10, %v16153_v25 }
 0x661   : > { %v16156_v54 = vpop.f32.mrf.mxu1 }
 0x662   : > { %v6113_v53 = vor.u32 %v6111_v24, %v6110_v21  ;;  %v6115_v37 = vshrl.u32 %v6100_v13, 16  ;;  %v6093_v33 = vmax.f32 %v6069_v15, 0.0  ;;  %v6118_v11 = vshll.u32 %v6100_v13, 16  ;;  %v6079_v13 = vpop.f32.mrf.mxu0 }
 0x663   : > { %v6007_v20 = vadd.f32 %v16155_v49, %v5942_v36  ;;  %v16157_v55 = vpop.f32.mrf.mxu1  ;;  %v5958_v24 = vadd.f32 %v16127_v18, %v21034_v3 }
 0x664   : > { %v6171_v40 = vsel %vm18822_vm4, 0, %v6113_v53  ;;  %v6117_v56 = vrot.slane %v6115_v37, 7  ;;  %v6101_v38 = vpack.c.bf16 %v6093_v33, %v6093_v33  ;;  %v16158_v44 = vadd.f32 %v16157_v55, %v16156_v54  ;;  %v17206_v54 = vld [vmem:[#allocation7 + $0xd0] sm:$0xff]  }
 0x665   : > { %v6072_v50 = vadd.f32 %v16853_v22, %v6007_v20  ;;  %v16159_v47 = vpop.f32.mrf.mxu1  ;;  %v21049_v12 = vsel %vm20613_vm1, %v6171_v40, 0  ;;  %16226 = vmatprep.subr.bf16.mxu0 %v17206_v54 }
 0x666   : > { %v6120_v1 = vor.u32 %v6118_v11, %v6117_v56  ;;  %v6122_v8 = vshrl.u32 %v6101_v38, 16  ;;  %v6012_v29 = vadd.f32 %v16158_v44, %v5947_v30  ;;  %v6125_v62 = vshll.u32 %v6101_v38, 16  ;;  %16227 = vmatpush3.bf16.msra.mxu0 %v17207_v31  ;;  %v17209_v56 = vld [vmem:[#allocation7 + $0x88] sm:$0xff]  }
 0x667   : > { %v6094_v26 = vmax.f32 %v6072_v50, 0.0  ;;  %v16160_v39 = vpop.f32.mrf.mxu1  ;;  %v21057_v22 = vcombine.low %v21049_v12, %v21049_v12  ;;  %v21061_v46 = vcombine.high %v21049_v12, %v21049_v12  ;;  %16228 = vmatprep.subr.bf16.mxu0 %v17208_v2  ;;  %v15166_v41 = vcombine.low %v22311_v27, %v21049_v12 }
 0x668   : > { %v6172_v6 = vsel %vm18822_vm4, 0, %v6120_v1  ;;  %v6124_v59 = vrot.slane %v6122_v8, 7  ;;  %v6077_v32 = vadd.f32 %v6076_v5, %v6012_v29  ;;  %v16161_v45 = vadd.f32 %v16160_v39, %v16159_v47 }
 0x669   : > { %v6102_v9 = vpack.c.bf16 %v6094_v26, %v6094_v26  ;;  %v16162_v25 = vpop.f32.mrf.mxu1  ;;  %v21067_v48 = vsel %vm20613_vm1, %v6172_v6, 0  ;;  %v6223_v52 = vshrl.u32 %v21057_v22, 16  ;;  %v6226_v51 = vshll.u32 %v21057_v22, 16 }
 0x66a   : > { %v6127_v10 = vor.u32 %v6125_v62, %v6124_v59  ;;  %v6095_v4 = vmax.f32 %v6077_v32, 0.0  ;;  %v6015_v21 = vadd.f32 %v16161_v45, %v5950_v17  ;;  %v21076_v36 = vcombine.low %v21067_v48, %v21067_v48  ;;  %16229 = vmatpush3.bf16.msra.mxu0 %v17209_v56 }
 0x66b   : > { %v6129_v15 = vshrl.u32 %v6102_v9, 16  ;;  %v16163_v49 = vpop.f32.mrf.mxu1  ;;  %v15178_v60 = vcombine.low %v21049_v12, %v21067_v48  ;;  %v6225_v61 = vrot.slane %v6223_v52, 4  ;;  %v6132_v19 = vshll.u32 %v6102_v9, 16 }
 0x66c   : > { %v6173_v3 = vsel %vm18822_vm4, 0, %v6127_v10  ;;  %v6103_v34 = vpack.c.bf16 %v6095_v4, %v6095_v4  ;;  %v6080_v53 = vadd.f32 %v6079_v13, %v6015_v21  ;;  %v16164_v37 = vadd.f32 %v16163_v49, %v16162_v25 }
 0x66d   : > { %v6131_v33 = vrot.slane %v6129_v15, 7  ;;  %6409 = vrot.lane.b32.xlu0 %v15178_v60, %s18239_s27  ;;  %v16165_v7 = vpop.f32.mrf.mxu1  ;;  %v6228_v5 = vrot.slane %v6226_v51, 5  ;;  %v6232_v30 = vshll.u32 %v21061_v46, 16  ;;  %v21087_v40 = vsel %vm20613_vm1, %v6173_v3, 0 }
 0x66e   : > { %v6136_v11 = vshrl.u32 %v6103_v34, 16  ;;  %v6096_v20 = vmax.f32 %v6080_v53, 0.0  ;;  %v6020_v55 = vadd.f32 %v16164_v37, %v5955_v0  ;;  %v6139_v44 = vshll.u32 %v6103_v34, 16  ;;  %v17211_v34 = vld [vmem:[#allocation7 + $0xc0] sm:$0xff]  }
 0x66f   : > { %v6134_v38 = vor.u32 %v6132_v19, %v6131_v33  ;;  %v16166_v63 = vpop.f32.mrf.mxu1  ;;  %v6229_v17 = vor.u32 %v6228_v5, %v6225_v61  ;;  %v6234_v50 = vrot.slane %v6232_v30, 5  ;;  %v21094_v62 = vcombine.low %v21087_v40, %v21087_v40  ;;  %v17212_v53 = vld [vmem:[#allocation7 + $0x80] sm:$0xff]   ;;  %16230 = vmatprep.subr.bf16.mxu0 %v17211_v34 }
 0x670   : > { %v6138_v47 = vrot.slane %v6136_v11, 7  ;;  %v6104_v18 = vpack.c.bf16 %v6096_v20, %v6096_v20  ;;  %v6085_v1 = vadd.f32 %v21039_v35, %v6020_v55  ;;  %v16167_v8 = vadd.f32 %v16166_v63, %v16165_v7  ;;  %16231 = vmatpush3.bf16.msra.mxu0 %v17212_v53 }
 0x671   : > { %v6174_v0 = vsel %vm18822_vm4, 0, %v6134_v38  ;;  %v6230_v29 = vrot.slane %v6229_v17, 4  ;;  %v21098_v26 = vcombine.high %v21067_v48, %v21067_v48  ;;  %v21102_v32 = vcombine.high %v21087_v40, %v21087_v40 }
 0x672   : > { %v6141_v39 = vor.u32 %v6139_v44, %v6138_v47  ;;  %v6143_v6 = vshrl.u32 %v6104_v18, 16  ;;  %v6097_v59 = vmax.f32 %v6085_v1, 0.0  ;;  %v6023_v35 = vadd.f32 %v16167_v8, %v5958_v24 }
 0x673   : > { %v21106_v45 = vsel %vm20690_vm8, %v6230_v29, %v6234_v50  ;;  %v21110_v9 = vsel %vm20613_vm1, %v6174_v0, 0  ;;  %v6237_v25 = vshrl.u32 %v21076_v36, 16  ;;  %v6146_v51 = vshll.u32 %v6104_v18, 16 }
 0x674   : > { %v6145_v52 = vrot.slane %v6143_v6, 7  ;;  %v6105_v10 = vpack.c.bf16 %v6097_v59, %v6097_v59  ;;  %v15170_v4 = vcombine.low %v20702_v14, %v21106_v45  ;;  %v6175_v21 = vsel %vm18822_vm4, 0, %v6141_v39 }
 0x675   : > { %v6088_v24 = vadd.f32 %v21053_v58, %v6023_v35  ;;  %v15179_v13 = vcombine.low %v21087_v40, %v21110_v9  ;;  %v6239_v15 = vrot.slane %v6237_v25, 4  ;;  %v6240_v54 = vshll.u32 %v21076_v36, 16 }
 0x676   : > { %v6148_v49 = vor.u32 %v6146_v51, %v6145_v52  ;;  %v6150_v60 = vshrl.u32 %v6105_v10, 16  ;;  %v6153_v61 = vshll.u32 %v6105_v10, 16  ;;  %6386 = vrot.lane.b32.xlu1 %v15170_v4, %s18239_s27  ;;  %v6246_v2 = vshll.u32 %v21098_v26, 16 }
 0x677   : > { %v6098_v31 = vmax.f32 %v6088_v24, 0.0  ;;  %6411 = vrot.lane.b32.xlu0 %v15179_v13, %s18239_s27  ;;  %v6251_v3 = vshrl.u32 %v21094_v62, 16  ;;  %v6254_v58 = vshll.u32 %v21094_v62, 16  ;;  %v6242_v19 = vrot.slane %v6240_v54, 5 }
 0x678   : > { %v6176_v37 = vsel %vm18822_vm4, 0, %v6148_v49  ;;  %v6152_v33 = vrot.slane %v6150_v60, 7  ;;  %v6260_v7 = vshll.u32 %v21102_v32, 16  ;;  %v21131_v30 = vcombine.low %v21110_v9, %v21110_v9 }
 0x679   : > { %v6106_v5 = vpack.c.bf16 %v6098_v31, %v6098_v31  ;;  %v6253_v11 = vrot.slane %v6251_v3, 4  ;;  %v6256_v20 = vrot.slane %v6254_v58, 5  ;;  %v6243_v56 = vor.u32 %v6242_v19, %v6239_v15 }
 0x67a   : > { %v6155_v55 = vor.u32 %v6153_v61, %v6152_v33  ;;  %v6248_v38 = vrot.slane %v6246_v2, 5  ;;  %v21135_v44 = vsel %vm20613_vm1, %v6175_v21, 0  ;;  %v6262_v50 = vrot.slane %v6260_v7, 5 }
 0x67b   : > { %v6157_v63 = vshrl.u32 %v6106_v5, 16  ;;  %v6257_v17 = vor.u32 %v6256_v20, %v6253_v11  ;;  %v21139_v47 = vsel %vm20613_vm1, %v6176_v37, 0  ;;  %v6160_v1 = vshll.u32 %v6106_v5, 16 }
 0x67c   : > { %v6177_v18 = vsel %vm18822_vm4, 0, %v6155_v55  ;;  %v6244_v8 = vrot.slane %v6243_v56, 4  ;;  %v21145_v0 = vcombine.low %v21135_v44, %v21135_v44  ;;  %v15180_v6 = vcombine.low %v21135_v44, %v21139_v47 }
 0x67d   : > { %v6159_v29 = vrot.slane %v6157_v63, 7  ;;  %v6258_v39 = vrot.slane %v6257_v17, 4  ;;  %v15156_v59 = vrot.slane %v21057_v22, 9  ;;  %v6322_v25 = vrot.slane %v21061_v46, 5 }
 0x67e   : > { %v21152_v35 = vsel %vm20690_vm8, %v6244_v8, %v6248_v38  ;;  %v15157_v52 = vrot.slane %v21076_v36, 9  ;;  %v6326_v51 = vrot.slane %v21098_v26, 5  ;;  %6413 = vrot.lane.b32.xlu0 %v15180_v6, %s18239_s27  ;;  %v15149_v22 = vcombine.high %v21110_v9, %v21110_v9 }
 0x67f   : > { %v6162_v10 = vor.u32 %v6160_v1, %v6159_v29  ;;  %v21159_v4 = vsel %vm20690_vm8, %v6258_v39, %v6262_v50  ;;  %v21166_v21 = vcombine.high %v21135_v44, %v21135_v44  ;;  %v21172_v36 = vsel %vm20771_vm5, %v15156_v59, %v6322_v25 }
 0x680   : > { %v15171_v46 = vcombine.low %v21152_v35, %v21159_v4  ;;  %v21176_v26 = vsel %vm20771_vm5, %v15157_v52, %v6326_v51  ;;  %v6265_v24 = vshrl.u32 %v21131_v30, 16  ;;  %v6268_v49 = vshll.u32 %v21131_v30, 16 }
 0x681   : > { %v6178_v13 = vsel %vm18822_vm4, 0, %v6162_v10  ;;  %v15186_v15 = vcombine.low %v21172_v36, %v21176_v26  ;;  %v6274_v60 = vshll.u32 %v15149_v22, 16  ;;  %v6279_v54 = vshrl.u32 %v21145_v0, 16 }
 0x682   : > { %6388 = vrot.lane.b32.xlu1 %v15171_v46, %s18239_s27  ;;  %v6267_v61 = vrot.slane %v6265_v24, 4  ;;  %v6282_v31 = vshll.u32 %v21145_v0, 16  ;;  %v6288_v2 = vshll.u32 %v21166_v21, 16  ;;  %v21190_v3 = vcombine.low %v21139_v47, %v21139_v47 }
 0x683   : > { %6427 = vrot.lane.b32.xlu0 %v15186_v15, %s18239_s27  ;;  %v6270_v58 = vrot.slane %v6268_v49, 5  ;;  %v21195_v34 = vsel %vm20613_vm1, %v6177_v18, 0  ;;  %v21199_v53 = vsel %vm20613_vm1, %v6178_v13, 0  ;;  %v6281_v37 = vrot.slane %v6279_v54, 4  ;;  %vm21344_vm1 = vmor %vm7514_vm14, %vm5126_vm13 }
 0x684   : > { %v6284_v33 = vrot.slane %v6282_v31, 5  ;;  %v6276_v7 = vrot.slane %v6274_v60, 5  ;;  %v6290_v5 = vrot.slane %v6288_v2, 5  ;;  %v21203_v11 = vcombine.low %v21199_v53, %v21199_v53  ;;  %vm21422_vm13 = vmand %vm5411_vm15, %vm7407_vm2 }
 0x685   : > { %v6271_v19 = vor.u32 %v6270_v58, %v6267_v61  ;;  %v15154_v55 = vcombine.low %v21195_v34, %v21195_v34  ;;  %v15159_v56 = vrot.slane %v21131_v30, 9  ;;  %v6334_v38 = vrot.slane %v15149_v22, 5 }
 0x686   : > { %v6285_v20 = vor.u32 %v6284_v33, %v6281_v37  ;;  %v15153_v28 = vcombine.high %v21139_v47, %v21139_v47  ;;  %v15155_v17 = vcombine.high %v21195_v34, %v21195_v34  ;;  %v6293_v50 = vshrl.u32 %v21190_v3, 16 }
 0x687   : > { %v6272_v63 = vrot.slane %v6271_v19, 4  ;;  %v15181_v1 = vcombine.low %v21195_v34, %v21199_v53  ;;  %v15158_v8 = vrot.slane %v21094_v62, 9  ;;  %v6296_v29 = vshll.u32 %v21190_v3, 16 }
 0x688   : > { %v6286_v18 = vrot.slane %v6285_v20, 4  ;;  %v6330_v39 = vrot.slane %v21102_v32, 5  ;;  %v6335_v6 = vsel %vm20771_vm5, %v15159_v56, %v6334_v38  ;;  %v6295_v59 = vrot.slane %v6293_v50, 4 }
 0x689   : > { %v21219_v30 = vsel %vm20690_vm8, %v6272_v63, %v6276_v7  ;;  %v6298_v52 = vrot.slane %v6296_v29, 5  ;;  %v6307_v51 = vshrl.u32 %v15154_v55, 16  ;;  %v6310_v10 = vshll.u32 %v15154_v55, 16 }
 0x68a   : > { %v21226_v25 = vsel %vm20690_vm8, %v6286_v18, %v6290_v5  ;;  %v6302_v22 = vshll.u32 %v15153_v28, 16  ;;  %v6316_v46 = vshll.u32 %v15155_v17, 16  ;;  %v15164_v24 = vcombine.high %v21199_v53, %v21199_v53 }
 0x68b   : > { %v15172_v62 = vcombine.low %v21219_v30, %v21226_v25  ;;  %v6299_v32 = vor.u32 %v6298_v52, %v6295_v59  ;;  %v6309_v13 = vrot.slane %v6307_v51, 4  ;;  %v6312_v15 = vrot.slane %v6310_v10, 5 }
 0x68c   : > { %v6354_v49 = vshrl.u32 %v21203_v11, 16  ;;  %v6331_v60 = vsel %vm20771_vm5, %v15158_v8, %v6330_v39  ;;  %v6357_v61 = vshll.u32 %v21203_v11, 16  ;;  %v6363_v54 = vshll.u32 %v15164_v24, 16 }
 0x68d   : > { %6390 = vrot.lane.b32.xlu1 %v15172_v62, %s18239_s27  ;;  %v15160_v31 = vrot.slane %v21145_v0, 9  ;;  %v6300_v2 = vrot.slane %v6299_v32, 4  ;;  %v6313_v58 = vor.u32 %v6312_v15, %v6309_v13  ;;  %v6338_v33 = vrot.slane %v21166_v21, 5  ;;  %v17214_v32 = vld [vmem:[#allocation7 + $0x100] sm:$0xff]  }
 0x68e   : > { %v6356_v37 = vrot.slane %v6354_v49, 4  ;;  %v15187_v19 = vcombine.low %v6331_v60, %v6335_v6  ;;  %v6359_v7 = vrot.slane %v6357_v61, 5  ;;  %v15161_v5 = vrot.slane %v21190_v3, 9 }
 0x68f   : > { %v6342_v20 = vrot.slane %v15153_v28, 5  ;;  %v6304_v56 = vrot.slane %v6302_v22, 5  ;;  %v6314_v38 = vrot.slane %v6313_v58, 4  ;;  %v6318_v63 = vrot.slane %v6316_v46, 5 }
 0x690   : > { %v15162_v50 = vrot.slane %v15154_v55, 9  ;;  %v6360_v18 = vor.u32 %v6359_v7, %v6356_v37  ;;  %v6365_v8 = vrot.slane %v6363_v54, 5  ;;  %v6339_v0 = vsel %vm20771_vm5, %v15160_v31, %v6338_v33 }
 0x691   : > { %6415 = vrot.lane.b32.xlu1 %v15181_v1, %s18239_s27  ;;  %v6346_v29 = vrot.slane %v15155_v17, 5  ;;  %v21245_v21 = vsel %vm20690_vm8, %v6300_v2, %v6304_v56  ;;  %v21249_v3 = vsel %vm20690_vm8, %v6314_v38, %v6318_v63  ;;  %v6343_v28 = vsel %vm20771_vm5, %v15161_v5, %v6342_v20 }
 0x692   : > { %v15165_v55 = vrot.slane %v21203_v11, 9  ;;  %v15173_v1 = vcombine.low %v21245_v21, %v21249_v3  ;;  %v6361_v39 = vrot.slane %v6360_v18, 4  ;;  %v21259_v59 = vcombine.low %v21176_v26, %v6331_v60  ;;  %v22331_v18 = vld [vmem:[#allocation44_spill] sm:$0xff] }
 0x693   : > { %v6347_v17 = vsel %vm20771_vm5, %v15162_v50, %v6346_v29  ;;  %v6369_v52 = vrot.slane %v15164_v24, 5  ;;  %v15167_v51 = vcombine.low %v21067_v48, %v21087_v40  ;;  %v21263_v10 = vcombine.low %v6335_v6, %v6339_v0 }
 0x694   : > { %v15182_v62 = vcombine.low %v21106_v45, %v21152_v35  ;;  %6392 = vrot.lane.b32.xlu0 %v15173_v1, %s18239_s27  ;;  %v21271_v11 = vsel %vm20690_vm8, %v6361_v39, %v6365_v8  ;;  %v15168_v22 = vcombine.low %v21110_v9, %v21135_v44  ;;  %v21277_v48 = vcombine.low %v6343_v28, %v6347_v17  ;;  %v17217_v1 = vld [vmem:[#allocation9 + $0x70] sm:$0xff]  }
 0x695   : > { %6429 = vrot.lane.b32.xlu1 %v15187_v19, %s18239_s27  ;;  %v15191_v26 = vcombine.low %v21271_v11, %v20702_v14  ;;  %v15169_v40 = vcombine.low %v21139_v47, %v21195_v34  ;;  %v15188_v45 = vcombine.low %v6339_v0, %v6343_v28  ;;  %v15183_v35 = vcombine.low %v21159_v4, %v21219_v30  ;;  %v17210_v30 = vld [vmem:[#allocation7 + $0x110] sm:$0xff]   ;;  %v17215_v28 = vld [vmem:[#allocation9 + $0x78] sm:$0xff]  }
 0x696   : > { %v15184_v16 = vcombine.low %v21226_v25, %v21245_v21  ;;  %v15185_v6 = vcombine.low %v21249_v3, %v21271_v11  ;;  %v21289_v14 = vsel %vm20771_vm5, %v15165_v55, %v6369_v52  ;;  %v15174_v44 = vcombine.low %v20952_v42, %v21172_v36  ;;  %v17213_v36 = vld [vmem:[#allocation7 + $0x108] sm:$0xff]   ;;  %v17216_v55 = vld [vmem:[#allocation9 + $0x38] sm:$0xff]   ;;  %16264 = vmatprep.subr.bf16.mxu0 %v17215_v28  ;;  %v17223_v52 = vld [vmem:[#allocation9 + $0xf0] sm:$0xff]  }
 0x697   : > { %v15189_v9 = vcombine.low %v6347_v17, %v21289_v14  ;;  %v15190_v20 = vcombine.low %v21199_v53, %v22311_v27  ;;  %v15192_v50 = vcombine.low %v21289_v14, %v20952_v42  ;;  %v21332_v8 = vrot.slane %v22311_v27, %v22331_v18  ;;  %v17219_v17 = vld [vmem:[#allocation9 + $0xf8] sm:$0xff]   ;;  %v17224_v11 = vld [vmem:[#allocation9 + $0xb0] sm:$0xff]  }
 0x698   : > { %6431 = vrot.lane.b32.xlu0 %v15188_v45, %s18239_s27  ;;  %v17228_v45 = vld [vmem:[#allocation9 + $0xa8] sm:$0xff]   ;;  %v17229_v14 = vld [vmem:[#allocation9 + $0x58] sm:$0xff]   ;;  %vm7449_vm8 = vsmask.f32 3336  ;;  %vm7451_vm15 = vsmask.f32 5392 }
 0x699   : > { %6437 = vrot.lane.b32.xlu1 %v15191_v26, %s18239_s27  ;;  %v21338_v0 = vcombine.high %v21332_v8, %v21332_v8  ;;  %v15266_v42 = vrot.slane %v21332_v8, 9  ;;  %vm7450_vm5 = vmor %vm7448_vm6, %vm7449_vm8  ;;  %vm9381_vm8 = vsmask.f32 4368 }
 0x69a   : > { %vm7452_vm12 = vmor %vm7450_vm5, %vm7451_vm15  ;;  %vm9326_vm15 = vcmask 1041408   ;;  %vm9383_vm5 = vsmask.f32 5396 }
 0x69b   : > { %v7519_v29 = vrot.slane %v21338_v0, 7  ;;  %vm21472_vm14 = vmor %vm7452_vm12, %vm7453_vm0 }
 0x69c   : > { %6433 = vrot.lane.b32.xlu0 %v15189_v9, %s18239_s27  ;;  %v17232_v9 = vld [vmem:[#allocation9 + $0xa0] sm:$0xff]   ;;  %vm21707_vm12 = vmand %vm9326_vm15, %vm7448_vm6 }
 0x69d   : > { %v21350_v3 = vsel %vm21344_vm1, %v15266_v42, %v7519_v29 }
 0x6df   : > { %v6410_v47 = vpop.permute.xlu0 %6409 }
 0x6e0   : > { %v6458_v4 = vsel %vm2617_vm7, %v15174_v44, %v6410_v47  ;;  %v17235_v47 = vld [vmem:[#allocation9 + $0xd8] sm:$0xff]  }
 0x6e1   : > { %6828 = vmatprep.mubr.bf16.mxu1 %v6458_v4 }
 0x6e8   : > { %v6387_v34 = vpop.permute.xlu1 %6386 }
 0x6e9   : > { %v6442_v25 = vsel %vm2617_vm7, %v15166_v41, %v6387_v34  ;;  %v6412_v46 = vpop.permute.xlu0 %6411  ;;  %v17230_v41 = vld [vmem:[#allocation9 + $0x18] sm:$0xff]   ;;  %v17233_v34 = vld [vmem:[#allocation9 + $0x50] sm:$0xff]  }
 0x6ea   : > { %6829 = vmatmul.mubr.bf16.vlgmr.msra.gmra.mxu1 %v6442_v25  ;;  %v6462_v24 = vsel %vm2617_vm7, %v21259_v59, %v6412_v46 }
 0x6eb   : > { %16859 = vmatpush3.bf16.msra.mxu1 %v21071_v23  ;;  %6836 = vmatprep.mubr.bf16.mxu1 %v6462_v24  ;;  %v17234_v24 = vld [vmem:[#allocation9 + $0x10] sm:$0xff]  }
 0x6ec   : > { %16860 = vmatprep.subr.bf16.mxu1 %v17210_v30 }
 0x6ef   : > { %16861 = vmatpush3.bf16.msra.mxu1 %v17210_v30  ;;  %v17236_v30 = vld [vmem:[#allocation9 + $0x98] sm:$0xff]  }
 0x6f0   : > { %16862 = vmatprep.subr.bf16.mxu1 %v17213_v36  ;;  %v6414_v13 = vpop.permute.xlu0 %6413 }
 0x6f1   : > { %v6466_v15 = vsel %vm2617_vm7, %v21263_v10, %v6414_v13 }
 0x6f3   : > { %16863 = vmatpush3.bf16.msra.mxu1 %v17213_v36 }
 0x6f4   : > { %v6389_v12 = vpop.permute.xlu1 %6388  ;;  %16864 = vmatprep.subr.bf16.mxu1 %v17214_v32 }
 0x6f5   : > { %v6446_v49 = vsel %vm2617_vm7, %v15167_v51, %v6389_v12  ;;  %v6428_v60 = vpop.permute.xlu0 %6427 }
 0x6f6   : > { %6837 = vmatmul.mubr.bf16.gmra.mxu1 %v6446_v49  ;;  %6893 = vmatprep.mubr.bf16.mxu0 %v6446_v49  ;;  %v6474_v23 = vsel %vm2617_vm7, %v15182_v62, %v6428_v60  ;;  %v17221_v62 = vld [vmem:[#allocation9 + $0x68] sm:$0xff]  }
 0x6f7   : > { %6844 = vmatprep.mubr.bf16.mxu1 %v6466_v15  ;;  %6894 = vmatmul.mubr.bf16.vlgmr.msra.gmra.mxu0 %v6474_v23 }
 0x6f8   : > { %16865 = vmatpush3.bf16.msra.mxu1 %v17214_v32  ;;  %16265 = vmatpush3.bf16.msra.mxu0 %v17216_v55  ;;  %v17237_v32 = vld [vmem:[#allocation9 + $0x48] sm:$0xff]  }
 0x6f9   : > { %16286 = vmatprep.subr.bf16.mxu1 %v17219_v17  ;;  %16266 = vmatprep.subr.bf16.mxu0 %v17217_v1 }
 0x6ff   : > { %v6391_v61 = vpop.permute.xlu1 %6390 }
 0x700   : > { %v6450_v54 = vsel %vm2617_vm7, %v15168_v22, %v6391_v61  ;;  %v17227_v22 = vld [vmem:[#allocation9 + $0xe8] sm:$0xff]  }
 0x701   : > { %6845 = vmatmul.mubr.bf16.gmra.mxu1 %v6450_v54  ;;  %6901 = vmatprep.mubr.bf16.mxu0 %v6450_v54 }
 0x703   : > { %v6416_v31 = vpop.permute.xlu1 %6415 }
 0x704   : > { %v6470_v2 = vsel %vm2617_vm7, %v21277_v48, %v6416_v31 }
 0x705   : > { %6852 = vmatprep.mubr.bf16.mxu1 %v6470_v2 }
 0x706   : > { %v6393_v37 = vpop.permute.xlu0 %6392 }
 0x707   : > { %v6430_v58 = vpop.permute.xlu1 %6429  ;;  %v6454_v33 = vsel %vm2617_vm7, %v15169_v40, %v6393_v37  ;;  %v17225_v40 = vld [vmem:[#allocation9 + $0x60] sm:$0xff]  }
 0x708   : > { %v6478_v19 = vsel %vm2617_vm7, %v15183_v35, %v6430_v58 }
 0x709   : > { %6853 = vmatmul.mubr.bf16.gmra.mxu1 %v6454_v33  ;;  %6902 = vmatmul.mubr.bf16.gmra.mxu0 %v6478_v19 }
 0x70a   : > { %6909 = vmatprep.mubr.bf16.mxu0 %v6454_v33  ;;  %16866 = vmatprep.mubr.msk.bf16.mxu1 %vm2617_vm7, %v21259_v59  ;;  %v6432_v7 = vpop.permute.xlu0 %6431  ;;  %v17220_v59 = vld [vmem:[#allocation9 + $0xb8] sm:$0xff]  }
 0x70b   : > { %v6438_v5 = vpop.permute.xlu1 %6437  ;;  %v6482_v56 = vsel %vm2617_vm7, %v15184_v16, %v6432_v7  ;;  %v17231_v16 = vld [vmem:[#allocation9 + $0xe0] sm:$0xff]  }
 0x70c   : > { %v6490_v38 = vsel %vm2617_vm7, %v15190_v20, %v6438_v5  ;;  %v21360_v7 = vld [vmem:[%s22095_s8] ss:$0 sm:$0xff] }
 0x70e   : > { %v6434_v63 = vpop.permute.xlu0 %6433 }
 0x70f   : > { %v6486_v53 = vsel %vm2617_vm7, %v15185_v6, %v6434_v63  ;;  %v17226_v6 = vld [vmem:[#allocation9 + $0x20] sm:$0xff]  }
 0x711   : > { %6910 = vmatmul.mubr.bf16.gmra.mxu0 %v6482_v56  ;;  %16867 = vmatmul.mubr.msk.bf16.vlgmr.msra.gmra.mxu1 %vm2617_vm7, %v21263_v10  ;;  %v17218_v10 = vld [vmem:[#allocation9 + $0x30] sm:$0xff]   ;;  %v7456_v56 = vshrl.u32 %v21332_v8, 16 }
 0x712   : > { %6917 = vmatprep.mubr.bf16.mxu0 %v6490_v38  ;;  %16870 = vmatprep.mubr.msk.bf16.mxu1 %vm2617_vm7, %v21277_v48  ;;  %v17222_v48 = vld [vmem:[#allocation9 + $0x28] sm:$0xff]   ;;  %v7459_v38 = vshll.u32 %v21332_v8, 16  ;;  %v7465_v8 = vshll.u32 %v21338_v0, 16 }
 0x713   : > { %16287 = vmatpush3.bf16.msra.mxu1 %v17220_v59  ;;  %16267 = vmatpush3.bf16.msra.mxu0 %v17218_v10 }
 0x714   : > { %16288 = vmatprep.subr.bf16.mxu1 %v17223_v52  ;;  %16268 = vmatprep.subr.bf16.mxu0 %v17221_v62  ;;  %v21367_v52 = vrot.slane %v7456_v56, 6 }
 0x717   : > { %16289 = vmatpush3.bf16.msra.mxu1 %v17224_v11  ;;  %16269 = vmatpush3.bf16.msra.mxu0 %v17222_v48 }
 0x718   : > { %16290 = vmatprep.subr.bf16.mxu1 %v17227_v22  ;;  %16270 = vmatprep.subr.bf16.mxu0 %v17225_v40 }
 0x719   : > { %6918 = vmatmul.mubr.bf16.gmra.mxu0 %v6486_v53  ;;  %16871 = vmatmul.mubr.msk.bf16.gmra.mxu1 %vm2617_vm7, %v15192_v50 }
 0x71b   : > { %16291 = vmatpush3.bf16.msra.mxu1 %v17228_v45  ;;  %16271 = vmatpush3.bf16.msra.mxu0 %v17226_v6 }
 0x71c   : > { %16292 = vmatprep.subr.bf16.mxu1 %v17231_v16  ;;  %16272 = vmatprep.subr.bf16.mxu0 %v17229_v14 }
 0x71f   : > { %16293 = vmatpush3.bf16.msra.mxu1 %v17232_v9  ;;  %16273 = vmatpush3.bf16.msra.mxu0 %v17230_v41 }
 0x720   : > { %16294 = vmatprep.subr.bf16.mxu1 %v17235_v47  ;;  %16274 = vmatprep.subr.bf16.mxu0 %v17233_v34 }
 0x723   : > { %16295 = vmatpush3.bf16.msra.mxu1 %v17236_v30  ;;  %16275 = vmatpush3.bf16.msra.mxu0 %v17234_v24 }
 0x724   : > { %16276 = vmatprep.subr.bf16.mxu0 %v17237_v32 }
 0x7aa   : > { %v21352_v39 = vpop.f32.mrf.mxu1 }
 0x7ac   : > { %v16193_v51 = vpop.f32.mrf.mxu1 }
 0x7ad   : > { %v16194_v33 = vadd.f32 %v16193_v51, %v21352_v39  ;;  %v21369_v51 = vrot.slane %v7459_v38, 7 }
 0x7ae   : > { %v21354_v26 = vpop.f32.mrf.mxu1 }
 0x7af   : > { %v6831_v28 = vadd.f32 %v16194_v33, %v21360_v7  ;;  %v7462_v0 = vor.u32 %v21369_v51, %v21367_v52 }
 0x7b0   : > { %v16196_v35 = vpop.f32.mrf.mxu1 }
 0x7b1   : > { %v16197_v39 = vadd.f32 %v16196_v35, %v21354_v26 }
 0x7b3   : > { %v6834_v35 = vadd.f32 %v16197_v39, %v21360_v7 }
 0x7b6   : > { %v16198_v44 = vpop.f32.mrf.mxu1 }
 0x7b7   : > { %v16232_v46 = vpop.f32.mrf.mxu0 }
 0x7b8   : > { %v16199_v4 = vpop.f32.mrf.mxu1 }
 0x7b9   : > { %v16233_v13 = vpop.f32.mrf.mxu0  ;;  %v16200_v2 = vadd.f32 %v16199_v4, %v16198_v44  ;;  %v21378_v4 = vrot.slane %v7465_v8, 7 }
 0x7ba   : > { %v16201_v25 = vpop.f32.mrf.mxu1  ;;  %v16234_v53 = vadd.f32 %v16233_v13, %v16232_v46 }
 0x7bb   : > { %v16235_v15 = vpop.f32.mrf.mxu0  ;;  %v6839_v63 = vadd.f32 %v16200_v2, %v21360_v7 }
 0x7bc   : > { %v16202_v36 = vpop.f32.mrf.mxu1  ;;  %v6896_v11 = vadd.f32 %v16234_v53, %v6831_v28 }
 0x7bd   : > { %v16236_v23 = vpop.f32.mrf.mxu0  ;;  %v16203_v50 = vadd.f32 %v16202_v36, %v16201_v25 }
 0x7be   : > { %v16237_v48 = vadd.f32 %v16236_v23, %v16235_v15 }
 0x7bf   : > { %v6842_v10 = vadd.f32 %v16203_v50, %v21360_v7 }
 0x7c0   : > { %v6899_v13 = vadd.f32 %v16237_v48, %v6834_v35 }
 0x7c1   : > { %v16204_v12 = vpop.f32.mrf.mxu1 }
 0x7c3   : > { %v16205_v49 = vpop.f32.mrf.mxu1 }
 0x7c4   : > { %v16206_v22 = vadd.f32 %v16205_v49, %v16204_v12 }
 0x7c5   : > { %v16207_v60 = vpop.f32.mrf.mxu1 }
 0x7c6   : > { %v21382_v46 = vadd.f32 %v16206_v22, %v21360_v7 }
 0x7c7   : > { %v16208_v61 = vpop.f32.mrf.mxu1 }
 0x7c8   : > { %v21384_v24 = vadd.f32 %v16208_v61, %v16207_v60 }
 0x7c9   : > { %v16210_v54 = vpop.f32.mrf.mxu1  ;;  %v16238_v31 = vpop.f32.mrf.mxu0 }
 0x7cb   : > { %v16211_v58 = vpop.f32.mrf.mxu1  ;;  %v16239_v37 = vpop.f32.mrf.mxu0 }
 0x7cc   : > { %v16240_v19 = vadd.f32 %v16239_v37, %v16238_v31  ;;  %v16212_v40 = vadd.f32 %v16211_v58, %v16210_v54 }
 0x7cd   : > { %v16213_v5 = vpop.f32.mrf.mxu1  ;;  %v16241_v20 = vpop.f32.mrf.mxu0 }
 0x7ce   : > { %v6904_v1 = vadd.f32 %v16240_v19, %v6839_v63  ;;  %v6855_v36 = vadd.f32 %v16212_v40, %v21360_v7 }
 0x7cf   : > { %v16214_v42 = vpop.f32.mrf.mxu1  ;;  %v16242_v29 = vpop.f32.mrf.mxu0 }
 0x7d0   : > { %v16243_v55 = vadd.f32 %v16242_v29, %v16241_v20  ;;  %v16215_v9 = vadd.f32 %v16214_v42, %v16213_v5 }
 0x7d1   : > { %v16244_v17 = vpop.f32.mrf.mxu0  ;;  %v16868_v59 = vpop.f32.mrf.mxu1 }
 0x7d2   : > { %v6969_v62 = vadd.f32 %v16868_v59, %v6904_v1  ;;  %v6907_v26 = vadd.f32 %v16243_v55, %v6842_v10  ;;  %v21391_v31 = vadd.f32 %v16215_v9, %v21360_v7 }
 0x7d3   : > { %v16245_v45 = vpop.f32.mrf.mxu0  ;;  %v6960_v16 = vpop.f32.mrf.mxu1 }
 0x7d4   : > { %v6993_v6 = vmax.f32 %v6969_v62, 0.0  ;;  %v6961_v14 = vadd.f32 %v6960_v16, %v6896_v11  ;;  %v21393_v2 = vadd.f32 %v16245_v45, %v16244_v17 }
 0x7d5   : > { %v21374_v44 = vpop.f32.mrf.mxu0  ;;  %v16869_v47 = vpop.f32.mrf.mxu1 }
 0x7d6   : > { %v7041_v41 = vcombine.high %v6993_v6, %v6993_v6  ;;  %v7048_v34 = vrot.slane %v6993_v6, %v22331_v18  ;;  %v6991_v30 = vmax.f32 %v6961_v14, 0.0  ;;  %v6972_v25 = vadd.f32 %v16869_v47, %v6907_v26 }
 0x7d7   : > { %v21387_v32 = vpop.f32.mrf.mxu0  ;;  %v6963_v12 = vpop.f32.mrf.mxu1 }
 0x7d8   : > { %v7055_v15 = vrot.slane %v7041_v41, %v22331_v18  ;;  %v7056_v49 = vcombine.high %v7048_v34, %v7048_v34  ;;  %v15238_v23 = vrot.slane %v7048_v34, 9  ;;  %v7007_v54 = vcombine.high %v6991_v30, %v6991_v30 }
 0x7d9   : > { %v7014_v58 = vrot.slane %v6991_v30, %v22331_v18  ;;  %v6994_v60 = vmax.f32 %v6972_v25, 0.0  ;;  %v6964_v19 = vadd.f32 %v6963_v12, %v6899_v13  ;;  %v16250_v5 = vpop.f32.mrf.mxu0 }
 0x7da   : > { %v7057_v61 = vcombine.high %v7055_v15, %v7055_v15  ;;  %v15239_v37 = vrot.slane %v7056_v49, 9  ;;  %v15240_v33 = vrot.slane %v7055_v15, 9  ;;  %v7021_v20 = vrot.slane %v7007_v54, %v22331_v18 }
 0x7db   : > { %v7022_v56 = vcombine.high %v7014_v58, %v7014_v58  ;;  %v15234_v38 = vrot.slane %v7014_v58, 9  ;;  %v7058_v63 = vcombine.high %v6994_v60, %v6994_v60  ;;  %v7227_v53 = vmax.f32 %v7048_v34, %v15238_v23  ;;  %v16251_v62 = vpop.f32.mrf.mxu0 }
 0x7dc   : > { %v15241_v50 = vrot.slane %v7057_v61, 9  ;;  %v7228_v42 = vmax.f32 %v7056_v49, %v15239_v37  ;;  %v7065_v29 = vrot.slane %v6994_v60, %v22331_v18  ;;  %v7229_v28 = vmax.f32 %v7055_v15, %v15240_v33 }
 0x7dd   : > { %v7023_v55 = vcombine.high %v7021_v20, %v7021_v20  ;;  %v15235_v1 = vrot.slane %v7022_v56, 9  ;;  %v15236_v39 = vrot.slane %v7021_v20, 9  ;;  %v7223_v17 = vmax.f32 %v7014_v58, %v15234_v38 }
 0x7de   : > { %v7072_v59 = vrot.slane %v7058_v63, %v22331_v18  ;;  %v7073_v8 = vcombine.high %v7065_v29, %v7065_v29  ;;  %v15254_v10 = vrot.slane %v7065_v29, 9  ;;  %v7230_v11 = vmax.f32 %v7057_v61, %v15241_v50 }
 0x7df   : > { %v15237_v22 = vrot.slane %v7023_v55, 9  ;;  %v7224_v48 = vmax.f32 %v7022_v56, %v15235_v1  ;;  %v6992_v40 = vmax.f32 %v6964_v19, 0.0  ;;  %v7225_v26 = vmax.f32 %v7021_v20, %v15236_v39  ;;  %v16872_v20 = vpop.f32.mrf.mxu1 }
 0x7e0   : > { %v7074_v45 = vcombine.high %v7072_v59, %v7072_v59  ;;  %v15255_v16 = vrot.slane %v7073_v8, 9  ;;  %v15256_v6 = vrot.slane %v7072_v59, 9  ;;  %v7291_v14 = vmax.f32 %v7065_v29, %v15254_v10 }
 0x7e1   : > { %v7024_v35 = vcombine.high %v6992_v40, %v6992_v40  ;;  %v7031_v9 = vrot.slane %v6992_v40, %v22331_v18  ;;  %v16252_v47 = vadd.f32 %v16251_v62, %v16250_v5  ;;  %v7226_v39 = vmax.f32 %v7023_v55, %v15237_v22 }
 0x7e2   : > { %v15257_v41 = vrot.slane %v7074_v45, 9  ;;  %v7292_v34 = vmax.f32 %v7073_v8, %v15255_v16  ;;  %v7293_v30 = vmax.f32 %v7072_v59, %v15256_v6  ;;  %v7307_v25 = vmax.f32 %v7227_v53, %v7291_v14 }
 0x7e3   : > { %v7038_v13 = vrot.slane %v7024_v35, %v22331_v18  ;;  %v7039_v12 = vcombine.high %v7031_v9, %v7031_v9  ;;  %v15250_v15 = vrot.slane %v7031_v9, 9  ;;  %v6920_v49 = vadd.f32 %v16252_v47, %v6855_v36 }
 0x7e4   : > { %v7294_v23 = vmax.f32 %v7074_v45, %v15257_v41  ;;  %v7308_v54 = vmax.f32 %v7228_v42, %v7292_v34  ;;  %v7309_v58 = vmax.f32 %v7229_v28, %v7293_v30  ;;  %v7323_v60 = vpack.c.bf16 %v7307_v25, %v7307_v25  ;;  %v16253_v42 = vpop.f32.mrf.mxu0  ;;  %v6976_v45 = vpop.f32.mrf.mxu1 }
 0x7e5   : > { %v7040_v61 = vcombine.high %v7038_v13, %v7038_v13  ;;  %v15251_v37 = vrot.slane %v7039_v12, 9  ;;  %v15252_v33 = vrot.slane %v7038_v13, 9  ;;  %v7287_v19 = vmax.f32 %v7031_v9, %v15250_v15 }
 0x7e6   : > { %v7310_v56 = vmax.f32 %v7230_v11, %v7294_v23  ;;  %v7324_v5 = vpack.c.bf16 %v7308_v54, %v7308_v54  ;;  %v7325_v38 = vpack.c.bf16 %v7309_v58, %v7309_v58  ;;  %v7355_v63 = vunpack.c.l.b16 %v7323_v60 }
 0x7e7   : > { %v15253_v50 = vrot.slane %v7040_v61, 9  ;;  %v7288_v53 = vmax.f32 %v7039_v12, %v15251_v37  ;;  %v7289_v29 = vmax.f32 %v7038_v13, %v15252_v33  ;;  %v7303_v1 = vmax.f32 %v7223_v17, %v7287_v19 }
 0x7e8   : > { %v7326_v59 = vpack.c.bf16 %v7310_v56, %v7310_v56  ;;  %v7356_v36 = vunpack.c.l.b16 %v7324_v5  ;;  %v7357_v8 = vunpack.c.l.b16 %v7325_v38  ;;  %v7374_v16 = vrot.slane %v7355_v63, 7 }
 0x7e9   : > { %v7290_v28 = vmax.f32 %v7040_v61, %v15253_v50  ;;  %v7304_v10 = vmax.f32 %v7224_v48, %v7288_v53  ;;  %v7305_v62 = vmax.f32 %v7225_v26, %v7289_v29  ;;  %v7319_v40 = vpack.c.bf16 %v7303_v1, %v7303_v1  ;;  %v16254_v48 = vpop.f32.mrf.mxu0 }
 0x7ea   : > { %v16249_v11 = vadd.f32 %v21387_v32, %v21374_v44  ;;  %v6985_v6 = vadd.f32 %v16872_v20, %v6920_v49  ;;  %v6912_v14 = vadd.f32 %v21393_v2, %v21382_v46  ;;  %v7358_v9 = vunpack.c.l.b16 %v7326_v59  ;;  %v16873_v20 = vpop.f32.mrf.mxu1 }
 0x7eb   : > { %v7306_v35 = vmax.f32 %v7226_v39, %v7290_v28  ;;  %v7320_v17 = vpack.c.bf16 %v7304_v10, %v7304_v10  ;;  %v7321_v55 = vpack.c.bf16 %v7305_v62, %v7305_v62  ;;  %v7351_v22 = vunpack.c.l.b16 %v7319_v40 }
 0x7ec   : > { %v7375_v47 = vrot.slane %v7356_v36, 6  ;;  %v6997_v41 = vmax.f32 %v6985_v6, 0.0  ;;  %v6977_v34 = vadd.f32 %v6976_v45, %v6912_v14  ;;  %v7377_v26 = vrot.slane %v7357_v8, 5  ;;  %v6979_v40 = vpop.f32.mrf.mxu1 }
 0x7ed   : > { %v7322_v30 = vpack.c.bf16 %v7306_v35, %v7306_v35  ;;  %v7352_v25 = vunpack.c.l.b16 %v7320_v17  ;;  %v7353_v13 = vunpack.c.l.b16 %v7321_v55  ;;  %v7367_v12 = vrot.slane %v7351_v22, 7 }
 0x7ee   : > { %v7109_v15 = vcombine.high %v6997_v41, %v6997_v41  ;;  %v7116_v44 = vrot.slane %v6997_v41, %v22331_v18  ;;  %v6995_v32 = vmax.f32 %v6977_v34, 0.0  ;;  %v16255_v23 = vadd.f32 %v16254_v48, %v16253_v42 }
 0x7ef   : > { %v7354_v49 = vunpack.c.l.b16 %v7322_v30  ;;  %v7368_v46 = vrot.slane %v7352_v25, 6  ;;  %v7370_v2 = vrot.slane %v7353_v13, 5  ;;  %v7376_v37 = vsel %vm5114_vm9, %v7375_v47, %v7374_v16 }
 0x7f0   : > { %v7123_v54 = vrot.slane %v7109_v15, %v22331_v18  ;;  %v7124_v58 = vcombine.high %v7116_v44, %v7116_v44  ;;  %v15246_v60 = vrot.slane %v7116_v44, 9  ;;  %v7075_v61 = vcombine.high %v6995_v32, %v6995_v32 }
 0x7f1   : > { %v7369_v33 = vsel %vm5114_vm9, %v7368_v46, %v7367_v12  ;;  %v7082_v19 = vrot.slane %v6995_v32, %v22331_v18  ;;  %v6923_v56 = vadd.f32 %v16255_v23, %v21391_v31  ;;  %v7379_v5 = vrot.slane %v7358_v9, 4 }
 0x7f2   : > { %v7372_v38 = vrot.slane %v7354_v49, 4  ;;  %v7125_v63 = vcombine.high %v7123_v54, %v7123_v54  ;;  %v15247_v50 = vrot.slane %v7124_v58, 9  ;;  %v7371_v53 = vsel %vm5117_vm10, %v7370_v2, %v7369_v33 }
 0x7f3   : > { %v15248_v29 = vrot.slane %v7123_v54, 9  ;;  %v7089_v1 = vrot.slane %v7075_v61, %v22331_v18  ;;  %v7090_v39 = vcombine.high %v7082_v19, %v7082_v19  ;;  %v6850_v59 = vadd.f32 %v21384_v24, %v21360_v7 }
 0x7f4   : > { %v7378_v36 = vsel %vm5117_vm10, %v7377_v26, %v7376_v37  ;;  %v7235_v8 = vmax.f32 %v7116_v44, %v15246_v60  ;;  %v6988_v42 = vadd.f32 %v16873_v20, %v6923_v56  ;;  %v15249_v28 = vrot.slane %v7125_v63, 9 }
 0x7f5   : > { %v7091_v10 = vcombine.high %v7089_v1, %v7089_v1  ;;  %v15242_v31 = vrot.slane %v7082_v19, 9  ;;  %v15243_v62 = vrot.slane %v7090_v39, 9  ;;  %v7236_v45 = vmax.f32 %v7124_v58, %v15247_v50 }
 0x7f6   : > { %v6998_v16 = vmax.f32 %v6988_v42, 0.0  ;;  %v6915_v6 = vadd.f32 %v16249_v11, %v6850_v59  ;;  %v7373_v14 = vsel %vm5120_vm11, %v7372_v38, %v7371_v53  ;;  %v7237_v35 = vmax.f32 %v7123_v54, %v15248_v29 }
 0x7f7   : > { %v15244_v17 = vrot.slane %v7089_v1, 9  ;;  %v15245_v55 = vrot.slane %v7091_v10, 9  ;;  %v7380_v22 = vsel %vm5120_vm11, %v7379_v5, %v7378_v36  ;;  %v7395_v47 = vpack.c.b16 %v7373_v14, %v7373_v14 }
 0x7f8   : > { %v7126_v7 = vcombine.high %v6998_v16, %v6998_v16  ;;  %v7133_v24 = vrot.slane %v6998_v16, %v22331_v18  ;;  %v6980_v9 = vadd.f32 %v6979_v40, %v6915_v6  ;;  %v7238_v41 = vmax.f32 %v7125_v63, %v15249_v28 }
 0x7f9   : > { %v7231_v34 = vmax.f32 %v7082_v19, %v15242_v31  ;;  %v7232_v48 = vmax.f32 %v7090_v39, %v15243_v62  ;;  %v7396_v26 = vpack.c.b16 %v7380_v22, %v7380_v22  ;;  %v7233_v15 = vmax.f32 %v7089_v1, %v15244_v17 }
 0x7fa   : > { %v7140_v30 = vrot.slane %v7126_v7, %v22331_v18  ;;  %v7141_v25 = vcombine.high %v7133_v24, %v7133_v24  ;;  %v15262_v11 = vrot.slane %v7133_v24, 9  ;;  %v6996_v13 = vmax.f32 %v6980_v9, 0.0 }
 0x7fb   : > { %v7234_v44 = vmax.f32 %v7091_v10, %v15245_v55  ;;  %v7403_v32 = vsel %vm18822_vm4, 0, %v7395_v47  ;;  %v7404_v49 = vsel %vm18822_vm4, 0, %v7396_v26 }
 0x7fc   : > { %v7142_v46 = vcombine.high %v7140_v30, %v7140_v30  ;;  %v15263_v2 = vrot.slane %v7141_v25, 9  ;;  %v15264_v23 = vrot.slane %v7140_v30, 9  ;;  %v7299_v54 = vmax.f32 %v7133_v24, %v15262_v11 }
 0x7fd   : > { %v7092_v58 = vcombine.high %v6996_v13, %v6996_v13  ;;  %v7099_v60 = vrot.slane %v6996_v13, %v22331_v18  ;;  %v21433_v61 = vsel %vm21422_vm13, %v7403_v32, 0  ;;  %v21437_v37 = vsel %vm21422_vm13, %v7404_v49, 0 }
 0x7fe   : > { %v15265_v33 = vrot.slane %v7142_v46, 9  ;;  %v7300_v19 = vmax.f32 %v7141_v25, %v15263_v2  ;;  %v7301_v20 = vmax.f32 %v7140_v30, %v15264_v23  ;;  %v7315_v56 = vmax.f32 %v7235_v8, %v7299_v54 }
 0x7ff   : > { %v7106_v5 = vrot.slane %v7092_v58, %v22331_v18  ;;  %v7107_v38 = vcombine.high %v7099_v60, %v7099_v60  ;;  %v15258_v63 = vrot.slane %v7099_v60, 9  ;;  %v21442_v50 = vrot.slane %v21433_v61, %v22331_v18 }
 0x800   : > { %v7302_v53 = vmax.f32 %v7142_v46, %v15265_v33  ;;  %v7316_v29 = vmax.f32 %v7236_v45, %v7300_v19  ;;  %v7317_v1 = vmax.f32 %v7237_v35, %v7301_v20  ;;  %v7331_v39 = vpack.c.bf16 %v7315_v56, %v7315_v56 }
 0x801   : > { %v7108_v59 = vcombine.high %v7106_v5, %v7106_v5  ;;  %v15259_v36 = vrot.slane %v7107_v38, 9  ;;  %v15260_v42 = vrot.slane %v7106_v5, 9  ;;  %v7295_v28 = vmax.f32 %v7099_v60, %v15258_v63  ;;  %v17238_v63 = vld [vmem:[#allocation9 + $0x8] sm:$0xff]  }
 0x802   : > { %v7318_v10 = vmax.f32 %v7238_v41, %v7302_v53  ;;  %v7332_v31 = vpack.c.bf16 %v7316_v29, %v7316_v29  ;;  %v7333_v8 = vpack.c.bf16 %v7317_v1, %v7317_v1  ;;  %v7363_v62 = vunpack.c.l.b16 %v7331_v39  ;;  %16277 = vmatpush3.bf16.msra.mxu0 %v17238_v63  ;;  %v17292_v1 = vld [vmem:[#allocation10 + $0x130] sm:$0xff]  }
 0x803   : > { %v15261_v40 = vrot.slane %v7108_v59, 9  ;;  %v7296_v16 = vmax.f32 %v7107_v38, %v15259_v36  ;;  %v7297_v6 = vmax.f32 %v7106_v5, %v15260_v42  ;;  %v7311_v14 = vmax.f32 %v7231_v34, %v7295_v28 }
 0x804   : > { %v7334_v17 = vpack.c.bf16 %v7318_v10, %v7318_v10  ;;  %v7364_v55 = vunpack.c.l.b16 %v7332_v31  ;;  %v7365_v22 = vunpack.c.l.b16 %v7333_v8  ;;  %v7388_v7 = vrot.slane %v7363_v62, 7  ;;  %v17239_v31 = vld [vmem:[#allocation9 + $0xd0] sm:$0xff]   ;;  %v17241_v62 = vld [vmem:[#allocation9 + $0x40] sm:$0xff]  }
 0x805   : > { %v7298_v45 = vmax.f32 %v7108_v59, %v15261_v40  ;;  %v7312_v35 = vmax.f32 %v7232_v48, %v7296_v16  ;;  %v7313_v24 = vmax.f32 %v7233_v15, %v7297_v6  ;;  %v7327_v9 = vpack.c.bf16 %v7311_v14, %v7311_v14  ;;  %v17240_v8 = vld [vmem:[#allocation9 + $0x90] sm:$0xff]   ;;  %16296 = vmatprep.subr.bf16.mxu1 %v17239_v31  ;;  %v17246_v31 = vld [vmem:[#allocation9 + $0xc0] sm:$0xff]  }
 0x806   : > { %v7366_v47 = vunpack.c.l.b16 %v7334_v17  ;;  %v7389_v26 = vrot.slane %v7364_v55, 6  ;;  %v7391_v30 = vrot.slane %v7365_v22, 5  ;;  %v21446_v41 = vrot.slane %v21437_v37, %v22331_v18  ;;  %v17242_v17 = vld [vmem:[#allocation9] sm:$0xff]   ;;  %v17243_v55 = vld [vmem:[#allocation9 + $0xc8] sm:$0xff]   ;;  %16278 = vmatprep.subr.bf16.mxu0 %v17241_v62  ;;  %16297 = vmatpush3.bf16.msra.mxu1 %v17240_v8 }
 0x807   : > { %v7314_v25 = vmax.f32 %v7234_v44, %v7298_v45  ;;  %v7328_v11 = vpack.c.bf16 %v7312_v35, %v7312_v35  ;;  %v7329_v13 = vpack.c.bf16 %v7313_v24, %v7313_v24  ;;  %v7359_v32 = vunpack.c.l.b16 %v7327_v9  ;;  %16279 = vmatpush3.bf16.msra.mxu0 %v17242_v17  ;;  %16298 = vmatprep.subr.bf16.mxu1 %v17243_v55  ;;  %v17247_v8 = vld [vmem:[#allocation9 + $0x80] sm:$0xff]  }
 0x808   : > { %v7390_v34 = vsel %vm5114_vm9, %v7389_v26, %v7388_v7  ;;  %v7393_v49 = vrot.slane %v7366_v47, 4  ;;  %v21453_v48 = vcombine.high %v21442_v50, %v21442_v50  ;;  %v7463_v15 = vrot.slane %v7462_v0, 2  ;;  %v17244_v47 = vld [vmem:[#allocation9 + $0x88] sm:$0xff]  }
 0x809   : > { %v7330_v46 = vpack.c.bf16 %v7314_v25, %v7314_v25  ;;  %v7360_v2 = vunpack.c.l.b16 %v7328_v11  ;;  %v7361_v44 = vunpack.c.l.b16 %v7329_v13  ;;  %v7613_v23 = vcombine.low %v21433_v61, %v21437_v37 }
 0x80a   : > { %v7381_v54 = vrot.slane %v7359_v32, 7  ;;  %v7392_v58 = vsel %vm5117_vm10, %v7391_v30, %v7390_v34  ;;  %v21463_v60 = vcombine.high %v21446_v41, %v21446_v41  ;;  %v7470_v33 = vshrl.u32 %v21442_v50, 16  ;;  %16299 = vmatpush3.bf16.msra.mxu1 %v17244_v47 }
 0x80b   : > { %v7362_v19 = vunpack.c.l.b16 %v7330_v46  ;;  %v7382_v52 = vrot.slane %v7360_v2, 6  ;;  %v7384_v51 = vrot.slane %v7361_v44, 5  ;;  %v7394_v0 = vsel %vm5120_vm11, %v7393_v49, %v7392_v58  ;;  %16300 = vmatprep.subr.bf16.mxu1 %v17246_v31  ;;  %v17250_v31 = vld [vmem:[#allocation9 + $0x100] sm:$0xff]  }
 0x80c   : > { %v7398_v20 = vpack.c.b16 %v7394_v0, %v7394_v0  ;;  %v7472_v56 = vrot.slane %v7470_v33, 6  ;;  %v7473_v5 = vshll.u32 %v21442_v50, 16  ;;  %v7479_v38 = vshll.u32 %v21453_v48, 16 }
 0x80d   : > { %v7383_v53 = vsel %vm5114_vm9, %v7382_v52, %v7381_v54  ;;  %v7386_v29 = vrot.slane %v7362_v19, 4  ;;  %v7484_v39 = vshrl.u32 %v21446_v41, 16  ;;  %v7487_v59 = vshll.u32 %v21446_v41, 16 }
 0x80e   : > { %v7385_v36 = vsel %vm5117_vm10, %v7384_v51, %v7383_v53  ;;  %v7406_v42 = vsel %vm18822_vm4, 0, %v7398_v20  ;;  %v21484_v28 = vsel %vm21472_vm14, %v7463_v15, %v21378_v4  ;;  %v7475_v10 = vrot.slane %v7473_v5, 7  ;;  %16301 = vmatpush3.bf16.msra.mxu1 %v17247_v8  ;;  %v17251_v8 = vld [vmem:[#allocation10 + $0xf8] sm:$0xff]  }
 0x80f   : > { %v7387_v40 = vsel %vm5120_vm11, %v7386_v29, %v7385_v36  ;;  %v21489_v16 = vsel %vm21422_vm13, %v7406_v42, 0  ;;  %v7486_v6 = vrot.slane %v7484_v39, 6  ;;  %v7489_v14 = vrot.slane %v7487_v59, 7 }
 0x810   : > { %v7397_v22 = vpack.c.b16 %v7387_v40, %v7387_v40  ;;  %v7540_v4 = vrot.slane %v21489_v16, %v22331_v18  ;;  %v7476_v7 = vor.u32 %v7475_v10, %v7472_v56  ;;  %v7621_v45 = vrot.slane %v7613_v23, %v22331_v18 }
 0x811   : > { %v7481_v35 = vrot.slane %v7479_v38, 7  ;;  %v7490_v24 = vor.u32 %v7489_v14, %v7486_v6  ;;  %v7493_v9 = vshll.u32 %v21463_v60, 16  ;;  %v15267_v25 = vrot.slane %v21442_v50, 9 }
 0x812   : > { %v7405_v26 = vsel %vm18822_vm4, 0, %v7397_v22  ;;  %v7477_v30 = vrot.slane %v7476_v7, 2  ;;  %v7523_v11 = vrot.slane %v21453_v48, 7  ;;  %v7527_v34 = vrot.slane %v21463_v60, 7 }
 0x813   : > { %v7411_v13 = vsel %vm21422_vm13, %v7405_v26, 0  ;;  %v7491_v32 = vrot.slane %v7490_v24, 2  ;;  %v7541_v49 = vcombine.high %v7540_v4, %v7540_v4  ;;  %v15268_v50 = vrot.slane %v21446_v41, 9 }
 0x814   : > { %v7446_v15 = vrot.slane %v7411_v13, %v22331_v18  ;;  %v7614_v46 = vcombine.low %v7411_v13, %v21489_v16  ;;  %v21506_v2 = vsel %vm21472_vm14, %v7477_v30, %v7481_v35  ;;  %v7495_v48 = vrot.slane %v7493_v9, 7 }
 0x815   : > { %v7577_v44 = vcombine.low %v21484_v28, %v21506_v2  ;;  %v15270_v23 = vrot.slane %v7540_v4, 9  ;;  %v7558_v54 = vrot.slane %v7541_v49, 7  ;;  %v7524_v51 = vsel %vm21344_vm1, %v15267_v25, %v7523_v11 }
 0x816   : > { %v7628_v58 = vrot.slane %v7614_v46, %v22331_v18  ;;  %v7447_v60 = vcombine.high %v7446_v15, %v7446_v15  ;;  %v7498_v33 = vshrl.u32 %v7446_v15, 16  ;;  %v7501_v19 = vshll.u32 %v7446_v15, 16 }
 0x817   : > { %v7496_v52 = vsel %vm21472_vm14, %v7491_v32, %v7495_v48  ;;  %v7528_v41 = vsel %vm21344_vm1, %v15268_v50, %v7527_v34  ;;  %v7559_v0 = vsel %vm21344_vm1, %v15270_v23, %v7558_v54  ;;  %v15269_v63 = vrot.slane %v7446_v15, 9 }
 0x818   : > { %v7629_v20 = vcombine.low %v7621_v45, %v7628_v58  ;;  %v7500_v56 = vrot.slane %v7498_v33, 6  ;;  %v7503_v5 = vrot.slane %v7501_v19, 7  ;;  %v7507_v38 = vshll.u32 %v7447_v60, 16 }
 0x819   : > { %v7531_v53 = vrot.slane %v7447_v60, 7  ;;  %v7688_v29 = vcombine.low %v7559_v0, %v21350_v3  ;;  %v7543_v39 = vshrl.u32 %v7540_v4, 16  ;;  %v7585_v36 = vrot.slane %v7577_v44, %v22331_v18 }
 0x81a   : > { %7630 = vrot.lane.b32.xlu1 %v7629_v20, %s18239_s27  ;;  %v7504_v59 = vor.u32 %v7503_v5, %v7500_v56  ;;  %v7649_v42 = vcombine.low %v7524_v51, %v7528_v41  ;;  %v7546_v10 = vshll.u32 %v7540_v4, 16  ;;  %v7509_v62 = vrot.slane %v7507_v38, 7  ;;  %v17245_v38 = vld [vmem:[#allocation9 + $0x118] sm:$0xff]  }
 0x81b   : > { %v7532_v40 = vsel %vm21344_vm1, %v15269_v63, %v7531_v53  ;;  %v7545_v6 = vrot.slane %v7543_v39, 6  ;;  %v7596_v14 = vcombine.low %v21350_v3, %v7524_v51  ;;  %v7552_v22 = vshll.u32 %v7541_v49, 16 }
 0x81c   : > { %v7505_v17 = vrot.slane %v7504_v59, 2  ;;  %v7548_v55 = vrot.slane %v7546_v10, 7  ;;  %v21527_v7 = vrot.slane %v7688_v29, %v22331_v18  ;;  %v7650_v45 = vcombine.low %v7532_v40, %v7559_v0  ;;  %v17248_v29 = vld [vmem:[#allocation9 + $0x110] sm:$0xff]   ;;  %v17249_v10 = vld [vmem:[#allocation9 + $0x108] sm:$0xff]  }
 0x81d   : > { %v7597_v35 = vcombine.low %v7528_v41, %v7532_v40  ;;  %v7560_v4 = vcombine.low %v22311_v27, %v21433_v61  ;;  %v7561_v24 = vcombine.low %v21437_v37, %v7411_v13  ;;  %v7604_v26 = vrot.slane %v7596_v14, %v22331_v18  ;;  %v17253_v40 = vld [vmem:[#allocation10 + $0xf0] sm:$0xff]  }
 0x81e   : > { %v7510_v9 = vsel %vm21472_vm14, %v7505_v17, %v7509_v62  ;;  %v7549_v47 = vor.u32 %v7548_v55, %v7545_v6  ;;  %v18241_v34 = vmov 0.0   ;;  %v7554_v49 = vrot.slane %v7552_v22, 7  ;;  %v17252_v62 = vld [vmem:[#allocation10 + $0xb8] sm:$0xff]   ;;  %v17255_v14 = vld [vmem:[#allocation10 + $0xb0] sm:$0xff]   ;;  %v17257_v55 = vld [vmem:[#allocation10 + $0xe8] sm:$0xff]  }
 0x81f   : > { %v7578_v30 = vcombine.low %v7496_v52, %v7510_v9  ;;  %v7611_v25 = vrot.slane %v7597_v35, %v22331_v18  ;;  %v7568_v11 = vrot.slane %v7560_v4, %v22331_v18  ;;  %v7575_v32 = vrot.slane %v7561_v24, %v22331_v18  ;;  %16874 = vmatprep.subr.bf16.mxu0 %v18241_v34  ;;  %v17254_v6 = vld [vmem:[#allocation10 + $0x78] sm:$0xff]   ;;  %v17258_v22 = vld [vmem:[#allocation10 + $0x70] sm:$0xff]   ;;  %v17261_v35 = vld [vmem:[#allocation10 + $0xe0] sm:$0xff]  }
 0x820   : > { %v7550_v61 = vrot.slane %v7549_v47, 2  ;;  %v7632_v37 = vcombine.low %v21506_v2, %v7496_v52  ;;  %v7668_v13 = vcombine.low %v21489_v16, %v22311_v27  ;;  %v7664_v58 = vrot.slane %v7650_v45, %v22331_v18  ;;  %v17256_v17 = vld [vmem:[#allocation10 + $0x38] sm:$0xff]   ;;  %16313 = vmatprep.subr.bf16.mxu1 %v17254_v6  ;;  %v17260_v45 = vld [vmem:[#allocation10 + $0x30] sm:$0xff]   ;;  %v17262_v4 = vld [vmem:[#allocation10 + $0x68] sm:$0xff]  }
 0x821   : > { %v7592_v15 = vrot.slane %v7578_v30, %v22331_v18  ;;  %v7612_v46 = vcombine.low %v7604_v26, %v7611_v25  ;;  %v7696_v50 = vcombine.low %v7611_v25, %v21527_v7  ;;  %v7576_v48 = vcombine.low %v7568_v11, %v7575_v32  ;;  %v17259_v7 = vld [vmem:[#allocation10 + $0xa8] sm:$0xff]   ;;  %v17263_v24 = vld [vmem:[#allocation10 + $0xa0] sm:$0xff]   ;;  %v17265_v47 = vld [vmem:[#allocation10 + $0xd8] sm:$0xff]  }
 0x822   : > { %v7555_v44 = vsel %vm21472_vm14, %v7550_v61, %v7554_v49  ;;  %v7675_v23 = vrot.slane %v7668_v13, %v22331_v18  ;;  %v7657_v16 = vrot.slane %v7649_v42, %v22331_v18  ;;  %v7640_v52 = vrot.slane %v7632_v37, %v22331_v18  ;;  %v17266_v26 = vld [vmem:[#allocation10 + $0x60] sm:$0xff]   ;;  %v17267_v30 = vld [vmem:[#allocation10 + $0x98] sm:$0xff]   ;;  %v17269_v11 = vld [vmem:[#allocation10 + $0xd0] sm:$0xff]  }
 0x823   : > { %v7593_v54 = vcombine.low %v7585_v36, %v7592_v15  ;;  %v7677_v60 = vcombine.low %v7555_v44, %v21484_v28  ;;  %v7633_v2 = vcombine.low %v7510_v9, %v7555_v44  ;;  %vm18242_vm10 = vmmov 0   ;;  %v17264_v9 = vld [vmem:[#allocation10 + $0x28] sm:$0xff]   ;;  %v17268_v25 = vld [vmem:[#allocation10 + $0x20] sm:$0xff]   ;;  %v17271_v61 = vld [vmem:[#allocation10 + $0x90] sm:$0xff]  }
 0x824   : > { %v7676_v33 = vcombine.low %v7575_v32, %v7675_v23  ;;  %v7665_v41 = vcombine.low %v7657_v16, %v7664_v58  ;;  %v17270_v32 = vld [vmem:[#allocation10 + $0x58] sm:$0xff]   ;;  %v17273_v37 = vld [vmem:[#allocation10 + $0xc8] sm:$0xff]   ;;  %v17274_v13 = vld [vmem:[#allocation10 + $0x50] sm:$0xff]  }
 0x825   : > { %7594 = vrot.lane.b32.xlu0 %v7593_v54, %s18239_s27  ;;  %v7684_v19 = vrot.slane %v7677_v60, %v22331_v18  ;;  %v7647_v51 = vrot.slane %v7633_v2, %v22331_v18  ;;  %v17272_v49 = vld [vmem:[#allocation10 + $0x18] sm:$0xff]   ;;  %v17279_v44 = vld [vmem:[#allocation10 + $0x80] sm:$0xff]   ;;  %v17280_v23 = vld [vmem:[#allocation10 + $0x8] sm:$0xff]  }
 0x826   : > { %v17281_v54 = vld [vmem:[#allocation10 + $0x1f8] sm:$0xff]   ;;  %v17282_v58 = vld [vmem:[#allocation10 + $0x40] sm:$0xff]  }
 0x827   : > { %v7685_v0 = vcombine.low %v7592_v15, %v7684_v19  ;;  %v7648_v20 = vcombine.low %v7640_v52, %v7647_v51  ;;  %v17275_v15 = vld [vmem:[#allocation10 + $0x88] sm:$0xff]   ;;  %v17284_v60 = vld [vmem:[#allocation10] sm:$0xff]   ;;  %v17286_v2 = vld [vmem:[#allocation10 + $0x178] sm:$0xff]  }
 0x829   : > { %7666 = vrot.lane.b32.xlu0 %v7665_v41, %s18239_s27  ;;  %7686 = vrot.lane.b32.xlu1 %v7685_v0, %s18239_s27  ;;  %s22347_s27 = sld [smem:[#allocation64_spill]] }
 0x82f   : > { %s832_s18 = scalar_lea.vmem %s22347_s27, %s15843_s1 }
 0x88c   : > { %v7631_v56 = vpop.permute.xlu1 %7630 }
 0x88d   : > { %v7703_v5 = vsel %vm2617_vm7, %v7612_v46, %v7631_v56  ;;  %v17276_v46 = vld [vmem:[#allocation10 + $0x10] sm:$0xff]  }
 0x88e   : > { %8043 = vmatprep.mubr.bf16.mxu0 %v7703_v5 }
 0x897   : > { %v7595_v63 = vpop.permute.xlu0 %7594 }
 0x898   : > { %v7699_v53 = vsel %vm2617_vm7, %v7576_v48, %v7595_v63  ;;  %v17278_v48 = vld [vmem:[#allocation10 + $0x48] sm:$0xff]  }
 0x899   : > { %8044 = vmatmul.mubr.bf16.vlgmr.msra.gmra.mxu0 %v7699_v53 }
 0x89a   : > { %16875 = vmatpush3.bf16.msra.mxu0 %v17245_v38  ;;  %16882 = vmatprep.mubr.msk.bf16.mxu0 %vm18242_vm10, %v18241_v34 }
 0x89b   : > { %v7687_v39 = vpop.permute.xlu1 %7686  ;;  %v7667_v59 = vpop.permute.xlu0 %7666  ;;  %16876 = vmatprep.subr.bf16.mxu0 %v18241_v34 }
 0x89c   : > { %v7707_v36 = vsel %vm2617_vm7, %v7648_v20, %v7667_v59  ;;  %v7711_v42 = vsel %vm2617_vm7, %v7676_v33, %v7687_v39  ;;  %v15271_v20 = vld [vmem:[%s22097_s10] ss:$0 sm:$0xff] }
 0x89d   : > { %8084 = vmatprep.mubr.bf16.mxu1 %v7711_v42 }
 0x89e   : > { %16877 = vmatpush3.bf16.msra.mxu0 %v17248_v29  ;;  %8085 = vmatmul.mubr.bf16.vlgmr.msra.gmra.mxu1 %v7707_v36 }
 0x89f   : > { %16878 = vmatprep.subr.bf16.mxu0 %v18241_v34  ;;  %16314 = vmatpush3.bf16.msra.mxu1 %v17256_v17 }
 0x8a0   : > { %16315 = vmatprep.subr.bf16.mxu1 %v17258_v22 }
 0x8a2   : > { %16879 = vmatpush3.bf16.msra.mxu0 %v17249_v10 }
 0x8a3   : > { %16880 = vmatprep.subr.bf16.mxu0 %v18241_v34  ;;  %16316 = vmatpush3.bf16.msra.mxu1 %v17260_v45 }
 0x8a4   : > { %16317 = vmatprep.subr.bf16.mxu1 %v17262_v4 }
 0x8a6   : > { %16881 = vmatpush3.bf16.msra.mxu0 %v17250_v31 }
 0x8a7   : > { %16335 = vmatprep.subr.bf16.mxu0 %v17251_v8  ;;  %16318 = vmatpush3.bf16.msra.mxu1 %v17264_v9 }
 0x8a8   : > { %16319 = vmatprep.subr.bf16.mxu1 %v17266_v26 }
 0x8a9   : > { %16883 = vmatmul.mubr.msk.bf16.vlgmr.msra.gmra.mxu0 %vm2617_vm7, %v7696_v50  ;;  %v17277_v50 = vld [vmem:[#allocation10 + $0xc0] sm:$0xff]   ;;  %vm9375_vm7 = vsmask.f32 1284 }
 0x8aa   : > { %16336 = vmatpush3.bf16.msra.mxu0 %v17252_v62  ;;  %vm9376_vm11 = vmor %vm2200_vm3, %vm9375_vm7  ;;  %vm9385_vm7 = vsmask.f32 6424 }
 0x8ab   : > { %16337 = vmatprep.subr.bf16.mxu0 %v17253_v40  ;;  %16320 = vmatpush3.bf16.msra.mxu1 %v17268_v25 }
 0x8ac   : > { %16321 = vmatprep.subr.bf16.mxu1 %v17270_v32 }
 0x8ae   : > { %16338 = vmatpush3.bf16.msra.mxu0 %v17255_v14 }
 0x8af   : > { %16339 = vmatprep.subr.bf16.mxu0 %v17257_v55  ;;  %16322 = vmatpush3.bf16.msra.mxu1 %v17272_v49 }
 0x8b0   : > { %16323 = vmatprep.subr.bf16.mxu1 %v17274_v13 }
 0x8b2   : > { %16340 = vmatpush3.bf16.msra.mxu0 %v17259_v7 }
 0x8b3   : > { %16341 = vmatprep.subr.bf16.mxu0 %v17261_v35  ;;  %16324 = vmatpush3.bf16.msra.mxu1 %v17276_v46 }
 0x8b4   : > { %16325 = vmatprep.subr.bf16.mxu1 %v17278_v48 }
 0x8b6   : > { %16342 = vmatpush3.bf16.msra.mxu0 %v17263_v24 }
 0x8b7   : > { %16343 = vmatprep.subr.bf16.mxu0 %v17265_v47  ;;  %16326 = vmatpush3.bf16.msra.mxu1 %v17280_v23 }
 0x8b8   : > { %16327 = vmatprep.subr.bf16.mxu1 %v17282_v58 }
 0x8ba   : > { %16344 = vmatpush3.bf16.msra.mxu0 %v17267_v30 }
 0x8bb   : > { %16345 = vmatprep.subr.bf16.mxu0 %v17269_v11  ;;  %16328 = vmatpush3.bf16.msra.mxu1 %v17284_v60 }
 0x8bc   : > { %16357 = vmatprep.subr.bf16.mxu1 %v17286_v2 }
 0x8be   : > { %16346 = vmatpush3.bf16.msra.mxu0 %v17271_v61 }
 0x8bf   : > { %16347 = vmatprep.subr.bf16.mxu0 %v17273_v37 }
 0x8c2   : > { %16348 = vmatpush3.bf16.msra.mxu0 %v17275_v15 }
 0x8c3   : > { %16349 = vmatprep.subr.bf16.mxu0 %v17277_v50 }
 0x8c6   : > { %16350 = vmatpush3.bf16.msra.mxu0 %v17279_v44 }
 0x8c7   : > { %16379 = vmatprep.subr.bf16.mxu0 %v17281_v54 }
 0x959   : > { %v16280_v33 = vpop.f32.mrf.mxu0 }
 0x95b   : > { %v16281_v16 = vpop.f32.mrf.mxu0 }
 0x95c   : > { %v16282_v41 = vadd.f32 %v16281_v16, %v16280_v33 }
 0x95d   : > { %v16283_v52 = vpop.f32.mrf.mxu0 }
 0x95e   : > { %v16302_v19 = vpop.f32.mrf.mxu1  ;;  %v8046_v63 = vadd.f32 %v16282_v41, %v15271_v20 }
 0x95f   : > { %v16284_v56 = vpop.f32.mrf.mxu0 }
 0x960   : > { %v16303_v51 = vpop.f32.mrf.mxu1  ;;  %v16285_v53 = vadd.f32 %v16284_v56, %v16283_v52 }
 0x961   : > { %v16304_v5 = vadd.f32 %v16303_v51, %v16302_v19 }
 0x962   : > { %v16305_v0 = vpop.f32.mrf.mxu1  ;;  %v8049_v36 = vadd.f32 %v16285_v53, %v15271_v20 }
 0x963   : > { %v8087_v39 = vadd.f32 %v16304_v5, %v8046_v63 }
 0x964   : > { %v16306_v38 = vpop.f32.mrf.mxu1 }
 0x965   : > { %v16307_v29 = vadd.f32 %v16306_v38, %v16305_v0 }
 0x967   : > { %v8090_v8 = vadd.f32 %v16307_v29, %v8049_v36 }
 0x969   : > { %v8127_v59 = vpop.f32.mrf.mxu0 }
 0x96a   : > { %v8128_v42 = vadd.f32 %v8127_v59, %v8087_v39 }
 0x96b   : > { %v16884_v10 = vpop.f32.mrf.mxu0 }
 0x96c   : > { %v8134_v31 = vmax.f32 %v8128_v42, 0.0 }
 0x96d   : > { %v8130_v62 = vpop.f32.mrf.mxu0 }
 0x96e   : > { %v8138_v40 = vcombine.high %v8134_v31, %v8134_v31  ;;  %v8142_v6 = vpack.c.bf16 %v8134_v31, %v8134_v31  ;;  %v8131_v14 = vadd.f32 %v8130_v62, %v8090_v8 }
 0x96f   : > { %v16885_v17 = vpop.f32.mrf.mxu0 }
 0x970   : > { %v8143_v55 = vpack.c.bf16 %v8138_v40, %v8138_v40  ;;  %v8147_v22 = vshrl.u32 %v8142_v6, 16  ;;  %v8135_v7 = vmax.f32 %v8131_v14, 0.0  ;;  %v8150_v35 = vshll.u32 %v8142_v6, 16 }
 0x972   : > { %v8149_v45 = vrot.slane %v8147_v22, 7  ;;  %v8154_v4 = vshrl.u32 %v8143_v55, 16  ;;  %v8139_v24 = vcombine.high %v8135_v7, %v8135_v7  ;;  %v8144_v9 = vpack.c.bf16 %v8135_v7, %v8135_v7 }
 0x973   : > { %v8157_v30 = vshll.u32 %v8143_v55, 16 }
 0x974   : > { %v8152_v47 = vor.u32 %v8150_v35, %v8149_v45  ;;  %v8156_v26 = vrot.slane %v8154_v4, 7  ;;  %v8145_v25 = vpack.c.bf16 %v8139_v24, %v8139_v24  ;;  %v8161_v11 = vshrl.u32 %v8144_v9, 16 }
 0x975   : > { %v8164_v15 = vshll.u32 %v8144_v9, 16 }
 0x976   : > { %v8159_v32 = vor.u32 %v8157_v30, %v8156_v26  ;;  %v8178_v61 = vsel %vm18822_vm4, 0, %v8152_v47  ;;  %v8168_v49 = vshrl.u32 %v8145_v25, 16  ;;  %v8163_v13 = vrot.slane %v8161_v11, 7 }
 0x977   : > { %v21573_v37 = vsel %vm21422_vm13, %v8178_v61, 0  ;;  %v8171_v44 = vshll.u32 %v8145_v25, 16 }
 0x978   : > { %v8179_v46 = vsel %vm18822_vm4, 0, %v8159_v32  ;;  %v8195_v50 = vrot.slane %v21573_v37, %v22331_v18  ;;  %v8170_v48 = vrot.slane %v8168_v49, 7  ;;  %v8166_v23 = vor.u32 %v8164_v15, %v8163_v13  ;;  %v17283_v49 = vld [vmem:[#allocation10 + $0x1b8] sm:$0xff]  }
 0x979   : > { %v21581_v54 = vsel %vm21422_vm13, %v8179_v46, 0 }
 0x97a   : > { %v8196_v58 = vcombine.high %v8195_v50, %v8195_v50  ;;  %v8173_v60 = vor.u32 %v8171_v44, %v8170_v48  ;;  %v8203_v2 = vrot.slane %v21581_v54, %v22331_v18  ;;  %v8180_v33 = vsel %vm18822_vm4, 0, %v8166_v23  ;;  %v17285_v48 = vld [vmem:[#allocation10 + $0x1f0] sm:$0xff]  }
 0x97b   : > { %v8348_v16 = vcombine.low %v21573_v37, %v21581_v54  ;;  %v8214_v19 = vshrl.u32 %v8195_v50, 16  ;;  %v21593_v51 = vsel %vm21422_vm13, %v8180_v33, 0  ;;  %v8217_v0 = vshll.u32 %v8195_v50, 16 }
 0x97c   : > { %v8181_v52 = vsel %vm18822_vm4, 0, %v8173_v60  ;;  %v8204_v41 = vcombine.high %v8203_v2, %v8203_v2  ;;  %v8211_v20 = vrot.slane %v21593_v51, %v22331_v18  ;;  %v15309_v5 = vrot.slane %v8195_v50, 9 }
 0x97d   : > { %v21599_v56 = vsel %vm21422_vm13, %v8181_v52, 0  ;;  %v8257_v63 = vrot.slane %v8196_v58, 7  ;;  %v15310_v29 = vrot.slane %v8203_v2, 9  ;;  %v8216_v59 = vrot.slane %v8214_v19, 6 }
 0x97e   : > { %v8349_v38 = vcombine.low %v21593_v51, %v21599_v56  ;;  %v8212_v53 = vcombine.high %v8211_v20, %v8211_v20  ;;  %v8261_v39 = vrot.slane %v8204_v41, 7  ;;  %v8356_v36 = vrot.slane %v8348_v16, %v22331_v18 }
 0x97f   : > { %v21607_v10 = vsel %vm21344_vm1, %v15309_v5, %v8257_v63  ;;  %v8219_v12 = vrot.slane %v8217_v0, 7  ;;  %v15311_v31 = vrot.slane %v8211_v20, 9  ;;  %v8223_v62 = vshll.u32 %v8196_v58, 16 }
 0x980   : > { %v8363_v42 = vrot.slane %v8349_v38, %v22331_v18  ;;  %v8265_v8 = vrot.slane %v8212_v53, 7  ;;  %v8228_v40 = vshrl.u32 %v8203_v2, 16  ;;  %v8330_v14 = vcombine.low %v21350_v3, %v21607_v10  ;;  %v17287_v38 = vld [vmem:[#allocation10 + $0x1b0] sm:$0xff]  }
 0x981   : > { %v8220_v17 = vor.u32 %v8219_v12, %v8216_v59  ;;  %v8231_v55 = vshll.u32 %v8203_v2, 16  ;;  %v8274_v22 = vrot.slane %v21599_v56, %v22331_v18  ;;  %v21615_v7 = vsel %vm21344_vm1, %v15310_v29, %v8261_v39  ;;  %v17289_v29 = vld [vmem:[#allocation10 + $0x1e8] sm:$0xff]  }
 0x982   : > { %v8364_v6 = vcombine.low %v8356_v36, %v8363_v42  ;;  %v8266_v45 = vsel %vm21344_vm1, %v15311_v31, %v8265_v8  ;;  %v8230_v35 = vrot.slane %v8228_v40, 6  ;;  %v8242_v47 = vshrl.u32 %v8211_v20, 16 }
 0x983   : > { %v8331_v4 = vcombine.low %v21615_v7, %v8266_v45  ;;  %v8221_v24 = vrot.slane %v8220_v17, 2  ;;  %v8233_v9 = vrot.slane %v8231_v55, 7  ;;  %v8225_v26 = vrot.slane %v8223_v62, 7  ;;  %v17291_v62 = vld [vmem:[#allocation10 + $0x1a8] sm:$0xff]   ;;  %v17293_v55 = vld [vmem:[#allocation10 + $0x1e0] sm:$0xff]  }
 0x984   : > { %9088 = vmatprep.mubr.bf16.mxu0 %v8364_v6  ;;  %v8245_v30 = vshll.u32 %v8211_v20, 16  ;;  %v8338_v25 = vrot.slane %v8330_v14, %v22331_v18  ;;  %v8244_v61 = vrot.slane %v8242_v47, 6  ;;  %v8237_v13 = vshll.u32 %v8204_v41, 16  ;;  %v17295_v47 = vld [vmem:[#allocation10 + $0x1a0] sm:$0xff]  }
 0x985   : > { %v21622_v11 = vrot.slane %v8331_v4, %v22331_v18  ;;  %v8234_v32 = vor.u32 %v8233_v9, %v8230_v35  ;;  %v8251_v46 = vshll.u32 %v8212_v53, 16  ;;  %v21627_v44 = vsel %vm21472_vm14, %v8221_v24, %v8225_v26  ;;  %v17290_v9 = vld [vmem:[#allocation10 + $0x170] sm:$0xff]  }
 0x986   : > { %v8247_v15 = vrot.slane %v8245_v30, 7  ;;  %v8275_v23 = vcombine.high %v8274_v22, %v8274_v22  ;;  %v8295_v58 = vcombine.low %v21581_v54, %v21593_v51  ;;  %v15312_v33 = vrot.slane %v8274_v22, 9  ;;  %v17297_v30 = vld [vmem:[#allocation10 + $0x1d8] sm:$0xff]  }
 0x987   : > { %v8346_v50 = vcombine.low %v8338_v25, %v21622_v11  ;;  %v8235_v60 = vrot.slane %v8234_v32, 2  ;;  %v8277_v19 = vshrl.u32 %v8274_v22, 16  ;;  %v8280_v52 = vshll.u32 %v8274_v22, 16 }
 0x988   : > { %v8248_v2 = vor.u32 %v8247_v15, %v8244_v61  ;;  %v8292_v16 = vrot.slane %v8275_v23, 7  ;;  %v8239_v41 = vrot.slane %v8237_v13, 7  ;;  %v8253_v20 = vrot.slane %v8251_v46, 7  ;;  %v17294_v61 = vld [vmem:[#allocation10 + $0x168] sm:$0xff]   ;;  %v17298_v15 = vld [vmem:[#allocation10 + $0x160] sm:$0xff]   ;;  %v17303_v46 = vld [vmem:[#allocation10 + $0x190] sm:$0xff]  }
 0x989   : > { %9089 = vmatmul.mubr.bf16.vlgmr.msra.gmra.mxu0 %v8346_v50  ;;  %v8312_v5 = vcombine.low %v21484_v28, %v21627_v44  ;;  %v8279_v54 = vrot.slane %v8277_v19, 6  ;;  %v8282_v51 = vrot.slane %v8280_v52, 7  ;;  %v8286_v53 = vshll.u32 %v8275_v23, 16  ;;  %v17296_v13 = vld [vmem:[#allocation10 + $0x128] sm:$0xff]   ;;  %v17302_v23 = vld [vmem:[#allocation10 + $0x158] sm:$0xff]   ;;  %v17311_v19 = vld [vmem:[#allocation10 + $0x180] sm:$0xff]  }
 0x98a   : > { %16380 = vmatpush3.bf16.msra.mxu0 %v17283_v49  ;;  %v8249_v0 = vrot.slane %v8248_v2, 2  ;;  %v21635_v63 = vsel %vm21344_vm1, %v15312_v33, %v8292_v16  ;;  %v8294_v39 = vcombine.low %v22311_v27, %v21573_v37  ;;  %v21641_v59 = vsel %vm21472_vm14, %v8235_v60, %v8239_v41  ;;  %v17299_v49 = vld [vmem:[#allocation10 + $0x198] sm:$0xff]   ;;  %v17305_v50 = vld [vmem:[#allocation10 + $0x1c8] sm:$0xff]   ;;  %v17309_v2 = vld [vmem:[#allocation10 + $0x1c0] sm:$0xff]  }
 0x98b   : > { %16381 = vmatprep.subr.bf16.mxu0 %v17285_v48  ;;  %v8385_v42 = vcombine.low %v8266_v45, %v21635_v63  ;;  %v8384_v12 = vcombine.low %v21607_v10, %v21615_v7  ;;  %v8283_v31 = vor.u32 %v8282_v51, %v8279_v54  ;;  %v8320_v8 = vrot.slane %v8312_v5, %v22331_v18  ;;  %v17288_v10 = vld [vmem:[#allocation10 + $0x138] sm:$0xff]   ;;  %v17300_v48 = vld [vmem:[#allocation10 + $0x120] sm:$0xff]   ;;  %v17306_v16 = vld [vmem:[#allocation10 + $0x150] sm:$0xff]  }
 0x98c   : > { %v21645_v36 = vsel %vm21472_vm14, %v8249_v0, %v8253_v20  ;;  %v21654_v37 = vrot.slane %v8295_v58, %v22331_v18  ;;  %v8288_v17 = vrot.slane %v8286_v53, 7  ;;  %v8302_v22 = vrot.slane %v8294_v39, %v22331_v18  ;;  %v17307_v58 = vld [vmem:[#allocation10 + $0x188] sm:$0xff]   ;;  %v17304_v33 = vld [vmem:[#allocation10 + $0x118] sm:$0xff]   ;;  %v17308_v41 = vld [vmem:[#allocation10 + $0x110] sm:$0xff]  }
 0x98d   : > { %v8313_v21 = vcombine.low %v21641_v59, %v21645_v36  ;;  %v8399_v6 = vrot.slane %v8385_v42, %v22331_v18  ;;  %v8284_v14 = vrot.slane %v8283_v31, 2  ;;  %v8392_v7 = vrot.slane %v8384_v12, %v22331_v18  ;;  %v17310_v0 = vld [vmem:[#allocation10 + $0x148] sm:$0xff]   ;;  %v17314_v51 = vld [vmem:[#allocation10 + $0x100] sm:$0xff]   ;;  %v17315_v39 = vld [vmem:[#allocation10 + $0x238] sm:$0xff]  }
 0x98e   : > { %16382 = vmatpush3.bf16.msra.mxu0 %v17287_v38  ;;  %v8310_v4 = vcombine.low %v8302_v22, %v21654_v37  ;;  %v8402_v60 = vcombine.low %v21599_v56, %v22311_v27  ;;  %v17312_v56 = vld [vmem:[#allocation10 + $0x108] sm:$0xff]   ;;  %v17313_v38 = vld [vmem:[#allocation10 + $0x140] sm:$0xff]   ;;  %v8366_v54 = vcombine.low %v21627_v44, %v21641_v59  ;;  %v17320_v12 = vld [vmem:[#allocation10 + $0x210] sm:$0xff]   ;;  %vm9377_vm1 = vsmask.f32 2312 }
 0x98f   : > { %v8327_v40 = vrot.slane %v8313_v21, %v22331_v18  ;;  %16383 = vmatprep.subr.bf16.mxu0 %v17289_v29  ;;  %v21662_v35 = vsel %vm21472_vm14, %v8284_v14, %v8288_v17  ;;  %v8400_v26 = vcombine.low %v8392_v7, %v8399_v6  ;;  %v17317_v44 = vld [vmem:[#allocation10 + $0x228] sm:$0xff]   ;;  %v17318_v59 = vld [vmem:[#allocation10 + $0x220] sm:$0xff]   ;;  %v17319_v21 = vld [vmem:[#allocation10 + $0x218] sm:$0xff]   ;;  %vm9379_vm13 = vsmask.f32 3340 }
 0x990   : > { %v8412_v24 = vcombine.low %v21662_v35, %v21484_v28  ;;  %v17301_v28 = vld [vmem:[#allocation10 + $0x1d0] sm:$0xff]   ;;  %v8409_v52 = vrot.slane %v8402_v60, %v22331_v18  ;;  %v8367_v5 = vcombine.low %v21645_v36, %v21662_v35  ;;  %v8374_v29 = vrot.slane %v8366_v54, %v22331_v18  ;;  %v17321_v31 = vld [vmem:[#allocation10 + $0x208] sm:$0xff]   ;;  %v17323_v6 = vld [vmem:[#allocation12 + $0xf8] sm:$0xff]  }
 0x991   : > { %v8328_v45 = vcombine.low %v8320_v8, %v8327_v40  ;;  %v17316_v36 = vld [vmem:[#allocation10 + $0x230] sm:$0xff]   ;;  %v8422_v8 = vcombine.low %v21635_v63, %v21350_v3  ;;  %v17324_v14 = vld [vmem:[#allocation12 + $0xb8] sm:$0xff]   ;;  %v17332_v7 = vld [vmem:[#allocation12 + $0xa8] sm:$0xff]  }
 0x992   : > { %16384 = vmatpush3.bf16.msra.mxu0 %v17291_v62  ;;  %v8419_v25 = vrot.slane %v8412_v24, %v22331_v18  ;;  %v8410_v20 = vcombine.low %v21654_v37, %v8409_v52  ;;  %v8381_v53 = vrot.slane %v8367_v5, %v22331_v18  ;;  %v17322_v37 = vld [vmem:[#allocation10 + $0x200] sm:$0xff]   ;;  %v17325_v17 = vld [vmem:[#allocation12 + $0x78] sm:$0xff]   ;;  %v17328_v3 = vld [vmem:[#allocation12 + $0xb0] sm:$0xff]  }
 0x993   : > { %9047 = vmatprep.mubr.bf16.mxu1 %v8328_v45  ;;  %16385 = vmatprep.subr.bf16.mxu0 %v17293_v55  ;;  %v8429_v62 = vrot.slane %v8422_v8, %v22331_v18  ;;  %v17326_v55 = vld [vmem:[#allocation12 + $0xf0] sm:$0xff]   ;;  %v17327_v22 = vld [vmem:[#allocation12 + $0x38] sm:$0xff]   ;;  %v17330_v45 = vld [vmem:[#allocation12 + $0xe8] sm:$0xff]  }
 0x994   : > { %9048 = vmatmul.mubr.bf16.vlgmr.msra.gmra.mxu1 %v8310_v4  ;;  %v8420_v32 = vcombine.low %v8327_v40, %v8419_v25  ;;  %v8382_v42 = vcombine.low %v8374_v29, %v8381_v53  ;;  %v17329_v63 = vld [vmem:[#allocation12 + $0x70] sm:$0xff]   ;;  %v17333_v35 = vld [vmem:[#allocation12 + $0x68] sm:$0xff]   ;;  %v17334_v4 = vld [vmem:[#allocation12 + $0xe0] sm:$0xff]  }
 0x995   : > { %16358 = vmatpush3.bf16.msra.mxu1 %v17288_v10  ;;  %9129 = vmatprep.mubr.bf16.mxu1 %v8400_v26  ;;  %v8430_v40 = vcombine.low %v21622_v11, %v8429_v62  ;;  %v17331_v10 = vld [vmem:[#allocation12 + $0x30] sm:$0xff]   ;;  %v17335_v11 = vld [vmem:[#allocation12 + $0x28] sm:$0xff]   ;;  %v17336_v24 = vld [vmem:[#allocation12 + $0xa0] sm:$0xff]  }
 0x996   : > { %16359 = vmatprep.subr.bf16.mxu1 %v17290_v9  ;;  %16386 = vmatpush3.bf16.msra.mxu0 %v17295_v47  ;;  %v17337_v9 = vld [vmem:[#allocation12 + $0x60] sm:$0xff]   ;;  %v17338_v47 = vld [vmem:[#allocation12 + $0xd8] sm:$0xff]   ;;  %vm9378_vm2 = vmor %vm9376_vm11, %vm9377_vm1  ;;  %vm9387_vm11 = vsmask.f32 7452 }
 0x997   : > { %16387 = vmatprep.subr.bf16.mxu0 %v17297_v30  ;;  %9170 = vmatprep.mubr.bf16.mxu0 %v8420_v32  ;;  %v17339_v26 = vld [vmem:[#allocation12 + $0x20] sm:$0xff]   ;;  %v17340_v30 = vld [vmem:[#allocation12 + $0x98] sm:$0xff]   ;;  %vm9380_vm3 = vmor %vm9378_vm2, %vm9379_vm13 }
 0x998   : > { %v17341_v25 = vld [vmem:[#allocation12 + $0x58] sm:$0xff]   ;;  %v15313_v53 = vld [vmem:[%s22099_s12] ss:$0 sm:$0xff]  ;;  %vm9382_vm0 = vmor %vm9380_vm3, %vm9381_vm8 }
 0x999   : > { %16360 = vmatpush3.bf16.msra.mxu1 %v17292_v1  ;;  %v17342_v1 = vld [vmem:[#allocation12 + $0xd0] sm:$0xff]   ;;  %v17343_v32 = vld [vmem:[#allocation12 + $0x18] sm:$0xff]   ;;  %vm9384_vm14 = vmor %vm9382_vm0, %vm9383_vm5 }
 0x99a   : > { %16361 = vmatprep.subr.bf16.mxu1 %v17294_v61  ;;  %16388 = vmatpush3.bf16.msra.mxu0 %v17299_v49  ;;  %v17344_v61 = vld [vmem:[#allocation12 + $0x90] sm:$0xff]   ;;  %v17354_v60 = vld [vmem:[#allocation12 + $0x1f8] sm:$0xff]   ;;  %vm9386_vm6 = vmor %vm9384_vm14, %vm9385_vm7 }
 0x99b   : > { %16389 = vmatprep.subr.bf16.mxu0 %v17301_v28  ;;  %v17345_v49 = vld [vmem:[#allocation12 + $0x50] sm:$0xff]   ;;  %v17346_v28 = vld [vmem:[#allocation12 + $0xc8] sm:$0xff]   ;;  %vm21723_vm1 = vmor %vm9386_vm6, %vm9387_vm11 }
 0x99d   : > { %16362 = vmatpush3.bf16.msra.mxu1 %v17296_v13  ;;  %v17347_v13 = vld [vmem:[#allocation12 + $0x10] sm:$0xff]  }
 0x99e   : > { %16363 = vmatprep.subr.bf16.mxu1 %v17298_v15  ;;  %16390 = vmatpush3.bf16.msra.mxu0 %v17303_v46  ;;  %v17348_v15 = vld [vmem:[#allocation12 + $0x88] sm:$0xff]  }
 0x99f   : > { %16391 = vmatprep.subr.bf16.mxu0 %v17305_v50  ;;  %v17349_v46 = vld [vmem:[#allocation12 + $0x48] sm:$0xff]   ;;  %v17350_v50 = vld [vmem:[#allocation12 + $0xc0] sm:$0xff]  }
 0x9a1   : > { %16364 = vmatpush3.bf16.msra.mxu1 %v17300_v48  ;;  %v17351_v48 = vld [vmem:[#allocation12 + $0x8] sm:$0xff]  }
 0x9a2   : > { %16365 = vmatprep.subr.bf16.mxu1 %v17302_v23  ;;  %16392 = vmatpush3.bf16.msra.mxu0 %v17307_v58  ;;  %v17352_v23 = vld [vmem:[#allocation12 + $0x80] sm:$0xff]  }
 0x9a3   : > { %16393 = vmatprep.subr.bf16.mxu0 %v17309_v2  ;;  %v17353_v58 = vld [vmem:[#allocation12 + $0x40] sm:$0xff]  }
 0x9a4   : > { %v17355_v2 = vld [vmem:[#allocation12] sm:$0xff]  }
 0x9a5   : > { %16366 = vmatpush3.bf16.msra.mxu1 %v17304_v33  ;;  %v17357_v33 = vld [vmem:[#allocation12 + $0x178] sm:$0xff]  }
 0x9a6   : > { %16367 = vmatprep.subr.bf16.mxu1 %v17306_v16  ;;  %16394 = vmatpush3.bf16.msra.mxu0 %v17311_v19 }
 0x9a7   : > { %16410 = vmatprep.subr.bf16.mxu0 %v17325_v17 }
 0x9a9   : > { %16368 = vmatpush3.bf16.msra.mxu1 %v17308_v41  ;;  %9171 = vmatmul.mubr.bf16.vlgmr.msra.gmra.mxu0 %v8410_v20 }
 0x9aa   : > { %16369 = vmatprep.subr.bf16.mxu1 %v17310_v0  ;;  %16411 = vmatpush3.bf16.msra.mxu0 %v17327_v22 }
 0x9ab   : > { %16412 = vmatprep.subr.bf16.mxu0 %v17329_v63 }
 0x9ad   : > { %16370 = vmatpush3.bf16.msra.mxu1 %v17312_v56 }
 0x9ae   : > { %16371 = vmatprep.subr.bf16.mxu1 %v17313_v38  ;;  %16413 = vmatpush3.bf16.msra.mxu0 %v17331_v10 }
 0x9af   : > { %16414 = vmatprep.subr.bf16.mxu0 %v17333_v35 }
 0x9b1   : > { %16372 = vmatpush3.bf16.msra.mxu1 %v17314_v51 }
 0x9b2   : > { %16886 = vmatprep.subr.bf16.mxu1 %v18241_v34  ;;  %16415 = vmatpush3.bf16.msra.mxu0 %v17335_v11  ;;  %v18243_v11 = vmov 1966171168  }
 0x9b3   : > { %16416 = vmatprep.subr.bf16.mxu0 %v17337_v9 }
 0x9b4   : > { %9130 = vmatmul.mubr.bf16.vlgmr.msra.gmra.mxu1 %v8382_v42 }
 0x9b5   : > { %16887 = vmatpush3.bf16.msra.mxu1 %v17315_v39  ;;  %16902 = vmatprep.mubr.msk.bf16.mxu1 %vm18242_vm10, %v18241_v34 }
 0x9b6   : > { %16888 = vmatprep.subr.bf16.mxu1 %v18241_v34  ;;  %16417 = vmatpush3.bf16.msra.mxu0 %v17339_v26 }
 0x9b7   : > { %16418 = vmatprep.subr.bf16.mxu0 %v17341_v25 }
 0x9b9   : > { %16889 = vmatpush3.bf16.msra.mxu1 %v17316_v36 }
 0x9ba   : > { %16890 = vmatprep.subr.bf16.mxu1 %v18241_v34  ;;  %16419 = vmatpush3.bf16.msra.mxu0 %v17343_v32 }
 0x9bb   : > { %16420 = vmatprep.subr.bf16.mxu0 %v17345_v49 }
 0x9bd   : > { %16891 = vmatpush3.bf16.msra.mxu1 %v17317_v44 }
 0x9be   : > { %16892 = vmatprep.subr.bf16.mxu1 %v18241_v34  ;;  %16421 = vmatpush3.bf16.msra.mxu0 %v17347_v13 }
 0x9bf   : > { %16422 = vmatprep.subr.bf16.mxu0 %v17349_v46 }
 0x9c1   : > { %16893 = vmatpush3.bf16.msra.mxu1 %v17318_v59 }
 0x9c2   : > { %16894 = vmatprep.subr.bf16.mxu1 %v18241_v34  ;;  %16423 = vmatpush3.bf16.msra.mxu0 %v17351_v48 }
 0x9c3   : > { %16424 = vmatprep.subr.bf16.mxu0 %v17353_v58 }
 0x9c5   : > { %16895 = vmatpush3.bf16.msra.mxu1 %v17319_v21 }
 0x9c6   : > { %16896 = vmatprep.subr.bf16.mxu1 %v18241_v34  ;;  %16425 = vmatpush3.bf16.msra.mxu0 %v17355_v2 }
 0x9c7   : > { %16454 = vmatprep.subr.bf16.mxu0 %v17357_v33 }
 0x9c9   : > { %16897 = vmatpush3.bf16.msra.mxu1 %v17320_v12 }
 0x9ca   : > { %16898 = vmatprep.subr.bf16.mxu1 %v18241_v34 }
 0x9cd   : > { %16899 = vmatpush3.bf16.msra.mxu1 %v17321_v31 }
 0x9ce   : > { %16900 = vmatprep.subr.bf16.mxu1 %v18241_v34 }
 0x9d1   : > { %16901 = vmatpush3.bf16.msra.mxu1 %v17322_v37 }
 0x9d2   : > { %16432 = vmatprep.subr.bf16.mxu1 %v17323_v6 }
 0x9d4   : > { %16903 = vmatmul.mubr.bf16.vlgmr.msra.gmra.mxu1 %v8430_v40 }
 0x9d5   : > { %16433 = vmatpush3.bf16.msra.mxu1 %v17324_v14 }
 0x9d6   : > { %16434 = vmatprep.subr.bf16.mxu1 %v17326_v55 }
 0x9d9   : > { %16435 = vmatpush3.bf16.msra.mxu1 %v17328_v3 }
 0x9da   : > { %16436 = vmatprep.subr.bf16.mxu1 %v17330_v45 }
 0x9dd   : > { %16437 = vmatpush3.bf16.msra.mxu1 %v17332_v7 }
 0x9de   : > { %16438 = vmatprep.subr.bf16.mxu1 %v17334_v4 }
 0x9e1   : > { %16439 = vmatpush3.bf16.msra.mxu1 %v17336_v24  ;;  %v9332_v24 = vunpack.c.l.s4 %v18243_v11 }
 0x9e2   : > { %16440 = vmatprep.subr.bf16.mxu1 %v17338_v47 }
 0x9e5   : > { %16441 = vmatpush3.bf16.msra.mxu1 %v17340_v30 }
 0x9e6   : > { %16442 = vmatprep.subr.bf16.mxu1 %v17342_v1 }
 0x9e9   : > { %16443 = vmatpush3.bf16.msra.mxu1 %v17344_v61 }
 0x9ea   : > { %16444 = vmatprep.subr.bf16.mxu1 %v17346_v28  ;;  %v9333_v28 = vunpack.c.0.s8 %v9332_v24 }
 0x9ed   : > { %16445 = vmatpush3.bf16.msra.mxu1 %v17348_v15 }
 0x9ee   : > { %16446 = vmatprep.subr.bf16.mxu1 %v17350_v50 }
 0x9f1   : > { %16447 = vmatpush3.bf16.msra.mxu1 %v17352_v23 }
 0x9f2   : > { %16476 = vmatprep.subr.bf16.mxu1 %v17354_v60 }
 0xa49   : > { %v16351_v52 = vpop.f32.mrf.mxu0 }
 0xa4b   : > { %v16352_v0 = vpop.f32.mrf.mxu0 }
 0xa4c   : > { %v16353_v59 = vadd.f32 %v16352_v0, %v16351_v52 }
 0xa4d   : > { %v16354_v56 = vpop.f32.mrf.mxu0 }
 0xa4f   : > { %v16355_v38 = vpop.f32.mrf.mxu0 }
 0xa50   : > { %v16356_v62 = vadd.f32 %v16355_v38, %v16354_v56 }
 0xa54   : > { %v16329_v16 = vpop.f32.mrf.mxu1 }
 0xa56   : > { %v16330_v19 = vpop.f32.mrf.mxu1 }
 0xa57   : > { %v16331_v51 = vadd.f32 %v16330_v19, %v16329_v16  ;;  %v22338_v19 = vld [vmem:[#allocation28_spill] sm:$0xff] }
 0xa58   : > { %v16332_v41 = vpop.f32.mrf.mxu1  ;;  %v21701_v52 = vsub.s32 %v9333_v28, %v22338_v19 }
 0xa59   : > { %v9050_v42 = vadd.f32 %v16331_v51, %v15313_v53 }
 0xa5a   : > { %v16333_v20 = vpop.f32.mrf.mxu1 }
 0xa5b   : > { %v16334_v36 = vadd.f32 %v16333_v20, %v16332_v41  ;;  %v9091_v8 = vadd.f32 %v16353_v59, %v9050_v42 }
 0xa5d   : > { %v9053_v31 = vadd.f32 %v16334_v36, %v15313_v53 }
 0xa5f   : > { %v9094_v17 = vadd.f32 %v16356_v62, %v9053_v31 }
 0xa69   : > { %v16395_v29 = vpop.f32.mrf.mxu0 }
 0xa6b   : > { %v16396_v44 = vpop.f32.mrf.mxu0 }
 0xa6c   : > { %v16397_v14 = vadd.f32 %v16396_v44, %v16395_v29  ;;  %v9337_v44 = vrot.slane %v22311_v27, %v21701_v52 }
 0xa6d   : > { %v16398_v37 = vpop.f32.mrf.mxu0 }
 0xa6f   : > { %v16399_v55 = vpop.f32.mrf.mxu0 }
 0xa70   : > { %v16400_v45 = vadd.f32 %v16399_v55, %v16398_v37 }
 0xa74   : > { %v16373_v5 = vpop.f32.mrf.mxu1 }
 0xa76   : > { %v16374_v54 = vpop.f32.mrf.mxu1 }
 0xa77   : > { %v16375_v21 = vadd.f32 %v16374_v54, %v16373_v5 }
 0xa78   : > { %v16376_v39 = vpop.f32.mrf.mxu1 }
 0xa79   : > { %v9132_v40 = vadd.f32 %v16375_v21, %v9091_v8 }
 0xa7a   : > { %v16377_v12 = vpop.f32.mrf.mxu1 }
 0xa7b   : > { %v16378_v6 = vadd.f32 %v16377_v12, %v16376_v39  ;;  %v9173_v3 = vadd.f32 %v16397_v14, %v9132_v40 }
 0xa7d   : > { %v9135_v22 = vadd.f32 %v16378_v6, %v9094_v17  ;;  %v9338_v6 = vcombine.high %v9337_v44, %v9337_v44 }
 0xa7f   : > { %v9176_v4 = vadd.f32 %v16400_v45, %v9135_v22  ;;  %v21712_v45 = vrot.slane %v9338_v6, %v21701_v52  ;;  %v17363_v6 = vld [vmem:[#allocation12 + $0x130] sm:$0xff]  }
 0xa94   : > { %v9213_v63 = vpop.f32.mrf.mxu1 }
 0xa95   : > { %v9214_v10 = vadd.f32 %v9213_v63, %v9173_v3 }
 0xa96   : > { %v16904_v7 = vpop.f32.mrf.mxu1 }
 0xa97   : > { %v9220_v35 = vmax.f32 %v9214_v10, 0.0  ;;  %v9345_v10 = vrot.slane %v9337_v44, %v21701_v52  ;;  %v17360_v44 = vld [vmem:[#allocation12 + $0x1b0] sm:$0xff]  }
 0xa98   : > { %v9216_v9 = vpop.f32.mrf.mxu1 }
 0xa99   : > { %v9224_v47 = vcombine.high %v9220_v35, %v9220_v35  ;;  %v9231_v26 = vrot.slane %v9220_v35, %v22331_v18  ;;  %v9217_v30 = vadd.f32 %v9216_v9, %v9176_v4 }
 0xa9a   : > { %v16905_v25 = vpop.f32.mrf.mxu1 }
 0xa9b   : > { %v9238_v1 = vrot.slane %v9224_v47, %v22331_v18  ;;  %v9239_v32 = vcombine.high %v9231_v26, %v9231_v26  ;;  %v15386_v61 = vrot.slane %v9231_v26, 9  ;;  %v9221_v49 = vmax.f32 %v9217_v30, 0.0 }
 0xa9c   : > { %v9395_v30 = vshll.u32 %v21712_v45, 16 }
 0xa9d   : > { %v9240_v13 = vcombine.high %v9238_v1, %v9238_v1  ;;  %v15387_v15 = vrot.slane %v9239_v32, 9  ;;  %v15390_v46 = vrot.slane %v9238_v1, 9  ;;  %v9241_v50 = vcombine.high %v9221_v49, %v9221_v49 }
 0xa9e   : > { %v9248_v48 = vrot.slane %v9221_v49, %v22331_v18  ;;  %v9278_v23 = vmax.f32 %v9231_v26, %v15386_v61  ;;  %v9390_v26 = vshrl.u32 %v9345_v10, 16  ;;  %v17368_v10 = vld [vmem:[#allocation12 + $0x1a0] sm:$0xff]  }
 0xa9f   : > { %v15391_v58 = vrot.slane %v9240_v13, 9  ;;  %v9294_v60 = vmax.f32 %v9238_v1, %v15390_v46  ;;  %v9255_v2 = vrot.slane %v9241_v50, %v22331_v18  ;;  %v9279_v41 = vmax.f32 %v9239_v32, %v15387_v15  ;;  %v17721_v32 = vld [vmem:[#allocation19 + $0x168] sm:$0xff]  }
 0xaa0   : > { %v9256_v33 = vcombine.high %v9248_v48, %v9248_v48  ;;  %v15388_v16 = vrot.slane %v9248_v48, 9  ;;  %v21739_v46 = vsel %vm21723_vm1, %v9390_v26, %v9395_v30  ;;  %v17376_v26 = vld [vmem:[#allocation12 + $0x190] sm:$0xff]  }
 0xaa1   : > { %v9295_v0 = vmax.f32 %v9240_v13, %v15391_v58  ;;  %v9298_v20 = vmax.f32 %v9278_v23, %v9294_v60  ;;  %v9257_v56 = vcombine.high %v9255_v2, %v9255_v2  ;;  %v15392_v38 = vrot.slane %v9255_v2, 9  ;;  %v17377_v30 = vld [vmem:[#allocation12 + $0x150] sm:$0xff]  }
 0xaa2   : > { %v15389_v5 = vrot.slane %v9256_v33, 9  ;;  %v9280_v53 = vmax.f32 %v9248_v48, %v15388_v16 }
 0xaa3   : > { %v9299_v54 = vmax.f32 %v9279_v41, %v9295_v0  ;;  %v9302_v51 = vpack.c.bf16 %v9298_v20, %v9298_v20  ;;  %v15393_v29 = vrot.slane %v9257_v56, 9  ;;  %v9296_v39 = vmax.f32 %v9255_v2, %v15392_v38  ;;  %v17356_v0 = vld [vmem:[#allocation12 + $0x1b8] sm:$0xff]   ;;  %v17358_v38 = vld [vmem:[#allocation12 + $0x1f0] sm:$0xff]  }
 0xaa4   : > { %v9281_v59 = vmax.f32 %v9256_v33, %v15389_v5 }
 0xaa5   : > { %v9303_v42 = vpack.c.bf16 %v9299_v54, %v9299_v54  ;;  %v9310_v36 = vunpack.c.l.b16 %v9302_v51  ;;  %v9297_v21 = vmax.f32 %v9257_v56, %v15393_v29  ;;  %v9300_v12 = vmax.f32 %v9280_v53, %v9296_v39 }
 0xaa7   : > { %v9311_v31 = vunpack.c.l.b16 %v9303_v42  ;;  %v9301_v8 = vmax.f32 %v9281_v59, %v9297_v21  ;;  %v9304_v37 = vpack.c.bf16 %v9300_v12, %v9300_v12  ;;  %v9314_v62 = vrot.slane %v9310_v36, 7  ;;  %v17359_v36 = vld [vmem:[#allocation12 + $0x138] sm:$0xff]  }
 0xaa9   : > { %v9315_v40 = vrot.slane %v9311_v31, 6  ;;  %v9305_v14 = vpack.c.bf16 %v9301_v8, %v9301_v8  ;;  %v9312_v17 = vunpack.c.l.b16 %v9304_v37  ;;  %v17361_v31 = vld [vmem:[#allocation12 + $0x170] sm:$0xff]  }
 0xaab   : > { %v9316_v55 = vsel %vm5114_vm9, %v9315_v40, %v9314_v62  ;;  %v9313_v3 = vunpack.c.l.b16 %v9305_v14  ;;  %v9317_v7 = vrot.slane %v9312_v17, 7  ;;  %v17362_v62 = vld [vmem:[#allocation12 + $0x1e8] sm:$0xff]  }
 0xaac   : > { %v9320_v63 = vpack.c.b16 %v9316_v55, %v9316_v55  ;;  %v17364_v14 = vld [vmem:[#allocation12 + $0x1a8] sm:$0xff]  }
 0xaad   : > { %v9318_v35 = vrot.slane %v9313_v3, 6  ;;  %v17365_v55 = vld [vmem:[#allocation12 + $0x168] sm:$0xff]   ;;  %v17366_v3 = vld [vmem:[#allocation12 + $0x1e0] sm:$0xff]  }
 0xaae   : > { %v9324_v4 = vsel %vm18822_vm4, 0, %v9320_v63  ;;  %v17367_v63 = vld [vmem:[#allocation12 + $0x128] sm:$0xff]  }
 0xaaf   : > { %v9328_v11 = vsel %vm21707_vm12, %v9324_v4, 0  ;;  %v9319_v24 = vsel %vm5114_vm9, %v9318_v35, %v9317_v7  ;;  %v17369_v7 = vld [vmem:[#allocation12 + $0x160] sm:$0xff]   ;;  %v17370_v35 = vld [vmem:[#allocation12 + $0x1d8] sm:$0xff]  }
 0xab0   : > { %v9359_v9 = vrot.slane %v9328_v11, %v21701_v52  ;;  %v9321_v47 = vpack.c.b16 %v9319_v24, %v9319_v24  ;;  %v9439_v50 = vcombine.low %v22311_v27, %v9328_v11  ;;  %v17371_v4 = vld [vmem:[#allocation12 + $0x120] sm:$0xff]   ;;  %v17373_v24 = vld [vmem:[#allocation12 + $0x158] sm:$0xff]  }
 0xab2   : > { %v9360_v25 = vcombine.high %v9359_v9, %v9359_v9  ;;  %v9367_v1 = vrot.slane %v9359_v9, %v21701_v52  ;;  %v9325_v61 = vsel %vm18822_vm4, 0, %v9321_v47  ;;  %v9446_v54 = vrot.slane %v9439_v50, %v21701_v52  ;;  %v17374_v9 = vld [vmem:[#allocation12 + $0x1d0] sm:$0xff]   ;;  %v17375_v47 = vld [vmem:[#allocation12 + $0x118] sm:$0xff]   ;;  %v17383_v50 = vld [vmem:[#allocation12 + $0x108] sm:$0xff]  }
 0xab3   : > { %v21731_v49 = vsel %vm21707_vm12, %v9325_v61, 0  ;;  %v17380_v61 = vld [vmem:[#allocation12 + $0x188] sm:$0xff]  }
 0xab4   : > { %v9374_v28 = vrot.slane %v9360_v25, %v21701_v52  ;;  %v9414_v13 = vrot.slane %v21731_v49, %v21701_v52  ;;  %v9487_v15 = vcombine.low %v9328_v11, %v21731_v49  ;;  %v9399_v23 = vshrl.u32 %v9367_v1, 16  ;;  %v17372_v11 = vld [vmem:[#allocation12 + $0x198] sm:$0xff]   ;;  %v17378_v25 = vld [vmem:[#allocation12 + $0x1c8] sm:$0xff]   ;;  %v17379_v1 = vld [vmem:[#allocation12 + $0x110] sm:$0xff]  }
 0xab5   : > { %v9453_v12 = vrot.slane %v9446_v54, %v21701_v52  ;;  %v17393_v54 = vld [vmem:[#allocation12 + $0x208] sm:$0xff]  }
 0xab6   : > { %v9471_v48 = vcombine.low %v21712_v45, %v9374_v28  ;;  %v9404_v58 = vshll.u32 %v9374_v28, 16  ;;  %v9494_v60 = vrot.slane %v9487_v15, %v21701_v52  ;;  %v9415_v2 = vcombine.high %v9414_v13, %v9414_v13  ;;  %v17382_v15 = vld [vmem:[#allocation12 + $0x1c0] sm:$0xff]  }
 0xab7   : > { %v9422_v33 = vrot.slane %v9414_v13, %v21701_v52  ;;  %v17381_v13 = vld [vmem:[#allocation12 + $0x148] sm:$0xff]  }
 0xab8   : > { %v9478_v16 = vrot.slane %v9471_v48, %v21701_v52  ;;  %v21748_v19 = vsel %vm21723_vm1, %v9399_v23, %v9404_v58  ;;  %v9501_v41 = vrot.slane %v9494_v60, %v21701_v52  ;;  %v21754_v56 = vrot.slane %v9415_v2, %v21701_v52  ;;  %v17384_v48 = vld [vmem:[#allocation12 + $0x180] sm:$0xff]  }
 0xab9   : > { %v9455_v20 = vcombine.low %v21739_v46, %v21748_v19  ;;  %v9431_v29 = vshrl.u32 %v9422_v33, 16  ;;  %v17385_v58 = vld [vmem:[#allocation12 + $0x140] sm:$0xff]  }
 0xaba   : > { %v9485_v5 = vrot.slane %v9478_v16, %v21701_v52  ;;  %10238 = vmatprep.mubr.bf16.mxu1 %v9501_v41  ;;  %v9519_v53 = vcombine.low %v9374_v28, %v21754_v56  ;;  %v9436_v39 = vshll.u32 %v21754_v56, 16  ;;  %v9535_v28 = vcombine.low %v21731_v49, %v22311_v27  ;;  %v17386_v2 = vld [vmem:[#allocation12 + $0x100] sm:$0xff]   ;;  %v17387_v16 = vld [vmem:[#allocation12 + $0x238] sm:$0xff]  }
 0xabb   : > { %v9462_v51 = vrot.slane %v9455_v20, %v21701_v52  ;;  %v17390_v20 = vld [vmem:[#allocation12 + $0x220] sm:$0xff]  }
 0xabc   : > { %10239 = vmatmul.mubr.bf16.vlgmr.msra.gmra.mxu1 %v9485_v5  ;;  %v9526_v59 = vrot.slane %v9519_v53, %v21701_v52  ;;  %v21765_v21 = vsel %vm21723_vm1, %v9431_v29, %v9436_v39  ;;  %v9542_v60 = vrot.slane %v9535_v28, %v21701_v52  ;;  %v17391_v5 = vld [vmem:[#allocation12 + $0x218] sm:$0xff]   ;;  %v17394_v53 = vld [vmem:[#allocation12 + $0x200] sm:$0xff]  }
 0xabd   : > { %16477 = vmatpush3.bf16.msra.mxu1 %v17356_v0  ;;  %v9469_v42 = vrot.slane %v9462_v51, %v21701_v52  ;;  %v9551_v8 = vcombine.low %v21765_v21, %v21739_v46  ;;  %v9503_v23 = vcombine.low %v21748_v19, %v21765_v21  ;;  %v17388_v19 = vld [vmem:[#allocation12 + $0x230] sm:$0xff]   ;;  %v17389_v0 = vld [vmem:[#allocation12 + $0x228] sm:$0xff]   ;;  %v9567_v51 = vcombine.low %v21754_v56, %v21712_v45  ;;  %v17399_v21 = vld [vmem:[#allocation15 + $0x38] sm:$0xff]  }
 0xabe   : > { %16478 = vmatprep.subr.bf16.mxu1 %v17358_v38  ;;  %v9533_v37 = vrot.slane %v9526_v59, %v21701_v52  ;;  %v9549_v33 = vrot.slane %v9542_v60, %v21701_v52  ;;  %v17392_v38 = vld [vmem:[#allocation12 + $0x210] sm:$0xff]   ;;  %v17426_v28 = vld [vmem:[#allocation15 + $0x1f8] sm:$0xff]  }
 0xabf   : > { %10198 = vmatprep.mubr.bf16.mxu0 %v9469_v42  ;;  %v9558_v40 = vrot.slane %v9551_v8, %v21701_v52  ;;  %v9510_v49 = vrot.slane %v9503_v23, %v21701_v52  ;;  %v9574_v29 = vrot.slane %v9567_v51, %v21701_v52  ;;  %v17395_v42 = vld [vmem:[#allocation15 + $0xf8] sm:$0xff]   ;;  %v17398_v59 = vld [vmem:[#allocation15 + $0xf0] sm:$0xff]  }
 0xac0   : > { %10199 = vmatmul.mubr.bf16.vlgmr.msra.gmra.mxu0 %v9453_v12  ;;  %v17400_v12 = vld [vmem:[#allocation15 + $0xb0] sm:$0xff]  }
 0xac1   : > { %16455 = vmatpush3.bf16.msra.mxu0 %v17359_v36  ;;  %16479 = vmatpush3.bf16.msra.mxu1 %v17360_v44  ;;  %v9565_v17 = vrot.slane %v9558_v40, %v21701_v52  ;;  %v9517_v41 = vrot.slane %v9510_v49, %v21701_v52  ;;  %v9581_v39 = vrot.slane %v9574_v29, %v21701_v52  ;;  %v17396_v36 = vld [vmem:[#allocation15 + $0xb8] sm:$0xff]   ;;  %v17401_v56 = vld [vmem:[#allocation15 + $0x70] sm:$0xff]   ;;  %v17406_v40 = vld [vmem:[#allocation15 + $0xe0] sm:$0xff]  }
 0xac2   : > { %10278 = vmatprep.mubr.bf16.mxu0 %v9533_v37  ;;  %16456 = vmatprep.subr.bf16.mxu0 %v17361_v31  ;;  %v17397_v44 = vld [vmem:[#allocation15 + $0x78] sm:$0xff]   ;;  %v17402_v31 = vld [vmem:[#allocation15 + $0xe8] sm:$0xff]   ;;  %v17403_v8 = vld [vmem:[#allocation15 + $0x30] sm:$0xff]  }
 0xac3   : > { %16480 = vmatprep.subr.bf16.mxu1 %v17362_v62  ;;  %10318 = vmatprep.mubr.bf16.mxu1 %v9565_v17  ;;  %v17404_v37 = vld [vmem:[#allocation15 + $0xa8] sm:$0xff]   ;;  %v17409_v17 = vld [vmem:[#allocation15 + $0x60] sm:$0xff]  }
 0xac4   : > { %v17405_v62 = vld [vmem:[#allocation15 + $0x68] sm:$0xff]  }
 0xac5   : > { %16457 = vmatpush3.bf16.msra.mxu0 %v17363_v6  ;;  %16481 = vmatpush3.bf16.msra.mxu1 %v17364_v14  ;;  %v17407_v6 = vld [vmem:[#allocation15 + $0x28] sm:$0xff]   ;;  %v17408_v14 = vld [vmem:[#allocation15 + $0xa0] sm:$0xff]  }
 0xac6   : > { %16458 = vmatprep.subr.bf16.mxu0 %v17365_v55  ;;  %16482 = vmatprep.subr.bf16.mxu1 %v17366_v3  ;;  %v17410_v55 = vld [vmem:[#allocation15 + $0xd8] sm:$0xff]   ;;  %v17411_v3 = vld [vmem:[#allocation15 + $0x20] sm:$0xff]  }
 0xac9   : > { %16459 = vmatpush3.bf16.msra.mxu0 %v17367_v63  ;;  %16483 = vmatpush3.bf16.msra.mxu1 %v17368_v10  ;;  %v17412_v63 = vld [vmem:[#allocation15 + $0x98] sm:$0xff]  }
 0xaca   : > { %16460 = vmatprep.subr.bf16.mxu0 %v17369_v7  ;;  %16484 = vmatprep.subr.bf16.mxu1 %v17370_v35  ;;  %v17413_v10 = vld [vmem:[#allocation15 + $0x58] sm:$0xff]   ;;  %v17414_v7 = vld [vmem:[#allocation15 + $0xd0] sm:$0xff]  }
 0xacb   : > { %v17415_v35 = vld [vmem:[#allocation15 + $0x18] sm:$0xff]  }
 0xacd   : > { %16461 = vmatpush3.bf16.msra.mxu0 %v17371_v4  ;;  %16485 = vmatpush3.bf16.msra.mxu1 %v17372_v11  ;;  %v17416_v4 = vld [vmem:[#allocation15 + $0x90] sm:$0xff]  }
 0xace   : > { %16462 = vmatprep.subr.bf16.mxu0 %v17373_v24  ;;  %16486 = vmatprep.subr.bf16.mxu1 %v17374_v9  ;;  %v17417_v11 = vld [vmem:[#allocation15 + $0x50] sm:$0xff]   ;;  %v17418_v24 = vld [vmem:[#allocation15 + $0xc8] sm:$0xff]  }
 0xacf   : > { %v17419_v9 = vld [vmem:[#allocation15 + $0x10] sm:$0xff]  }
 0xad1   : > { %16463 = vmatpush3.bf16.msra.mxu0 %v17375_v47  ;;  %16487 = vmatpush3.bf16.msra.mxu1 %v17376_v26  ;;  %v17420_v47 = vld [vmem:[#allocation15 + $0x88] sm:$0xff]  }
 0xad2   : > { %16464 = vmatprep.subr.bf16.mxu0 %v17377_v30  ;;  %16488 = vmatprep.subr.bf16.mxu1 %v17378_v25  ;;  %v17421_v26 = vld [vmem:[#allocation15 + $0x48] sm:$0xff]   ;;  %v17422_v30 = vld [vmem:[#allocation15 + $0xc0] sm:$0xff]  }
 0xad3   : > { %v17423_v25 = vld [vmem:[#allocation15 + $0x8] sm:$0xff]  }
 0xad5   : > { %16465 = vmatpush3.bf16.msra.mxu0 %v17379_v1  ;;  %16489 = vmatpush3.bf16.msra.mxu1 %v17380_v61  ;;  %v17424_v1 = vld [vmem:[#allocation15 + $0x80] sm:$0xff]  }
 0xad6   : > { %16466 = vmatprep.subr.bf16.mxu0 %v17381_v13  ;;  %16490 = vmatprep.subr.bf16.mxu1 %v17382_v15  ;;  %v17425_v61 = vld [vmem:[#allocation15 + $0x40] sm:$0xff]   ;;  %v17429_v15 = vld [vmem:[#allocation15 + $0x178] sm:$0xff]  }
 0xad7   : > { %v17427_v13 = vld [vmem:[#allocation15] sm:$0xff]  }
 0xad9   : > { %16467 = vmatpush3.bf16.msra.mxu0 %v17383_v50  ;;  %16491 = vmatpush3.bf16.msra.mxu1 %v17384_v48 }
 0xada   : > { %16468 = vmatprep.subr.bf16.mxu0 %v17385_v58  ;;  %16507 = vmatprep.subr.bf16.mxu1 %v17397_v44 }
 0xadc   : > { %10319 = vmatmul.mubr.bf16.vlgmr.msra.gmra.mxu1 %v9549_v33 }
 0xadd   : > { %16469 = vmatpush3.bf16.msra.mxu0 %v17386_v2  ;;  %16508 = vmatpush3.bf16.msra.mxu1 %v17399_v21 }
 0xade   : > { %16906 = vmatprep.subr.bf16.mxu0 %v18241_v34  ;;  %16509 = vmatprep.subr.bf16.mxu1 %v17401_v56 }
 0xae0   : > { %10279 = vmatmul.mubr.bf16.vlgmr.msra.gmra.mxu0 %v9517_v41 }
 0xae1   : > { %16907 = vmatpush3.bf16.msra.mxu0 %v17387_v16  ;;  %16922 = vmatprep.mubr.msk.bf16.mxu0 %vm18242_vm10, %v18241_v34 }
 0xae2   : > { %16908 = vmatprep.subr.bf16.mxu0 %v18241_v34  ;;  %16510 = vmatpush3.bf16.msra.mxu1 %v17403_v8 }
 0xae3   : > { %16511 = vmatprep.subr.bf16.mxu1 %v17405_v62 }
 0xae5   : > { %16909 = vmatpush3.bf16.msra.mxu0 %v17388_v19 }
 0xae6   : > { %16910 = vmatprep.subr.bf16.mxu0 %v18241_v34  ;;  %16512 = vmatpush3.bf16.msra.mxu1 %v17407_v6 }
 0xae7   : > { %16513 = vmatprep.subr.bf16.mxu1 %v17409_v17 }
 0xae9   : > { %16911 = vmatpush3.bf16.msra.mxu0 %v17389_v0 }
 0xaea   : > { %16912 = vmatprep.subr.bf16.mxu0 %v18241_v34  ;;  %16514 = vmatpush3.bf16.msra.mxu1 %v17411_v3 }
 0xaeb   : > { %16515 = vmatprep.subr.bf16.mxu1 %v17413_v10 }
 0xaed   : > { %16913 = vmatpush3.bf16.msra.mxu0 %v17390_v20 }
 0xaee   : > { %16914 = vmatprep.subr.bf16.mxu0 %v18241_v34  ;;  %16516 = vmatpush3.bf16.msra.mxu1 %v17415_v35 }
 0xaef   : > { %16517 = vmatprep.subr.bf16.mxu1 %v17417_v11 }
 0xaf1   : > { %16915 = vmatpush3.bf16.msra.mxu0 %v17391_v5 }
 0xaf2   : > { %16916 = vmatprep.subr.bf16.mxu0 %v18241_v34  ;;  %16518 = vmatpush3.bf16.msra.mxu1 %v17419_v9 }
 0xaf3   : > { %16519 = vmatprep.subr.bf16.mxu1 %v17421_v26 }
 0xaf5   : > { %16917 = vmatpush3.bf16.msra.mxu0 %v17392_v38 }
 0xaf6   : > { %16918 = vmatprep.subr.bf16.mxu0 %v18241_v34  ;;  %16520 = vmatpush3.bf16.msra.mxu1 %v17423_v25 }
 0xaf7   : > { %16521 = vmatprep.subr.bf16.mxu1 %v17425_v61 }
 0xaf9   : > { %16919 = vmatpush3.bf16.msra.mxu0 %v17393_v54 }
 0xafa   : > { %16920 = vmatprep.subr.bf16.mxu0 %v18241_v34  ;;  %16522 = vmatpush3.bf16.msra.mxu1 %v17427_v13 }
 0xafb   : > { %16551 = vmatprep.subr.bf16.mxu1 %v17429_v15 }
 0xafd   : > { %16921 = vmatpush3.bf16.msra.mxu0 %v17394_v53  ;;  %v15397_v53 = vld [vmem:[#allocation13] ss:$0 sm:$0xff] }
 0xafe   : > { %16529 = vmatprep.subr.bf16.mxu0 %v17395_v42 }
 0xb00   : > { %16923 = vmatmul.mubr.bf16.vlgmr.msra.gmra.mxu0 %v9581_v39 }
 0xb01   : > { %16530 = vmatpush3.bf16.msra.mxu0 %v17396_v36 }
 0xb02   : > { %16531 = vmatprep.subr.bf16.mxu0 %v17398_v59 }
 0xb05   : > { %16532 = vmatpush3.bf16.msra.mxu0 %v17400_v12 }
 0xb06   : > { %16533 = vmatprep.subr.bf16.mxu0 %v17402_v31 }
 0xb09   : > { %16534 = vmatpush3.bf16.msra.mxu0 %v17404_v37 }
 0xb0a   : > { %16535 = vmatprep.subr.bf16.mxu0 %v17406_v40 }
 0xb0d   : > { %16536 = vmatpush3.bf16.msra.mxu0 %v17408_v14 }
 0xb0e   : > { %16537 = vmatprep.subr.bf16.mxu0 %v17410_v55 }
 0xb11   : > { %16538 = vmatpush3.bf16.msra.mxu0 %v17412_v63 }
 0xb12   : > { %16539 = vmatprep.subr.bf16.mxu0 %v17414_v7 }
 0xb15   : > { %16540 = vmatpush3.bf16.msra.mxu0 %v17416_v4 }
 0xb16   : > { %16541 = vmatprep.subr.bf16.mxu0 %v17418_v24 }
 0xb19   : > { %16542 = vmatpush3.bf16.msra.mxu0 %v17420_v47 }
 0xb1a   : > { %16543 = vmatprep.subr.bf16.mxu0 %v17422_v30 }
 0xb1d   : > { %16544 = vmatpush3.bf16.msra.mxu0 %v17424_v1 }
 0xb1e   : > { %16573 = vmatprep.subr.bf16.mxu0 %v17426_v28 }
 0xb7c   : > { %v16448_v50 = vpop.f32.mrf.mxu1 }
 0xb7e   : > { %v16449_v48 = vpop.f32.mrf.mxu1 }
 0xb7f   : > { %v16450_v39 = vadd.f32 %v16449_v48, %v16448_v50 }
 0xb80   : > { %v16426_v23 = vpop.f32.mrf.mxu0  ;;  %v16451_v58 = vpop.f32.mrf.mxu1 }
 0xb82   : > { %v16427_v60 = vpop.f32.mrf.mxu0  ;;  %v16452_v2 = vpop.f32.mrf.mxu1 }
 0xb83   : > { %v16428_v51 = vadd.f32 %v16427_v60, %v16426_v23 }
 0xb84   : > { %v16429_v49 = vpop.f32.mrf.mxu0 }
 0xb85   : > { %v10201_v29 = vadd.f32 %v16428_v51, %v15397_v53  ;;  %v17430_v51 = vld [vmem:[#allocation15 + $0x1f0] sm:$0xff]  }
 0xb86   : > { %v16430_v33 = vpop.f32.mrf.mxu0 }
 0xb87   : > { %v10241_v36 = vadd.f32 %v16450_v39, %v10201_v29 }
 0xb9c   : > { %v16492_v16 = vpop.f32.mrf.mxu1 }
 0xb9e   : > { %v16493_v41 = vpop.f32.mrf.mxu1 }
 0xb9f   : > { %v16494_v59 = vadd.f32 %v16493_v41, %v16492_v16 }
 0xba0   : > { %v16470_v19 = vpop.f32.mrf.mxu0  ;;  %v16495_v0 = vpop.f32.mrf.mxu1 }
 0xba2   : > { %v16471_v20 = vpop.f32.mrf.mxu0  ;;  %v16496_v5 = vpop.f32.mrf.mxu1 }
 0xba3   : > { %v16472_v42 = vadd.f32 %v16471_v20, %v16470_v19  ;;  %v17428_v5 = vld [vmem:[#allocation15 + $0x1b8] sm:$0xff]  }
 0xba4   : > { %v16473_v38 = vpop.f32.mrf.mxu0 }
 0xba5   : > { %v10281_v44 = vadd.f32 %v16472_v42, %v10241_v36 }
 0xba6   : > { %v16474_v54 = vpop.f32.mrf.mxu0 }
 0xba7   : > { %v10321_v21 = vadd.f32 %v16494_v59, %v10281_v44  ;;  %v17431_v59 = vld [vmem:[#allocation15 + $0x138] sm:$0xff]  }
 0xbc0   : > { %v10360_v12 = vpop.f32.mrf.mxu0 }
 0xbc1   : > { %v10361_v56 = vadd.f32 %v10360_v12, %v10321_v21  ;;  %v17432_v21 = vld [vmem:[#allocation15 + $0x1b0] sm:$0xff]  }
 0xbc2   : > { %v16924_v31 = vpop.f32.mrf.mxu0 }
 0xbc3   : > { %v10366_v8 = vmax.f32 %v10361_v56, 0.0 }
 0xbc4   : > { %v10363_v37 = vpop.f32.mrf.mxu0 }
 0xbc5   : > { %v10374_v62 = vrot.slane %v10366_v8, %v22331_v18  ;;  %v17433_v8 = vld [vmem:[#allocation15 + $0x170] sm:$0xff]   ;;  %v17434_v37 = vld [vmem:[#allocation15 + $0x1e8] sm:$0xff]  }
 0xbc6   : > { %v16925_v40 = vpop.f32.mrf.mxu0 }
 0xbc7   : > { %v10375_v6 = vcombine.high %v10374_v62, %v10374_v62  ;;  %v10378_v14 = vpack.c.bf16 %v10374_v62, %v10374_v62  ;;  %v17435_v40 = vld [vmem:[#allocation15 + $0x130] sm:$0xff]  }
 0xbc9   : > { %v10379_v17 = vpack.c.bf16 %v10375_v6, %v10375_v6  ;;  %v10381_v55 = vshrl.u32 %v10378_v14, 16  ;;  %v10384_v63 = vshll.u32 %v10378_v14, 16  ;;  %v17436_v6 = vld [vmem:[#allocation15 + $0x1a8] sm:$0xff]  }
 0xbca   : > { %v17437_v14 = vld [vmem:[#allocation15 + $0x168] sm:$0xff]  }
 0xbcb   : > { %v10383_v3 = vrot.slane %v10381_v55, 7  ;;  %v10388_v10 = vshrl.u32 %v10379_v17, 16  ;;  %v10391_v4 = vshll.u32 %v10379_v17, 16  ;;  %v17438_v17 = vld [vmem:[#allocation15 + $0x1e0] sm:$0xff]   ;;  %v17439_v55 = vld [vmem:[#allocation15 + $0x128] sm:$0xff]  }
 0xbcd   : > { %v10386_v7 = vor.u32 %v10384_v63, %v10383_v3  ;;  %v10390_v35 = vrot.slane %v10388_v10, 7  ;;  %v17440_v3 = vld [vmem:[#allocation15 + $0x1a0] sm:$0xff]   ;;  %v17442_v10 = vld [vmem:[#allocation15 + $0x1d8] sm:$0xff]  }
 0xbce   : > { %v17441_v63 = vld [vmem:[#allocation15 + $0x160] sm:$0xff]  }
 0xbcf   : > { %v10393_v11 = vor.u32 %v10391_v4, %v10390_v35  ;;  %v10396_v24 = vsel %vm18822_vm4, 0, %v10386_v7  ;;  %v17443_v7 = vld [vmem:[#allocation15 + $0x120] sm:$0xff]   ;;  %v17444_v35 = vld [vmem:[#allocation15 + $0x198] sm:$0xff]  }
 0xbd0   : > { %v10398_v9 = vsel %vm21707_vm12, %v10396_v24, 0  ;;  %v17445_v4 = vld [vmem:[#allocation15 + $0x158] sm:$0xff]  }
 0xbd1   : > { %v10397_v47 = vsel %vm18822_vm4, 0, %v10393_v11  ;;  %v10407_v26 = vrot.slane %v10398_v9, %v21701_v52  ;;  %v10464_v23 = vcombine.low %v22311_v27, %v10398_v9  ;;  %v17446_v11 = vld [vmem:[#allocation15 + $0x1d0] sm:$0xff]   ;;  %v17447_v24 = vld [vmem:[#allocation15 + $0x118] sm:$0xff]  }
 0xbd2   : > { %v21805_v30 = vsel %vm21707_vm12, %v10397_v47, 0  ;;  %v17449_v47 = vld [vmem:[#allocation15 + $0x150] sm:$0xff]  }
 0xbd3   : > { %v10408_v25 = vcombine.high %v10407_v26, %v10407_v26  ;;  %v10439_v1 = vrot.slane %v21805_v30, %v21701_v52  ;;  %v10512_v61 = vcombine.low %v10398_v9, %v21805_v30  ;;  %v10415_v28 = vrot.slane %v10407_v26, %v21701_v52  ;;  %v17448_v9 = vld [vmem:[#allocation15 + $0x190] sm:$0xff]   ;;  %v17450_v26 = vld [vmem:[#allocation15 + $0x1c8] sm:$0xff]  }
 0xbd4   : > { %v10471_v53 = vrot.slane %v10464_v23, %v21701_v52  ;;  %v17457_v23 = vld [vmem:[#allocation15 + $0x140] sm:$0xff]  }
 0xbd5   : > { %v10422_v13 = vrot.slane %v10408_v25, %v21701_v52  ;;  %v10519_v15 = vrot.slane %v10512_v61, %v21701_v52  ;;  %v10440_v50 = vcombine.high %v10439_v1, %v10439_v1  ;;  %v10447_v48 = vrot.slane %v10439_v1, %v21701_v52  ;;  %v17451_v25 = vld [vmem:[#allocation15 + $0x110] sm:$0xff]   ;;  %v17452_v1 = vld [vmem:[#allocation15 + $0x188] sm:$0xff]  }
 0xbd6   : > { %v10424_v58 = vshrl.u32 %v10415_v28, 16  ;;  %v10478_v56 = vrot.slane %v10471_v53, %v21701_v52  ;;  %v10560_v61 = vcombine.low %v21805_v30, %v22311_v27  ;;  %v17453_v28 = vld [vmem:[#allocation15 + $0x148] sm:$0xff]  }
 0xbd7   : > { %v10526_v60 = vrot.slane %v10519_v15, %v21701_v52  ;;  %v10496_v2 = vcombine.low %v21712_v45, %v10422_v13  ;;  %v10429_v49 = vshll.u32 %v10422_v13, 16  ;;  %v21818_v33 = vrot.slane %v10440_v50, %v21701_v52  ;;  %v17455_v15 = vld [vmem:[#allocation15 + $0x108] sm:$0xff]   ;;  %v17456_v50 = vld [vmem:[#allocation15 + $0x180] sm:$0xff]  }
 0xbd8   : > { %v10456_v16 = vshrl.u32 %v10447_v48, 16 }
 0xbd9   : > { %11263 = vmatprep.mubr.bf16.mxu0 %v10526_v60  ;;  %v10503_v41 = vrot.slane %v10496_v2, %v21701_v52  ;;  %v21823_v19 = vsel %vm21723_vm1, %v10424_v58, %v10429_v49  ;;  %v10544_v0 = vcombine.low %v10422_v13, %v21818_v33  ;;  %v10461_v20 = vshll.u32 %v21818_v33, 16  ;;  %v17454_v13 = vld [vmem:[#allocation15 + $0x1c0] sm:$0xff]   ;;  %v17459_v49 = vld [vmem:[#allocation15 + $0x238] sm:$0xff]  }
 0xbda   : > { %v10480_v38 = vcombine.low %v21739_v46, %v21823_v19  ;;  %v10567_v58 = vrot.slane %v10560_v61, %v21701_v52  ;;  %v17458_v60 = vld [vmem:[#allocation15 + $0x100] sm:$0xff]  }
 0xbdb   : > { %v10510_v54 = vrot.slane %v10503_v41, %v21701_v52  ;;  %v21833_v29 = vsel %vm21723_vm1, %v10456_v16, %v10461_v20  ;;  %v10551_v36 = vrot.slane %v10544_v0, %v21701_v52  ;;  %v17460_v41 = vld [vmem:[#allocation15 + $0x230] sm:$0xff]   ;;  %v17462_v0 = vld [vmem:[#allocation15 + $0x220] sm:$0xff]   ;;  %v17463_v20 = vld [vmem:[#allocation15 + $0x218] sm:$0xff]  }
 0xbdc   : > { %v10487_v39 = vrot.slane %v10480_v38, %v21701_v52  ;;  %v10576_v42 = vcombine.low %v21833_v29, %v21739_v46  ;;  %v10528_v48 = vcombine.low %v21823_v19, %v21833_v29  ;;  %v10574_v2 = vrot.slane %v10567_v58, %v21701_v52  ;;  %v17461_v19 = vld [vmem:[#allocation15 + $0x228] sm:$0xff]   ;;  %v17529_v58 = vld [vmem:[#allocation18 + $0x1d4] ss:$8 sps:$4 sm:$0xff]  }
 0xbdd   : > { %11264 = vmatmul.mubr.bf16.vlgmr.msra.gmra.mxu0 %v10510_v54  ;;  %v10558_v62 = vrot.slane %v10551_v36, %v21701_v52  ;;  %v17465_v38 = vld [vmem:[#allocation15 + $0x208] sm:$0xff]   ;;  %v10592_v54 = vcombine.low %v21818_v33, %v21712_v45  ;;  %v17470_v36 = vld [vmem:[#allocation18 + $0x70] ss:$8 sps:$4 sm:$0xff]  }
 0xbde   : > { %16574 = vmatpush3.bf16.msra.mxu0 %v17428_v5  ;;  %v10494_v44 = vrot.slane %v10487_v39, %v21701_v52  ;;  %v10583_v12 = vrot.slane %v10576_v42, %v21701_v52  ;;  %v10535_v30 = vrot.slane %v10528_v48, %v21701_v52  ;;  %v17464_v5 = vld [vmem:[#allocation15 + $0x210] sm:$0xff]   ;;  %v17476_v33 = vld [vmem:[#allocation18 + $0x60] ss:$8 sps:$4 sm:$0xff]  }
 0xbdf   : > { %16575 = vmatprep.subr.bf16.mxu0 %v17430_v51  ;;  %v17466_v51 = vld [vmem:[#allocation15 + $0x200] sm:$0xff]   ;;  %v10599_v53 = vrot.slane %v10592_v54, %v21701_v52  ;;  %v17467_v39 = vld [vmem:[#allocation18 + $0x170] ss:$8 sps:$4 sm:$0xff]  }
 0xbe0   : > { %11223 = vmatprep.mubr.bf16.mxu1 %v10494_v44  ;;  %v10590_v31 = vrot.slane %v10583_v12, %v21701_v52  ;;  %v10542_v16 = vrot.slane %v10535_v30, %v21701_v52  ;;  %v17469_v42 = vld [vmem:[#allocation18 + $0x174] ss:$8 sps:$4 sm:$0xff]   ;;  %v17479_v12 = vld [vmem:[#allocation18 + $0x150] ss:$8 sps:$4 sm:$0xff]   ;;  %v17512_v61 = vld [vmem:[#allocation18] ss:$8 sps:$4 sm:$0xff]  }
 0xbe1   : > { %11224 = vmatmul.mubr.bf16.vlgmr.msra.gmra.mxu1 %v10478_v56  ;;  %v10606_v29 = vrot.slane %v10599_v53, %v21701_v52  ;;  %v17472_v44 = vld [vmem:[#allocation18 + $0x74] ss:$8 sps:$4 sm:$0xff]   ;;  %v17521_v48 = vld [vmem:[#allocation18 + $0x1e0] ss:$8 sps:$4 sm:$0xff]   ;;  %v17527_v30 = vld [vmem:[#allocation18 + $0x1d0] ss:$8 sps:$4 sm:$0xff]  }
 0xbe2   : > { %16552 = vmatpush3.bf16.msra.mxu1 %v17431_v59  ;;  %16576 = vmatpush3.bf16.msra.mxu0 %v17432_v21  ;;  %v17473_v59 = vld [vmem:[#allocation18 + $0x160] ss:$8 sps:$4 sm:$0xff]   ;;  %v17475_v21 = vld [vmem:[#allocation18 + $0x164] ss:$8 sps:$4 sm:$0xff]   ;;  %v17481_v56 = vld [vmem:[#allocation18 + $0x154] ss:$8 sps:$4 sm:$0xff]  }
 0xbe3   : > { %11303 = vmatprep.mubr.bf16.mxu1 %v10558_v62  ;;  %11343 = vmatprep.mubr.bf16.mxu0 %v10590_v31  ;;  %v17484_v31 = vld [vmem:[#allocation18 + $0x54] ss:$8 sps:$4 sm:$0xff]   ;;  %v17485_v62 = vld [vmem:[#allocation18 + $0x140] ss:$8 sps:$4 sm:$0xff]   ;;  %v17547_v54 = vld [vmem:[#allocation18 + $0x1a4] ss:$8 sps:$4 sm:$0xff]  }
 0xbe4   : > { %16553 = vmatprep.subr.bf16.mxu1 %v17433_v8  ;;  %16577 = vmatprep.subr.bf16.mxu0 %v17434_v37  ;;  %v17487_v8 = vld [vmem:[#allocation18 + $0x144] ss:$8 sps:$4 sm:$0xff]   ;;  %v17482_v37 = vld [vmem:[#allocation18 + $0x50] ss:$8 sps:$4 sm:$0xff]   ;;  %v17545_v53 = vld [vmem:[#allocation18 + $0x1a0] ss:$8 sps:$4 sm:$0xff]  }
 0xbe6   : > { %16554 = vmatpush3.bf16.msra.mxu1 %v17435_v40  ;;  %16578 = vmatpush3.bf16.msra.mxu0 %v17436_v6  ;;  %v17490_v40 = vld [vmem:[#allocation18 + $0x44] ss:$8 sps:$4 sm:$0xff]   ;;  %v17493_v6 = vld [vmem:[#allocation18 + $0x134] ss:$8 sps:$4 sm:$0xff]  }
 0xbe7   : > { %16555 = vmatprep.subr.bf16.mxu1 %v17437_v14  ;;  %16579 = vmatprep.subr.bf16.mxu0 %v17438_v17  ;;  %v17488_v14 = vld [vmem:[#allocation18 + $0x40] ss:$8 sps:$4 sm:$0xff]   ;;  %v17491_v17 = vld [vmem:[#allocation18 + $0x130] ss:$8 sps:$4 sm:$0xff]  }
 0xbea   : > { %16556 = vmatpush3.bf16.msra.mxu1 %v17439_v55  ;;  %16580 = vmatpush3.bf16.msra.mxu0 %v17440_v3  ;;  %v17496_v55 = vld [vmem:[#allocation18 + $0x34] ss:$8 sps:$4 sm:$0xff]   ;;  %v17499_v3 = vld [vmem:[#allocation18 + $0x124] ss:$8 sps:$4 sm:$0xff]  }
 0xbeb   : > { %16557 = vmatprep.subr.bf16.mxu1 %v17441_v63  ;;  %16581 = vmatprep.subr.bf16.mxu0 %v17442_v10  ;;  %v17494_v63 = vld [vmem:[#allocation18 + $0x30] ss:$8 sps:$4 sm:$0xff]   ;;  %v17497_v10 = vld [vmem:[#allocation18 + $0x120] ss:$8 sps:$4 sm:$0xff]  }
 0xbee   : > { %16558 = vmatpush3.bf16.msra.mxu1 %v17443_v7  ;;  %16582 = vmatpush3.bf16.msra.mxu0 %v17444_v35  ;;  %v17502_v7 = vld [vmem:[#allocation18 + $0x24] ss:$8 sps:$4 sm:$0xff]   ;;  %v17505_v35 = vld [vmem:[#allocation18 + $0x114] ss:$8 sps:$4 sm:$0xff]  }
 0xbef   : > { %16559 = vmatprep.subr.bf16.mxu1 %v17445_v4  ;;  %16583 = vmatprep.subr.bf16.mxu0 %v17446_v11  ;;  %v17500_v4 = vld [vmem:[#allocation18 + $0x20] ss:$8 sps:$4 sm:$0xff]   ;;  %v17503_v11 = vld [vmem:[#allocation18 + $0x110] ss:$8 sps:$4 sm:$0xff]  }
 0xbf2   : > { %16560 = vmatpush3.bf16.msra.mxu1 %v17447_v24  ;;  %16584 = vmatpush3.bf16.msra.mxu0 %v17448_v9  ;;  %v17508_v24 = vld [vmem:[#allocation18 + $0x14] ss:$8 sps:$4 sm:$0xff]   ;;  %v17511_v9 = vld [vmem:[#allocation18 + $0x104] ss:$8 sps:$4 sm:$0xff]  }
 0xbf3   : > { %16561 = vmatprep.subr.bf16.mxu1 %v17449_v47  ;;  %16585 = vmatprep.subr.bf16.mxu0 %v17450_v26  ;;  %v17506_v47 = vld [vmem:[#allocation18 + $0x10] ss:$8 sps:$4 sm:$0xff]   ;;  %v17509_v26 = vld [vmem:[#allocation18 + $0x100] ss:$8 sps:$4 sm:$0xff]  }
 0xbf6   : > { %16562 = vmatpush3.bf16.msra.mxu1 %v17451_v25  ;;  %16586 = vmatpush3.bf16.msra.mxu0 %v17452_v1  ;;  %v17514_v25 = vld [vmem:[#allocation18 + $0x4] ss:$8 sps:$4 sm:$0xff]   ;;  %v17517_v1 = vld [vmem:[#allocation18 + $0x1f4] ss:$8 sps:$4 sm:$0xff]  }
 0xbf7   : > { %16563 = vmatprep.subr.bf16.mxu1 %v17453_v28  ;;  %16587 = vmatprep.subr.bf16.mxu0 %v17454_v13  ;;  %v17515_v28 = vld [vmem:[#allocation18 + $0x1f0] ss:$8 sps:$4 sm:$0xff]   ;;  %v17520_v13 = vld [vmem:[#allocation18 + $0xf4] ss:$8 sps:$4 sm:$0xff]  }
 0xbfa   : > { %16564 = vmatpush3.bf16.msra.mxu1 %v17455_v15  ;;  %16588 = vmatpush3.bf16.msra.mxu0 %v17456_v50  ;;  %v17523_v15 = vld [vmem:[#allocation18 + $0x1e4] ss:$8 sps:$4 sm:$0xff]   ;;  %v17518_v50 = vld [vmem:[#allocation18 + $0xf0] ss:$8 sps:$4 sm:$0xff]  }
 0xbfb   : > { %16565 = vmatprep.subr.bf16.mxu1 %v17457_v23  ;;  %12509 = vmatprep.subr.bf16.mxu0 %v17472_v44  ;;  %v17526_v23 = vld [vmem:[#allocation18 + $0xe4] ss:$8 sps:$4 sm:$0xff]   ;;  %v17556_v44 = vld [vmem:[#allocation18 + $0x94] ss:$8 sps:$4 sm:$0xff]  }
 0xbfd   : > { %11344 = vmatmul.mubr.bf16.vlgmr.msra.gmra.mxu0 %v10574_v2  ;;  %v17532_v2 = vld [vmem:[#allocation18 + $0xd4] ss:$8 sps:$4 sm:$0xff]  }
 0xbfe   : > { %16566 = vmatpush3.bf16.msra.mxu1 %v17458_v60  ;;  %12510 = vmatpush1.bf16.msra.mxu0 %v17470_v36  ;;  %v17524_v60 = vld [vmem:[#allocation18 + $0xe0] ss:$8 sps:$4 sm:$0xff]   ;;  %v17551_v36 = vld [vmem:[#allocation18 + $0x190] ss:$8 sps:$4 sm:$0xff]  }
 0xbff   : > { %16926 = vmatprep.subr.bf16.mxu1 %v18241_v34 }
 0xc01   : > { %11304 = vmatmul.mubr.bf16.vlgmr.msra.gmra.mxu1 %v10542_v16  ;;  %v17533_v16 = vld [vmem:[#allocation18 + $0x1c0] ss:$8 sps:$4 sm:$0xff]  }
 0xc02   : > { %16927 = vmatpush3.bf16.msra.mxu1 %v17459_v49  ;;  %16942 = vmatprep.mubr.msk.bf16.mxu1 %vm18242_vm10, %v18241_v34  ;;  %v17530_v49 = vld [vmem:[#allocation18 + $0xd0] ss:$8 sps:$4 sm:$0xff]  }
 0xc03   : > { %16928 = vmatprep.subr.bf16.mxu1 %v18241_v34 }
 0xc06   : > { %16929 = vmatpush3.bf16.msra.mxu1 %v17460_v41  ;;  %v17535_v41 = vld [vmem:[#allocation18 + $0x1c4] ss:$8 sps:$4 sm:$0xff]  }
 0xc07   : > { %16930 = vmatprep.subr.bf16.mxu1 %v18241_v34 }
 0xc0a   : > { %16931 = vmatpush3.bf16.msra.mxu1 %v17461_v19  ;;  %v17538_v19 = vld [vmem:[#allocation18 + $0xc4] ss:$8 sps:$4 sm:$0xff]  }
 0xc0b   : > { %16932 = vmatprep.subr.bf16.mxu1 %v18241_v34 }
 0xc0e   : > { %16933 = vmatpush3.bf16.msra.mxu1 %v17462_v0  ;;  %v17541_v0 = vld [vmem:[#allocation18 + $0x1b4] ss:$8 sps:$4 sm:$0xff]  }
 0xc0f   : > { %16934 = vmatprep.subr.bf16.mxu1 %v18241_v34 }
 0xc12   : > { %16935 = vmatpush3.bf16.msra.mxu1 %v17463_v20  ;;  %v17536_v20 = vld [vmem:[#allocation18 + $0xc0] ss:$8 sps:$4 sm:$0xff]  }
 0xc13   : > { %16936 = vmatprep.subr.bf16.mxu1 %v18241_v34 }
 0xc16   : > { %16937 = vmatpush3.bf16.msra.mxu1 %v17464_v5  ;;  %v17539_v5 = vld [vmem:[#allocation18 + $0x1b0] ss:$8 sps:$4 sm:$0xff]  }
 0xc17   : > { %16938 = vmatprep.subr.bf16.mxu1 %v18241_v34 }
 0xc1a   : > { %16939 = vmatpush3.bf16.msra.mxu1 %v17465_v38  ;;  %v17544_v38 = vld [vmem:[#allocation18 + $0xb4] ss:$8 sps:$4 sm:$0xff]  }
 0xc1b   : > { %16940 = vmatprep.subr.bf16.mxu1 %v18241_v34  ;;  %v17478_v34 = vld [vmem:[#allocation18 + $0x64] ss:$8 sps:$4 sm:$0xff]  }
 0xc1c   : > { %12511 = vmatprep.subr.bf16.mxu0 %v17478_v34  ;;  %v17562_v34 = vld [vmem:[#allocation18 + $0x84] ss:$8 sps:$4 sm:$0xff]  }
 0xc1d   : > { %12512 = vmatpush1.bf16.msra.mxu0 %v17476_v33  ;;  %v17557_v33 = vld [vmem:[#allocation18 + $0x180] ss:$8 sps:$4 sm:$0xff]  }
 0xc1e   : > { %16941 = vmatpush3.bf16.msra.mxu1 %v17466_v51  ;;  %12513 = vmatprep.subr.bf16.mxu0 %v17484_v31  ;;  %v17542_v51 = vld [vmem:[#allocation18 + $0xb0] ss:$8 sps:$4 sm:$0xff]   ;;  %v17568_v31 = vld [vmem:[#allocation18 + $0x274] ss:$8 sps:$4 sm:$0xff]  }
 0xc1f   : > { %12550 = vmatprep.subr.bf16.mxu1 %v17469_v42  ;;  %v17548_v42 = vld [vmem:[#allocation18 + $0xa0] ss:$8 sps:$4 sm:$0xff]  }
 0xc21   : > { %16943 = vmatmul.mubr.bf16.vlgmr.msra.gmra.mxu1 %v10606_v29  ;;  %12514 = vmatpush1.bf16.msra.mxu0 %v17482_v37  ;;  %v17550_v29 = vld [vmem:[#allocation18 + $0xa4] ss:$8 sps:$4 sm:$0xff]  }
 0xc22   : > { %12551 = vmatpush1.bf16.msra.mxu1 %v17467_v39  ;;  %12515 = vmatprep.subr.bf16.mxu0 %v17490_v40  ;;  %v17553_v39 = vld [vmem:[#allocation18 + $0x194] ss:$8 sps:$4 sm:$0xff]  }
 0xc23   : > { %12552 = vmatprep.subr.bf16.mxu1 %v17475_v21  ;;  %v17554_v21 = vld [vmem:[#allocation18 + $0x90] ss:$8 sps:$4 sm:$0xff]  }
 0xc25   : > { %12516 = vmatpush1.bf16.msra.mxu0 %v17488_v14 }
 0xc26   : > { %12553 = vmatpush1.bf16.msra.mxu1 %v17473_v59  ;;  %12517 = vmatprep.subr.bf16.mxu0 %v17496_v55  ;;  %v17559_v59 = vld [vmem:[#allocation18 + $0x184] ss:$8 sps:$4 sm:$0xff]  }
 0xc27   : > { %12554 = vmatprep.subr.bf16.mxu1 %v17481_v56  ;;  %v17560_v56 = vld [vmem:[#allocation18 + $0x80] ss:$8 sps:$4 sm:$0xff]  }
 0xc29   : > { %12518 = vmatpush1.bf16.msra.mxu0 %v17494_v63 }
 0xc2a   : > { %12555 = vmatpush1.bf16.msra.mxu1 %v17479_v12  ;;  %12519 = vmatprep.subr.bf16.mxu0 %v17502_v7  ;;  %v17565_v12 = vld [vmem:[#allocation18 + $0x374] ss:$8 sps:$4 sm:$0xff]  }
 0xc2b   : > { %12556 = vmatprep.subr.bf16.mxu1 %v17487_v8 }
 0xc2d   : > { %12520 = vmatpush1.bf16.msra.mxu0 %v17500_v4 }
 0xc2e   : > { %12557 = vmatpush1.bf16.msra.mxu1 %v17485_v62  ;;  %12521 = vmatprep.subr.bf16.mxu0 %v17508_v24 }
 0xc2f   : > { %12558 = vmatprep.subr.bf16.mxu1 %v17493_v6 }
 0xc31   : > { %12522 = vmatpush1.bf16.msra.mxu0 %v17506_v47  ;;  %v15472_v47 = vld [vmem:[#allocation16] ss:$0 sm:$0xff] }
 0xc32   : > { %12559 = vmatpush1.bf16.msra.mxu1 %v17491_v17  ;;  %12523 = vmatprep.subr.bf16.mxu0 %v17514_v25 }
 0xc33   : > { %12560 = vmatprep.subr.bf16.mxu1 %v17499_v3 }
 0xc35   : > { %12524 = vmatpush1.bf16.msra.mxu0 %v17512_v61 }
 0xc36   : > { %12561 = vmatpush1.bf16.msra.mxu1 %v17497_v10  ;;  %12525 = vmatprep.subr.bf16.mxu0 %v17520_v13 }
 0xc37   : > { %12562 = vmatprep.subr.bf16.mxu1 %v17505_v35 }
 0xc39   : > { %12526 = vmatpush2.bf16.msra.mxu0 %v17518_v50 }
 0xc3a   : > { %12563 = vmatpush1.bf16.msra.mxu1 %v17503_v11  ;;  %12527 = vmatprep.subr.bf16.mxu0 %v17526_v23 }
 0xc3b   : > { %12564 = vmatprep.subr.bf16.mxu1 %v17511_v9 }
 0xc3d   : > { %12528 = vmatpush2.bf16.msra.mxu0 %v17524_v60 }
 0xc3e   : > { %12565 = vmatpush1.bf16.msra.mxu1 %v17509_v26  ;;  %12529 = vmatprep.subr.bf16.mxu0 %v17532_v2 }
 0xc3f   : > { %12566 = vmatprep.subr.bf16.mxu1 %v17517_v1 }
 0xc41   : > { %12530 = vmatpush2.bf16.msra.mxu0 %v17530_v49 }
 0xc42   : > { %12567 = vmatpush2.bf16.msra.mxu1 %v17515_v28  ;;  %12531 = vmatprep.subr.bf16.mxu0 %v17538_v19 }
 0xc43   : > { %12568 = vmatprep.subr.bf16.mxu1 %v17523_v15 }
 0xc45   : > { %12532 = vmatpush2.bf16.msra.mxu0 %v17536_v20 }
 0xc46   : > { %12569 = vmatpush2.bf16.msra.mxu1 %v17521_v48  ;;  %12533 = vmatprep.subr.bf16.mxu0 %v17544_v38 }
 0xc47   : > { %12570 = vmatprep.subr.bf16.mxu1 %v17529_v58 }
 0xc49   : > { %12534 = vmatpush2.bf16.msra.mxu0 %v17542_v51 }
 0xc4a   : > { %12571 = vmatpush2.bf16.msra.mxu1 %v17527_v30  ;;  %12535 = vmatprep.subr.bf16.mxu0 %v17550_v29 }
 0xc4b   : > { %12572 = vmatprep.subr.bf16.mxu1 %v17535_v41 }
 0xc4d   : > { %12536 = vmatpush2.bf16.msra.mxu0 %v17548_v42 }
 0xc4e   : > { %12573 = vmatpush2.bf16.msra.mxu1 %v17533_v16  ;;  %12537 = vmatprep.subr.bf16.mxu0 %v17556_v44 }
 0xc4f   : > { %12574 = vmatprep.subr.bf16.mxu1 %v17541_v0 }
 0xc51   : > { %12538 = vmatpush2.bf16.msra.mxu0 %v17554_v21 }
 0xc52   : > { %12575 = vmatpush2.bf16.msra.mxu1 %v17539_v5  ;;  %12539 = vmatprep.subr.bf16.mxu0 %v17562_v34 }
 0xc53   : > { %12576 = vmatprep.subr.bf16.mxu1 %v17547_v54 }
 0xc55   : > { %12540 = vmatpush2.bf16.msra.mxu0 %v17560_v56 }
 0xc56   : > { %12577 = vmatpush2.bf16.msra.mxu1 %v17545_v53  ;;  %12591 = vmatprep.subr.bf16.mxu0 %v17568_v31 }
 0xc57   : > { %12578 = vmatprep.subr.bf16.mxu1 %v17553_v39 }
 0xc5a   : > { %12579 = vmatpush2.bf16.msra.mxu1 %v17551_v36 }
 0xc5b   : > { %12580 = vmatprep.subr.bf16.mxu1 %v17559_v59 }
 0xc5e   : > { %12581 = vmatpush2.bf16.msra.mxu1 %v17557_v33 }
 0xc5f   : > { %12632 = vmatprep.subr.bf16.mxu1 %v17565_v12 }
 0xc9d   : > { %v16545_v8 = vpop.f32.mrf.mxu0 }
 0xc9f   : > { %v16546_v37 = vpop.f32.mrf.mxu0 }
 0xca0   : > { %v16547_v25 = vadd.f32 %v16546_v37, %v16545_v8 }
 0xca1   : > { %v16523_v62 = vpop.f32.mrf.mxu1  ;;  %v16548_v40 = vpop.f32.mrf.mxu0 }
 0xca3   : > { %v16524_v6 = vpop.f32.mrf.mxu1  ;;  %v16549_v14 = vpop.f32.mrf.mxu0 }
 0xca4   : > { %v16525_v9 = vadd.f32 %v16524_v6, %v16523_v62 }
 0xca5   : > { %v16526_v17 = vpop.f32.mrf.mxu1 }
 0xca6   : > { %v11226_v26 = vadd.f32 %v16525_v9, %v15472_v47 }
 0xca7   : > { %v16527_v55 = vpop.f32.mrf.mxu1 }
 0xca8   : > { %v11266_v61 = vadd.f32 %v16547_v25, %v11226_v26 }
 0xcbd   : > { %v16589_v3 = vpop.f32.mrf.mxu0 }
 0xcbf   : > { %v16590_v63 = vpop.f32.mrf.mxu0 }
 0xcc0   : > { %v16591_v13 = vadd.f32 %v16590_v63, %v16589_v3 }
 0xcc1   : > { %v16567_v10 = vpop.f32.mrf.mxu1  ;;  %v16592_v7 = vpop.f32.mrf.mxu0 }
 0xcc3   : > { %v16568_v35 = vpop.f32.mrf.mxu1  ;;  %v16593_v4 = vpop.f32.mrf.mxu0 }
 0xcc4   : > { %v16569_v1 = vadd.f32 %v16568_v35, %v16567_v10  ;;  %v17563_v35 = vld [vmem:[#allocation18 + $0x370] ss:$8 sps:$4 sm:$0xff]  }
 0xcc5   : > { %v16570_v11 = vpop.f32.mrf.mxu1 }
 0xcc6   : > { %v11306_v28 = vadd.f32 %v16569_v1, %v11266_v61 }
 0xcc7   : > { %v16571_v24 = vpop.f32.mrf.mxu1 }
 0xcc8   : > { %v11346_v15 = vadd.f32 %v16591_v13, %v11306_v28  ;;  %v17571_v24 = vld [vmem:[#allocation18 + $0x364] ss:$8 sps:$4 sm:$0xff]   ;;  %v17566_v28 = vld [vmem:[#allocation18 + $0x270] ss:$8 sps:$4 sm:$0xff]   ;;  %v17569_v13 = vld [vmem:[#allocation18 + $0x360] ss:$8 sps:$4 sm:$0xff]  }
 0xce1   : > { %v11385_v50 = vpop.f32.mrf.mxu1 }
 0xce2   : > { %v11386_v48 = vadd.f32 %v11385_v50, %v11346_v15 }
 0xce3   : > { %v16944_v23 = vpop.f32.mrf.mxu1 }
 0xce4   : > { %v11391_v58 = vmax.f32 %v11386_v48, 0.0  ;;  %v17574_v23 = vld [vmem:[#allocation18 + $0x264] ss:$8 sps:$4 sm:$0xff]  }
 0xce5   : > { %v11388_v60 = vpop.f32.mrf.mxu1 }
 0xce6   : > { %v11399_v30 = vrot.slane %v11391_v58, %v22331_v18  ;;  %v17577_v58 = vld [vmem:[#allocation18 + $0x354] ss:$8 sps:$4 sm:$0xff]   ;;  %v17572_v60 = vld [vmem:[#allocation18 + $0x260] ss:$8 sps:$4 sm:$0xff]  }
 0xce7   : > { %v16945_v2 = vpop.f32.mrf.mxu1 }
 0xce8   : > { %v11400_v49 = vcombine.high %v11399_v30, %v11399_v30  ;;  %v11403_v16 = vpack.c.bf16 %v11399_v30, %v11399_v30  ;;  %v17575_v30 = vld [vmem:[#allocation18 + $0x350] ss:$8 sps:$4 sm:$0xff]   ;;  %v17580_v2 = vld [vmem:[#allocation18 + $0x254] ss:$8 sps:$4 sm:$0xff]  }
 0xcea   : > { %v11404_v41 = vpack.c.bf16 %v11400_v49, %v11400_v49  ;;  %v11406_v19 = vshrl.u32 %v11403_v16, 16  ;;  %v11409_v20 = vshll.u32 %v11403_v16, 16  ;;  %v17583_v49 = vld [vmem:[#allocation18 + $0x344] ss:$8 sps:$4 sm:$0xff]   ;;  %v17578_v16 = vld [vmem:[#allocation18 + $0x250] ss:$8 sps:$4 sm:$0xff]  }
 0xcec   : > { %v11408_v0 = vrot.slane %v11406_v19, 7  ;;  %v11413_v5 = vshrl.u32 %v11404_v41, 16  ;;  %v11416_v51 = vshll.u32 %v11404_v41, 16  ;;  %v17581_v41 = vld [vmem:[#allocation18 + $0x340] ss:$8 sps:$4 sm:$0xff]  }
 0xced   : > { %v17586_v19 = vld [vmem:[#allocation18 + $0x244] ss:$8 sps:$4 sm:$0xff]  }
 0xcee   : > { %v11411_v38 = vor.u32 %v11409_v20, %v11408_v0  ;;  %v11415_v54 = vrot.slane %v11413_v5, 7  ;;  %v17589_v0 = vld [vmem:[#allocation18 + $0x334] ss:$8 sps:$4 sm:$0xff]   ;;  %v17584_v20 = vld [vmem:[#allocation18 + $0x240] ss:$8 sps:$4 sm:$0xff]  }
 0xcef   : > { %v17587_v5 = vld [vmem:[#allocation18 + $0x330] ss:$8 sps:$4 sm:$0xff]  }
 0xcf0   : > { %v11418_v53 = vor.u32 %v11416_v51, %v11415_v54  ;;  %v11421_v29 = vsel %vm18822_vm4, 0, %v11411_v38  ;;  %v17592_v38 = vld [vmem:[#allocation18 + $0x234] ss:$8 sps:$4 sm:$0xff]   ;;  %v17595_v54 = vld [vmem:[#allocation18 + $0x324] ss:$8 sps:$4 sm:$0xff]  }
 0xcf1   : > { %v11423_v39 = vsel %vm21707_vm12, %v11421_v29, 0  ;;  %v17590_v51 = vld [vmem:[#allocation18 + $0x230] ss:$8 sps:$4 sm:$0xff]   ;;  %v17598_v29 = vld [vmem:[#allocation18 + $0x224] ss:$8 sps:$4 sm:$0xff]  }
 0xcf2   : > { %v11422_v42 = vsel %vm18822_vm4, 0, %v11418_v53  ;;  %v11432_v36 = vrot.slane %v11423_v39, %v21701_v52  ;;  %v11489_v37 = vcombine.low %v22311_v27, %v11423_v39  ;;  %v17593_v53 = vld [vmem:[#allocation18 + $0x320] ss:$8 sps:$4 sm:$0xff]  }
 0xcf3   : > { %v21876_v44 = vsel %vm21707_vm12, %v11422_v42, 0  ;;  %v17596_v42 = vld [vmem:[#allocation18 + $0x220] ss:$8 sps:$4 sm:$0xff]  }
 0xcf4   : > { %v11433_v59 = vcombine.high %v11432_v36, %v11432_v36  ;;  %v11464_v21 = vrot.slane %v21876_v44, %v21701_v52  ;;  %v11537_v33 = vcombine.low %v11423_v39, %v21876_v44  ;;  %v11440_v34 = vrot.slane %v11432_v36, %v21701_v52  ;;  %v17601_v39 = vld [vmem:[#allocation18 + $0x314] ss:$8 sps:$4 sm:$0xff]   ;;  %v17599_v36 = vld [vmem:[#allocation18 + $0x310] ss:$8 sps:$4 sm:$0xff]  }
 0xcf5   : > { %v11496_v9 = vrot.slane %v11489_v37, %v21701_v52  ;;  %v17616_v37 = vld [vmem:[#allocation18 + $0x2f4] ss:$8 sps:$4 sm:$0xff]  }
 0xcf6   : > { %v11447_v12 = vrot.slane %v11433_v59, %v21701_v52  ;;  %v11544_v56 = vrot.slane %v11537_v33, %v21701_v52  ;;  %v11465_v31 = vcombine.high %v11464_v21, %v11464_v21  ;;  %v11472_v8 = vrot.slane %v11464_v21, %v21701_v52  ;;  %v17604_v59 = vld [vmem:[#allocation18 + $0x214] ss:$8 sps:$4 sm:$0xff]   ;;  %v17607_v21 = vld [vmem:[#allocation18 + $0x304] ss:$8 sps:$4 sm:$0xff]   ;;  %v17602_v33 = vld [vmem:[#allocation18 + $0x210] ss:$8 sps:$4 sm:$0xff]  }
 0xcf7   : > { %v11449_v62 = vshrl.u32 %v11440_v34, 16  ;;  %v11503_v50 = vrot.slane %v11496_v9, %v21701_v52  ;;  %v17605_v34 = vld [vmem:[#allocation18 + $0x300] ss:$8 sps:$4 sm:$0xff]   ;;  %v17637_v9 = vld [vmem:[#allocation18 + $0x3b4] ss:$8 sps:$4 sm:$0xff]  }
 0xcf8   : > { %v11551_v40 = vrot.slane %v11544_v56, %v21701_v52  ;;  %v11521_v6 = vcombine.low %v21712_v45, %v11447_v12  ;;  %v11454_v14 = vshll.u32 %v11447_v12, 16  ;;  %v21889_v17 = vrot.slane %v11465_v31, %v21701_v52  ;;  %v17613_v56 = vld [vmem:[#allocation18 + $0x3f4] ss:$8 sps:$4 sm:$0xff]   ;;  %v17608_v31 = vld [vmem:[#allocation18 + $0x200] ss:$8 sps:$4 sm:$0xff]  }
 0xcf9   : > { %v11481_v55 = vshrl.u32 %v11472_v8, 16  ;;  %v17611_v8 = vld [vmem:[#allocation18 + $0x3f0] ss:$8 sps:$4 sm:$0xff]  }
 0xcfa   : > { %12582 = vmatprep.mubr.bf16.mxu1 %v11551_v40  ;;  %v11528_v3 = vrot.slane %v11521_v6, %v21701_v52  ;;  %v21894_v63 = vsel %vm21723_vm1, %v11449_v62, %v11454_v14  ;;  %v11569_v10 = vcombine.low %v11447_v12, %v21889_v17  ;;  %v11486_v7 = vshll.u32 %v21889_v17, 16  ;;  %v17610_v12 = vld [vmem:[#allocation18 + $0x204] ss:$8 sps:$4 sm:$0xff]   ;;  %v17614_v40 = vld [vmem:[#allocation18 + $0x2f0] ss:$8 sps:$4 sm:$0xff]  }
 0xcfb   : > { %v11505_v4 = vcombine.low %v21739_v46, %v21894_v63  ;;  %v17619_v62 = vld [vmem:[#allocation18 + $0x3e4] ss:$8 sps:$4 sm:$0xff]   ;;  %v17617_v6 = vld [vmem:[#allocation18 + $0x3e0] ss:$8 sps:$4 sm:$0xff]  }
 0xcfc   : > { %v11535_v11 = vrot.slane %v11528_v3, %v21701_v52  ;;  %v21904_v47 = vsel %vm21723_vm1, %v11481_v55, %v11486_v7  ;;  %v11576_v1 = vrot.slane %v11569_v10, %v21701_v52  ;;  %v17622_v14 = vld [vmem:[#allocation18 + $0x2e4] ss:$8 sps:$4 sm:$0xff]   ;;  %v17625_v55 = vld [vmem:[#allocation18 + $0x3d4] ss:$8 sps:$4 sm:$0xff]   ;;  %v17620_v3 = vld [vmem:[#allocation18 + $0x2e0] ss:$8 sps:$4 sm:$0xff]  }
 0xcfd   : > { %v11512_v26 = vrot.slane %v11505_v4, %v21701_v52  ;;  %v11601_v25 = vcombine.low %v21904_v47, %v21739_v46  ;;  %v17623_v10 = vld [vmem:[#allocation18 + $0x3d0] ss:$8 sps:$4 sm:$0xff]   ;;  %v17628_v7 = vld [vmem:[#allocation18 + $0x2d4] ss:$8 sps:$4 sm:$0xff]  }
 0xcfe   : > { %12583 = vmatmul.mubr.bf16.vlgmr.msra.gmra.mxu1 %v11535_v11  ;;  %v11583_v46 = vrot.slane %v11576_v1, %v21701_v52  ;;  %v17626_v4 = vld [vmem:[#allocation18 + $0x2d0] ss:$8 sps:$4 sm:$0xff]   ;;  %v17629_v11 = vld [vmem:[#allocation18 + $0x3c0] ss:$8 sps:$4 sm:$0xff]   ;;  %v17640_v1 = vld [vmem:[#allocation18 + $0x2b4] ss:$8 sps:$4 sm:$0xff]  }
 0xcff   : > { %12633 = vmatpush1.bf16.msra.mxu1 %v17563_v35  ;;  %v11519_v61 = vrot.slane %v11512_v26, %v21701_v52  ;;  %v11608_v15 = vrot.slane %v11601_v25, %v21701_v52  ;;  %v17631_v35 = vld [vmem:[#allocation18 + $0x3c4] ss:$8 sps:$4 sm:$0xff]   ;;  %v17632_v26 = vld [vmem:[#allocation18 + $0x2c0] ss:$8 sps:$4 sm:$0xff]   ;;  %v17635_v25 = vld [vmem:[#allocation18 + $0x3b0] ss:$8 sps:$4 sm:$0xff]  }
 0xd00   : > { %12634 = vmatprep.subr.bf16.mxu1 %v17571_v24  ;;  %v17634_v24 = vld [vmem:[#allocation18 + $0x2c4] ss:$8 sps:$4 sm:$0xff]  }
 0xd01   : > { %12541 = vmatprep.mubr.bf16.mxu0 %v11519_v61  ;;  %v11615_v48 = vrot.slane %v11608_v15, %v21701_v52  ;;  %v17643_v61 = vld [vmem:[#allocation18 + $0x3a4] ss:$8 sps:$4 sm:$0xff]  }
 0xd02   : > { %12542 = vmatmul.mubr.bf16.vlgmr.msra.gmra.mxu0 %v11503_v50  ;;  %v17646_v15 = vld [vmem:[#allocation18 + $0x2a4] ss:$8 sps:$4 sm:$0xff]   ;;  %v17649_v50 = vld [vmem:[#allocation18 + $0x394] ss:$8 sps:$4 sm:$0xff]  }
 0xd03   : > { %12592 = vmatpush1.bf16.msra.mxu0 %v17566_v28  ;;  %12635 = vmatpush1.bf16.msra.mxu1 %v17569_v13  ;;  %v17638_v28 = vld [vmem:[#allocation18 + $0x2b0] ss:$8 sps:$4 sm:$0xff]   ;;  %v17641_v13 = vld [vmem:[#allocation18 + $0x3a0] ss:$8 sps:$4 sm:$0xff]  }
 0xd04   : > { %12623 = vmatprep.mubr.bf16.mxu0 %v11583_v46  ;;  %12664 = vmatprep.mubr.bf16.mxu1 %v11615_v48  ;;  %v17644_v48 = vld [vmem:[#allocation18 + $0x2a0] ss:$8 sps:$4 sm:$0xff]   ;;  %v17652_v46 = vld [vmem:[#allocation18 + $0x294] ss:$8 sps:$4 sm:$0xff]  }
 0xd05   : > { %12593 = vmatprep.subr.bf16.mxu0 %v17574_v23  ;;  %12636 = vmatprep.subr.bf16.mxu1 %v17577_v58  ;;  %v17647_v23 = vld [vmem:[#allocation18 + $0x390] ss:$8 sps:$4 sm:$0xff]   ;;  %v11585_v58 = vcombine.low %v21876_v44, %v22311_v27 }
 0xd07   : > { %12594 = vmatpush1.bf16.msra.mxu0 %v17572_v60  ;;  %12637 = vmatpush1.bf16.msra.mxu1 %v17575_v30  ;;  %v17655_v60 = vld [vmem:[#allocation18 + $0x384] ss:$8 sps:$4 sm:$0xff]   ;;  %v17650_v30 = vld [vmem:[#allocation18 + $0x290] ss:$8 sps:$4 sm:$0xff]  }
 0xd08   : > { %12595 = vmatprep.subr.bf16.mxu0 %v17580_v2  ;;  %12638 = vmatprep.subr.bf16.mxu1 %v17583_v49  ;;  %v17653_v2 = vld [vmem:[#allocation18 + $0x380] ss:$8 sps:$4 sm:$0xff]   ;;  %v11553_v49 = vcombine.low %v21894_v63, %v21904_v47  ;;  %v17664_v63 = vld [vmem:[#allocation18 + $0x464] ss:$8 sps:$4 sm:$0xff]  }
 0xd09   : > { %v17662_v47 = vld [vmem:[#allocation18 + $0x460] ss:$8 sps:$4 sm:$0xff]  }
 0xd0a   : > { %v11560_v44 = vrot.slane %v11553_v49, %v21701_v52  ;;  %v17702_v49 = vld [vmem:[#allocation19 + $0x10] sm:$0xff]  }
 0xd0b   : > { %12596 = vmatpush1.bf16.msra.mxu0 %v17578_v16  ;;  %12639 = vmatpush1.bf16.msra.mxu1 %v17581_v41  ;;  %v17658_v16 = vld [vmem:[#allocation18 + $0x284] ss:$8 sps:$4 sm:$0xff]   ;;  %v11592_v41 = vrot.slane %v11585_v58, %v21701_v52 }
 0xd0c   : > { %12597 = vmatprep.subr.bf16.mxu0 %v17586_v19  ;;  %12640 = vmatprep.subr.bf16.mxu1 %v17589_v0  ;;  %v17656_v19 = vld [vmem:[#allocation18 + $0x280] ss:$8 sps:$4 sm:$0xff]  }
 0xd0d   : > { %v11599_v0 = vrot.slane %v11592_v41, %v21701_v52 }
 0xd0f   : > { %12598 = vmatpush1.bf16.msra.mxu0 %v17584_v20  ;;  %12641 = vmatpush1.bf16.msra.mxu1 %v17587_v5  ;;  %v17661_v20 = vld [vmem:[#allocation18 + $0x474] ss:$8 sps:$4 sm:$0xff]   ;;  %v17659_v5 = vld [vmem:[#allocation18 + $0x470] ss:$8 sps:$4 sm:$0xff]  }
 0xd10   : > { %12599 = vmatprep.subr.bf16.mxu0 %v17592_v38  ;;  %12642 = vmatprep.subr.bf16.mxu1 %v17595_v54  ;;  %v11567_v38 = vrot.slane %v11560_v44, %v21701_v52  ;;  %v17667_v54 = vld [vmem:[#allocation18 + $0x454] ss:$8 sps:$4 sm:$0xff]   ;;  %v17705_v44 = vld [vmem:[#allocation19 + $0x48] sm:$0xff]  }
 0xd13   : > { %12600 = vmatpush1.bf16.msra.mxu0 %v17590_v51  ;;  %12643 = vmatpush1.bf16.msra.mxu1 %v17593_v53  ;;  %v17665_v51 = vld [vmem:[#allocation18 + $0x450] ss:$8 sps:$4 sm:$0xff]   ;;  %v17670_v53 = vld [vmem:[#allocation18 + $0x444] ss:$8 sps:$4 sm:$0xff]  }
 0xd14   : > { %12601 = vmatprep.subr.bf16.mxu0 %v17598_v29  ;;  %12644 = vmatprep.subr.bf16.mxu1 %v17601_v39  ;;  %v17668_v29 = vld [vmem:[#allocation18 + $0x440] ss:$8 sps:$4 sm:$0xff]   ;;  %v17673_v39 = vld [vmem:[#allocation18 + $0x434] ss:$8 sps:$4 sm:$0xff]  }
 0xd17   : > { %12602 = vmatpush1.bf16.msra.mxu0 %v17596_v42  ;;  %12645 = vmatpush1.bf16.msra.mxu1 %v17599_v36  ;;  %v17671_v42 = vld [vmem:[#allocation18 + $0x430] ss:$8 sps:$4 sm:$0xff]   ;;  %v17676_v36 = vld [vmem:[#allocation18 + $0x424] ss:$8 sps:$4 sm:$0xff]  }
 0xd18   : > { %12603 = vmatprep.subr.bf16.mxu0 %v17604_v59  ;;  %12646 = vmatprep.subr.bf16.mxu1 %v17607_v21  ;;  %v17674_v59 = vld [vmem:[#allocation18 + $0x420] ss:$8 sps:$4 sm:$0xff]   ;;  %v17679_v21 = vld [vmem:[#allocation18 + $0x414] ss:$8 sps:$4 sm:$0xff]  }
 0xd1b   : > { %12604 = vmatpush1.bf16.msra.mxu0 %v17602_v33  ;;  %12647 = vmatpush1.bf16.msra.mxu1 %v17605_v34  ;;  %v17682_v33 = vld [vmem:[#allocation18 + $0x404] ss:$8 sps:$4 sm:$0xff]   ;;  %v11617_v34 = vcombine.low %v21889_v17, %v21712_v45 }
 0xd1c   : > { %12605 = vmatprep.subr.bf16.mxu0 %v17610_v12  ;;  %12648 = vmatprep.subr.bf16.mxu1 %v17613_v56  ;;  %v17680_v12 = vld [vmem:[#allocation18 + $0x400] ss:$8 sps:$4 sm:$0xff]  }
 0xd1d   : > { %v11624_v56 = vrot.slane %v11617_v34, %v21701_v52  ;;  %v17689_v45 = vld [vmem:[#allocation19 + $0x68] sm:$0xff]  }
 0xd1e   : > { %v17690_v17 = vld [vmem:[#allocation19 + $0x28] sm:$0xff]  }
 0xd1f   : > { %12606 = vmatpush1.bf16.msra.mxu0 %v17608_v31  ;;  %12649 = vmatpush2.bf16.msra.mxu1 %v17611_v8  ;;  %v11631_v31 = vrot.slane %v11624_v56, %v21701_v52  ;;  %v17683_v8 = vld [vmem:[#allocation19 + $0x78] sm:$0xff]  }
 0xd20   : > { %12607 = vmatprep.subr.bf16.mxu0 %v17616_v37  ;;  %12650 = vmatprep.subr.bf16.mxu1 %v17619_v62  ;;  %v17684_v37 = vld [vmem:[#allocation19 + $0x38] sm:$0xff]   ;;  %v17685_v62 = vld [vmem:[#allocation19 + $0x70] sm:$0xff]  }
 0xd23   : > { %12608 = vmatpush2.bf16.msra.mxu0 %v17614_v40  ;;  %12651 = vmatpush2.bf16.msra.mxu1 %v17617_v6  ;;  %v17686_v40 = vld [vmem:[#allocation19 + $0x30] sm:$0xff]   ;;  %v17687_v6 = vld [vmem:[#allocation19 + $0xf8] sm:$0xff]  }
 0xd24   : > { %12609 = vmatprep.subr.bf16.mxu0 %v17622_v14  ;;  %12652 = vmatprep.subr.bf16.mxu1 %v17625_v55  ;;  %v17688_v14 = vld [vmem:[#allocation19 + $0xb8] sm:$0xff]   ;;  %v17691_v55 = vld [vmem:[#allocation19 + $0xf0] sm:$0xff]  }
 0xd27   : > { %12610 = vmatpush2.bf16.msra.mxu0 %v17620_v3  ;;  %12653 = vmatpush2.bf16.msra.mxu1 %v17623_v10  ;;  %v11777_v3 = vld [vmem:[%s22343_s7] sm:$0x3]  ;;  %v17692_v10 = vld [vmem:[#allocation19 + $0xb0] sm:$0xff]  }
 0xd28   : > { %12611 = vmatprep.subr.bf16.mxu0 %v17628_v7  ;;  %12654 = vmatprep.subr.bf16.mxu1 %v17631_v35  ;;  %v17693_v7 = vld [vmem:[#allocation19 + $0x60] sm:$0xff]  }
 0xd29   : > { %v17694_v35 = vld [vmem:[#allocation19 + $0x20] sm:$0xff]  }
 0xd2b   : > { %12612 = vmatpush2.bf16.msra.mxu0 %v17626_v4  ;;  %12655 = vmatpush2.bf16.msra.mxu1 %v17629_v11  ;;  %v17695_v4 = vld [vmem:[#allocation19 + $0xe8] sm:$0xff]  }
 0xd2c   : > { %12613 = vmatprep.subr.bf16.mxu0 %v17634_v24  ;;  %12656 = vmatprep.subr.bf16.mxu1 %v17637_v9  ;;  %v17696_v11 = vld [vmem:[#allocation19 + $0xa8] sm:$0xff]   ;;  %v17697_v24 = vld [vmem:[#allocation19 + $0x58] sm:$0xff]  }
 0xd2f   : > { %12614 = vmatpush2.bf16.msra.mxu0 %v17632_v26  ;;  %12657 = vmatpush2.bf16.msra.mxu1 %v17635_v25  ;;  %v17699_v26 = vld [vmem:[#allocation19 + $0xe0] sm:$0xff]   ;;  %v22344_v25 = vld [vmem:[#allocation29_spill] sm:$0xff] }
 0xd30   : > { %12615 = vmatprep.subr.bf16.mxu0 %v17640_v1  ;;  %12658 = vmatprep.subr.bf16.mxu1 %v17643_v61  ;;  %v11782_v1 = vrot.slane %v11777_v3, %v22344_v25 }
 0xd33   : > { %12616 = vmatpush2.bf16.msra.mxu0 %v17638_v28  ;;  %12659 = vmatpush2.bf16.msra.mxu1 %v17641_v13  ;;  %v17698_v28 = vld [vmem:[#allocation19 + $0x18] sm:$0xff]   ;;  %v22345_v13 = vld [vmem:[#allocation30_spill] sm:$0xff] }
 0xd34   : > { %12617 = vmatprep.subr.bf16.mxu0 %v17646_v15  ;;  %12660 = vmatprep.subr.bf16.mxu1 %v17649_v50  ;;  %v11786_v15 = vrot.slane %v11777_v3, %v22345_v13  ;;  %v17700_v50 = vld [vmem:[#allocation19 + $0xa0] sm:$0xff]  }
 0xd37   : > { %12618 = vmatpush2.bf16.msra.mxu0 %v17644_v48  ;;  %12661 = vmatpush2.bf16.msra.mxu1 %v17647_v23  ;;  %v17701_v48 = vld [vmem:[#allocation19 + $0x50] sm:$0xff]  }
 0xd38   : > { %12619 = vmatprep.subr.bf16.mxu0 %v17652_v46  ;;  %12662 = vmatprep.subr.bf16.mxu1 %v17655_v60  ;;  %v17703_v46 = vld [vmem:[#allocation19 + $0xd8] sm:$0xff]  }
 0xd3b   : > { %12620 = vmatpush2.bf16.msra.mxu0 %v17650_v30  ;;  %12663 = vmatpush2.bf16.msra.mxu1 %v17653_v2 }
 0xd3c   : > { %12621 = vmatprep.subr.bf16.mxu0 %v17658_v16  ;;  %16604 = vmatprep.subr.bf16.mxu1 %v17683_v8 }
 0xd3e   : > { %12665 = vmatmul.mubr.bf16.vlgmr.msra.gmra.mxu1 %v11599_v0 }
 0xd3f   : > { %12622 = vmatpush2.bf16.msra.mxu0 %v17656_v19  ;;  %16605 = vmatpush3.bf16.msra.mxu1 %v17684_v37  ;;  %v17704_v19 = vld [vmem:[#allocation19 + $0x98] sm:$0xff]  }
 0xd40   : > { %12673 = vmatprep.subr.bf16.mxu0 %v17661_v20  ;;  %16606 = vmatprep.subr.bf16.mxu1 %v17685_v62  ;;  %v17707_v20 = vld [vmem:[#allocation19 + $0xd0] sm:$0xff]  }
 0xd42   : > { %12624 = vmatmul.mubr.bf16.vlgmr.msra.gmra.mxu0 %v11567_v38 }
 0xd43   : > { %12674 = vmatpush1.bf16.msra.mxu0 %v17659_v5  ;;  %12705 = vmatprep.mubr.bf16.mxu0 %v22311_v27  ;;  %v17677_v27 = vld [vmem:[#allocation18 + $0x410] ss:$8 sps:$4 sm:$0xff]  }
 0xd44   : > { %12675 = vmatprep.subr.bf16.mxu0 %v17664_v63  ;;  %16607 = vmatpush3.bf16.msra.mxu1 %v17686_v40  ;;  %v17706_v63 = vld [vmem:[#allocation19 + $0x8] sm:$0xff]  }
 0xd45   : > { %16608 = vmatprep.subr.bf16.mxu1 %v17689_v45 }
 0xd47   : > { %12676 = vmatpush1.bf16.msra.mxu0 %v17662_v47  ;;  %v17708_v47 = vld [vmem:[#allocation19 + $0x90] sm:$0xff]  }
 0xd48   : > { %12677 = vmatprep.subr.bf16.mxu0 %v17667_v54  ;;  %16609 = vmatpush3.bf16.msra.mxu1 %v17690_v17  ;;  %v17709_v54 = vld [vmem:[#allocation19 + $0x40] sm:$0xff]  }
 0xd49   : > { %16610 = vmatprep.subr.bf16.mxu1 %v17693_v7 }
 0xd4b   : > { %12678 = vmatpush1.bf16.msra.mxu0 %v17665_v51  ;;  %v17711_v51 = vld [vmem:[#allocation19 + $0xc8] sm:$0xff]  }
 0xd4c   : > { %12679 = vmatprep.subr.bf16.mxu0 %v17670_v53  ;;  %16611 = vmatpush3.bf16.msra.mxu1 %v17694_v35  ;;  %v17710_v53 = vld [vmem:[#allocation19] sm:$0xff]  }
 0xd4d   : > { %16612 = vmatprep.subr.bf16.mxu1 %v17697_v24 }
 0xd4f   : > { %12680 = vmatpush1.bf16.msra.mxu0 %v17668_v29  ;;  %v17712_v29 = vld [vmem:[#allocation19 + $0x88] sm:$0xff]  }
 0xd50   : > { %12681 = vmatprep.subr.bf16.mxu0 %v17673_v39  ;;  %16613 = vmatpush3.bf16.msra.mxu1 %v17698_v28  ;;  %v17713_v39 = vld [vmem:[#allocation19 + $0x178] sm:$0xff]  }
 0xd51   : > { %16614 = vmatprep.subr.bf16.mxu1 %v17701_v48 }
 0xd53   : > { %12682 = vmatpush1.bf16.msra.mxu0 %v17671_v42  ;;  %v17714_v42 = vld [vmem:[#allocation19 + $0xc0] sm:$0xff]  }
 0xd54   : > { %12683 = vmatprep.subr.bf16.mxu0 %v17676_v36  ;;  %16615 = vmatpush3.bf16.msra.mxu1 %v17702_v49  ;;  %v17716_v36 = vld [vmem:[#allocation19 + $0x80] sm:$0xff]  }
 0xd55   : > { %16616 = vmatprep.subr.bf16.mxu1 %v17705_v44 }
 0xd57   : > { %12684 = vmatpush1.bf16.msra.mxu0 %v17674_v59  ;;  %v17719_v59 = vld [vmem:[#allocation19 + $0x1f8] sm:$0xff]  }
 0xd58   : > { %12685 = vmatprep.subr.bf16.mxu0 %v17679_v21  ;;  %16617 = vmatpush3.bf16.msra.mxu1 %v17706_v63 }
 0xd59   : > { %16618 = vmatprep.subr.bf16.mxu1 %v17709_v54 }
 0xd5b   : > { %12686 = vmatpush1.bf16.msra.mxu0 %v17677_v27 }
 0xd5c   : > { %12687 = vmatprep.subr.bf16.mxu0 %v17682_v33  ;;  %16619 = vmatpush3.bf16.msra.mxu1 %v17710_v53 }
 0xd5d   : > { %16648 = vmatprep.subr.bf16.mxu1 %v17713_v39 }
 0xd5f   : > { %12688 = vmatpush1.bf16.msra.mxu0 %v17680_v12 }
 0xd60   : > { %16626 = vmatprep.subr.bf16.mxu0 %v17687_v6 }
 0xd62   : > { %12706 = vmatmul.mubr.bf16.vlgmr.msra.gmra.mxu0 %v11631_v31 }
 0xd63   : > { %16627 = vmatpush3.bf16.msra.mxu0 %v17688_v14 }
 0xd64   : > { %16628 = vmatprep.subr.bf16.mxu0 %v17691_v55 }
 0xd67   : > { %16629 = vmatpush3.bf16.msra.mxu0 %v17692_v10 }
 0xd68   : > { %16630 = vmatprep.subr.bf16.mxu0 %v17695_v4 }
 0xd6b   : > { %16631 = vmatpush3.bf16.msra.mxu0 %v17696_v11 }
 0xd6c   : > { %16632 = vmatprep.subr.bf16.mxu0 %v17699_v26 }
 0xd6f   : > { %16633 = vmatpush3.bf16.msra.mxu0 %v17700_v50  ;;  %v12800_v50 = vrot.slane %v20664_v43, %v21701_v52 }
 0xd70   : > { %16634 = vmatprep.subr.bf16.mxu0 %v17703_v46 }
 0xd71   : > { %v12823_v44 = vcombine.high %v12800_v50, %v12800_v50 }
 0xd73   : > { %16635 = vmatpush3.bf16.msra.mxu0 %v17704_v19 }
 0xd74   : > { %16636 = vmatprep.subr.bf16.mxu0 %v17707_v20 }
 0xd77   : > { %16637 = vmatpush3.bf16.msra.mxu0 %v17708_v47 }
 0xd78   : > { %16638 = vmatprep.subr.bf16.mxu0 %v17711_v51 }
 0xd7b   : > { %16639 = vmatpush3.bf16.msra.mxu0 %v17712_v29  ;;  %v21949_v29 = vrot.slane %v12823_v44, %v21701_v52  ;;  %v17725_v44 = vld [vmem:[#allocation19 + $0x160] sm:$0xff]  }
 0xd7c   : > { %16640 = vmatprep.subr.bf16.mxu0 %v17714_v42 }
 0xd7f   : > { %16641 = vmatpush3.bf16.msra.mxu0 %v17716_v36 }
 0xd80   : > { %16670 = vmatprep.subr.bf16.mxu0 %v17719_v59 }
 0xdbe   : > { %v12584_v9 = vpop.f32.mrf.mxu1 }
 0xdc0   : > { %v12586_v61 = vpop.f32.mrf.mxu1 }
 0xdc2   : > { %v12543_v23 = vpop.f32.mrf.mxu0  ;;  %v12588_v58 = vpop.f32.mrf.mxu1 }
 0xdc3   : > { %v12544_v60 = vadd.f32 %v12543_v23, %v11782_v1 }
 0xdc4   : > { %v12545_v30 = vpop.f32.mrf.mxu0  ;;  %v12589_v2 = vpop.f32.mrf.mxu1 }
 0xdc5   : > { %v12546_v16 = vadd.f32 %v12545_v30, %v11786_v15  ;;  %v12585_v41 = vadd.f32 %v12584_v9, %v12544_v60 }
 0xdc6   : > { %v12547_v0 = vpop.f32.mrf.mxu0 }
 0xdc7   : > { %v12587_v5 = vadd.f32 %v12586_v61, %v12546_v16 }
 0xdc8   : > { %v12548_v38 = vpop.f32.mrf.mxu0 }
 0xdfe   : > { %v12666_v21 = vpop.f32.mrf.mxu1 }
 0xe00   : > { %v12668_v27 = vpop.f32.mrf.mxu1 }
 0xe02   : > { %v12625_v33 = vpop.f32.mrf.mxu0  ;;  %v12670_v34 = vpop.f32.mrf.mxu1 }
 0xe03   : > { %v12626_v37 = vadd.f32 %v12625_v33, %v12585_v41 }
 0xe04   : > { %v12627_v12 = vpop.f32.mrf.mxu0  ;;  %v12671_v56 = vpop.f32.mrf.mxu1 }
 0xe05   : > { %v12628_v62 = vadd.f32 %v12627_v12, %v12587_v5  ;;  %v12667_v40 = vadd.f32 %v12666_v21, %v12626_v37  ;;  %v21958_v21 = vrot.slane %v12800_v50, %v21701_v52  ;;  %v12845_v12 = vshll.u32 %v21949_v29, 16 }
 0xe06   : > { %v12629_v31 = vpop.f32.mrf.mxu0 }
 0xe07   : > { %v12669_v45 = vadd.f32 %v12668_v27, %v12628_v62  ;;  %v12840_v34 = vshrl.u32 %v21958_v21, 16 }
 0xe08   : > { %v12630_v8 = vpop.f32.mrf.mxu0 }
 0xe09   : > { %v21974_v62 = vsel %vm21723_vm1, %v12840_v34, %v12845_v12  ;;  %v17741_v34 = vld [vmem:[#allocation19 + $0x140] sm:$0xff]   ;;  %v17743_v12 = vld [vmem:[#allocation19 + $0x1c8] sm:$0xff]  }
 0xe22   : > { %v12707_v6 = vpop.f32.mrf.mxu0 }
 0xe23   : > { %v12708_v14 = vadd.f32 %v12707_v6, %v12667_v40 }
 0xe24   : > { %v12709_v17 = vpop.f32.mrf.mxu0 }
 0xe25   : > { %v12710_v55 = vadd.f32 %v12709_v17, %v12669_v45  ;;  %v12714_v10 = vmax.f32 %v12708_v14, 0.0 }
 0xe26   : > { %v12711_v3 = vpop.f32.mrf.mxu0 }
 0xe27   : > { %v12715_v7 = vmax.f32 %v12710_v55, 0.0 }
 0xe28   : > { %v12712_v35 = vpop.f32.mrf.mxu0 }
 0xe29   : > { %v12718_v4 = vcombine.low %v12714_v10, %v12715_v7 }
 0xe2b   : > { %v12725_v11 = vrot.slane %v12718_v4, %v22331_v18 }
 0xe2d   : > { %v12726_v24 = vcombine.high %v12725_v11, %v12725_v11  ;;  %v12733_v9 = vrot.slane %v12725_v11, %v22331_v18 }
 0xe2f   : > { %v12734_v26 = vcombine.high %v12733_v9, %v12733_v9  ;;  %v12741_v25 = vrot.slane %v12726_v24, %v22331_v18  ;;  %v12747_v1 = vpack.c.bf16 %v12733_v9, %v12733_v9 }
 0xe31   : > { %v12742_v61 = vcombine.high %v12741_v25, %v12741_v25  ;;  %v12748_v28 = vpack.c.bf16 %v12734_v26, %v12734_v26  ;;  %v12749_v13 = vpack.c.bf16 %v12741_v25, %v12741_v25  ;;  %v12752_v15 = vshrl.u32 %v12747_v1, 16  ;;  %v17715_v26 = vld [vmem:[#allocation19 + $0x138] sm:$0xff]  }
 0xe32   : > { %v12755_v58 = vshll.u32 %v12747_v1, 16 }
 0xe33   : > { %v12750_v48 = vpack.c.bf16 %v12742_v61, %v12742_v61  ;;  %v12754_v23 = vrot.slane %v12752_v15, 7  ;;  %v12759_v46 = vshrl.u32 %v12748_v28, 16  ;;  %v12766_v60 = vshrl.u32 %v12749_v13, 16 }
 0xe34   : > { %v12762_v49 = vshll.u32 %v12748_v28, 16  ;;  %v12769_v19 = vshll.u32 %v12749_v13, 16  ;;  %v17717_v28 = vld [vmem:[#allocation19 + $0x170] sm:$0xff]  }
 0xe35   : > { %v12757_v30 = vor.u32 %v12755_v58, %v12754_v23  ;;  %v12761_v2 = vrot.slane %v12759_v46, 7  ;;  %v12773_v16 = vshrl.u32 %v12750_v48, 16  ;;  %v12768_v41 = vrot.slane %v12766_v60, 7  ;;  %v17718_v58 = vld [vmem:[#allocation19 + $0x130] sm:$0xff]   ;;  %v17720_v60 = vld [vmem:[#allocation19 + $0x1b8] sm:$0xff]  }
 0xe36   : > { %v12776_v5 = vshll.u32 %v12750_v48, 16 }
 0xe37   : > { %v12764_v0 = vor.u32 %v12762_v49, %v12761_v2  ;;  %v12775_v20 = vrot.slane %v12773_v16, 7  ;;  %v12783_v38 = vsel %vm18822_vm4, 0, %v12757_v30  ;;  %v12771_v63 = vor.u32 %v12769_v19, %v12768_v41  ;;  %v17723_v49 = vld [vmem:[#allocation19 + $0x1f0] sm:$0xff]   ;;  %v17722_v41 = vld [vmem:[#allocation19 + $0x128] sm:$0xff]  }
 0xe38   : > { %v12787_v51 = vsel %vm21707_vm12, %v12783_v38, 0  ;;  %v17724_v19 = vld [vmem:[#allocation19 + $0x1b0] sm:$0xff]   ;;  %v17729_v38 = vld [vmem:[#allocation19 + $0x158] sm:$0xff]  }
 0xe39   : > { %v12778_v43 = vor.u32 %v12776_v5, %v12775_v20  ;;  %v12784_v47 = vsel %vm18822_vm4, 0, %v12764_v0  ;;  %v12785_v54 = vsel %vm18822_vm4, 0, %v12771_v63  ;;  %v17727_v0 = vld [vmem:[#allocation19 + $0x1e8] sm:$0xff]   ;;  %v17726_v20 = vld [vmem:[#allocation19 + $0x120] sm:$0xff]  }
 0xe3a   : > { %v12788_v53 = vsel %vm21707_vm12, %v12784_v47, 0  ;;  %v12789_v36 = vsel %vm21707_vm12, %v12785_v54, 0  ;;  %v17728_v5 = vld [vmem:[#allocation19 + $0x1a8] sm:$0xff]   ;;  %v17731_v63 = vld [vmem:[#allocation19 + $0x1e0] sm:$0xff]   ;;  %v17733_v54 = vld [vmem:[#allocation19 + $0x150] sm:$0xff]  }
 0xe3b   : > { %v12786_v39 = vsel %vm18822_vm4, 0, %v12778_v43  ;;  %v12808_v42 = vcombine.low %v12787_v51, %v12788_v53  ;;  %v17730_v43 = vld [vmem:[#allocation19 + $0x118] sm:$0xff]   ;;  %v17732_v47 = vld [vmem:[#allocation19 + $0x1a0] sm:$0xff]   ;;  %v17734_v53 = vld [vmem:[#allocation19 + $0x110] sm:$0xff]  }
 0xe3c   : > { %v12790_v59 = vsel %vm21707_vm12, %v12786_v39, 0  ;;  %v17735_v51 = vld [vmem:[#allocation19 + $0x1d8] sm:$0xff]  }
 0xe3d   : > { %v12815_v27 = vrot.slane %v12808_v42, %v21701_v52  ;;  %v12859_v33 = vcombine.low %v12789_v36, %v12790_v59  ;;  %v17736_v39 = vld [vmem:[#allocation19 + $0x198] sm:$0xff]   ;;  %v17737_v42 = vld [vmem:[#allocation19 + $0x148] sm:$0xff]   ;;  %v17739_v36 = vld [vmem:[#allocation19 + $0x1d0] sm:$0xff]  }
 0xe3f   : > { %v12822_v57 = vrot.slane %v12815_v27, %v21701_v52  ;;  %v12831_v56 = vcombine.high %v12815_v27, %v12815_v27  ;;  %v12866_v31 = vrot.slane %v12859_v33, %v21701_v52  ;;  %v17738_v27 = vld [vmem:[#allocation19 + $0x108] sm:$0xff]   ;;  %v17740_v33 = vld [vmem:[#allocation19 + $0x190] sm:$0xff]  }
 0xe41   : > { %v12891_v8 = vcombine.low %v21958_v21, %v12822_v57  ;;  %v21967_v22 = vrot.slane %v12831_v56, %v21701_v52  ;;  %v21970_v37 = vrot.slane %v12866_v31, %v21701_v52  ;;  %v12849_v40 = vshrl.u32 %v12822_v57, 16 }
 0xe42   : > { %v12874_v6 = vcombine.high %v12866_v31, %v12866_v31  ;;  %v17742_v31 = vld [vmem:[#allocation19 + $0x100] sm:$0xff]  }
 0xe43   : > { %v12898_v14 = vrot.slane %v12891_v8, %v21701_v52  ;;  %v12941_v45 = vcombine.low %v21949_v29, %v21967_v22  ;;  %v12854_v17 = vshll.u32 %v21967_v22, 16  ;;  %v12966_v55 = vcombine.low %v12822_v57, %v21970_v37  ;;  %v17744_v8 = vld [vmem:[#allocation19 + $0x188] sm:$0xff]  }
 0xe44   : > { %v21982_v3 = vrot.slane %v12874_v6, %v21701_v52  ;;  %v12883_v1 = vshrl.u32 %v21970_v37, 16  ;;  %v17746_v6 = vld [vmem:[#allocation19 + $0x1c0] sm:$0xff]  }
 0xe45   : > { %v12899_v10 = vcombine.high %v12898_v14, %v12898_v14  ;;  %v21985_v7 = vrot.slane %v12941_v45, %v21701_v52  ;;  %v21989_v35 = vsel %vm21723_vm1, %v12849_v40, %v12854_v17  ;;  %v21994_v11 = vrot.slane %v12966_v55, %v21701_v52  ;;  %v17745_v40 = vld [vmem:[#allocation19 + $0x278] sm:$0xff]  }
 0xe46   : > { %v12916_v4 = vcombine.low %v21974_v62, %v21989_v35  ;;  %v12888_v24 = vshll.u32 %v21982_v3, 16  ;;  %v12906_v61 = vrot.slane %v12898_v14, %v21701_v52  ;;  %v13016_v56 = vcombine.low %v21967_v22, %v21982_v3  ;;  %v17747_v17 = vld [vmem:[#allocation19 + $0x238] sm:$0xff]   ;;  %v17748_v22 = vld [vmem:[#allocation19 + $0x180] sm:$0xff]  }
 0xe47   : > { %v12913_v9 = vrot.slane %v12899_v10, %v21701_v52  ;;  %v12949_v25 = vcombine.high %v21985_v7, %v21985_v7  ;;  %v12974_v23 = vcombine.high %v21994_v11, %v21994_v11  ;;  %v12956_v55 = vrot.slane %v21985_v7, %v21701_v52  ;;  %v17749_v10 = vld [vmem:[#allocation19 + $0x270] sm:$0xff]  }
 0xe48   : > { %v12923_v13 = vrot.slane %v12916_v4, %v21701_v52  ;;  %v22006_v50 = vsel %vm21723_vm1, %v12883_v1, %v12888_v24  ;;  %v22025_v45 = vrot.slane %v13016_v56, %v21701_v52  ;;  %v17751_v4 = vld [vmem:[#allocation19 + $0x2f8] sm:$0xff]   ;;  %v12981_v7 = vrot.slane %v21994_v11, %v21701_v52  ;;  %v17755_v1 = vld [vmem:[#allocation19 + $0x2f0] sm:$0xff]   ;;  %v17760_v11 = vld [vmem:[#allocation19 + $0x2a8] sm:$0xff]  }
 0xe49   : > { %14307 = vmatprep.mubr.bf16.mxu1 %v12913_v9  ;;  %v12963_v15 = vrot.slane %v12949_v25, %v21701_v52  ;;  %v13066_v30 = vcombine.low %v22006_v50, %v21974_v62  ;;  %v12988_v16 = vrot.slane %v12974_v23, %v21701_v52  ;;  %v12991_v59 = vcombine.low %v21989_v35, %v22006_v50  ;;  %v17750_v9 = vld [vmem:[#allocation19 + $0x230] sm:$0xff]   ;;  %v17753_v25 = vld [vmem:[#allocation19 + $0x268] sm:$0xff]   ;;  %v17758_v23 = vld [vmem:[#allocation19 + $0x220] sm:$0xff]  }
 0xe4a   : > { %14308 = vmatmul.mubr.bf16.vlgmr.msra.gmra.mxu1 %v12906_v61  ;;  %v12924_v48 = vcombine.high %v12923_v13, %v12923_v13  ;;  %v12931_v2 = vrot.slane %v12923_v13, %v21701_v52  ;;  %v13024_v24 = vcombine.high %v22025_v45, %v22025_v45  ;;  %v17756_v13 = vld [vmem:[#allocation19 + $0x2b0] sm:$0xff]   ;;  %v17784_v50 = vld [vmem:[#allocation19 + $0x3b8] sm:$0xff]  }
 0xe4b   : > { %16649 = vmatpush3.bf16.msra.mxu1 %v17715_v26  ;;  %14387 = vmatprep.mubr.bf16.mxu1 %v12963_v15  ;;  %v22018_v57 = vrot.slane %v12991_v59, %v21701_v52  ;;  %v17752_v26 = vld [vmem:[#allocation19 + $0x2b8] sm:$0xff]   ;;  %v17757_v15 = vld [vmem:[#allocation19 + $0x260] sm:$0xff]   ;;  %v17781_v59 = vld [vmem:[#allocation19 + $0x370] sm:$0xff]  }
 0xe4c   : > { %16650 = vmatprep.subr.bf16.mxu1 %v17717_v28  ;;  %v12938_v46 = vrot.slane %v12924_v48, %v21701_v52  ;;  %v13038_v61 = vrot.slane %v13024_v24, %v21701_v52  ;;  %v17754_v28 = vld [vmem:[#allocation19 + $0x228] sm:$0xff]   ;;  %v17782_v62 = vld [vmem:[#allocation19 + $0x330] sm:$0xff]  }
 0xe4d   : > { %v12999_v14 = vcombine.high %v22018_v57, %v22018_v57  ;;  %v17759_v48 = vld [vmem:[#allocation19 + $0x2e8] sm:$0xff]   ;;  %v17798_v24 = vld [vmem:[#allocation19 + $0x310] sm:$0xff]  }
 0xe4e   : > { %14347 = vmatprep.mubr.bf16.mxu0 %v12938_v46  ;;  %v17763_v46 = vld [vmem:[#allocation19 + $0x2e0] sm:$0xff]  }
 0xe4f   : > { %16651 = vmatpush3.bf16.msra.mxu1 %v17718_v58  ;;  %14348 = vmatmul.mubr.bf16.vlgmr.msra.gmra.mxu0 %v12931_v2  ;;  %v13013_v35 = vrot.slane %v12999_v14, %v21701_v52  ;;  %v17761_v58 = vld [vmem:[#allocation19 + $0x258] sm:$0xff]   ;;  %v17764_v2 = vld [vmem:[#allocation19 + $0x2a0] sm:$0xff]  }
 0xe50   : > { %16671 = vmatpush3.bf16.msra.mxu0 %v17720_v60  ;;  %14427 = vmatprep.mubr.bf16.mxu0 %v12988_v16  ;;  %v17762_v60 = vld [vmem:[#allocation19 + $0x218] sm:$0xff]   ;;  %v17766_v16 = vld [vmem:[#allocation19 + $0x210] sm:$0xff]   ;;  %v17790_v14 = vld [vmem:[#allocation19 + $0x320] sm:$0xff]  }
 0xe51   : > { %16652 = vmatprep.subr.bf16.mxu1 %v17721_v32  ;;  %16672 = vmatprep.subr.bf16.mxu0 %v17723_v49  ;;  %v17765_v32 = vld [vmem:[#allocation19 + $0x250] sm:$0xff]   ;;  %v17767_v49 = vld [vmem:[#allocation19 + $0x2d8] sm:$0xff]  }
 0xe53   : > { %16653 = vmatpush3.bf16.msra.mxu1 %v17722_v41  ;;  %v17768_v41 = vld [vmem:[#allocation19 + $0x298] sm:$0xff]  }
 0xe54   : > { %16673 = vmatpush3.bf16.msra.mxu0 %v17724_v19  ;;  %16654 = vmatprep.subr.bf16.mxu1 %v17725_v44  ;;  %v17769_v19 = vld [vmem:[#allocation19 + $0x248] sm:$0xff]   ;;  %v17771_v44 = vld [vmem:[#allocation19 + $0x2d0] sm:$0xff]  }
 0xe55   : > { %16674 = vmatprep.subr.bf16.mxu0 %v17727_v0  ;;  %v13041_v0 = vcombine.low %v21970_v37, %v21958_v21  ;;  %v22046_v37 = vrot.slane %v13066_v30, %v21701_v52  ;;  %v13031_v30 = vrot.slane %v22025_v45, %v21701_v52  ;;  %v17792_v45 = vld [vmem:[#allocation19 + $0x3a8] sm:$0xff]  }
 0xe57   : > { %16655 = vmatpush3.bf16.msra.mxu1 %v17726_v20  ;;  %v17770_v20 = vld [vmem:[#allocation19 + $0x208] sm:$0xff]  }
 0xe58   : > { %16675 = vmatpush3.bf16.msra.mxu0 %v17728_v5  ;;  %16656 = vmatprep.subr.bf16.mxu1 %v17729_v38  ;;  %v17772_v5 = vld [vmem:[#allocation19 + $0x290] sm:$0xff]   ;;  %v17773_v38 = vld [vmem:[#allocation19 + $0x240] sm:$0xff]  }
 0xe59   : > { %16676 = vmatprep.subr.bf16.mxu0 %v17731_v63  ;;  %v17775_v63 = vld [vmem:[#allocation19 + $0x2c8] sm:$0xff]  }
 0xe5b   : > { %16657 = vmatpush3.bf16.msra.mxu1 %v17730_v43  ;;  %v22038_v43 = vrot.slane %v13041_v0, %v21701_v52  ;;  %v17818_v0 = vld [vmem:[#allocation19 + $0x420] sm:$0xff]  }
 0xe5c   : > { %16677 = vmatpush3.bf16.msra.mxu0 %v17732_v47  ;;  %16658 = vmatprep.subr.bf16.mxu1 %v17733_v54  ;;  %v17774_v47 = vld [vmem:[#allocation19 + $0x200] sm:$0xff]   ;;  %v17776_v54 = vld [vmem:[#allocation19 + $0x288] sm:$0xff]  }
 0xe5d   : > { %16678 = vmatprep.subr.bf16.mxu0 %v17735_v51  ;;  %v17777_v51 = vld [vmem:[#allocation19 + $0x378] sm:$0xff]   ;;  %v13049_v21 = vcombine.high %v22038_v43, %v22038_v43 }
 0xe5f   : > { %16659 = vmatpush3.bf16.msra.mxu1 %v17734_v53  ;;  %v17778_v53 = vld [vmem:[#allocation19 + $0x2c0] sm:$0xff]  }
 0xe60   : > { %16679 = vmatpush3.bf16.msra.mxu0 %v17736_v39  ;;  %16660 = vmatprep.subr.bf16.mxu1 %v17737_v42  ;;  %v17779_v39 = vld [vmem:[#allocation19 + $0x338] sm:$0xff]   ;;  %v13006_v42 = vrot.slane %v22018_v57, %v21701_v52  ;;  %v17787_v57 = vld [vmem:[#allocation19 + $0x3f0] sm:$0xff]  }
 0xe61   : > { %16680 = vmatprep.subr.bf16.mxu0 %v17739_v36  ;;  %v17780_v36 = vld [vmem:[#allocation19 + $0x280] sm:$0xff]  }
 0xe63   : > { %16661 = vmatpush3.bf16.msra.mxu1 %v17738_v27  ;;  %v13063_v27 = vrot.slane %v13049_v21, %v21701_v52 }
 0xe64   : > { %16681 = vmatpush3.bf16.msra.mxu0 %v17740_v33  ;;  %16662 = vmatprep.subr.bf16.mxu1 %v17741_v34  ;;  %v17783_v33 = vld [vmem:[#allocation19 + $0x3f8] sm:$0xff]   ;;  %v13074_v34 = vcombine.high %v22046_v37, %v22046_v37 }
 0xe65   : > { %16682 = vmatprep.subr.bf16.mxu0 %v17743_v12  ;;  %v17785_v12 = vld [vmem:[#allocation19 + $0x368] sm:$0xff]  }
 0xe66   : > { %v13088_v56 = vrot.slane %v13074_v34, %v21701_v52 }
 0xe67   : > { %16663 = vmatpush3.bf16.msra.mxu1 %v17742_v31  ;;  %v17786_v31 = vld [vmem:[#allocation19 + $0x328] sm:$0xff]  }
 0xe68   : > { %16683 = vmatpush3.bf16.msra.mxu0 %v17744_v8  ;;  %16692 = vmatprep.subr.bf16.mxu1 %v17745_v40  ;;  %v17788_v8 = vld [vmem:[#allocation19 + $0x3b0] sm:$0xff]   ;;  %v17789_v40 = vld [vmem:[#allocation19 + $0x360] sm:$0xff]  }
 0xe69   : > { %16684 = vmatprep.subr.bf16.mxu0 %v17746_v6  ;;  %v17791_v6 = vld [vmem:[#allocation19 + $0x3e8] sm:$0xff]  }
 0xe6a   : > { %14388 = vmatmul.mubr.bf16.vlgmr.msra.gmra.mxu1 %v12956_v55  ;;  %v17795_v55 = vld [vmem:[#allocation19 + $0x3e0] sm:$0xff]  }
 0xe6b   : > { %16693 = vmatpush3.bf16.msra.mxu1 %v17747_v17  ;;  %14467 = vmatprep.mubr.bf16.mxu1 %v13013_v35  ;;  %v17793_v17 = vld [vmem:[#allocation19 + $0x358] sm:$0xff]   ;;  %v17797_v35 = vld [vmem:[#allocation19 + $0x350] sm:$0xff]  }
 0xe6c   : > { %16685 = vmatpush3.bf16.msra.mxu0 %v17748_v22  ;;  %16694 = vmatprep.subr.bf16.mxu1 %v17749_v10  ;;  %v17794_v22 = vld [vmem:[#allocation19 + $0x318] sm:$0xff]   ;;  %v17796_v10 = vld [vmem:[#allocation19 + $0x3a0] sm:$0xff]  }
 0xe6d   : > { %16714 = vmatprep.subr.bf16.mxu0 %v17751_v4  ;;  %v17799_v4 = vld [vmem:[#allocation19 + $0x3d8] sm:$0xff]  }
 0xe6f   : > { %14428 = vmatmul.mubr.bf16.vlgmr.msra.gmra.mxu0 %v12981_v7  ;;  %16695 = vmatpush3.bf16.msra.mxu1 %v17750_v9  ;;  %v17800_v9 = vld [vmem:[#allocation19 + $0x398] sm:$0xff]   ;;  %v17803_v7 = vld [vmem:[#allocation19 + $0x3d0] sm:$0xff]  }
 0xe70   : > { %16715 = vmatpush3.bf16.msra.mxu0 %v17752_v26  ;;  %14507 = vmatprep.mubr.bf16.mxu0 %v13038_v61  ;;  %v17801_v26 = vld [vmem:[#allocation19 + $0x348] sm:$0xff]   ;;  %v17804_v61 = vld [vmem:[#allocation19 + $0x390] sm:$0xff]  }
 0xe71   : > { %16696 = vmatprep.subr.bf16.mxu1 %v17753_v25  ;;  %16716 = vmatprep.subr.bf16.mxu0 %v17755_v1  ;;  %v13091_v25 = vcombine.low %v21982_v3, %v21949_v29  ;;  %v17802_v1 = vld [vmem:[#allocation19 + $0x308] sm:$0xff]   ;;  %v17811_v29 = vld [vmem:[#allocation19 + $0x438] sm:$0xff]   ;;  %v13056_v3 = vrot.slane %v22038_v43, %v21701_v52 }
 0xe72   : > { %v17823_v43 = vld [vmem:[#allocation19 + $0x448] sm:$0xff]  }
 0xe73   : > { %16697 = vmatpush3.bf16.msra.mxu1 %v17754_v28  ;;  %v17805_v28 = vld [vmem:[#allocation19 + $0x340] sm:$0xff]  }
 0xe74   : > { %16717 = vmatpush3.bf16.msra.mxu0 %v17756_v13  ;;  %16698 = vmatprep.subr.bf16.mxu1 %v17757_v15  ;;  %v17807_v13 = vld [vmem:[#allocation19 + $0x3c8] sm:$0xff]   ;;  %v13098_v15 = vrot.slane %v13091_v25, %v21701_v52 }
 0xe75   : > { %16718 = vmatprep.subr.bf16.mxu0 %v17759_v48  ;;  %v17806_v48 = vld [vmem:[#allocation19 + $0x300] sm:$0xff]  }
 0xe77   : > { %16699 = vmatpush3.bf16.msra.mxu1 %v17758_v23  ;;  %v17808_v23 = vld [vmem:[#allocation19 + $0x388] sm:$0xff]  }
 0xe78   : > { %16719 = vmatpush3.bf16.msra.mxu0 %v17760_v11  ;;  %16700 = vmatprep.subr.bf16.mxu1 %v17761_v58  ;;  %v17809_v11 = vld [vmem:[#allocation19 + $0x478] sm:$0xff]   ;;  %v17810_v58 = vld [vmem:[#allocation19 + $0x3c0] sm:$0xff]  }
 0xe79   : > { %16720 = vmatprep.subr.bf16.mxu0 %v17763_v46  ;;  %v13099_v46 = vcombine.high %v13098_v15, %v13098_v15 }
 0xe7b   : > { %16701 = vmatpush3.bf16.msra.mxu1 %v17762_v60  ;;  %v17812_v60 = vld [vmem:[#allocation19 + $0x380] sm:$0xff]  }
 0xe7c   : > { %16721 = vmatpush3.bf16.msra.mxu0 %v17764_v2  ;;  %16702 = vmatprep.subr.bf16.mxu1 %v17765_v32  ;;  %v17813_v2 = vld [vmem:[#allocation19 + $0x470] sm:$0xff]   ;;  %v13113_v32 = vrot.slane %v13099_v46, %v21701_v52 }
 0xe7d   : > { %16722 = vmatprep.subr.bf16.mxu0 %v17767_v49  ;;  %v17814_v49 = vld [vmem:[#allocation19 + $0x430] sm:$0xff]  }
 0xe7f   : > { %16703 = vmatpush3.bf16.msra.mxu1 %v17766_v16  ;;  %v17815_v16 = vld [vmem:[#allocation19 + $0x468] sm:$0xff]  }
 0xe80   : > { %16723 = vmatpush3.bf16.msra.mxu0 %v17768_v41  ;;  %16704 = vmatprep.subr.bf16.mxu1 %v17769_v19  ;;  %v13081_v41 = vrot.slane %v22046_v37, %v21701_v52  ;;  %v17816_v19 = vld [vmem:[#allocation19 + $0x428] sm:$0xff]  }
 0xe81   : > { %16724 = vmatprep.subr.bf16.mxu0 %v17771_v44  ;;  %v17817_v44 = vld [vmem:[#allocation19 + $0x460] sm:$0xff]  }
 0xe83   : > { %16705 = vmatpush3.bf16.msra.mxu1 %v17770_v20  ;;  %v17819_v20 = vld [vmem:[#allocation19 + $0x458] sm:$0xff]  }
 0xe84   : > { %16725 = vmatpush3.bf16.msra.mxu0 %v17772_v5  ;;  %16706 = vmatprep.subr.bf16.mxu1 %v17773_v38  ;;  %v17820_v5 = vld [vmem:[#allocation19 + $0x418] sm:$0xff]   ;;  %v17821_v38 = vld [vmem:[#allocation19 + $0x450] sm:$0xff]  }
 0xe85   : > { %16726 = vmatprep.subr.bf16.mxu0 %v17775_v63  ;;  %v17822_v63 = vld [vmem:[#allocation19 + $0x410] sm:$0xff]  }
 0xe87   : > { %16707 = vmatpush3.bf16.msra.mxu1 %v17774_v47  ;;  %v17824_v47 = vld [vmem:[#allocation19 + $0x408] sm:$0xff]  }
 0xe88   : > { %16727 = vmatpush3.bf16.msra.mxu0 %v17776_v54  ;;  %16736 = vmatprep.subr.bf16.mxu1 %v17777_v51  ;;  %v17825_v54 = vld [vmem:[#allocation19 + $0x440] sm:$0xff]  }
 0xe89   : > { %16728 = vmatprep.subr.bf16.mxu0 %v17778_v53  ;;  %v17826_v51 = vld [vmem:[#allocation19 + $0x400] sm:$0xff]   ;;  %v13106_v53 = vrot.slane %v13098_v15, %v21701_v52 }
 0xe8a   : > { %14468 = vmatmul.mubr.bf16.vlgmr.msra.gmra.mxu1 %v13006_v42 }
 0xe8b   : > { %16737 = vmatpush3.bf16.msra.mxu1 %v17779_v39  ;;  %14547 = vmatprep.mubr.bf16.mxu1 %v13063_v27 }
 0xe8c   : > { %16729 = vmatpush3.bf16.msra.mxu0 %v17780_v36  ;;  %16738 = vmatprep.subr.bf16.mxu1 %v17781_v59  ;;  %v15694_v36 = vld [vmem:[%s22346_s24] ss:$0 sm:$0xff] }
 0xe8d   : > { %16758 = vmatprep.subr.bf16.mxu0 %v17783_v33 }
 0xe8f   : > { %14508 = vmatmul.mubr.bf16.vlgmr.msra.gmra.mxu0 %v13031_v30  ;;  %16739 = vmatpush3.bf16.msra.mxu1 %v17782_v62 }
 0xe90   : > { %16759 = vmatpush3.bf16.msra.mxu0 %v17784_v50  ;;  %14587 = vmatprep.mubr.bf16.mxu0 %v13088_v56 }
 0xe91   : > { %16740 = vmatprep.subr.bf16.mxu1 %v17785_v12  ;;  %16760 = vmatprep.subr.bf16.mxu0 %v17787_v57 }
 0xe93   : > { %16741 = vmatpush3.bf16.msra.mxu1 %v17786_v31 }
 0xe94   : > { %16761 = vmatpush3.bf16.msra.mxu0 %v17788_v8  ;;  %16742 = vmatprep.subr.bf16.mxu1 %v17789_v40 }
 0xe95   : > { %16762 = vmatprep.subr.bf16.mxu0 %v17791_v6 }
 0xe97   : > { %16743 = vmatpush3.bf16.msra.mxu1 %v17790_v14 }
 0xe98   : > { %16763 = vmatpush3.bf16.msra.mxu0 %v17792_v45  ;;  %16744 = vmatprep.subr.bf16.mxu1 %v17793_v17 }
 0xe99   : > { %16764 = vmatprep.subr.bf16.mxu0 %v17795_v55 }
 0xe9b   : > { %16745 = vmatpush3.bf16.msra.mxu1 %v17794_v22 }
 0xe9c   : > { %16765 = vmatpush3.bf16.msra.mxu0 %v17796_v10  ;;  %16746 = vmatprep.subr.bf16.mxu1 %v17797_v35 }
 0xe9d   : > { %16766 = vmatprep.subr.bf16.mxu0 %v17799_v4 }
 0xe9f   : > { %16747 = vmatpush3.bf16.msra.mxu1 %v17798_v24 }
 0xea0   : > { %16767 = vmatpush3.bf16.msra.mxu0 %v17800_v9  ;;  %16748 = vmatprep.subr.bf16.mxu1 %v17801_v26 }
 0xea1   : > { %16768 = vmatprep.subr.bf16.mxu0 %v17803_v7 }
 0xea3   : > { %16749 = vmatpush3.bf16.msra.mxu1 %v17802_v1 }
 0xea4   : > { %16769 = vmatpush3.bf16.msra.mxu0 %v17804_v61  ;;  %16750 = vmatprep.subr.bf16.mxu1 %v17805_v28 }
 0xea5   : > { %16770 = vmatprep.subr.bf16.mxu0 %v17807_v13 }
 0xea7   : > { %16751 = vmatpush3.bf16.msra.mxu1 %v17806_v48 }
 0xea8   : > { %16771 = vmatpush3.bf16.msra.mxu0 %v17808_v23  ;;  %16780 = vmatprep.subr.bf16.mxu1 %v17809_v11 }
 0xea9   : > { %16772 = vmatprep.subr.bf16.mxu0 %v17810_v58 }
 0xeaa   : > { %14548 = vmatmul.mubr.bf16.vlgmr.msra.gmra.mxu1 %v13056_v3 }
 0xeab   : > { %16781 = vmatpush3.bf16.msra.mxu1 %v17811_v29  ;;  %14627 = vmatprep.mubr.bf16.mxu1 %v13113_v32 }
 0xeac   : > { %16773 = vmatpush3.bf16.msra.mxu0 %v17812_v60  ;;  %16782 = vmatprep.subr.bf16.mxu1 %v17813_v2 }
 0xeaf   : > { %14588 = vmatmul.mubr.bf16.vlgmr.msra.gmra.mxu0 %v13081_v41  ;;  %16783 = vmatpush3.bf16.msra.mxu1 %v17814_v49 }
 0xeb0   : > { %16784 = vmatprep.subr.bf16.mxu1 %v17815_v16 }
 0xeb3   : > { %16785 = vmatpush3.bf16.msra.mxu1 %v17816_v19 }
 0xeb4   : > { %16786 = vmatprep.subr.bf16.mxu1 %v17817_v44 }
 0xeb7   : > { %16787 = vmatpush3.bf16.msra.mxu1 %v17818_v0 }
 0xeb8   : > { %16788 = vmatprep.subr.bf16.mxu1 %v17819_v20 }
 0xebb   : > { %16789 = vmatpush3.bf16.msra.mxu1 %v17820_v5 }
 0xebc   : > { %16790 = vmatprep.subr.bf16.mxu1 %v17821_v38 }
 0xebf   : > { %16791 = vmatpush3.bf16.msra.mxu1 %v17822_v63 }
 0xec0   : > { %16792 = vmatprep.subr.bf16.mxu1 %v17823_v43 }
 0xec3   : > { %16793 = vmatpush3.bf16.msra.mxu1 %v17824_v47 }
 0xec4   : > { %16794 = vmatprep.subr.bf16.mxu1 %v17825_v54 }
 0xec7   : > { %16795 = vmatpush3.bf16.msra.mxu1 %v17826_v51 }
 0xeca   : > { %14628 = vmatmul.mubr.bf16.vlgmr.msra.gmra.mxu1 %v13106_v53 }
 0xf0a   : > { %v16620_v21 = vpop.f32.mrf.mxu1 }
 0xf0c   : > { %v16621_v37 = vpop.f32.mrf.mxu1 }
 0xf0d   : > { %v16622_v39 = vadd.f32 %v16621_v37, %v16620_v21 }
 0xf0e   : > { %v16623_v42 = vpop.f32.mrf.mxu1 }
 0xf0f   : > { %v16642_v59 = vpop.f32.mrf.mxu0  ;;  %v14310_v34 = vadd.f32 %v16622_v39, %v15694_v36 }
 0xf10   : > { %v16624_v27 = vpop.f32.mrf.mxu1 }
 0xf11   : > { %v16643_v33 = vpop.f32.mrf.mxu0 }
 0xf12   : > { %v16644_v62 = vadd.f32 %v16643_v33, %v16642_v59 }
 0xf13   : > { %v16645_v50 = vpop.f32.mrf.mxu0 }
 0xf14   : > { %v14350_v30 = vadd.f32 %v16644_v62, %v14310_v34 }
 0xf15   : > { %v16646_v12 = vpop.f32.mrf.mxu0 }
 0xf2a   : > { %v16664_v57 = vpop.f32.mrf.mxu1 }
 0xf2c   : > { %v16665_v56 = vpop.f32.mrf.mxu1 }
 0xf2d   : > { %v16666_v52 = vadd.f32 %v16665_v56, %v16664_v57 }
 0xf2e   : > { %v16667_v31 = vpop.f32.mrf.mxu1 }
 0xf2f   : > { %v14390_v8 = vadd.f32 %v16666_v52, %v14350_v30  ;;  %v16686_v40 = vpop.f32.mrf.mxu0 }
 0xf30   : > { %v16668_v6 = vpop.f32.mrf.mxu1 }
 0xf31   : > { %v16687_v14 = vpop.f32.mrf.mxu0 }
 0xf32   : > { %v16688_v45 = vadd.f32 %v16687_v14, %v16686_v40 }
 0xf33   : > { %v16689_v17 = vpop.f32.mrf.mxu0 }
 0xf34   : > { %v14430_v55 = vadd.f32 %v16688_v45, %v14390_v8 }
 0xf35   : > { %v16690_v22 = vpop.f32.mrf.mxu0 }
 0xf4a   : > { %v16708_v10 = vpop.f32.mrf.mxu1 }
 0xf4c   : > { %v16709_v35 = vpop.f32.mrf.mxu1 }
 0xf4d   : > { %v16710_v58 = vadd.f32 %v16709_v35, %v16708_v10 }
 0xf4e   : > { %v16711_v4 = vpop.f32.mrf.mxu1 }
 0xf4f   : > { %v16730_v24 = vpop.f32.mrf.mxu0  ;;  %v14470_v29 = vadd.f32 %v16710_v58, %v14430_v55 }
 0xf50   : > { %v16712_v9 = vpop.f32.mrf.mxu1 }
 0xf51   : > { %v16731_v26 = vpop.f32.mrf.mxu0 }
 0xf52   : > { %v16732_v46 = vadd.f32 %v16731_v26, %v16730_v24 }
 0xf53   : > { %v16733_v7 = vpop.f32.mrf.mxu0 }
 0xf54   : > { %v14510_v60 = vadd.f32 %v16732_v46, %v14470_v29 }
 0xf55   : > { %v16734_v25 = vpop.f32.mrf.mxu0 }
 0xf6a   : > { %v16752_v1 = vpop.f32.mrf.mxu1 }
 0xf6c   : > { %v16753_v61 = vpop.f32.mrf.mxu1 }
 0xf6d   : > { %v16754_v3 = vadd.f32 %v16753_v61, %v16752_v1 }
 0xf6e   : > { %v16755_v28 = vpop.f32.mrf.mxu1 }
 0xf6f   : > { %v16774_v13 = vpop.f32.mrf.mxu0  ;;  %v14550_v49 = vadd.f32 %v16754_v3, %v14510_v60 }
 0xf70   : > { %v16756_v15 = vpop.f32.mrf.mxu1 }
 0xf71   : > { %v16775_v48 = vpop.f32.mrf.mxu0 }
 0xf72   : > { %v16776_v2 = vadd.f32 %v16775_v48, %v16774_v13 }
 0xf73   : > { %v16777_v23 = vpop.f32.mrf.mxu0 }
 0xf74   : > { %v14590_v41 = vadd.f32 %v16776_v2, %v14550_v49 }
 0xf75   : > { %v16778_v11 = vpop.f32.mrf.mxu0 }
 0xf8a   : > { %v16796_v32 = vpop.f32.mrf.mxu1 }
 0xf8c   : > { %v16797_v16 = vpop.f32.mrf.mxu1 }
 0xf8d   : > { %v16798_v19 = vadd.f32 %v16797_v16, %v16796_v32 }
 0xf8e   : > { %v16799_v44 = vpop.f32.mrf.mxu1 }
 0xf8f   : > { %v14630_v0 = vadd.f32 %v16798_v19, %v14590_v41 }
 0xf90   : > { %v16800_v20 = vpop.f32.mrf.mxu1 }
 0xf91   : > { %v14642_v5 = vrot.slane %v14630_v0, %v22331_v18  ;;  %15839 = vst.sshfl [vmem:[%s832_s18] sm:$0x3 pattern:$0x76325410] %v14630_v0 }
 0xf93   : > { %v14643_v38 = vcombine.high %v14642_v5, %v14642_v5 }
 0xf95   : > { %14647 = vst [vmem:[%s832_s18 + $0x2] sm:$0x3] %v14643_v38 }
 0xf96 PF: > { %p37_p0 = scmp.ge.s32.totalorder %s18517_s5, 4   ;;  %s22348_s2 = smov %s18211_s25 }
 0xf97   : > { %s22349_s25 = smov %s18215_s26  ;;  %s22350_s26 = smov %s18528_s3 }
 0xf98   : > { %s22351_s27 = smov %s18517_s5  ;;  %39 = sbr.rel (!%p37_p0) target bundleno = 22 (0x16), region = 188 }
 0xf9d   :  { %14669 = vsyncpa [#allocation3], 1 }
 0xf9e   :  { %14671 = vsyncpa [#allocation3 + $0x1], 1 }
 0xf9f   :  { %14672 = vsyncpa [#allocation5], 1 }
 0xfa0   :  { %14673 = vsyncpa [#allocation8], 1 }
 0xfa1   :  { %14674 = vsyncpa [#allocation11], 1 }
 0xfa2   :  { %14675 = vsyncpa [#allocation14], 1 }
 0xfa3   :  { %14676 = vsyncpa [#allocation17], 1 }
 0xfa4   :  { %14677 = vsyncpa [#allocation20], 1 }

</bundles_post_ra>
